<compile_context>
chip_gen: v7x
topology: tpu7x:2x2x1
jax: 0.10.0
libtpu: 0.0.40
codegen_flags: <defaults>
</compile_context>

<pallas_src>
import jax
import jax.numpy as jnp
from jax import lax
from jax.experimental import pallas as pl
from jax.experimental.pallas import tpu as pltpu

# --- MPNNet_v2 config (defaults, version='v4') -------------------------------
NUM_FEAT = 14
NUM_VEC = 3
IN_DIM = NUM_FEAT + NUM_VEC        # lin0 input features (data.x carries 17)
IN_PAD = 32                        # lane-friendly padded lin0 input width
DIM = 64
NUM_OUT_PER_MOL = 1
NUM_OUT_PER_STEM = 105
STEM_OUT_PAD = 128                 # lane-dense padded stem-output width
NUM_CONV_STEPS = 12
EDGE_DIM = 4
NEG_SLOPE = 0.01                   # nn.LeakyReLU default (version < 5)


def _lrelu(v):
    return jnp.where(v >= 0, v, NEG_SLOPE * v)


def mpnn_kernel(
    # graph / gather operands
    x_ref, mask_ref, ea_ref, pool_ref, stem_node_ref, stem_graph_ref,
    # lin0
    w0_ref, b0_ref,
    # TransformerConv(dim, dim, edge_dim=4): fused [Wq|Wk|Wv|Wskip] + lin_edge
    wqkvs_ref, bqkvs_ref, we_ref, wet_ref,
    # stem2out: Linear(2D, D) -> act -> Linear(D, D) -> act -> Linear(D, 105pad)
    ws1_ref, bs1_ref, ws2_ref, bs2_ref, ws3_ref, bs3_ref,
    # lin3: Linear(D, D) -> act -> Linear(D, D) -> act -> Linear(D, 1)
    wm1_ref, bm1_ref, wm2_ref, bm2_ref, wm3_ref, bm3_ref,
    # outputs
    stem_out_ref, mol_out_ref,
):
    f32 = jnp.float32
    bf16 = jnp.bfloat16

    x = x_ref[...]                       # (N, IN_PAD)
    mask = mask_ref[...]                 # (N, N)  mask[i, j] = 1 iff edge j->i
    we = we_ref[...]                     # (EDGE_DIM, DIM)   lin_edge (no bias)
    wet = wet_ref[...]                   # (DIM, EDGE_DIM)   = we.T (precomputed)
    inv_sqrt_d = 1.0 / (float(DIM) ** 0.5)
    # Nodes with no incoming edges get a zero aggregated message (PyG semantics).
    row_has_edge = (jnp.sum(mask, axis=1, keepdims=True) > 0).astype(f32)

    # lin0 + LeakyReLU
    out0 = _lrelu(jnp.dot(x, w0_ref[...], preferred_element_type=f32) + b0_ref[...])

    wqkvs = wqkvs_ref[...]               # (DIM, 4*DIM) bf16, fused [Wq|Wk|Wv|Wskip]
    bqkvs = bqkvs_ref[...]               # (1, 4*DIM)   f32

    def conv_step(_, out):
        # One lane-dense fused projection matmul (bf16 operands, f32 accum).
        proj = (jnp.dot(out.astype(bf16), wqkvs, preferred_element_type=f32)
                + bqkvs)                                            # (N, 4D)
        q = proj[:, 0 * DIM:1 * DIM]
        k = proj[:, 1 * DIM:2 * DIM]
        v = proj[:, 2 * DIM:3 * DIM]
        skip = proj[:, 3 * DIM:4 * DIM]

        # attention logits: (q_i . (k_j + We^T ea_ij)) / sqrt(D)
        score = lax.dot_general(q.astype(bf16), k.astype(bf16),
                                (((1,), (1,)), ((), ())),
                                preferred_element_type=f32)         # (N, N) = q k^T
        qe = jnp.dot(q, wet, preferred_element_type=f32)            # (N, EDGE_DIM)
        for c in range(EDGE_DIM):                                   # static unroll
            score = score + ea_ref[c] * qe[:, c:c + 1]
        score = score * inv_sqrt_d

        # masked softmax over source nodes j (segment softmax, densified).
        # exp(-1e30 - m) underflows to exactly 0, so no extra `* mask` needed.
        score = jnp.where(mask > 0, score, -1e30)
        m = jnp.max(score, axis=1, keepdims=True)
        p = jnp.exp(score - m)
        denom = jnp.sum(p, axis=1, keepdims=True)
        alpha = (p * pl.reciprocal(jnp.maximum(denom, 1e-30), approx=True)
                 * row_has_edge)                                    # (N, N)

        # messages: alpha_ij * (v_j + We^T ea_ij), summed over j
        msg = jnp.dot(alpha.astype(bf16), v.astype(bf16),
                      preferred_element_type=f32)                   # (N, D)
        w_cols = [jnp.sum(alpha * ea_ref[c], axis=1, keepdims=True)
                  for c in range(EDGE_DIM)]                         # 4 x (N, 1)
        w4 = jnp.concatenate(w_cols, axis=1)                        # (N, EDGE_DIM)
        msg = msg + jnp.dot(w4, we, preferred_element_type=f32)     # (N, D)

        return _lrelu(msg + skip)

    out = lax.fori_loop(0, NUM_CONV_STEPS, conv_step, out0, unroll=True)

    # global_mean_pool(out, batch): pool_mat already holds 1/|graph g| weights
    global_out = jnp.dot(pool_ref[...], out, preferred_element_type=f32)    # (G, D)

    # stems: out[stem_idx] and global_out[stems_batch] as one-hot matmuls (gather)
    stem_atom = jnp.dot(stem_node_ref[...], out, preferred_element_type=f32)         # (Sp, D)
    stem_glob = jnp.dot(stem_graph_ref[...], global_out, preferred_element_type=f32)  # (Sp, D)

    # stem2out on concat([stem_atom, stem_glob], 1)  (split-weight form, no concat)
    ws1 = ws1_ref[...]                                  # (2D, D)
    h = _lrelu(jnp.dot(stem_atom, ws1[:DIM], preferred_element_type=f32)
               + jnp.dot(stem_glob, ws1[DIM:], preferred_element_type=f32)
               + bs1_ref[...])
    h = _lrelu(jnp.dot(h, ws2_ref[...], preferred_element_type=f32) + bs2_ref[...])
    stem_out_ref[...] = (jnp.dot(h, ws3_ref[...], preferred_element_type=f32)
                         + bs3_ref[...])                # (Sp, STEM_OUT_PAD)

    # lin3 MLP on pooled features
    g = _lrelu(jnp.dot(global_out, wm1_ref[...], preferred_element_type=f32) + bm1_ref[...])
    g = _lrelu(jnp.dot(g, wm2_ref[...], preferred_element_type=f32) + bm2_ref[...])
    mol_out_ref[...] = (jnp.dot(g, wm3_ref[...], preferred_element_type=f32)
                        + bm3_ref[...])                 # (G, 1)


def mpnn_forward(inputs, params):
    x = inputs["x"]                          # (N, IN_DIM)
    N = x.shape[0]
    G = inputs["pool_mat"].shape[0]
    S = inputs["stem_node_oh"].shape[0]
    S_PAD = ((S + 7) // 8) * 8

    f32 = jnp.float32

    # --- trace-time layout plumbing (padding / fusion), all zero-filled ------
    xp = jnp.zeros((N, IN_PAD), f32).at[:, :IN_DIM].set(x)
    w0p = jnp.zeros((IN_PAD, DIM), f32).at[:IN_DIM, :].set(params["w0"])

    stem_node_oh = jnp.zeros((S_PAD, N), f32).at[:S].set(inputs["stem_node_oh"])
    stem_graph_oh = jnp.zeros((S_PAD, G), f32).at[:S].set(inputs["stem_graph_oh"])

    # Fuse [Wq | Wk | Wv | Wskip] -> one (DIM, 4*DIM) bf16 weight (f32 accum in-kernel).
    wqkvs = jnp.concatenate(
        [params["wq"], params["wk"], params["wv"], params["wsk"]], axis=1
    ).astype(jnp.bfloat16)
    bqkvs = jnp.concatenate(
        [params["bq"], params["bk"], params["bv"], params["bsk"]], axis=1)

    we = params["we"]                        # (EDGE_DIM, DIM)
    wet = we.T                               # (DIM, EDGE_DIM)

    # Lane-dense stem head: pad 105 -> 128 output columns.
    ws3p = jnp.zeros((DIM, STEM_OUT_PAD), f32).at[:, :NUM_OUT_PER_STEM].set(params["ws3"])
    bs3p = jnp.zeros((1, STEM_OUT_PAD), f32).at[:, :NUM_OUT_PER_STEM].set(params["bs3"])

    args = [
        xp, inputs["mask"], inputs["ea4"], inputs["pool_mat"],
        stem_node_oh, stem_graph_oh,
        w0p, params["b0"],
        wqkvs, bqkvs, we, wet,
        params["ws1"], params["bs1"], params["ws2"], params["bs2"], ws3p, bs3p,
        params["wm1"], params["bm1"], params["wm2"], params["bm2"],
        params["wm3"], params["bm3"],
    ]
    vspec = pl.BlockSpec(memory_space=pltpu.MemorySpace.VMEM)
    stem_pad_out, mol_out = pl.pallas_call(
        mpnn_kernel,
        out_shape=(
            jax.ShapeDtypeStruct((S_PAD, STEM_OUT_PAD), jnp.float32),
            jax.ShapeDtypeStruct((G, NUM_OUT_PER_MOL), jnp.float32),
        ),
        in_specs=[vspec] * len(args),
        out_specs=(vspec, vspec),
        compiler_params=pltpu.CompilerParams(vmem_limit_bytes=32 * 1024 * 1024),
    )(*args)
    return stem_pad_out[:S, :NUM_OUT_PER_STEM], mol_out


def _linear_init(key, fan_in, fan_out, bias=True):
    # Deterministic torch-Linear-style U(-1/sqrt(fan_in), 1/sqrt(fan_in)) init.
    kw, kb = jax.random.split(key)
    s = (1.0 / fan_in) ** 0.5
    w = jax.random.uniform(kw, (fan_in, fan_out), jnp.float32, -s, s)
    b = (jax.random.uniform(kb, (1, fan_out), jnp.float32, -s, s)
         if bias else None)
    return w, b


def init_params(key):
    ks = jax.random.split(key, 16)
    p = {}
    p["w0"], p["b0"] = _linear_init(ks[0], IN_DIM, DIM)
    p["wq"], p["bq"] = _linear_init(ks[1], DIM, DIM)
    p["wk"], p["bk"] = _linear_init(ks[2], DIM, DIM)
    p["wv"], p["bv"] = _linear_init(ks[3], DIM, DIM)
    p["we"], _ = _linear_init(ks[4], EDGE_DIM, DIM, bias=False)   # lin_edge: no bias
    p["wsk"], p["bsk"] = _linear_init(ks[5], DIM, DIM)            # lin_skip (root)
    p["ws1"], p["bs1"] = _linear_init(ks[6], 2 * DIM, DIM)
    p["ws2"], p["bs2"] = _linear_init(ks[7], DIM, DIM)
    p["ws3"], p["bs3"] = _linear_init(ks[8], DIM, NUM_OUT_PER_STEM)
    p["wm1"], p["bm1"] = _linear_init(ks[9], DIM, DIM)
    p["wm2"], p["bm2"] = _linear_init(ks[10], DIM, DIM)
    p["wm3"], p["bm3"] = _linear_init(ks[11], DIM, NUM_OUT_PER_MOL)
    return p


if __name__ == "__main__":
    key = jax.random.PRNGKey(0)
    N, G, S = 32, 2, 6                       # nodes, graphs, stems
    per = N // G

    # Directed ring (both ways) within each graph -> every node has incoming edges.
    src_l, dst_l = [], []
    for g in range(G):
        off = g * per
        for i in range(per):
            j = (i + 1) % per
            src_l += [off + i, off + j]
            dst_l += [off + j, off + i]
    src = jnp.array(src_l, dtype=jnp.int32)
    dst = jnp.array(dst_l, dtype=jnp.int32)
    E = int(src.shape[0])

    k_x, k_e, k_p = jax.random.split(key, 3)
    x = jax.random.normal(k_x, (N, IN_DIM), dtype=jnp.float32)            # data.x
    edge_attr = jax.random.normal(k_e, (E, EDGE_DIM), dtype=jnp.float32)  # data.edge_attr
    batch = jnp.repeat(jnp.arange(G, dtype=jnp.int32), per)               # data.batch

    # stems / stems_batch / __slices__['x'] offsets
    stems_batch = jnp.array([0, 0, 0, 1, 1, 1], dtype=jnp.int32)
    stems = jnp.array([1, 3, 5, 2, 4, 6], dtype=jnp.int32)
    node_offsets = jnp.array([0, per], dtype=jnp.int32)
    stem_idx = node_offsets[stems_batch] + stems

    # Dense graph operands (glue; pure layout plumbing).
    mask = jnp.zeros((N, N), jnp.float32).at[dst, src].set(1.0)
    ea4 = jnp.zeros((EDGE_DIM, N, N), jnp.float32).at[:, dst, src].set(edge_attr.T)
    onehot_batch = jax.nn.one_hot(batch, G, dtype=jnp.float32)            # (N, G)
    counts = jnp.sum(onehot_batch, axis=0)                                 # (G,)
    pool_mat = onehot_batch.T / counts[:, None]                            # (G, N)
    stem_node_oh = jax.nn.one_hot(stem_idx, N, dtype=jnp.float32)          # (S, N)
    stem_graph_oh = jax.nn.one_hot(stems_batch, G, dtype=jnp.float32)      # (S, G)

    inputs = dict(x=x, mask=mask, ea4=ea4, pool_mat=pool_mat,
                  stem_node_oh=stem_node_oh, stem_graph_oh=stem_graph_oh)
    params = init_params(k_p)

    per_stem_out, per_mol_out = mpnn_forward(inputs, params)
    jax.block_until_ready((per_stem_out, per_mol_out))
    assert per_stem_out.shape == (S, NUM_OUT_PER_STEM)
    assert per_mol_out.shape == (G, NUM_OUT_PER_MOL)
    assert bool(jnp.all(jnp.isfinite(per_stem_out)))
    assert bool(jnp.all(jnp.isfinite(per_mol_out)))
    print("KERNEL_OK")
</pallas_src>

<mosaic_0001>
module attributes {stable_mosaic.version = 11 : i64} {
  func.func @mpnn_kernel(%arg0: memref<32x32xf32, #tpu.memory_space<vmem>>, %arg1: memref<32x32xf32, #tpu.memory_space<vmem>>, %arg2: memref<4x32x32xf32, #tpu.memory_space<vmem>>, %arg3: memref<2x32xf32, #tpu.memory_space<vmem>>, %arg4: memref<8x32xf32, #tpu.memory_space<vmem>>, %arg5: memref<8x2xf32, #tpu.memory_space<vmem>>, %arg6: memref<32x64xf32, #tpu.memory_space<vmem>>, %arg7: memref<1x64xf32, #tpu.memory_space<vmem>>, %arg8: memref<64x256xbf16, #tpu.memory_space<vmem>>, %arg9: memref<1x256xf32, #tpu.memory_space<vmem>>, %arg10: memref<4x64xf32, #tpu.memory_space<vmem>>, %arg11: memref<64x4xf32, #tpu.memory_space<vmem>>, %arg12: memref<128x64xf32, #tpu.memory_space<vmem>>, %arg13: memref<1x64xf32, #tpu.memory_space<vmem>>, %arg14: memref<64x64xf32, #tpu.memory_space<vmem>>, %arg15: memref<1x64xf32, #tpu.memory_space<vmem>>, %arg16: memref<64x128xf32, #tpu.memory_space<vmem>>, %arg17: memref<1x128xf32, #tpu.memory_space<vmem>>, %arg18: memref<64x64xf32, #tpu.memory_space<vmem>>, %arg19: memref<1x64xf32, #tpu.memory_space<vmem>>, %arg20: memref<64x64xf32, #tpu.memory_space<vmem>>, %arg21: memref<1x64xf32, #tpu.memory_space<vmem>>, %arg22: memref<64x1xf32, #tpu.memory_space<vmem>>, %arg23: memref<1x1xf32, #tpu.memory_space<vmem>>, %arg24: memref<8x128xf32, #tpu.memory_space<vmem>>, %arg25: memref<2x1xf32, #tpu.memory_space<vmem>>) attributes {dimension_semantics = [], scalar_prefetch = 0 : i64, scratch_operands = 0 : i64, tpu.core_type = #tpu.core_type<tc>} {
    %c0 = arith.constant 0 : index
    %c0_0 = arith.constant 0 : index
    %0 = vector.load %arg0[%c0, %c0_0] : memref<32x32xf32, #tpu.memory_space<vmem>>, vector<32x32xf32>
    %c0_1 = arith.constant 0 : index
    %c0_2 = arith.constant 0 : index
    %1 = vector.load %arg1[%c0_1, %c0_2] : memref<32x32xf32, #tpu.memory_space<vmem>>, vector<32x32xf32>
    %c0_3 = arith.constant 0 : index
    %c0_4 = arith.constant 0 : index
    %2 = vector.load %arg10[%c0_3, %c0_4] : memref<4x64xf32, #tpu.memory_space<vmem>>, vector<4x64xf32>
    %c0_5 = arith.constant 0 : index
    %c0_6 = arith.constant 0 : index
    %3 = vector.load %arg11[%c0_5, %c0_6] : memref<64x4xf32, #tpu.memory_space<vmem>>, vector<64x4xf32>
    %cst = arith.constant dense<0.000000e+00> : vector<32xf32>
    %4 = vector.multi_reduction <add>, %1, %cst [1] : vector<32x32xf32> to vector<32xf32>
    %5 = vector.shape_cast %4 : vector<32xf32> to vector<32x1xf32>
    %cst_7 = arith.constant 0.000000e+00 : f32
    %6 = vector.broadcast %cst_7 : f32 to vector<32x1xf32>
    %7 = arith.cmpf ogt, %5, %6 : vector<32x1xf32>
    %8 = arith.extui %7 : vector<32x1xi1> to vector<32x1xi32>
    %9 = arith.sitofp %8 : vector<32x1xi32> to vector<32x1xf32>
    %c0_8 = arith.constant 0 : index
    %c0_9 = arith.constant 0 : index
    %10 = vector.load %arg6[%c0_8, %c0_9] : memref<32x64xf32, #tpu.memory_space<vmem>>, vector<32x64xf32>
    %cst_10 = arith.constant dense<0.000000e+00> : vector<32x64xf32>
    %11 = tpu.matmul %0, %10, %cst_10 {dimension_numbers = #tpu.dot_dimension_numbers<[1], [0], [0], [1], [0, 0, 1, 1], [], []>} : vector<32x32xf32>, vector<32x64xf32>, vector<32x64xf32> -> vector<32x64xf32>
    %c0_11 = arith.constant 0 : index
    %c0_12 = arith.constant 0 : index
    %12 = vector.load %arg7[%c0_11, %c0_12] : memref<1x64xf32, #tpu.memory_space<vmem>>, vector<1x64xf32>
    %13 = vector.broadcast %12 : vector<1x64xf32> to vector<32x64xf32>
    %14 = arith.addf %11, %13 : vector<32x64xf32>
    %cst_13 = arith.constant 0.000000e+00 : f32
    %15 = vector.broadcast %cst_13 : f32 to vector<32x64xf32>
    %16 = arith.cmpf oge, %14, %15 : vector<32x64xf32>
    %cst_14 = arith.constant 0.00999999977 : f32
    %17 = vector.broadcast %cst_14 : f32 to vector<32x64xf32>
    %18 = arith.mulf %17, %14 : vector<32x64xf32>
    %19 = arith.select %16, %14, %18 : vector<32x64xi1>, vector<32x64xf32>
    %c0_15 = arith.constant 0 : index
    %c0_16 = arith.constant 0 : index
    %20 = vector.load %arg8[%c0_15, %c0_16] : memref<64x256xbf16, #tpu.memory_space<vmem>>, vector<64x256xbf16>
    %c0_17 = arith.constant 0 : index
    %c0_18 = arith.constant 0 : index
    %21 = vector.load %arg9[%c0_17, %c0_18] : memref<1x256xf32, #tpu.memory_space<vmem>>, vector<1x256xf32>
    %c0_i32 = arith.constant 0 : i32
    %22 = arith.truncf %19 : vector<32x64xf32> to vector<32x64xbf16>
    %cst_19 = arith.constant dense<0.000000e+00> : vector<32x256xf32>
    %23 = tpu.matmul %22, %20, %cst_19 {dimension_numbers = #tpu.dot_dimension_numbers<[1], [0], [0], [1], [0, 0, 1, 1], [], []>} : vector<32x64xbf16>, vector<64x256xbf16>, vector<32x256xf32> -> vector<32x256xf32>
    %24 = vector.broadcast %21 : vector<1x256xf32> to vector<32x256xf32>
    %25 = arith.addf %23, %24 : vector<32x256xf32>
    %26 = vector.extract_strided_slice %25 {offsets = [0, 0], sizes = [32, 64], strides = [1, 1]} : vector<32x256xf32> to vector<32x64xf32>
    %27 = vector.extract_strided_slice %25 {offsets = [0, 64], sizes = [32, 64], strides = [1, 1]} : vector<32x256xf32> to vector<32x64xf32>
    %28 = vector.extract_strided_slice %25 {offsets = [0, 128], sizes = [32, 64], strides = [1, 1]} : vector<32x256xf32> to vector<32x64xf32>
    %29 = vector.extract_strided_slice %25 {offsets = [0, 192], sizes = [32, 64], strides = [1, 1]} : vector<32x256xf32> to vector<32x64xf32>
    %30 = arith.truncf %26 : vector<32x64xf32> to vector<32x64xbf16>
    %31 = arith.truncf %27 : vector<32x64xf32> to vector<32x64xbf16>
    %cst_20 = arith.constant dense<0.000000e+00> : vector<32x32xf32>
    %32 = tpu.matmul %30, %31, %cst_20 {dimension_numbers = #tpu.dot_dimension_numbers<[1], [1], [0], [0], [0, 0, 1, 0], [], []>} : vector<32x64xbf16>, vector<32x64xbf16>, vector<32x32xf32> -> vector<32x32xf32>
    %cst_21 = arith.constant dense<0.000000e+00> : vector<32x4xf32>
    %33 = tpu.matmul %26, %3, %cst_21 {dimension_numbers = #tpu.dot_dimension_numbers<[1], [0], [0], [1], [0, 0, 1, 1], [], []>} : vector<32x64xf32>, vector<64x4xf32>, vector<32x4xf32> -> vector<32x4xf32>
    %c0_22 = arith.constant 0 : index
    %c0_23 = arith.constant 0 : index
    %c0_24 = arith.constant 0 : index
    %34 = vector.load %arg2[%c0_22, %c0_23, %c0_24] : memref<4x32x32xf32, #tpu.memory_space<vmem>>, vector<1x32x32xf32>
    %35 = vector.shape_cast %34 : vector<1x32x32xf32> to vector<32x32xf32>
    %36 = vector.extract_strided_slice %33 {offsets = [0, 0], sizes = [32, 1], strides = [1, 1]} : vector<32x4xf32> to vector<32x1xf32>
    %37 = vector.broadcast %36 : vector<32x1xf32> to vector<32x32xf32>
    %38 = arith.mulf %35, %37 : vector<32x32xf32>
    %39 = arith.addf %32, %38 : vector<32x32xf32>
    %c1 = arith.constant 1 : index
    %c0_25 = arith.constant 0 : index
    %c0_26 = arith.constant 0 : index
    %40 = vector.load %arg2[%c1, %c0_25, %c0_26] : memref<4x32x32xf32, #tpu.memory_space<vmem>>, vector<1x32x32xf32>
    %41 = vector.shape_cast %40 : vector<1x32x32xf32> to vector<32x32xf32>
    %42 = vector.extract_strided_slice %33 {offsets = [0, 1], sizes = [32, 1], strides = [1, 1]} : vector<32x4xf32> to vector<32x1xf32>
    %43 = vector.broadcast %42 : vector<32x1xf32> to vector<32x32xf32>
    %44 = arith.mulf %41, %43 : vector<32x32xf32>
    %45 = arith.addf %39, %44 : vector<32x32xf32>
    %c2 = arith.constant 2 : index
    %c0_27 = arith.constant 0 : index
    %c0_28 = arith.constant 0 : index
    %46 = vector.load %arg2[%c2, %c0_27, %c0_28] : memref<4x32x32xf32, #tpu.memory_space<vmem>>, vector<1x32x32xf32>
    %47 = vector.shape_cast %46 : vector<1x32x32xf32> to vector<32x32xf32>
    %48 = vector.extract_strided_slice %33 {offsets = [0, 2], sizes = [32, 1], strides = [1, 1]} : vector<32x4xf32> to vector<32x1xf32>
    %49 = vector.broadcast %48 : vector<32x1xf32> to vector<32x32xf32>
    %50 = arith.mulf %47, %49 : vector<32x32xf32>
    %51 = arith.addf %45, %50 : vector<32x32xf32>
    %c3 = arith.constant 3 : index
    %c0_29 = arith.constant 0 : index
    %c0_30 = arith.constant 0 : index
    %52 = vector.load %arg2[%c3, %c0_29, %c0_30] : memref<4x32x32xf32, #tpu.memory_space<vmem>>, vector<1x32x32xf32>
    %53 = vector.shape_cast %52 : vector<1x32x32xf32> to vector<32x32xf32>
    %54 = vector.extract_strided_slice %33 {offsets = [0, 3], sizes = [32, 1], strides = [1, 1]} : vector<32x4xf32> to vector<32x1xf32>
    %55 = vector.broadcast %54 : vector<32x1xf32> to vector<32x32xf32>
    %56 = arith.mulf %53, %55 : vector<32x32xf32>
    %57 = arith.addf %51, %56 : vector<32x32xf32>
    %cst_31 = arith.constant 1.250000e-01 : f32
    %58 = vector.broadcast %cst_31 : f32 to vector<32x32xf32>
    %59 = arith.mulf %57, %58 : vector<32x32xf32>
    %cst_32 = arith.constant 0.000000e+00 : f32
    %60 = vector.broadcast %cst_32 : f32 to vector<32x32xf32>
    %61 = arith.cmpf ogt, %1, %60 : vector<32x32xf32>
    %cst_33 = arith.constant -1.000000e+30 : f32
    %62 = vector.broadcast %cst_33 : f32 to vector<32x32xf32>
    %63 = arith.select %61, %59, %62 : vector<32x32xi1>, vector<32x32xf32>
    %cst_34 = arith.constant dense<0xFF800000> : vector<32xf32>
    %64 = vector.multi_reduction <maximumf>, %63, %cst_34 [1] : vector<32x32xf32> to vector<32xf32>
    %65 = vector.shape_cast %64 : vector<32xf32> to vector<32x1xf32>
    %66 = vector.broadcast %65 : vector<32x1xf32> to vector<32x32xf32>
    %67 = arith.subf %63, %66 : vector<32x32xf32>
    %68 = math.exp %67 : vector<32x32xf32>
    %cst_35 = arith.constant dense<0.000000e+00> : vector<32xf32>
    %69 = vector.multi_reduction <add>, %68, %cst_35 [1] : vector<32x32xf32> to vector<32xf32>
    %70 = vector.shape_cast %69 : vector<32xf32> to vector<32x1xf32>
    %cst_36 = arith.constant 1.000000e-30 : f32
    %71 = vector.broadcast %cst_36 : f32 to vector<32x1xf32>
    %72 = arith.maximumf %70, %71 : vector<32x1xf32>
    %73 = tpu.reciprocal %72 {approx = true} : vector<32x1xf32> -> vector<32x1xf32>
    %74 = vector.broadcast %73 : vector<32x1xf32> to vector<32x32xf32>
    %75 = arith.mulf %68, %74 : vector<32x32xf32>
    %76 = vector.broadcast %9 : vector<32x1xf32> to vector<32x32xf32>
    %77 = arith.mulf %75, %76 : vector<32x32xf32>
    %78 = arith.truncf %77 : vector<32x32xf32> to vector<32x32xbf16>
    %79 = arith.truncf %28 : vector<32x64xf32> to vector<32x64xbf16>
    %cst_37 = arith.constant dense<0.000000e+00> : vector<32x64xf32>
    %80 = tpu.matmul %78, %79, %cst_37 {dimension_numbers = #tpu.dot_dimension_numbers<[1], [0], [0], [1], [0, 0, 1, 1], [], []>} : vector<32x32xbf16>, vector<32x64xbf16>, vector<32x64xf32> -> vector<32x64xf32>
    %c0_38 = arith.constant 0 : index
    %c0_39 = arith.constant 0 : index
    %c0_40 = arith.constant 0 : index
    %81 = vector.load %arg2[%c0_38, %c0_39, %c0_40] : memref<4x32x32xf32, #tpu.memory_space<vmem>>, vector<1x32x32xf32>
    %82 = vector.shape_cast %81 : vector<1x32x32xf32> to vector<32x32xf32>
    %83 = arith.mulf %77, %82 : vector<32x32xf32>
    %cst_41 = arith.constant dense<0.000000e+00> : vector<32xf32>
    %84 = vector.multi_reduction <add>, %83, %cst_41 [1] : vector<32x32xf32> to vector<32xf32>
    %85 = vector.shape_cast %84 : vector<32xf32> to vector<32x1xf32>
    %c1_42 = arith.constant 1 : index
    %c0_43 = arith.constant 0 : index
    %c0_44 = arith.constant 0 : index
    %86 = vector.load %arg2[%c1_42, %c0_43, %c0_44] : memref<4x32x32xf32, #tpu.memory_space<vmem>>, vector<1x32x32xf32>
    %87 = vector.shape_cast %86 : vector<1x32x32xf32> to vector<32x32xf32>
    %88 = arith.mulf %77, %87 : vector<32x32xf32>
    %cst_45 = arith.constant dense<0.000000e+00> : vector<32xf32>
    %89 = vector.multi_reduction <add>, %88, %cst_45 [1] : vector<32x32xf32> to vector<32xf32>
    %90 = vector.shape_cast %89 : vector<32xf32> to vector<32x1xf32>
    %c2_46 = arith.constant 2 : index
    %c0_47 = arith.constant 0 : index
    %c0_48 = arith.constant 0 : index
    %91 = vector.load %arg2[%c2_46, %c0_47, %c0_48] : memref<4x32x32xf32, #tpu.memory_space<vmem>>, vector<1x32x32xf32>
    %92 = vector.shape_cast %91 : vector<1x32x32xf32> to vector<32x32xf32>
    %93 = arith.mulf %77, %92 : vector<32x32xf32>
    %cst_49 = arith.constant dense<0.000000e+00> : vector<32xf32>
    %94 = vector.multi_reduction <add>, %93, %cst_49 [1] : vector<32x32xf32> to vector<32xf32>
    %95 = vector.shape_cast %94 : vector<32xf32> to vector<32x1xf32>
    %c3_50 = arith.constant 3 : index
    %c0_51 = arith.constant 0 : index
    %c0_52 = arith.constant 0 : index
    %96 = vector.load %arg2[%c3_50, %c0_51, %c0_52] : memref<4x32x32xf32, #tpu.memory_space<vmem>>, vector<1x32x32xf32>
    %97 = vector.shape_cast %96 : vector<1x32x32xf32> to vector<32x32xf32>
    %98 = arith.mulf %77, %97 : vector<32x32xf32>
    %cst_53 = arith.constant dense<0.000000e+00> : vector<32xf32>
    %99 = vector.multi_reduction <add>, %98, %cst_53 [1] : vector<32x32xf32> to vector<32xf32>
    %100 = vector.shape_cast %99 : vector<32xf32> to vector<32x1xf32>
    %101 = tpu.concatenate %85, %90, %95, %100 in 1 : vector<32x1xf32>, vector<32x1xf32>, vector<32x1xf32>, vector<32x1xf32> -> vector<32x4xf32>
    %cst_54 = arith.constant dense<0.000000e+00> : vector<32x64xf32>
    %102 = tpu.matmul %101, %2, %cst_54 {dimension_numbers = #tpu.dot_dimension_numbers<[1], [0], [0], [1], [0, 0, 1, 1], [], []>} : vector<32x4xf32>, vector<4x64xf32>, vector<32x64xf32> -> vector<32x64xf32>
    %103 = arith.addf %80, %102 : vector<32x64xf32>
    %104 = arith.addf %103, %29 : vector<32x64xf32>
    %cst_55 = arith.constant 0.000000e+00 : f32
    %105 = vector.broadcast %cst_55 : f32 to vector<32x64xf32>
    %106 = arith.cmpf oge, %104, %105 : vector<32x64xf32>
    %cst_56 = arith.constant 0.00999999977 : f32
    %107 = vector.broadcast %cst_56 : f32 to vector<32x64xf32>
    %108 = arith.mulf %107, %104 : vector<32x64xf32>
    %109 = arith.select %106, %104, %108 : vector<32x64xi1>, vector<32x64xf32>
    %c1_i32 = arith.constant 1 : i32
    %110 = arith.truncf %109 : vector<32x64xf32> to vector<32x64xbf16>
    %cst_57 = arith.constant dense<0.000000e+00> : vector<32x256xf32>
    %111 = tpu.matmul %110, %20, %cst_57 {dimension_numbers = #tpu.dot_dimension_numbers<[1], [0], [0], [1], [0, 0, 1, 1], [], []>} : vector<32x64xbf16>, vector<64x256xbf16>, vector<32x256xf32> -> vector<32x256xf32>
    %112 = vector.broadcast %21 : vector<1x256xf32> to vector<32x256xf32>
    %113 = arith.addf %111, %112 : vector<32x256xf32>
    %114 = vector.extract_strided_slice %113 {offsets = [0, 0], sizes = [32, 64], strides = [1, 1]} : vector<32x256xf32> to vector<32x64xf32>
    %115 = vector.extract_strided_slice %113 {offsets = [0, 64], sizes = [32, 64], strides = [1, 1]} : vector<32x256xf32> to vector<32x64xf32>
    %116 = vector.extract_strided_slice %113 {offsets = [0, 128], sizes = [32, 64], strides = [1, 1]} : vector<32x256xf32> to vector<32x64xf32>
    %117 = vector.extract_strided_slice %113 {offsets = [0, 192], sizes = [32, 64], strides = [1, 1]} : vector<32x256xf32> to vector<32x64xf32>
    %118 = arith.truncf %114 : vector<32x64xf32> to vector<32x64xbf16>
    %119 = arith.truncf %115 : vector<32x64xf32> to vector<32x64xbf16>
    %cst_58 = arith.constant dense<0.000000e+00> : vector<32x32xf32>
    %120 = tpu.matmul %118, %119, %cst_58 {dimension_numbers = #tpu.dot_dimension_numbers<[1], [1], [0], [0], [0, 0, 1, 0], [], []>} : vector<32x64xbf16>, vector<32x64xbf16>, vector<32x32xf32> -> vector<32x32xf32>
    %cst_59 = arith.constant dense<0.000000e+00> : vector<32x4xf32>
    %121 = tpu.matmul %114, %3, %cst_59 {dimension_numbers = #tpu.dot_dimension_numbers<[1], [0], [0], [1], [0, 0, 1, 1], [], []>} : vector<32x64xf32>, vector<64x4xf32>, vector<32x4xf32> -> vector<32x4xf32>
    %c0_60 = arith.constant 0 : index
    %c0_61 = arith.constant 0 : index
    %c0_62 = arith.constant 0 : index
    %122 = vector.load %arg2[%c0_60, %c0_61, %c0_62] : memref<4x32x32xf32, #tpu.memory_space<vmem>>, vector<1x32x32xf32>
    %123 = vector.shape_cast %122 : vector<1x32x32xf32> to vector<32x32xf32>
    %124 = vector.extract_strided_slice %121 {offsets = [0, 0], sizes = [32, 1], strides = [1, 1]} : vector<32x4xf32> to vector<32x1xf32>
    %125 = vector.broadcast %124 : vector<32x1xf32> to vector<32x32xf32>
    %126 = arith.mulf %123, %125 : vector<32x32xf32>
    %127 = arith.addf %120, %126 : vector<32x32xf32>
    %c1_63 = arith.constant 1 : index
    %c0_64 = arith.constant 0 : index
    %c0_65 = arith.constant 0 : index
    %128 = vector.load %arg2[%c1_63, %c0_64, %c0_65] : memref<4x32x32xf32, #tpu.memory_space<vmem>>, vector<1x32x32xf32>
    %129 = vector.shape_cast %128 : vector<1x32x32xf32> to vector<32x32xf32>
    %130 = vector.extract_strided_slice %121 {offsets = [0, 1], sizes = [32, 1], strides = [1, 1]} : vector<32x4xf32> to vector<32x1xf32>
    %131 = vector.broadcast %130 : vector<32x1xf32> to vector<32x32xf32>
    %132 = arith.mulf %129, %131 : vector<32x32xf32>
    %133 = arith.addf %127, %132 : vector<32x32xf32>
    %c2_66 = arith.constant 2 : index
    %c0_67 = arith.constant 0 : index
    %c0_68 = arith.constant 0 : index
    %134 = vector.load %arg2[%c2_66, %c0_67, %c0_68] : memref<4x32x32xf32, #tpu.memory_space<vmem>>, vector<1x32x32xf32>
    %135 = vector.shape_cast %134 : vector<1x32x32xf32> to vector<32x32xf32>
    %136 = vector.extract_strided_slice %121 {offsets = [0, 2], sizes = [32, 1], strides = [1, 1]} : vector<32x4xf32> to vector<32x1xf32>
    %137 = vector.broadcast %136 : vector<32x1xf32> to vector<32x32xf32>
    %138 = arith.mulf %135, %137 : vector<32x32xf32>
    %139 = arith.addf %133, %138 : vector<32x32xf32>
    %c3_69 = arith.constant 3 : index
    %c0_70 = arith.constant 0 : index
    %c0_71 = arith.constant 0 : index
    %140 = vector.load %arg2[%c3_69, %c0_70, %c0_71] : memref<4x32x32xf32, #tpu.memory_space<vmem>>, vector<1x32x32xf32>
    %141 = vector.shape_cast %140 : vector<1x32x32xf32> to vector<32x32xf32>
    %142 = vector.extract_strided_slice %121 {offsets = [0, 3], sizes = [32, 1], strides = [1, 1]} : vector<32x4xf32> to vector<32x1xf32>
    %143 = vector.broadcast %142 : vector<32x1xf32> to vector<32x32xf32>
    %144 = arith.mulf %141, %143 : vector<32x32xf32>
    %145 = arith.addf %139, %144 : vector<32x32xf32>
    %cst_72 = arith.constant 1.250000e-01 : f32
    %146 = vector.broadcast %cst_72 : f32 to vector<32x32xf32>
    %147 = arith.mulf %145, %146 : vector<32x32xf32>
    %cst_73 = arith.constant 0.000000e+00 : f32
    %148 = vector.broadcast %cst_73 : f32 to vector<32x32xf32>
    %149 = arith.cmpf ogt, %1, %148 : vector<32x32xf32>
    %cst_74 = arith.constant -1.000000e+30 : f32
    %150 = vector.broadcast %cst_74 : f32 to vector<32x32xf32>
    %151 = arith.select %149, %147, %150 : vector<32x32xi1>, vector<32x32xf32>
    %cst_75 = arith.constant dense<0xFF800000> : vector<32xf32>
    %152 = vector.multi_reduction <maximumf>, %151, %cst_75 [1] : vector<32x32xf32> to vector<32xf32>
    %153 = vector.shape_cast %152 : vector<32xf32> to vector<32x1xf32>
    %154 = vector.broadcast %153 : vector<32x1xf32> to vector<32x32xf32>
    %155 = arith.subf %151, %154 : vector<32x32xf32>
    %156 = math.exp %155 : vector<32x32xf32>
    %cst_76 = arith.constant dense<0.000000e+00> : vector<32xf32>
    %157 = vector.multi_reduction <add>, %156, %cst_76 [1] : vector<32x32xf32> to vector<32xf32>
    %158 = vector.shape_cast %157 : vector<32xf32> to vector<32x1xf32>
    %cst_77 = arith.constant 1.000000e-30 : f32
    %159 = vector.broadcast %cst_77 : f32 to vector<32x1xf32>
    %160 = arith.maximumf %158, %159 : vector<32x1xf32>
    %161 = tpu.reciprocal %160 {approx = true} : vector<32x1xf32> -> vector<32x1xf32>
    %162 = vector.broadcast %161 : vector<32x1xf32> to vector<32x32xf32>
    %163 = arith.mulf %156, %162 : vector<32x32xf32>
    %164 = vector.broadcast %9 : vector<32x1xf32> to vector<32x32xf32>
    %165 = arith.mulf %163, %164 : vector<32x32xf32>
    %166 = arith.truncf %165 : vector<32x32xf32> to vector<32x32xbf16>
    %167 = arith.truncf %116 : vector<32x64xf32> to vector<32x64xbf16>
    %cst_78 = arith.constant dense<0.000000e+00> : vector<32x64xf32>
    %168 = tpu.matmul %166, %167, %cst_78 {dimension_numbers = #tpu.dot_dimension_numbers<[1], [0], [0], [1], [0, 0, 1, 1], [], []>} : vector<32x32xbf16>, vector<32x64xbf16>, vector<32x64xf32> -> vector<32x64xf32>
    %c0_79 = arith.constant 0 : index
    %c0_80 = arith.constant 0 : index
    %c0_81 = arith.constant 0 : index
    %169 = vector.load %arg2[%c0_79, %c0_80, %c0_81] : memref<4x32x32xf32, #tpu.memory_space<vmem>>, vector<1x32x32xf32>
    %170 = vector.shape_cast %169 : vector<1x32x32xf32> to vector<32x32xf32>
    %171 = arith.mulf %165, %170 : vector<32x32xf32>
    %cst_82 = arith.constant dense<0.000000e+00> : vector<32xf32>
    %172 = vector.multi_reduction <add>, %171, %cst_82 [1] : vector<32x32xf32> to vector<32xf32>
    %173 = vector.shape_cast %172 : vector<32xf32> to vector<32x1xf32>
    %c1_83 = arith.constant 1 : index
    %c0_84 = arith.constant 0 : index
    %c0_85 = arith.constant 0 : index
    %174 = vector.load %arg2[%c1_83, %c0_84, %c0_85] : memref<4x32x32xf32, #tpu.memory_space<vmem>>, vector<1x32x32xf32>
    %175 = vector.shape_cast %174 : vector<1x32x32xf32> to vector<32x32xf32>
    %176 = arith.mulf %165, %175 : vector<32x32xf32>
    %cst_86 = arith.constant dense<0.000000e+00> : vector<32xf32>
    %177 = vector.multi_reduction <add>, %176, %cst_86 [1] : vector<32x32xf32> to vector<32xf32>
    %178 = vector.shape_cast %177 : vector<32xf32> to vector<32x1xf32>
    %c2_87 = arith.constant 2 : index
    %c0_88 = arith.constant 0 : index
    %c0_89 = arith.constant 0 : index
    %179 = vector.load %arg2[%c2_87, %c0_88, %c0_89] : memref<4x32x32xf32, #tpu.memory_space<vmem>>, vector<1x32x32xf32>
    %180 = vector.shape_cast %179 : vector<1x32x32xf32> to vector<32x32xf32>
    %181 = arith.mulf %165, %180 : vector<32x32xf32>
    %cst_90 = arith.constant dense<0.000000e+00> : vector<32xf32>
    %182 = vector.multi_reduction <add>, %181, %cst_90 [1] : vector<32x32xf32> to vector<32xf32>
    %183 = vector.shape_cast %182 : vector<32xf32> to vector<32x1xf32>
    %c3_91 = arith.constant 3 : index
    %c0_92 = arith.constant 0 : index
    %c0_93 = arith.constant 0 : index
    %184 = vector.load %arg2[%c3_91, %c0_92, %c0_93] : memref<4x32x32xf32, #tpu.memory_space<vmem>>, vector<1x32x32xf32>
    %185 = vector.shape_cast %184 : vector<1x32x32xf32> to vector<32x32xf32>
    %186 = arith.mulf %165, %185 : vector<32x32xf32>
    %cst_94 = arith.constant dense<0.000000e+00> : vector<32xf32>
    %187 = vector.multi_reduction <add>, %186, %cst_94 [1] : vector<32x32xf32> to vector<32xf32>
    %188 = vector.shape_cast %187 : vector<32xf32> to vector<32x1xf32>
    %189 = tpu.concatenate %173, %178, %183, %188 in 1 : vector<32x1xf32>, vector<32x1xf32>, vector<32x1xf32>, vector<32x1xf32> -> vector<32x4xf32>
    %cst_95 = arith.constant dense<0.000000e+00> : vector<32x64xf32>
    %190 = tpu.matmul %189, %2, %cst_95 {dimension_numbers = #tpu.dot_dimension_numbers<[1], [0], [0], [1], [0, 0, 1, 1], [], []>} : vector<32x4xf32>, vector<4x64xf32>, vector<32x64xf32> -> vector<32x64xf32>
    %191 = arith.addf %168, %190 : vector<32x64xf32>
    %192 = arith.addf %191, %117 : vector<32x64xf32>
    %cst_96 = arith.constant 0.000000e+00 : f32
    %193 = vector.broadcast %cst_96 : f32 to vector<32x64xf32>
    %194 = arith.cmpf oge, %192, %193 : vector<32x64xf32>
    %cst_97 = arith.constant 0.00999999977 : f32
    %195 = vector.broadcast %cst_97 : f32 to vector<32x64xf32>
    %196 = arith.mulf %195, %192 : vector<32x64xf32>
    %197 = arith.select %194, %192, %196 : vector<32x64xi1>, vector<32x64xf32>
    %c2_i32 = arith.constant 2 : i32
    %198 = arith.truncf %197 : vector<32x64xf32> to vector<32x64xbf16>
    %cst_98 = arith.constant dense<0.000000e+00> : vector<32x256xf32>
    %199 = tpu.matmul %198, %20, %cst_98 {dimension_numbers = #tpu.dot_dimension_numbers<[1], [0], [0], [1], [0, 0, 1, 1], [], []>} : vector<32x64xbf16>, vector<64x256xbf16>, vector<32x256xf32> -> vector<32x256xf32>
    %200 = vector.broadcast %21 : vector<1x256xf32> to vector<32x256xf32>
    %201 = arith.addf %199, %200 : vector<32x256xf32>
    %202 = vector.extract_strided_slice %201 {offsets = [0, 0], sizes = [32, 64], strides = [1, 1]} : vector<32x256xf32> to vector<32x64xf32>
    %203 = vector.extract_strided_slice %201 {offsets = [0, 64], sizes = [32, 64], strides = [1, 1]} : vector<32x256xf32> to vector<32x64xf32>
    %204 = vector.extract_strided_slice %201 {offsets = [0, 128], sizes = [32, 64], strides = [1, 1]} : vector<32x256xf32> to vector<32x64xf32>
    %205 = vector.extract_strided_slice %201 {offsets = [0, 192], sizes = [32, 64], strides = [1, 1]} : vector<32x256xf32> to vector<32x64xf32>
    %206 = arith.truncf %202 : vector<32x64xf32> to vector<32x64xbf16>
    %207 = arith.truncf %203 : vector<32x64xf32> to vector<32x64xbf16>
    %cst_99 = arith.constant dense<0.000000e+00> : vector<32x32xf32>
    %208 = tpu.matmul %206, %207, %cst_99 {dimension_numbers = #tpu.dot_dimension_numbers<[1], [1], [0], [0], [0, 0, 1, 0], [], []>} : vector<32x64xbf16>, vector<32x64xbf16>, vector<32x32xf32> -> vector<32x32xf32>
    %cst_100 = arith.constant dense<0.000000e+00> : vector<32x4xf32>
    %209 = tpu.matmul %202, %3, %cst_100 {dimension_numbers = #tpu.dot_dimension_numbers<[1], [0], [0], [1], [0, 0, 1, 1], [], []>} : vector<32x64xf32>, vector<64x4xf32>, vector<32x4xf32> -> vector<32x4xf32>
    %c0_101 = arith.constant 0 : index
    %c0_102 = arith.constant 0 : index
    %c0_103 = arith.constant 0 : index
    %210 = vector.load %arg2[%c0_101, %c0_102, %c0_103] : memref<4x32x32xf32, #tpu.memory_space<vmem>>, vector<1x32x32xf32>
    %211 = vector.shape_cast %210 : vector<1x32x32xf32> to vector<32x32xf32>
    %212 = vector.extract_strided_slice %209 {offsets = [0, 0], sizes = [32, 1], strides = [1, 1]} : vector<32x4xf32> to vector<32x1xf32>
    %213 = vector.broadcast %212 : vector<32x1xf32> to vector<32x32xf32>
    %214 = arith.mulf %211, %213 : vector<32x32xf32>
    %215 = arith.addf %208, %214 : vector<32x32xf32>
    %c1_104 = arith.constant 1 : index
    %c0_105 = arith.constant 0 : index
    %c0_106 = arith.constant 0 : index
    %216 = vector.load %arg2[%c1_104, %c0_105, %c0_106] : memref<4x32x32xf32, #tpu.memory_space<vmem>>, vector<1x32x32xf32>
    %217 = vector.shape_cast %216 : vector<1x32x32xf32> to vector<32x32xf32>
    %218 = vector.extract_strided_slice %209 {offsets = [0, 1], sizes = [32, 1], strides = [1, 1]} : vector<32x4xf32> to vector<32x1xf32>
    %219 = vector.broadcast %218 : vector<32x1xf32> to vector<32x32xf32>
    %220 = arith.mulf %217, %219 : vector<32x32xf32>
    %221 = arith.addf %215, %220 : vector<32x32xf32>
    %c2_107 = arith.constant 2 : index
    %c0_108 = arith.constant 0 : index
    %c0_109 = arith.constant 0 : index
    %222 = vector.load %arg2[%c2_107, %c0_108, %c0_109] : memref<4x32x32xf32, #tpu.memory_space<vmem>>, vector<1x32x32xf32>
    %223 = vector.shape_cast %222 : vector<1x32x32xf32> to vector<32x32xf32>
    %224 = vector.extract_strided_slice %209 {offsets = [0, 2], sizes = [32, 1], strides = [1, 1]} : vector<32x4xf32> to vector<32x1xf32>
    %225 = vector.broadcast %224 : vector<32x1xf32> to vector<32x32xf32>
    %226 = arith.mulf %223, %225 : vector<32x32xf32>
    %227 = arith.addf %221, %226 : vector<32x32xf32>
    %c3_110 = arith.constant 3 : index
    %c0_111 = arith.constant 0 : index
    %c0_112 = arith.constant 0 : index
    %228 = vector.load %arg2[%c3_110, %c0_111, %c0_112] : memref<4x32x32xf32, #tpu.memory_space<vmem>>, vector<1x32x32xf32>
    %229 = vector.shape_cast %228 : vector<1x32x32xf32> to vector<32x32xf32>
    %230 = vector.extract_strided_slice %209 {offsets = [0, 3], sizes = [32, 1], strides = [1, 1]} : vector<32x4xf32> to vector<32x1xf32>
    %231 = vector.broadcast %230 : vector<32x1xf32> to vector<32x32xf32>
    %232 = arith.mulf %229, %231 : vector<32x32xf32>
    %233 = arith.addf %227, %232 : vector<32x32xf32>
    %cst_113 = arith.constant 1.250000e-01 : f32
    %234 = vector.broadcast %cst_113 : f32 to vector<32x32xf32>
    %235 = arith.mulf %233, %234 : vector<32x32xf32>
    %cst_114 = arith.constant 0.000000e+00 : f32
    %236 = vector.broadcast %cst_114 : f32 to vector<32x32xf32>
    %237 = arith.cmpf ogt, %1, %236 : vector<32x32xf32>
    %cst_115 = arith.constant -1.000000e+30 : f32
    %238 = vector.broadcast %cst_115 : f32 to vector<32x32xf32>
    %239 = arith.select %237, %235, %238 : vector<32x32xi1>, vector<32x32xf32>
    %cst_116 = arith.constant dense<0xFF800000> : vector<32xf32>
    %240 = vector.multi_reduction <maximumf>, %239, %cst_116 [1] : vector<32x32xf32> to vector<32xf32>
    %241 = vector.shape_cast %240 : vector<32xf32> to vector<32x1xf32>
    %242 = vector.broadcast %241 : vector<32x1xf32> to vector<32x32xf32>
    %243 = arith.subf %239, %242 : vector<32x32xf32>
    %244 = math.exp %243 : vector<32x32xf32>
    %cst_117 = arith.constant dense<0.000000e+00> : vector<32xf32>
    %245 = vector.multi_reduction <add>, %244, %cst_117 [1] : vector<32x32xf32> to vector<32xf32>
    %246 = vector.shape_cast %245 : vector<32xf32> to vector<32x1xf32>
    %cst_118 = arith.constant 1.000000e-30 : f32
    %247 = vector.broadcast %cst_118 : f32 to vector<32x1xf32>
    %248 = arith.maximumf %246, %247 : vector<32x1xf32>
    %249 = tpu.reciprocal %248 {approx = true} : vector<32x1xf32> -> vector<32x1xf32>
    %250 = vector.broadcast %249 : vector<32x1xf32> to vector<32x32xf32>
    %251 = arith.mulf %244, %250 : vector<32x32xf32>
    %252 = vector.broadcast %9 : vector<32x1xf32> to vector<32x32xf32>
    %253 = arith.mulf %251, %252 : vector<32x32xf32>
    %254 = arith.truncf %253 : vector<32x32xf32> to vector<32x32xbf16>
    %255 = arith.truncf %204 : vector<32x64xf32> to vector<32x64xbf16>
    %cst_119 = arith.constant dense<0.000000e+00> : vector<32x64xf32>
    %256 = tpu.matmul %254, %255, %cst_119 {dimension_numbers = #tpu.dot_dimension_numbers<[1], [0], [0], [1], [0, 0, 1, 1], [], []>} : vector<32x32xbf16>, vector<32x64xbf16>, vector<32x64xf32> -> vector<32x64xf32>
    %c0_120 = arith.constant 0 : index
    %c0_121 = arith.constant 0 : index
    %c0_122 = arith.constant 0 : index
    %257 = vector.load %arg2[%c0_120, %c0_121, %c0_122] : memref<4x32x32xf32, #tpu.memory_space<vmem>>, vector<1x32x32xf32>
    %258 = vector.shape_cast %257 : vector<1x32x32xf32> to vector<32x32xf32>
    %259 = arith.mulf %253, %258 : vector<32x32xf32>
    %cst_123 = arith.constant dense<0.000000e+00> : vector<32xf32>
    %260 = vector.multi_reduction <add>, %259, %cst_123 [1] : vector<32x32xf32> to vector<32xf32>
    %261 = vector.shape_cast %260 : vector<32xf32> to vector<32x1xf32>
    %c1_124 = arith.constant 1 : index
    %c0_125 = arith.constant 0 : index
    %c0_126 = arith.constant 0 : index
    %262 = vector.load %arg2[%c1_124, %c0_125, %c0_126] : memref<4x32x32xf32, #tpu.memory_space<vmem>>, vector<1x32x32xf32>
    %263 = vector.shape_cast %262 : vector<1x32x32xf32> to vector<32x32xf32>
    %264 = arith.mulf %253, %263 : vector<32x32xf32>
    %cst_127 = arith.constant dense<0.000000e+00> : vector<32xf32>
    %265 = vector.multi_reduction <add>, %264, %cst_127 [1] : vector<32x32xf32> to vector<32xf32>
    %266 = vector.shape_cast %265 : vector<32xf32> to vector<32x1xf32>
    %c2_128 = arith.constant 2 : index
    %c0_129 = arith.constant 0 : index
    %c0_130 = arith.constant 0 : index
    %267 = vector.load %arg2[%c2_128, %c0_129, %c0_130] : memref<4x32x32xf32, #tpu.memory_space<vmem>>, vector<1x32x32xf32>
    %268 = vector.shape_cast %267 : vector<1x32x32xf32> to vector<32x32xf32>
    %269 = arith.mulf %253, %268 : vector<32x32xf32>
    %cst_131 = arith.constant dense<0.000000e+00> : vector<32xf32>
    %270 = vector.multi_reduction <add>, %269, %cst_131 [1] : vector<32x32xf32> to vector<32xf32>
    %271 = vector.shape_cast %270 : vector<32xf32> to vector<32x1xf32>
    %c3_132 = arith.constant 3 : index
    %c0_133 = arith.constant 0 : index
    %c0_134 = arith.constant 0 : index
    %272 = vector.load %arg2[%c3_132, %c0_133, %c0_134] : memref<4x32x32xf32, #tpu.memory_space<vmem>>, vector<1x32x32xf32>
    %273 = vector.shape_cast %272 : vector<1x32x32xf32> to vector<32x32xf32>
    %274 = arith.mulf %253, %273 : vector<32x32xf32>
    %cst_135 = arith.constant dense<0.000000e+00> : vector<32xf32>
    %275 = vector.multi_reduction <add>, %274, %cst_135 [1] : vector<32x32xf32> to vector<32xf32>
    %276 = vector.shape_cast %275 : vector<32xf32> to vector<32x1xf32>
    %277 = tpu.concatenate %261, %266, %271, %276 in 1 : vector<32x1xf32>, vector<32x1xf32>, vector<32x1xf32>, vector<32x1xf32> -> vector<32x4xf32>
    %cst_136 = arith.constant dense<0.000000e+00> : vector<32x64xf32>
    %278 = tpu.matmul %277, %2, %cst_136 {dimension_numbers = #tpu.dot_dimension_numbers<[1], [0], [0], [1], [0, 0, 1, 1], [], []>} : vector<32x4xf32>, vector<4x64xf32>, vector<32x64xf32> -> vector<32x64xf32>
    %279 = arith.addf %256, %278 : vector<32x64xf32>
    %280 = arith.addf %279, %205 : vector<32x64xf32>
    %cst_137 = arith.constant 0.000000e+00 : f32
    %281 = vector.broadcast %cst_137 : f32 to vector<32x64xf32>
    %282 = arith.cmpf oge, %280, %281 : vector<32x64xf32>
    %cst_138 = arith.constant 0.00999999977 : f32
    %283 = vector.broadcast %cst_138 : f32 to vector<32x64xf32>
    %284 = arith.mulf %283, %280 : vector<32x64xf32>
    %285 = arith.select %282, %280, %284 : vector<32x64xi1>, vector<32x64xf32>
    %c3_i32 = arith.constant 3 : i32
    %286 = arith.truncf %285 : vector<32x64xf32> to vector<32x64xbf16>
    %cst_139 = arith.constant dense<0.000000e+00> : vector<32x256xf32>
    %287 = tpu.matmul %286, %20, %cst_139 {dimension_numbers = #tpu.dot_dimension_numbers<[1], [0], [0], [1], [0, 0, 1, 1], [], []>} : vector<32x64xbf16>, vector<64x256xbf16>, vector<32x256xf32> -> vector<32x256xf32>
    %288 = vector.broadcast %21 : vector<1x256xf32> to vector<32x256xf32>
    %289 = arith.addf %287, %288 : vector<32x256xf32>
    %290 = vector.extract_strided_slice %289 {offsets = [0, 0], sizes = [32, 64], strides = [1, 1]} : vector<32x256xf32> to vector<32x64xf32>
    %291 = vector.extract_strided_slice %289 {offsets = [0, 64], sizes = [32, 64], strides = [1, 1]} : vector<32x256xf32> to vector<32x64xf32>
    %292 = vector.extract_strided_slice %289 {offsets = [0, 128], sizes = [32, 64], strides = [1, 1]} : vector<32x256xf32> to vector<32x64xf32>
    %293 = vector.extract_strided_slice %289 {offsets = [0, 192], sizes = [32, 64], strides = [1, 1]} : vector<32x256xf32> to vector<32x64xf32>
    %294 = arith.truncf %290 : vector<32x64xf32> to vector<32x64xbf16>
    %295 = arith.truncf %291 : vector<32x64xf32> to vector<32x64xbf16>
    %cst_140 = arith.constant dense<0.000000e+00> : vector<32x32xf32>
    %296 = tpu.matmul %294, %295, %cst_140 {dimension_numbers = #tpu.dot_dimension_numbers<[1], [1], [0], [0], [0, 0, 1, 0], [], []>} : vector<32x64xbf16>, vector<32x64xbf16>, vector<32x32xf32> -> vector<32x32xf32>
    %cst_141 = arith.constant dense<0.000000e+00> : vector<32x4xf32>
    %297 = tpu.matmul %290, %3, %cst_141 {dimension_numbers = #tpu.dot_dimension_numbers<[1], [0], [0], [1], [0, 0, 1, 1], [], []>} : vector<32x64xf32>, vector<64x4xf32>, vector<32x4xf32> -> vector<32x4xf32>
    %c0_142 = arith.constant 0 : index
    %c0_143 = arith.constant 0 : index
    %c0_144 = arith.constant 0 : index
    %298 = vector.load %arg2[%c0_142, %c0_143, %c0_144] : memref<4x32x32xf32, #tpu.memory_space<vmem>>, vector<1x32x32xf32>
    %299 = vector.shape_cast %298 : vector<1x32x32xf32> to vector<32x32xf32>
    %300 = vector.extract_strided_slice %297 {offsets = [0, 0], sizes = [32, 1], strides = [1, 1]} : vector<32x4xf32> to vector<32x1xf32>
    %301 = vector.broadcast %300 : vector<32x1xf32> to vector<32x32xf32>
    %302 = arith.mulf %299, %301 : vector<32x32xf32>
    %303 = arith.addf %296, %302 : vector<32x32xf32>
    %c1_145 = arith.constant 1 : index
    %c0_146 = arith.constant 0 : index
    %c0_147 = arith.constant 0 : index
    %304 = vector.load %arg2[%c1_145, %c0_146, %c0_147] : memref<4x32x32xf32, #tpu.memory_space<vmem>>, vector<1x32x32xf32>
    %305 = vector.shape_cast %304 : vector<1x32x32xf32> to vector<32x32xf32>
    %306 = vector.extract_strided_slice %297 {offsets = [0, 1], sizes = [32, 1], strides = [1, 1]} : vector<32x4xf32> to vector<32x1xf32>
    %307 = vector.broadcast %306 : vector<32x1xf32> to vector<32x32xf32>
    %308 = arith.mulf %305, %307 : vector<32x32xf32>
    %309 = arith.addf %303, %308 : vector<32x32xf32>
    %c2_148 = arith.constant 2 : index
    %c0_149 = arith.constant 0 : index
    %c0_150 = arith.constant 0 : index
    %310 = vector.load %arg2[%c2_148, %c0_149, %c0_150] : memref<4x32x32xf32, #tpu.memory_space<vmem>>, vector<1x32x32xf32>
    %311 = vector.shape_cast %310 : vector<1x32x32xf32> to vector<32x32xf32>
    %312 = vector.extract_strided_slice %297 {offsets = [0, 2], sizes = [32, 1], strides = [1, 1]} : vector<32x4xf32> to vector<32x1xf32>
    %313 = vector.broadcast %312 : vector<32x1xf32> to vector<32x32xf32>
    %314 = arith.mulf %311, %313 : vector<32x32xf32>
    %315 = arith.addf %309, %314 : vector<32x32xf32>
    %c3_151 = arith.constant 3 : index
    %c0_152 = arith.constant 0 : index
    %c0_153 = arith.constant 0 : index
    %316 = vector.load %arg2[%c3_151, %c0_152, %c0_153] : memref<4x32x32xf32, #tpu.memory_space<vmem>>, vector<1x32x32xf32>
    %317 = vector.shape_cast %316 : vector<1x32x32xf32> to vector<32x32xf32>
    %318 = vector.extract_strided_slice %297 {offsets = [0, 3], sizes = [32, 1], strides = [1, 1]} : vector<32x4xf32> to vector<32x1xf32>
    %319 = vector.broadcast %318 : vector<32x1xf32> to vector<32x32xf32>
    %320 = arith.mulf %317, %319 : vector<32x32xf32>
    %321 = arith.addf %315, %320 : vector<32x32xf32>
    %cst_154 = arith.constant 1.250000e-01 : f32
    %322 = vector.broadcast %cst_154 : f32 to vector<32x32xf32>
    %323 = arith.mulf %321, %322 : vector<32x32xf32>
    %cst_155 = arith.constant 0.000000e+00 : f32
    %324 = vector.broadcast %cst_155 : f32 to vector<32x32xf32>
    %325 = arith.cmpf ogt, %1, %324 : vector<32x32xf32>
    %cst_156 = arith.constant -1.000000e+30 : f32
    %326 = vector.broadcast %cst_156 : f32 to vector<32x32xf32>
    %327 = arith.select %325, %323, %326 : vector<32x32xi1>, vector<32x32xf32>
    %cst_157 = arith.constant dense<0xFF800000> : vector<32xf32>
    %328 = vector.multi_reduction <maximumf>, %327, %cst_157 [1] : vector<32x32xf32> to vector<32xf32>
    %329 = vector.shape_cast %328 : vector<32xf32> to vector<32x1xf32>
    %330 = vector.broadcast %329 : vector<32x1xf32> to vector<32x32xf32>
    %331 = arith.subf %327, %330 : vector<32x32xf32>
    %332 = math.exp %331 : vector<32x32xf32>
    %cst_158 = arith.constant dense<0.000000e+00> : vector<32xf32>
    %333 = vector.multi_reduction <add>, %332, %cst_158 [1] : vector<32x32xf32> to vector<32xf32>
    %334 = vector.shape_cast %333 : vector<32xf32> to vector<32x1xf32>
    %cst_159 = arith.constant 1.000000e-30 : f32
    %335 = vector.broadcast %cst_159 : f32 to vector<32x1xf32>
    %336 = arith.maximumf %334, %335 : vector<32x1xf32>
    %337 = tpu.reciprocal %336 {approx = true} : vector<32x1xf32> -> vector<32x1xf32>
    %338 = vector.broadcast %337 : vector<32x1xf32> to vector<32x32xf32>
    %339 = arith.mulf %332, %338 : vector<32x32xf32>
    %340 = vector.broadcast %9 : vector<32x1xf32> to vector<32x32xf32>
    %341 = arith.mulf %339, %340 : vector<32x32xf32>
    %342 = arith.truncf %341 : vector<32x32xf32> to vector<32x32xbf16>
    %343 = arith.truncf %292 : vector<32x64xf32> to vector<32x64xbf16>
    %cst_160 = arith.constant dense<0.000000e+00> : vector<32x64xf32>
    %344 = tpu.matmul %342, %343, %cst_160 {dimension_numbers = #tpu.dot_dimension_numbers<[1], [0], [0], [1], [0, 0, 1, 1], [], []>} : vector<32x32xbf16>, vector<32x64xbf16>, vector<32x64xf32> -> vector<32x64xf32>
    %c0_161 = arith.constant 0 : index
    %c0_162 = arith.constant 0 : index
    %c0_163 = arith.constant 0 : index
    %345 = vector.load %arg2[%c0_161, %c0_162, %c0_163] : memref<4x32x32xf32, #tpu.memory_space<vmem>>, vector<1x32x32xf32>
    %346 = vector.shape_cast %345 : vector<1x32x32xf32> to vector<32x32xf32>
    %347 = arith.mulf %341, %346 : vector<32x32xf32>
    %cst_164 = arith.constant dense<0.000000e+00> : vector<32xf32>
    %348 = vector.multi_reduction <add>, %347, %cst_164 [1] : vector<32x32xf32> to vector<32xf32>
    %349 = vector.shape_cast %348 : vector<32xf32> to vector<32x1xf32>
    %c1_165 = arith.constant 1 : index
    %c0_166 = arith.constant 0 : index
    %c0_167 = arith.constant 0 : index
    %350 = vector.load %arg2[%c1_165, %c0_166, %c0_167] : memref<4x32x32xf32, #tpu.memory_space<vmem>>, vector<1x32x32xf32>
    %351 = vector.shape_cast %350 : vector<1x32x32xf32> to vector<32x32xf32>
    %352 = arith.mulf %341, %351 : vector<32x32xf32>
    %cst_168 = arith.constant dense<0.000000e+00> : vector<32xf32>
    %353 = vector.multi_reduction <add>, %352, %cst_168 [1] : vector<32x32xf32> to vector<32xf32>
    %354 = vector.shape_cast %353 : vector<32xf32> to vector<32x1xf32>
    %c2_169 = arith.constant 2 : index
    %c0_170 = arith.constant 0 : index
    %c0_171 = arith.constant 0 : index
    %355 = vector.load %arg2[%c2_169, %c0_170, %c0_171] : memref<4x32x32xf32, #tpu.memory_space<vmem>>, vector<1x32x32xf32>
    %356 = vector.shape_cast %355 : vector<1x32x32xf32> to vector<32x32xf32>
    %357 = arith.mulf %341, %356 : vector<32x32xf32>
    %cst_172 = arith.constant dense<0.000000e+00> : vector<32xf32>
    %358 = vector.multi_reduction <add>, %357, %cst_172 [1] : vector<32x32xf32> to vector<32xf32>
    %359 = vector.shape_cast %358 : vector<32xf32> to vector<32x1xf32>
    %c3_173 = arith.constant 3 : index
    %c0_174 = arith.constant 0 : index
    %c0_175 = arith.constant 0 : index
    %360 = vector.load %arg2[%c3_173, %c0_174, %c0_175] : memref<4x32x32xf32, #tpu.memory_space<vmem>>, vector<1x32x32xf32>
    %361 = vector.shape_cast %360 : vector<1x32x32xf32> to vector<32x32xf32>
    %362 = arith.mulf %341, %361 : vector<32x32xf32>
    %cst_176 = arith.constant dense<0.000000e+00> : vector<32xf32>
    %363 = vector.multi_reduction <add>, %362, %cst_176 [1] : vector<32x32xf32> to vector<32xf32>
    %364 = vector.shape_cast %363 : vector<32xf32> to vector<32x1xf32>
    %365 = tpu.concatenate %349, %354, %359, %364 in 1 : vector<32x1xf32>, vector<32x1xf32>, vector<32x1xf32>, vector<32x1xf32> -> vector<32x4xf32>
    %cst_177 = arith.constant dense<0.000000e+00> : vector<32x64xf32>
    %366 = tpu.matmul %365, %2, %cst_177 {dimension_numbers = #tpu.dot_dimension_numbers<[1], [0], [0], [1], [0, 0, 1, 1], [], []>} : vector<32x4xf32>, vector<4x64xf32>, vector<32x64xf32> -> vector<32x64xf32>
    %367 = arith.addf %344, %366 : vector<32x64xf32>
    %368 = arith.addf %367, %293 : vector<32x64xf32>
    %cst_178 = arith.constant 0.000000e+00 : f32
    %369 = vector.broadcast %cst_178 : f32 to vector<32x64xf32>
    %370 = arith.cmpf oge, %368, %369 : vector<32x64xf32>
    %cst_179 = arith.constant 0.00999999977 : f32
    %371 = vector.broadcast %cst_179 : f32 to vector<32x64xf32>
    %372 = arith.mulf %371, %368 : vector<32x64xf32>
    %373 = arith.select %370, %368, %372 : vector<32x64xi1>, vector<32x64xf32>
    %c4_i32 = arith.constant 4 : i32
    %374 = arith.truncf %373 : vector<32x64xf32> to vector<32x64xbf16>
    %cst_180 = arith.constant dense<0.000000e+00> : vector<32x256xf32>
    %375 = tpu.matmul %374, %20, %cst_180 {dimension_numbers = #tpu.dot_dimension_numbers<[1], [0], [0], [1], [0, 0, 1, 1], [], []>} : vector<32x64xbf16>, vector<64x256xbf16>, vector<32x256xf32> -> vector<32x256xf32>
    %376 = vector.broadcast %21 : vector<1x256xf32> to vector<32x256xf32>
    %377 = arith.addf %375, %376 : vector<32x256xf32>
    %378 = vector.extract_strided_slice %377 {offsets = [0, 0], sizes = [32, 64], strides = [1, 1]} : vector<32x256xf32> to vector<32x64xf32>
    %379 = vector.extract_strided_slice %377 {offsets = [0, 64], sizes = [32, 64], strides = [1, 1]} : vector<32x256xf32> to vector<32x64xf32>
    %380 = vector.extract_strided_slice %377 {offsets = [0, 128], sizes = [32, 64], strides = [1, 1]} : vector<32x256xf32> to vector<32x64xf32>
    %381 = vector.extract_strided_slice %377 {offsets = [0, 192], sizes = [32, 64], strides = [1, 1]} : vector<32x256xf32> to vector<32x64xf32>
    %382 = arith.truncf %378 : vector<32x64xf32> to vector<32x64xbf16>
    %383 = arith.truncf %379 : vector<32x64xf32> to vector<32x64xbf16>
    %cst_181 = arith.constant dense<0.000000e+00> : vector<32x32xf32>
    %384 = tpu.matmul %382, %383, %cst_181 {dimension_numbers = #tpu.dot_dimension_numbers<[1], [1], [0], [0], [0, 0, 1, 0], [], []>} : vector<32x64xbf16>, vector<32x64xbf16>, vector<32x32xf32> -> vector<32x32xf32>
    %cst_182 = arith.constant dense<0.000000e+00> : vector<32x4xf32>
    %385 = tpu.matmul %378, %3, %cst_182 {dimension_numbers = #tpu.dot_dimension_numbers<[1], [0], [0], [1], [0, 0, 1, 1], [], []>} : vector<32x64xf32>, vector<64x4xf32>, vector<32x4xf32> -> vector<32x4xf32>
    %c0_183 = arith.constant 0 : index
    %c0_184 = arith.constant 0 : index
    %c0_185 = arith.constant 0 : index
    %386 = vector.load %arg2[%c0_183, %c0_184, %c0_185] : memref<4x32x32xf32, #tpu.memory_space<vmem>>, vector<1x32x32xf32>
    %387 = vector.shape_cast %386 : vector<1x32x32xf32> to vector<32x32xf32>
    %388 = vector.extract_strided_slice %385 {offsets = [0, 0], sizes = [32, 1], strides = [1, 1]} : vector<32x4xf32> to vector<32x1xf32>
    %389 = vector.broadcast %388 : vector<32x1xf32> to vector<32x32xf32>
    %390 = arith.mulf %387, %389 : vector<32x32xf32>
    %391 = arith.addf %384, %390 : vector<32x32xf32>
    %c1_186 = arith.constant 1 : index
    %c0_187 = arith.constant 0 : index
    %c0_188 = arith.constant 0 : index
    %392 = vector.load %arg2[%c1_186, %c0_187, %c0_188] : memref<4x32x32xf32, #tpu.memory_space<vmem>>, vector<1x32x32xf32>
    %393 = vector.shape_cast %392 : vector<1x32x32xf32> to vector<32x32xf32>
    %394 = vector.extract_strided_slice %385 {offsets = [0, 1], sizes = [32, 1], strides = [1, 1]} : vector<32x4xf32> to vector<32x1xf32>
    %395 = vector.broadcast %394 : vector<32x1xf32> to vector<32x32xf32>
    %396 = arith.mulf %393, %395 : vector<32x32xf32>
    %397 = arith.addf %391, %396 : vector<32x32xf32>
    %c2_189 = arith.constant 2 : index
    %c0_190 = arith.constant 0 : index
    %c0_191 = arith.constant 0 : index
    %398 = vector.load %arg2[%c2_189, %c0_190, %c0_191] : memref<4x32x32xf32, #tpu.memory_space<vmem>>, vector<1x32x32xf32>
    %399 = vector.shape_cast %398 : vector<1x32x32xf32> to vector<32x32xf32>
    %400 = vector.extract_strided_slice %385 {offsets = [0, 2], sizes = [32, 1], strides = [1, 1]} : vector<32x4xf32> to vector<32x1xf32>
    %401 = vector.broadcast %400 : vector<32x1xf32> to vector<32x32xf32>
    %402 = arith.mulf %399, %401 : vector<32x32xf32>
    %403 = arith.addf %397, %402 : vector<32x32xf32>
    %c3_192 = arith.constant 3 : index
    %c0_193 = arith.constant 0 : index
    %c0_194 = arith.constant 0 : index
    %404 = vector.load %arg2[%c3_192, %c0_193, %c0_194] : memref<4x32x32xf32, #tpu.memory_space<vmem>>, vector<1x32x32xf32>
    %405 = vector.shape_cast %404 : vector<1x32x32xf32> to vector<32x32xf32>
    %406 = vector.extract_strided_slice %385 {offsets = [0, 3], sizes = [32, 1], strides = [1, 1]} : vector<32x4xf32> to vector<32x1xf32>
    %407 = vector.broadcast %406 : vector<32x1xf32> to vector<32x32xf32>
    %408 = arith.mulf %405, %407 : vector<32x32xf32>
    %409 = arith.addf %403, %408 : vector<32x32xf32>
    %cst_195 = arith.constant 1.250000e-01 : f32
    %410 = vector.broadcast %cst_195 : f32 to vector<32x32xf32>
    %411 = arith.mulf %409, %410 : vector<32x32xf32>
    %cst_196 = arith.constant 0.000000e+00 : f32
    %412 = vector.broadcast %cst_196 : f32 to vector<32x32xf32>
    %413 = arith.cmpf ogt, %1, %412 : vector<32x32xf32>
    %cst_197 = arith.constant -1.000000e+30 : f32
    %414 = vector.broadcast %cst_197 : f32 to vector<32x32xf32>
    %415 = arith.select %413, %411, %414 : vector<32x32xi1>, vector<32x32xf32>
    %cst_198 = arith.constant dense<0xFF800000> : vector<32xf32>
    %416 = vector.multi_reduction <maximumf>, %415, %cst_198 [1] : vector<32x32xf32> to vector<32xf32>
    %417 = vector.shape_cast %416 : vector<32xf32> to vector<32x1xf32>
    %418 = vector.broadcast %417 : vector<32x1xf32> to vector<32x32xf32>
    %419 = arith.subf %415, %418 : vector<32x32xf32>
    %420 = math.exp %419 : vector<32x32xf32>
    %cst_199 = arith.constant dense<0.000000e+00> : vector<32xf32>
    %421 = vector.multi_reduction <add>, %420, %cst_199 [1] : vector<32x32xf32> to vector<32xf32>
    %422 = vector.shape_cast %421 : vector<32xf32> to vector<32x1xf32>
    %cst_200 = arith.constant 1.000000e-30 : f32
    %423 = vector.broadcast %cst_200 : f32 to vector<32x1xf32>
    %424 = arith.maximumf %422, %423 : vector<32x1xf32>
    %425 = tpu.reciprocal %424 {approx = true} : vector<32x1xf32> -> vector<32x1xf32>
    %426 = vector.broadcast %425 : vector<32x1xf32> to vector<32x32xf32>
    %427 = arith.mulf %420, %426 : vector<32x32xf32>
    %428 = vector.broadcast %9 : vector<32x1xf32> to vector<32x32xf32>
    %429 = arith.mulf %427, %428 : vector<32x32xf32>
    %430 = arith.truncf %429 : vector<32x32xf32> to vector<32x32xbf16>
    %431 = arith.truncf %380 : vector<32x64xf32> to vector<32x64xbf16>
    %cst_201 = arith.constant dense<0.000000e+00> : vector<32x64xf32>
    %432 = tpu.matmul %430, %431, %cst_201 {dimension_numbers = #tpu.dot_dimension_numbers<[1], [0], [0], [1], [0, 0, 1, 1], [], []>} : vector<32x32xbf16>, vector<32x64xbf16>, vector<32x64xf32> -> vector<32x64xf32>
    %c0_202 = arith.constant 0 : index
    %c0_203 = arith.constant 0 : index
    %c0_204 = arith.constant 0 : index
    %433 = vector.load %arg2[%c0_202, %c0_203, %c0_204] : memref<4x32x32xf32, #tpu.memory_space<vmem>>, vector<1x32x32xf32>
    %434 = vector.shape_cast %433 : vector<1x32x32xf32> to vector<32x32xf32>
    %435 = arith.mulf %429, %434 : vector<32x32xf32>
    %cst_205 = arith.constant dense<0.000000e+00> : vector<32xf32>
    %436 = vector.multi_reduction <add>, %435, %cst_205 [1] : vector<32x32xf32> to vector<32xf32>
    %437 = vector.shape_cast %436 : vector<32xf32> to vector<32x1xf32>
    %c1_206 = arith.constant 1 : index
    %c0_207 = arith.constant 0 : index
    %c0_208 = arith.constant 0 : index
    %438 = vector.load %arg2[%c1_206, %c0_207, %c0_208] : memref<4x32x32xf32, #tpu.memory_space<vmem>>, vector<1x32x32xf32>
    %439 = vector.shape_cast %438 : vector<1x32x32xf32> to vector<32x32xf32>
    %440 = arith.mulf %429, %439 : vector<32x32xf32>
    %cst_209 = arith.constant dense<0.000000e+00> : vector<32xf32>
    %441 = vector.multi_reduction <add>, %440, %cst_209 [1] : vector<32x32xf32> to vector<32xf32>
    %442 = vector.shape_cast %441 : vector<32xf32> to vector<32x1xf32>
    %c2_210 = arith.constant 2 : index
    %c0_211 = arith.constant 0 : index
    %c0_212 = arith.constant 0 : index
    %443 = vector.load %arg2[%c2_210, %c0_211, %c0_212] : memref<4x32x32xf32, #tpu.memory_space<vmem>>, vector<1x32x32xf32>
    %444 = vector.shape_cast %443 : vector<1x32x32xf32> to vector<32x32xf32>
    %445 = arith.mulf %429, %444 : vector<32x32xf32>
    %cst_213 = arith.constant dense<0.000000e+00> : vector<32xf32>
    %446 = vector.multi_reduction <add>, %445, %cst_213 [1] : vector<32x32xf32> to vector<32xf32>
    %447 = vector.shape_cast %446 : vector<32xf32> to vector<32x1xf32>
    %c3_214 = arith.constant 3 : index
    %c0_215 = arith.constant 0 : index
    %c0_216 = arith.constant 0 : index
    %448 = vector.load %arg2[%c3_214, %c0_215, %c0_216] : memref<4x32x32xf32, #tpu.memory_space<vmem>>, vector<1x32x32xf32>
    %449 = vector.shape_cast %448 : vector<1x32x32xf32> to vector<32x32xf32>
    %450 = arith.mulf %429, %449 : vector<32x32xf32>
    %cst_217 = arith.constant dense<0.000000e+00> : vector<32xf32>
    %451 = vector.multi_reduction <add>, %450, %cst_217 [1] : vector<32x32xf32> to vector<32xf32>
    %452 = vector.shape_cast %451 : vector<32xf32> to vector<32x1xf32>
    %453 = tpu.concatenate %437, %442, %447, %452 in 1 : vector<32x1xf32>, vector<32x1xf32>, vector<32x1xf32>, vector<32x1xf32> -> vector<32x4xf32>
    %cst_218 = arith.constant dense<0.000000e+00> : vector<32x64xf32>
    %454 = tpu.matmul %453, %2, %cst_218 {dimension_numbers = #tpu.dot_dimension_numbers<[1], [0], [0], [1], [0, 0, 1, 1], [], []>} : vector<32x4xf32>, vector<4x64xf32>, vector<32x64xf32> -> vector<32x64xf32>
    %455 = arith.addf %432, %454 : vector<32x64xf32>
    %456 = arith.addf %455, %381 : vector<32x64xf32>
    %cst_219 = arith.constant 0.000000e+00 : f32
    %457 = vector.broadcast %cst_219 : f32 to vector<32x64xf32>
    %458 = arith.cmpf oge, %456, %457 : vector<32x64xf32>
    %cst_220 = arith.constant 0.00999999977 : f32
    %459 = vector.broadcast %cst_220 : f32 to vector<32x64xf32>
    %460 = arith.mulf %459, %456 : vector<32x64xf32>
    %461 = arith.select %458, %456, %460 : vector<32x64xi1>, vector<32x64xf32>
    %c5_i32 = arith.constant 5 : i32
    %462 = arith.truncf %461 : vector<32x64xf32> to vector<32x64xbf16>
    %cst_221 = arith.constant dense<0.000000e+00> : vector<32x256xf32>
    %463 = tpu.matmul %462, %20, %cst_221 {dimension_numbers = #tpu.dot_dimension_numbers<[1], [0], [0], [1], [0, 0, 1, 1], [], []>} : vector<32x64xbf16>, vector<64x256xbf16>, vector<32x256xf32> -> vector<32x256xf32>
    %464 = vector.broadcast %21 : vector<1x256xf32> to vector<32x256xf32>
    %465 = arith.addf %463, %464 : vector<32x256xf32>
    %466 = vector.extract_strided_slice %465 {offsets = [0, 0], sizes = [32, 64], strides = [1, 1]} : vector<32x256xf32> to vector<32x64xf32>
    %467 = vector.extract_strided_slice %465 {offsets = [0, 64], sizes = [32, 64], strides = [1, 1]} : vector<32x256xf32> to vector<32x64xf32>
    %468 = vector.extract_strided_slice %465 {offsets = [0, 128], sizes = [32, 64], strides = [1, 1]} : vector<32x256xf32> to vector<32x64xf32>
    %469 = vector.extract_strided_slice %465 {offsets = [0, 192], sizes = [32, 64], strides = [1, 1]} : vector<32x256xf32> to vector<32x64xf32>
    %470 = arith.truncf %466 : vector<32x64xf32> to vector<32x64xbf16>
    %471 = arith.truncf %467 : vector<32x64xf32> to vector<32x64xbf16>
    %cst_222 = arith.constant dense<0.000000e+00> : vector<32x32xf32>
    %472 = tpu.matmul %470, %471, %cst_222 {dimension_numbers = #tpu.dot_dimension_numbers<[1], [1], [0], [0], [0, 0, 1, 0], [], []>} : vector<32x64xbf16>, vector<32x64xbf16>, vector<32x32xf32> -> vector<32x32xf32>
    %cst_223 = arith.constant dense<0.000000e+00> : vector<32x4xf32>
    %473 = tpu.matmul %466, %3, %cst_223 {dimension_numbers = #tpu.dot_dimension_numbers<[1], [0], [0], [1], [0, 0, 1, 1], [], []>} : vector<32x64xf32>, vector<64x4xf32>, vector<32x4xf32> -> vector<32x4xf32>
    %c0_224 = arith.constant 0 : index
    %c0_225 = arith.constant 0 : index
    %c0_226 = arith.constant 0 : index
    %474 = vector.load %arg2[%c0_224, %c0_225, %c0_226] : memref<4x32x32xf32, #tpu.memory_space<vmem>>, vector<1x32x32xf32>
    %475 = vector.shape_cast %474 : vector<1x32x32xf32> to vector<32x32xf32>
    %476 = vector.extract_strided_slice %473 {offsets = [0, 0], sizes = [32, 1], strides = [1, 1]} : vector<32x4xf32> to vector<32x1xf32>
    %477 = vector.broadcast %476 : vector<32x1xf32> to vector<32x32xf32>
    %478 = arith.mulf %475, %477 : vector<32x32xf32>
    %479 = arith.addf %472, %478 : vector<32x32xf32>
    %c1_227 = arith.constant 1 : index
    %c0_228 = arith.constant 0 : index
    %c0_229 = arith.constant 0 : index
    %480 = vector.load %arg2[%c1_227, %c0_228, %c0_229] : memref<4x32x32xf32, #tpu.memory_space<vmem>>, vector<1x32x32xf32>
    %481 = vector.shape_cast %480 : vector<1x32x32xf32> to vector<32x32xf32>
    %482 = vector.extract_strided_slice %473 {offsets = [0, 1], sizes = [32, 1], strides = [1, 1]} : vector<32x4xf32> to vector<32x1xf32>
    %483 = vector.broadcast %482 : vector<32x1xf32> to vector<32x32xf32>
    %484 = arith.mulf %481, %483 : vector<32x32xf32>
    %485 = arith.addf %479, %484 : vector<32x32xf32>
    %c2_230 = arith.constant 2 : index
    %c0_231 = arith.constant 0 : index
    %c0_232 = arith.constant 0 : index
    %486 = vector.load %arg2[%c2_230, %c0_231, %c0_232] : memref<4x32x32xf32, #tpu.memory_space<vmem>>, vector<1x32x32xf32>
    %487 = vector.shape_cast %486 : vector<1x32x32xf32> to vector<32x32xf32>
    %488 = vector.extract_strided_slice %473 {offsets = [0, 2], sizes = [32, 1], strides = [1, 1]} : vector<32x4xf32> to vector<32x1xf32>
    %489 = vector.broadcast %488 : vector<32x1xf32> to vector<32x32xf32>
    %490 = arith.mulf %487, %489 : vector<32x32xf32>
    %491 = arith.addf %485, %490 : vector<32x32xf32>
    %c3_233 = arith.constant 3 : index
    %c0_234 = arith.constant 0 : index
    %c0_235 = arith.constant 0 : index
    %492 = vector.load %arg2[%c3_233, %c0_234, %c0_235] : memref<4x32x32xf32, #tpu.memory_space<vmem>>, vector<1x32x32xf32>
    %493 = vector.shape_cast %492 : vector<1x32x32xf32> to vector<32x32xf32>
    %494 = vector.extract_strided_slice %473 {offsets = [0, 3], sizes = [32, 1], strides = [1, 1]} : vector<32x4xf32> to vector<32x1xf32>
    %495 = vector.broadcast %494 : vector<32x1xf32> to vector<32x32xf32>
    %496 = arith.mulf %493, %495 : vector<32x32xf32>
    %497 = arith.addf %491, %496 : vector<32x32xf32>
    %cst_236 = arith.constant 1.250000e-01 : f32
    %498 = vector.broadcast %cst_236 : f32 to vector<32x32xf32>
    %499 = arith.mulf %497, %498 : vector<32x32xf32>
    %cst_237 = arith.constant 0.000000e+00 : f32
    %500 = vector.broadcast %cst_237 : f32 to vector<32x32xf32>
    %501 = arith.cmpf ogt, %1, %500 : vector<32x32xf32>
    %cst_238 = arith.constant -1.000000e+30 : f32
    %502 = vector.broadcast %cst_238 : f32 to vector<32x32xf32>
    %503 = arith.select %501, %499, %502 : vector<32x32xi1>, vector<32x32xf32>
    %cst_239 = arith.constant dense<0xFF800000> : vector<32xf32>
    %504 = vector.multi_reduction <maximumf>, %503, %cst_239 [1] : vector<32x32xf32> to vector<32xf32>
    %505 = vector.shape_cast %504 : vector<32xf32> to vector<32x1xf32>
    %506 = vector.broadcast %505 : vector<32x1xf32> to vector<32x32xf32>
    %507 = arith.subf %503, %506 : vector<32x32xf32>
    %508 = math.exp %507 : vector<32x32xf32>
    %cst_240 = arith.constant dense<0.000000e+00> : vector<32xf32>
    %509 = vector.multi_reduction <add>, %508, %cst_240 [1] : vector<32x32xf32> to vector<32xf32>
    %510 = vector.shape_cast %509 : vector<32xf32> to vector<32x1xf32>
    %cst_241 = arith.constant 1.000000e-30 : f32
    %511 = vector.broadcast %cst_241 : f32 to vector<32x1xf32>
    %512 = arith.maximumf %510, %511 : vector<32x1xf32>
    %513 = tpu.reciprocal %512 {approx = true} : vector<32x1xf32> -> vector<32x1xf32>
    %514 = vector.broadcast %513 : vector<32x1xf32> to vector<32x32xf32>
    %515 = arith.mulf %508, %514 : vector<32x32xf32>
    %516 = vector.broadcast %9 : vector<32x1xf32> to vector<32x32xf32>
    %517 = arith.mulf %515, %516 : vector<32x32xf32>
    %518 = arith.truncf %517 : vector<32x32xf32> to vector<32x32xbf16>
    %519 = arith.truncf %468 : vector<32x64xf32> to vector<32x64xbf16>
    %cst_242 = arith.constant dense<0.000000e+00> : vector<32x64xf32>
    %520 = tpu.matmul %518, %519, %cst_242 {dimension_numbers = #tpu.dot_dimension_numbers<[1], [0], [0], [1], [0, 0, 1, 1], [], []>} : vector<32x32xbf16>, vector<32x64xbf16>, vector<32x64xf32> -> vector<32x64xf32>
    %c0_243 = arith.constant 0 : index
    %c0_244 = arith.constant 0 : index
    %c0_245 = arith.constant 0 : index
    %521 = vector.load %arg2[%c0_243, %c0_244, %c0_245] : memref<4x32x32xf32, #tpu.memory_space<vmem>>, vector<1x32x32xf32>
    %522 = vector.shape_cast %521 : vector<1x32x32xf32> to vector<32x32xf32>
    %523 = arith.mulf %517, %522 : vector<32x32xf32>
    %cst_246 = arith.constant dense<0.000000e+00> : vector<32xf32>
    %524 = vector.multi_reduction <add>, %523, %cst_246 [1] : vector<32x32xf32> to vector<32xf32>
    %525 = vector.shape_cast %524 : vector<32xf32> to vector<32x1xf32>
    %c1_247 = arith.constant 1 : index
    %c0_248 = arith.constant 0 : index
    %c0_249 = arith.constant 0 : index
    %526 = vector.load %arg2[%c1_247, %c0_248, %c0_249] : memref<4x32x32xf32, #tpu.memory_space<vmem>>, vector<1x32x32xf32>
    %527 = vector.shape_cast %526 : vector<1x32x32xf32> to vector<32x32xf32>
    %528 = arith.mulf %517, %527 : vector<32x32xf32>
    %cst_250 = arith.constant dense<0.000000e+00> : vector<32xf32>
    %529 = vector.multi_reduction <add>, %528, %cst_250 [1] : vector<32x32xf32> to vector<32xf32>
    %530 = vector.shape_cast %529 : vector<32xf32> to vector<32x1xf32>
    %c2_251 = arith.constant 2 : index
    %c0_252 = arith.constant 0 : index
    %c0_253 = arith.constant 0 : index
    %531 = vector.load %arg2[%c2_251, %c0_252, %c0_253] : memref<4x32x32xf32, #tpu.memory_space<vmem>>, vector<1x32x32xf32>
    %532 = vector.shape_cast %531 : vector<1x32x32xf32> to vector<32x32xf32>
    %533 = arith.mulf %517, %532 : vector<32x32xf32>
    %cst_254 = arith.constant dense<0.000000e+00> : vector<32xf32>
    %534 = vector.multi_reduction <add>, %533, %cst_254 [1] : vector<32x32xf32> to vector<32xf32>
    %535 = vector.shape_cast %534 : vector<32xf32> to vector<32x1xf32>
    %c3_255 = arith.constant 3 : index
    %c0_256 = arith.constant 0 : index
    %c0_257 = arith.constant 0 : index
    %536 = vector.load %arg2[%c3_255, %c0_256, %c0_257] : memref<4x32x32xf32, #tpu.memory_space<vmem>>, vector<1x32x32xf32>
    %537 = vector.shape_cast %536 : vector<1x32x32xf32> to vector<32x32xf32>
    %538 = arith.mulf %517, %537 : vector<32x32xf32>
    %cst_258 = arith.constant dense<0.000000e+00> : vector<32xf32>
    %539 = vector.multi_reduction <add>, %538, %cst_258 [1] : vector<32x32xf32> to vector<32xf32>
    %540 = vector.shape_cast %539 : vector<32xf32> to vector<32x1xf32>
    %541 = tpu.concatenate %525, %530, %535, %540 in 1 : vector<32x1xf32>, vector<32x1xf32>, vector<32x1xf32>, vector<32x1xf32> -> vector<32x4xf32>
    %cst_259 = arith.constant dense<0.000000e+00> : vector<32x64xf32>
    %542 = tpu.matmul %541, %2, %cst_259 {dimension_numbers = #tpu.dot_dimension_numbers<[1], [0], [0], [1], [0, 0, 1, 1], [], []>} : vector<32x4xf32>, vector<4x64xf32>, vector<32x64xf32> -> vector<32x64xf32>
    %543 = arith.addf %520, %542 : vector<32x64xf32>
    %544 = arith.addf %543, %469 : vector<32x64xf32>
    %cst_260 = arith.constant 0.000000e+00 : f32
    %545 = vector.broadcast %cst_260 : f32 to vector<32x64xf32>
    %546 = arith.cmpf oge, %544, %545 : vector<32x64xf32>
    %cst_261 = arith.constant 0.00999999977 : f32
    %547 = vector.broadcast %cst_261 : f32 to vector<32x64xf32>
    %548 = arith.mulf %547, %544 : vector<32x64xf32>
    %549 = arith.select %546, %544, %548 : vector<32x64xi1>, vector<32x64xf32>
    %c6_i32 = arith.constant 6 : i32
    %550 = arith.truncf %549 : vector<32x64xf32> to vector<32x64xbf16>
    %cst_262 = arith.constant dense<0.000000e+00> : vector<32x256xf32>
    %551 = tpu.matmul %550, %20, %cst_262 {dimension_numbers = #tpu.dot_dimension_numbers<[1], [0], [0], [1], [0, 0, 1, 1], [], []>} : vector<32x64xbf16>, vector<64x256xbf16>, vector<32x256xf32> -> vector<32x256xf32>
    %552 = vector.broadcast %21 : vector<1x256xf32> to vector<32x256xf32>
    %553 = arith.addf %551, %552 : vector<32x256xf32>
    %554 = vector.extract_strided_slice %553 {offsets = [0, 0], sizes = [32, 64], strides = [1, 1]} : vector<32x256xf32> to vector<32x64xf32>
    %555 = vector.extract_strided_slice %553 {offsets = [0, 64], sizes = [32, 64], strides = [1, 1]} : vector<32x256xf32> to vector<32x64xf32>
    %556 = vector.extract_strided_slice %553 {offsets = [0, 128], sizes = [32, 64], strides = [1, 1]} : vector<32x256xf32> to vector<32x64xf32>
    %557 = vector.extract_strided_slice %553 {offsets = [0, 192], sizes = [32, 64], strides = [1, 1]} : vector<32x256xf32> to vector<32x64xf32>
    %558 = arith.truncf %554 : vector<32x64xf32> to vector<32x64xbf16>
    %559 = arith.truncf %555 : vector<32x64xf32> to vector<32x64xbf16>
    %cst_263 = arith.constant dense<0.000000e+00> : vector<32x32xf32>
    %560 = tpu.matmul %558, %559, %cst_263 {dimension_numbers = #tpu.dot_dimension_numbers<[1], [1], [0], [0], [0, 0, 1, 0], [], []>} : vector<32x64xbf16>, vector<32x64xbf16>, vector<32x32xf32> -> vector<32x32xf32>
    %cst_264 = arith.constant dense<0.000000e+00> : vector<32x4xf32>
    %561 = tpu.matmul %554, %3, %cst_264 {dimension_numbers = #tpu.dot_dimension_numbers<[1], [0], [0], [1], [0, 0, 1, 1], [], []>} : vector<32x64xf32>, vector<64x4xf32>, vector<32x4xf32> -> vector<32x4xf32>
    %c0_265 = arith.constant 0 : index
    %c0_266 = arith.constant 0 : index
    %c0_267 = arith.constant 0 : index
    %562 = vector.load %arg2[%c0_265, %c0_266, %c0_267] : memref<4x32x32xf32, #tpu.memory_space<vmem>>, vector<1x32x32xf32>
    %563 = vector.shape_cast %562 : vector<1x32x32xf32> to vector<32x32xf32>
    %564 = vector.extract_strided_slice %561 {offsets = [0, 0], sizes = [32, 1], strides = [1, 1]} : vector<32x4xf32> to vector<32x1xf32>
    %565 = vector.broadcast %564 : vector<32x1xf32> to vector<32x32xf32>
    %566 = arith.mulf %563, %565 : vector<32x32xf32>
    %567 = arith.addf %560, %566 : vector<32x32xf32>
    %c1_268 = arith.constant 1 : index
    %c0_269 = arith.constant 0 : index
    %c0_270 = arith.constant 0 : index
    %568 = vector.load %arg2[%c1_268, %c0_269, %c0_270] : memref<4x32x32xf32, #tpu.memory_space<vmem>>, vector<1x32x32xf32>
    %569 = vector.shape_cast %568 : vector<1x32x32xf32> to vector<32x32xf32>
    %570 = vector.extract_strided_slice %561 {offsets = [0, 1], sizes = [32, 1], strides = [1, 1]} : vector<32x4xf32> to vector<32x1xf32>
    %571 = vector.broadcast %570 : vector<32x1xf32> to vector<32x32xf32>
    %572 = arith.mulf %569, %571 : vector<32x32xf32>
    %573 = arith.addf %567, %572 : vector<32x32xf32>
    %c2_271 = arith.constant 2 : index
    %c0_272 = arith.constant 0 : index
    %c0_273 = arith.constant 0 : index
    %574 = vector.load %arg2[%c2_271, %c0_272, %c0_273] : memref<4x32x32xf32, #tpu.memory_space<vmem>>, vector<1x32x32xf32>
    %575 = vector.shape_cast %574 : vector<1x32x32xf32> to vector<32x32xf32>
    %576 = vector.extract_strided_slice %561 {offsets = [0, 2], sizes = [32, 1], strides = [1, 1]} : vector<32x4xf32> to vector<32x1xf32>
    %577 = vector.broadcast %576 : vector<32x1xf32> to vector<32x32xf32>
    %578 = arith.mulf %575, %577 : vector<32x32xf32>
    %579 = arith.addf %573, %578 : vector<32x32xf32>
    %c3_274 = arith.constant 3 : index
    %c0_275 = arith.constant 0 : index
    %c0_276 = arith.constant 0 : index
    %580 = vector.load %arg2[%c3_274, %c0_275, %c0_276] : memref<4x32x32xf32, #tpu.memory_space<vmem>>, vector<1x32x32xf32>
    %581 = vector.shape_cast %580 : vector<1x32x32xf32> to vector<32x32xf32>
    %582 = vector.extract_strided_slice %561 {offsets = [0, 3], sizes = [32, 1], strides = [1, 1]} : vector<32x4xf32> to vector<32x1xf32>
    %583 = vector.broadcast %582 : vector<32x1xf32> to vector<32x32xf32>
    %584 = arith.mulf %581, %583 : vector<32x32xf32>
    %585 = arith.addf %579, %584 : vector<32x32xf32>
    %cst_277 = arith.constant 1.250000e-01 : f32
    %586 = vector.broadcast %cst_277 : f32 to vector<32x32xf32>
    %587 = arith.mulf %585, %586 : vector<32x32xf32>
    %cst_278 = arith.constant 0.000000e+00 : f32
    %588 = vector.broadcast %cst_278 : f32 to vector<32x32xf32>
    %589 = arith.cmpf ogt, %1, %588 : vector<32x32xf32>
    %cst_279 = arith.constant -1.000000e+30 : f32
    %590 = vector.broadcast %cst_279 : f32 to vector<32x32xf32>
    %591 = arith.select %589, %587, %590 : vector<32x32xi1>, vector<32x32xf32>
    %cst_280 = arith.constant dense<0xFF800000> : vector<32xf32>
    %592 = vector.multi_reduction <maximumf>, %591, %cst_280 [1] : vector<32x32xf32> to vector<32xf32>
    %593 = vector.shape_cast %592 : vector<32xf32> to vector<32x1xf32>
    %594 = vector.broadcast %593 : vector<32x1xf32> to vector<32x32xf32>
    %595 = arith.subf %591, %594 : vector<32x32xf32>
    %596 = math.exp %595 : vector<32x32xf32>
    %cst_281 = arith.constant dense<0.000000e+00> : vector<32xf32>
    %597 = vector.multi_reduction <add>, %596, %cst_281 [1] : vector<32x32xf32> to vector<32xf32>
    %598 = vector.shape_cast %597 : vector<32xf32> to vector<32x1xf32>
    %cst_282 = arith.constant 1.000000e-30 : f32
    %599 = vector.broadcast %cst_282 : f32 to vector<32x1xf32>
    %600 = arith.maximumf %598, %599 : vector<32x1xf32>
    %601 = tpu.reciprocal %600 {approx = true} : vector<32x1xf32> -> vector<32x1xf32>
    %602 = vector.broadcast %601 : vector<32x1xf32> to vector<32x32xf32>
    %603 = arith.mulf %596, %602 : vector<32x32xf32>
    %604 = vector.broadcast %9 : vector<32x1xf32> to vector<32x32xf32>
    %605 = arith.mulf %603, %604 : vector<32x32xf32>
    %606 = arith.truncf %605 : vector<32x32xf32> to vector<32x32xbf16>
    %607 = arith.truncf %556 : vector<32x64xf32> to vector<32x64xbf16>
    %cst_283 = arith.constant dense<0.000000e+00> : vector<32x64xf32>
    %608 = tpu.matmul %606, %607, %cst_283 {dimension_numbers = #tpu.dot_dimension_numbers<[1], [0], [0], [1], [0, 0, 1, 1], [], []>} : vector<32x32xbf16>, vector<32x64xbf16>, vector<32x64xf32> -> vector<32x64xf32>
    %c0_284 = arith.constant 0 : index
    %c0_285 = arith.constant 0 : index
    %c0_286 = arith.constant 0 : index
    %609 = vector.load %arg2[%c0_284, %c0_285, %c0_286] : memref<4x32x32xf32, #tpu.memory_space<vmem>>, vector<1x32x32xf32>
    %610 = vector.shape_cast %609 : vector<1x32x32xf32> to vector<32x32xf32>
    %611 = arith.mulf %605, %610 : vector<32x32xf32>
    %cst_287 = arith.constant dense<0.000000e+00> : vector<32xf32>
    %612 = vector.multi_reduction <add>, %611, %cst_287 [1] : vector<32x32xf32> to vector<32xf32>
    %613 = vector.shape_cast %612 : vector<32xf32> to vector<32x1xf32>
    %c1_288 = arith.constant 1 : index
    %c0_289 = arith.constant 0 : index
    %c0_290 = arith.constant 0 : index
    %614 = vector.load %arg2[%c1_288, %c0_289, %c0_290] : memref<4x32x32xf32, #tpu.memory_space<vmem>>, vector<1x32x32xf32>
    %615 = vector.shape_cast %614 : vector<1x32x32xf32> to vector<32x32xf32>
    %616 = arith.mulf %605, %615 : vector<32x32xf32>
    %cst_291 = arith.constant dense<0.000000e+00> : vector<32xf32>
    %617 = vector.multi_reduction <add>, %616, %cst_291 [1] : vector<32x32xf32> to vector<32xf32>
    %618 = vector.shape_cast %617 : vector<32xf32> to vector<32x1xf32>
    %c2_292 = arith.constant 2 : index
    %c0_293 = arith.constant 0 : index
    %c0_294 = arith.constant 0 : index
    %619 = vector.load %arg2[%c2_292, %c0_293, %c0_294] : memref<4x32x32xf32, #tpu.memory_space<vmem>>, vector<1x32x32xf32>
    %620 = vector.shape_cast %619 : vector<1x32x32xf32> to vector<32x32xf32>
    %621 = arith.mulf %605, %620 : vector<32x32xf32>
    %cst_295 = arith.constant dense<0.000000e+00> : vector<32xf32>
    %622 = vector.multi_reduction <add>, %621, %cst_295 [1] : vector<32x32xf32> to vector<32xf32>
    %623 = vector.shape_cast %622 : vector<32xf32> to vector<32x1xf32>
    %c3_296 = arith.constant 3 : index
    %c0_297 = arith.constant 0 : index
    %c0_298 = arith.constant 0 : index
    %624 = vector.load %arg2[%c3_296, %c0_297, %c0_298] : memref<4x32x32xf32, #tpu.memory_space<vmem>>, vector<1x32x32xf32>
    %625 = vector.shape_cast %624 : vector<1x32x32xf32> to vector<32x32xf32>
    %626 = arith.mulf %605, %625 : vector<32x32xf32>
    %cst_299 = arith.constant dense<0.000000e+00> : vector<32xf32>
    %627 = vector.multi_reduction <add>, %626, %cst_299 [1] : vector<32x32xf32> to vector<32xf32>
    %628 = vector.shape_cast %627 : vector<32xf32> to vector<32x1xf32>
    %629 = tpu.concatenate %613, %618, %623, %628 in 1 : vector<32x1xf32>, vector<32x1xf32>, vector<32x1xf32>, vector<32x1xf32> -> vector<32x4xf32>
    %cst_300 = arith.constant dense<0.000000e+00> : vector<32x64xf32>
    %630 = tpu.matmul %629, %2, %cst_300 {dimension_numbers = #tpu.dot_dimension_numbers<[1], [0], [0], [1], [0, 0, 1, 1], [], []>} : vector<32x4xf32>, vector<4x64xf32>, vector<32x64xf32> -> vector<32x64xf32>
    %631 = arith.addf %608, %630 : vector<32x64xf32>
    %632 = arith.addf %631, %557 : vector<32x64xf32>
    %cst_301 = arith.constant 0.000000e+00 : f32
    %633 = vector.broadcast %cst_301 : f32 to vector<32x64xf32>
    %634 = arith.cmpf oge, %632, %633 : vector<32x64xf32>
    %cst_302 = arith.constant 0.00999999977 : f32
    %635 = vector.broadcast %cst_302 : f32 to vector<32x64xf32>
    %636 = arith.mulf %635, %632 : vector<32x64xf32>
    %637 = arith.select %634, %632, %636 : vector<32x64xi1>, vector<32x64xf32>
    %c7_i32 = arith.constant 7 : i32
    %638 = arith.truncf %637 : vector<32x64xf32> to vector<32x64xbf16>
    %cst_303 = arith.constant dense<0.000000e+00> : vector<32x256xf32>
    %639 = tpu.matmul %638, %20, %cst_303 {dimension_numbers = #tpu.dot_dimension_numbers<[1], [0], [0], [1], [0, 0, 1, 1], [], []>} : vector<32x64xbf16>, vector<64x256xbf16>, vector<32x256xf32> -> vector<32x256xf32>
    %640 = vector.broadcast %21 : vector<1x256xf32> to vector<32x256xf32>
    %641 = arith.addf %639, %640 : vector<32x256xf32>
    %642 = vector.extract_strided_slice %641 {offsets = [0, 0], sizes = [32, 64], strides = [1, 1]} : vector<32x256xf32> to vector<32x64xf32>
    %643 = vector.extract_strided_slice %641 {offsets = [0, 64], sizes = [32, 64], strides = [1, 1]} : vector<32x256xf32> to vector<32x64xf32>
    %644 = vector.extract_strided_slice %641 {offsets = [0, 128], sizes = [32, 64], strides = [1, 1]} : vector<32x256xf32> to vector<32x64xf32>
    %645 = vector.extract_strided_slice %641 {offsets = [0, 192], sizes = [32, 64], strides = [1, 1]} : vector<32x256xf32> to vector<32x64xf32>
    %646 = arith.truncf %642 : vector<32x64xf32> to vector<32x64xbf16>
    %647 = arith.truncf %643 : vector<32x64xf32> to vector<32x64xbf16>
    %cst_304 = arith.constant dense<0.000000e+00> : vector<32x32xf32>
    %648 = tpu.matmul %646, %647, %cst_304 {dimension_numbers = #tpu.dot_dimension_numbers<[1], [1], [0], [0], [0, 0, 1, 0], [], []>} : vector<32x64xbf16>, vector<32x64xbf16>, vector<32x32xf32> -> vector<32x32xf32>
    %cst_305 = arith.constant dense<0.000000e+00> : vector<32x4xf32>
    %649 = tpu.matmul %642, %3, %cst_305 {dimension_numbers = #tpu.dot_dimension_numbers<[1], [0], [0], [1], [0, 0, 1, 1], [], []>} : vector<32x64xf32>, vector<64x4xf32>, vector<32x4xf32> -> vector<32x4xf32>
    %c0_306 = arith.constant 0 : index
    %c0_307 = arith.constant 0 : index
    %c0_308 = arith.constant 0 : index
    %650 = vector.load %arg2[%c0_306, %c0_307, %c0_308] : memref<4x32x32xf32, #tpu.memory_space<vmem>>, vector<1x32x32xf32>
    %651 = vector.shape_cast %650 : vector<1x32x32xf32> to vector<32x32xf32>
    %652 = vector.extract_strided_slice %649 {offsets = [0, 0], sizes = [32, 1], strides = [1, 1]} : vector<32x4xf32> to vector<32x1xf32>
    %653 = vector.broadcast %652 : vector<32x1xf32> to vector<32x32xf32>
    %654 = arith.mulf %651, %653 : vector<32x32xf32>
    %655 = arith.addf %648, %654 : vector<32x32xf32>
    %c1_309 = arith.constant 1 : index
    %c0_310 = arith.constant 0 : index
    %c0_311 = arith.constant 0 : index
    %656 = vector.load %arg2[%c1_309, %c0_310, %c0_311] : memref<4x32x32xf32, #tpu.memory_space<vmem>>, vector<1x32x32xf32>
    %657 = vector.shape_cast %656 : vector<1x32x32xf32> to vector<32x32xf32>
    %658 = vector.extract_strided_slice %649 {offsets = [0, 1], sizes = [32, 1], strides = [1, 1]} : vector<32x4xf32> to vector<32x1xf32>
    %659 = vector.broadcast %658 : vector<32x1xf32> to vector<32x32xf32>
    %660 = arith.mulf %657, %659 : vector<32x32xf32>
    %661 = arith.addf %655, %660 : vector<32x32xf32>
    %c2_312 = arith.constant 2 : index
    %c0_313 = arith.constant 0 : index
    %c0_314 = arith.constant 0 : index
    %662 = vector.load %arg2[%c2_312, %c0_313, %c0_314] : memref<4x32x32xf32, #tpu.memory_space<vmem>>, vector<1x32x32xf32>
    %663 = vector.shape_cast %662 : vector<1x32x32xf32> to vector<32x32xf32>
    %664 = vector.extract_strided_slice %649 {offsets = [0, 2], sizes = [32, 1], strides = [1, 1]} : vector<32x4xf32> to vector<32x1xf32>
    %665 = vector.broadcast %664 : vector<32x1xf32> to vector<32x32xf32>
    %666 = arith.mulf %663, %665 : vector<32x32xf32>
    %667 = arith.addf %661, %666 : vector<32x32xf32>
    %c3_315 = arith.constant 3 : index
    %c0_316 = arith.constant 0 : index
    %c0_317 = arith.constant 0 : index
    %668 = vector.load %arg2[%c3_315, %c0_316, %c0_317] : memref<4x32x32xf32, #tpu.memory_space<vmem>>, vector<1x32x32xf32>
    %669 = vector.shape_cast %668 : vector<1x32x32xf32> to vector<32x32xf32>
    %670 = vector.extract_strided_slice %649 {offsets = [0, 3], sizes = [32, 1], strides = [1, 1]} : vector<32x4xf32> to vector<32x1xf32>
    %671 = vector.broadcast %670 : vector<32x1xf32> to vector<32x32xf32>
    %672 = arith.mulf %669, %671 : vector<32x32xf32>
    %673 = arith.addf %667, %672 : vector<32x32xf32>
    %cst_318 = arith.constant 1.250000e-01 : f32
    %674 = vector.broadcast %cst_318 : f32 to vector<32x32xf32>
    %675 = arith.mulf %673, %674 : vector<32x32xf32>
    %cst_319 = arith.constant 0.000000e+00 : f32
    %676 = vector.broadcast %cst_319 : f32 to vector<32x32xf32>
    %677 = arith.cmpf ogt, %1, %676 : vector<32x32xf32>
    %cst_320 = arith.constant -1.000000e+30 : f32
    %678 = vector.broadcast %cst_320 : f32 to vector<32x32xf32>
    %679 = arith.select %677, %675, %678 : vector<32x32xi1>, vector<32x32xf32>
    %cst_321 = arith.constant dense<0xFF800000> : vector<32xf32>
    %680 = vector.multi_reduction <maximumf>, %679, %cst_321 [1] : vector<32x32xf32> to vector<32xf32>
    %681 = vector.shape_cast %680 : vector<32xf32> to vector<32x1xf32>
    %682 = vector.broadcast %681 : vector<32x1xf32> to vector<32x32xf32>
    %683 = arith.subf %679, %682 : vector<32x32xf32>
    %684 = math.exp %683 : vector<32x32xf32>
    %cst_322 = arith.constant dense<0.000000e+00> : vector<32xf32>
    %685 = vector.multi_reduction <add>, %684, %cst_322 [1] : vector<32x32xf32> to vector<32xf32>
    %686 = vector.shape_cast %685 : vector<32xf32> to vector<32x1xf32>
    %cst_323 = arith.constant 1.000000e-30 : f32
    %687 = vector.broadcast %cst_323 : f32 to vector<32x1xf32>
    %688 = arith.maximumf %686, %687 : vector<32x1xf32>
    %689 = tpu.reciprocal %688 {approx = true} : vector<32x1xf32> -> vector<32x1xf32>
    %690 = vector.broadcast %689 : vector<32x1xf32> to vector<32x32xf32>
    %691 = arith.mulf %684, %690 : vector<32x32xf32>
    %692 = vector.broadcast %9 : vector<32x1xf32> to vector<32x32xf32>
    %693 = arith.mulf %691, %692 : vector<32x32xf32>
    %694 = arith.truncf %693 : vector<32x32xf32> to vector<32x32xbf16>
    %695 = arith.truncf %644 : vector<32x64xf32> to vector<32x64xbf16>
    %cst_324 = arith.constant dense<0.000000e+00> : vector<32x64xf32>
    %696 = tpu.matmul %694, %695, %cst_324 {dimension_numbers = #tpu.dot_dimension_numbers<[1], [0], [0], [1], [0, 0, 1, 1], [], []>} : vector<32x32xbf16>, vector<32x64xbf16>, vector<32x64xf32> -> vector<32x64xf32>
    %c0_325 = arith.constant 0 : index
    %c0_326 = arith.constant 0 : index
    %c0_327 = arith.constant 0 : index
    %697 = vector.load %arg2[%c0_325, %c0_326, %c0_327] : memref<4x32x32xf32, #tpu.memory_space<vmem>>, vector<1x32x32xf32>
    %698 = vector.shape_cast %697 : vector<1x32x32xf32> to vector<32x32xf32>
    %699 = arith.mulf %693, %698 : vector<32x32xf32>
    %cst_328 = arith.constant dense<0.000000e+00> : vector<32xf32>
    %700 = vector.multi_reduction <add>, %699, %cst_328 [1] : vector<32x32xf32> to vector<32xf32>
    %701 = vector.shape_cast %700 : vector<32xf32> to vector<32x1xf32>
    %c1_329 = arith.constant 1 : index
    %c0_330 = arith.constant 0 : index
    %c0_331 = arith.constant 0 : index
    %702 = vector.load %arg2[%c1_329, %c0_330, %c0_331] : memref<4x32x32xf32, #tpu.memory_space<vmem>>, vector<1x32x32xf32>
    %703 = vector.shape_cast %702 : vector<1x32x32xf32> to vector<32x32xf32>
    %704 = arith.mulf %693, %703 : vector<32x32xf32>
    %cst_332 = arith.constant dense<0.000000e+00> : vector<32xf32>
    %705 = vector.multi_reduction <add>, %704, %cst_332 [1] : vector<32x32xf32> to vector<32xf32>
    %706 = vector.shape_cast %705 : vector<32xf32> to vector<32x1xf32>
    %c2_333 = arith.constant 2 : index
    %c0_334 = arith.constant 0 : index
    %c0_335 = arith.constant 0 : index
    %707 = vector.load %arg2[%c2_333, %c0_334, %c0_335] : memref<4x32x32xf32, #tpu.memory_space<vmem>>, vector<1x32x32xf32>
    %708 = vector.shape_cast %707 : vector<1x32x32xf32> to vector<32x32xf32>
    %709 = arith.mulf %693, %708 : vector<32x32xf32>
    %cst_336 = arith.constant dense<0.000000e+00> : vector<32xf32>
    %710 = vector.multi_reduction <add>, %709, %cst_336 [1] : vector<32x32xf32> to vector<32xf32>
    %711 = vector.shape_cast %710 : vector<32xf32> to vector<32x1xf32>
    %c3_337 = arith.constant 3 : index
    %c0_338 = arith.constant 0 : index
    %c0_339 = arith.constant 0 : index
    %712 = vector.load %arg2[%c3_337, %c0_338, %c0_339] : memref<4x32x32xf32, #tpu.memory_space<vmem>>, vector<1x32x32xf32>
    %713 = vector.shape_cast %712 : vector<1x32x32xf32> to vector<32x32xf32>
    %714 = arith.mulf %693, %713 : vector<32x32xf32>
    %cst_340 = arith.constant dense<0.000000e+00> : vector<32xf32>
    %715 = vector.multi_reduction <add>, %714, %cst_340 [1] : vector<32x32xf32> to vector<32xf32>
    %716 = vector.shape_cast %715 : vector<32xf32> to vector<32x1xf32>
    %717 = tpu.concatenate %701, %706, %711, %716 in 1 : vector<32x1xf32>, vector<32x1xf32>, vector<32x1xf32>, vector<32x1xf32> -> vector<32x4xf32>
    %cst_341 = arith.constant dense<0.000000e+00> : vector<32x64xf32>
    %718 = tpu.matmul %717, %2, %cst_341 {dimension_numbers = #tpu.dot_dimension_numbers<[1], [0], [0], [1], [0, 0, 1, 1], [], []>} : vector<32x4xf32>, vector<4x64xf32>, vector<32x64xf32> -> vector<32x64xf32>
    %719 = arith.addf %696, %718 : vector<32x64xf32>
    %720 = arith.addf %719, %645 : vector<32x64xf32>
    %cst_342 = arith.constant 0.000000e+00 : f32
    %721 = vector.broadcast %cst_342 : f32 to vector<32x64xf32>
    %722 = arith.cmpf oge, %720, %721 : vector<32x64xf32>
    %cst_343 = arith.constant 0.00999999977 : f32
    %723 = vector.broadcast %cst_343 : f32 to vector<32x64xf32>
    %724 = arith.mulf %723, %720 : vector<32x64xf32>
    %725 = arith.select %722, %720, %724 : vector<32x64xi1>, vector<32x64xf32>
    %c8_i32 = arith.constant 8 : i32
    %726 = arith.truncf %725 : vector<32x64xf32> to vector<32x64xbf16>
    %cst_344 = arith.constant dense<0.000000e+00> : vector<32x256xf32>
    %727 = tpu.matmul %726, %20, %cst_344 {dimension_numbers = #tpu.dot_dimension_numbers<[1], [0], [0], [1], [0, 0, 1, 1], [], []>} : vector<32x64xbf16>, vector<64x256xbf16>, vector<32x256xf32> -> vector<32x256xf32>
    %728 = vector.broadcast %21 : vector<1x256xf32> to vector<32x256xf32>
    %729 = arith.addf %727, %728 : vector<32x256xf32>
    %730 = vector.extract_strided_slice %729 {offsets = [0, 0], sizes = [32, 64], strides = [1, 1]} : vector<32x256xf32> to vector<32x64xf32>
    %731 = vector.extract_strided_slice %729 {offsets = [0, 64], sizes = [32, 64], strides = [1, 1]} : vector<32x256xf32> to vector<32x64xf32>
    %732 = vector.extract_strided_slice %729 {offsets = [0, 128], sizes = [32, 64], strides = [1, 1]} : vector<32x256xf32> to vector<32x64xf32>
    %733 = vector.extract_strided_slice %729 {offsets = [0, 192], sizes = [32, 64], strides = [1, 1]} : vector<32x256xf32> to vector<32x64xf32>
    %734 = arith.truncf %730 : vector<32x64xf32> to vector<32x64xbf16>
    %735 = arith.truncf %731 : vector<32x64xf32> to vector<32x64xbf16>
    %cst_345 = arith.constant dense<0.000000e+00> : vector<32x32xf32>
    %736 = tpu.matmul %734, %735, %cst_345 {dimension_numbers = #tpu.dot_dimension_numbers<[1], [1], [0], [0], [0, 0, 1, 0], [], []>} : vector<32x64xbf16>, vector<32x64xbf16>, vector<32x32xf32> -> vector<32x32xf32>
    %cst_346 = arith.constant dense<0.000000e+00> : vector<32x4xf32>
    %737 = tpu.matmul %730, %3, %cst_346 {dimension_numbers = #tpu.dot_dimension_numbers<[1], [0], [0], [1], [0, 0, 1, 1], [], []>} : vector<32x64xf32>, vector<64x4xf32>, vector<32x4xf32> -> vector<32x4xf32>
    %c0_347 = arith.constant 0 : index
    %c0_348 = arith.constant 0 : index
    %c0_349 = arith.constant 0 : index
    %738 = vector.load %arg2[%c0_347, %c0_348, %c0_349] : memref<4x32x32xf32, #tpu.memory_space<vmem>>, vector<1x32x32xf32>
    %739 = vector.shape_cast %738 : vector<1x32x32xf32> to vector<32x32xf32>
    %740 = vector.extract_strided_slice %737 {offsets = [0, 0], sizes = [32, 1], strides = [1, 1]} : vector<32x4xf32> to vector<32x1xf32>
    %741 = vector.broadcast %740 : vector<32x1xf32> to vector<32x32xf32>
    %742 = arith.mulf %739, %741 : vector<32x32xf32>
    %743 = arith.addf %736, %742 : vector<32x32xf32>
    %c1_350 = arith.constant 1 : index
    %c0_351 = arith.constant 0 : index
    %c0_352 = arith.constant 0 : index
    %744 = vector.load %arg2[%c1_350, %c0_351, %c0_352] : memref<4x32x32xf32, #tpu.memory_space<vmem>>, vector<1x32x32xf32>
    %745 = vector.shape_cast %744 : vector<1x32x32xf32> to vector<32x32xf32>
    %746 = vector.extract_strided_slice %737 {offsets = [0, 1], sizes = [32, 1], strides = [1, 1]} : vector<32x4xf32> to vector<32x1xf32>
    %747 = vector.broadcast %746 : vector<32x1xf32> to vector<32x32xf32>
    %748 = arith.mulf %745, %747 : vector<32x32xf32>
    %749 = arith.addf %743, %748 : vector<32x32xf32>
    %c2_353 = arith.constant 2 : index
    %c0_354 = arith.constant 0 : index
    %c0_355 = arith.constant 0 : index
    %750 = vector.load %arg2[%c2_353, %c0_354, %c0_355] : memref<4x32x32xf32, #tpu.memory_space<vmem>>, vector<1x32x32xf32>
    %751 = vector.shape_cast %750 : vector<1x32x32xf32> to vector<32x32xf32>
    %752 = vector.extract_strided_slice %737 {offsets = [0, 2], sizes = [32, 1], strides = [1, 1]} : vector<32x4xf32> to vector<32x1xf32>
    %753 = vector.broadcast %752 : vector<32x1xf32> to vector<32x32xf32>
    %754 = arith.mulf %751, %753 : vector<32x32xf32>
    %755 = arith.addf %749, %754 : vector<32x32xf32>
    %c3_356 = arith.constant 3 : index
    %c0_357 = arith.constant 0 : index
    %c0_358 = arith.constant 0 : index
    %756 = vector.load %arg2[%c3_356, %c0_357, %c0_358] : memref<4x32x32xf32, #tpu.memory_space<vmem>>, vector<1x32x32xf32>
    %757 = vector.shape_cast %756 : vector<1x32x32xf32> to vector<32x32xf32>
    %758 = vector.extract_strided_slice %737 {offsets = [0, 3], sizes = [32, 1], strides = [1, 1]} : vector<32x4xf32> to vector<32x1xf32>
    %759 = vector.broadcast %758 : vector<32x1xf32> to vector<32x32xf32>
    %760 = arith.mulf %757, %759 : vector<32x32xf32>
    %761 = arith.addf %755, %760 : vector<32x32xf32>
    %cst_359 = arith.constant 1.250000e-01 : f32
    %762 = vector.broadcast %cst_359 : f32 to vector<32x32xf32>
    %763 = arith.mulf %761, %762 : vector<32x32xf32>
    %cst_360 = arith.constant 0.000000e+00 : f32
    %764 = vector.broadcast %cst_360 : f32 to vector<32x32xf32>
    %765 = arith.cmpf ogt, %1, %764 : vector<32x32xf32>
    %cst_361 = arith.constant -1.000000e+30 : f32
    %766 = vector.broadcast %cst_361 : f32 to vector<32x32xf32>
    %767 = arith.select %765, %763, %766 : vector<32x32xi1>, vector<32x32xf32>
    %cst_362 = arith.constant dense<0xFF800000> : vector<32xf32>
    %768 = vector.multi_reduction <maximumf>, %767, %cst_362 [1] : vector<32x32xf32> to vector<32xf32>
    %769 = vector.shape_cast %768 : vector<32xf32> to vector<32x1xf32>
    %770 = vector.broadcast %769 : vector<32x1xf32> to vector<32x32xf32>
    %771 = arith.subf %767, %770 : vector<32x32xf32>
    %772 = math.exp %771 : vector<32x32xf32>
    %cst_363 = arith.constant dense<0.000000e+00> : vector<32xf32>
    %773 = vector.multi_reduction <add>, %772, %cst_363 [1] : vector<32x32xf32> to vector<32xf32>
    %774 = vector.shape_cast %773 : vector<32xf32> to vector<32x1xf32>
    %cst_364 = arith.constant 1.000000e-30 : f32
    %775 = vector.broadcast %cst_364 : f32 to vector<32x1xf32>
    %776 = arith.maximumf %774, %775 : vector<32x1xf32>
    %777 = tpu.reciprocal %776 {approx = true} : vector<32x1xf32> -> vector<32x1xf32>
    %778 = vector.broadcast %777 : vector<32x1xf32> to vector<32x32xf32>
    %779 = arith.mulf %772, %778 : vector<32x32xf32>
    %780 = vector.broadcast %9 : vector<32x1xf32> to vector<32x32xf32>
    %781 = arith.mulf %779, %780 : vector<32x32xf32>
    %782 = arith.truncf %781 : vector<32x32xf32> to vector<32x32xbf16>
    %783 = arith.truncf %732 : vector<32x64xf32> to vector<32x64xbf16>
    %cst_365 = arith.constant dense<0.000000e+00> : vector<32x64xf32>
    %784 = tpu.matmul %782, %783, %cst_365 {dimension_numbers = #tpu.dot_dimension_numbers<[1], [0], [0], [1], [0, 0, 1, 1], [], []>} : vector<32x32xbf16>, vector<32x64xbf16>, vector<32x64xf32> -> vector<32x64xf32>
    %c0_366 = arith.constant 0 : index
    %c0_367 = arith.constant 0 : index
    %c0_368 = arith.constant 0 : index
    %785 = vector.load %arg2[%c0_366, %c0_367, %c0_368] : memref<4x32x32xf32, #tpu.memory_space<vmem>>, vector<1x32x32xf32>
    %786 = vector.shape_cast %785 : vector<1x32x32xf32> to vector<32x32xf32>
    %787 = arith.mulf %781, %786 : vector<32x32xf32>
    %cst_369 = arith.constant dense<0.000000e+00> : vector<32xf32>
    %788 = vector.multi_reduction <add>, %787, %cst_369 [1] : vector<32x32xf32> to vector<32xf32>
    %789 = vector.shape_cast %788 : vector<32xf32> to vector<32x1xf32>
    %c1_370 = arith.constant 1 : index
    %c0_371 = arith.constant 0 : index
    %c0_372 = arith.constant 0 : index
    %790 = vector.load %arg2[%c1_370, %c0_371, %c0_372] : memref<4x32x32xf32, #tpu.memory_space<vmem>>, vector<1x32x32xf32>
    %791 = vector.shape_cast %790 : vector<1x32x32xf32> to vector<32x32xf32>
    %792 = arith.mulf %781, %791 : vector<32x32xf32>
    %cst_373 = arith.constant dense<0.000000e+00> : vector<32xf32>
    %793 = vector.multi_reduction <add>, %792, %cst_373 [1] : vector<32x32xf32> to vector<32xf32>
    %794 = vector.shape_cast %793 : vector<32xf32> to vector<32x1xf32>
    %c2_374 = arith.constant 2 : index
    %c0_375 = arith.constant 0 : index
    %c0_376 = arith.constant 0 : index
    %795 = vector.load %arg2[%c2_374, %c0_375, %c0_376] : memref<4x32x32xf32, #tpu.memory_space<vmem>>, vector<1x32x32xf32>
    %796 = vector.shape_cast %795 : vector<1x32x32xf32> to vector<32x32xf32>
    %797 = arith.mulf %781, %796 : vector<32x32xf32>
    %cst_377 = arith.constant dense<0.000000e+00> : vector<32xf32>
    %798 = vector.multi_reduction <add>, %797, %cst_377 [1] : vector<32x32xf32> to vector<32xf32>
    %799 = vector.shape_cast %798 : vector<32xf32> to vector<32x1xf32>
    %c3_378 = arith.constant 3 : index
    %c0_379 = arith.constant 0 : index
    %c0_380 = arith.constant 0 : index
    %800 = vector.load %arg2[%c3_378, %c0_379, %c0_380] : memref<4x32x32xf32, #tpu.memory_space<vmem>>, vector<1x32x32xf32>
    %801 = vector.shape_cast %800 : vector<1x32x32xf32> to vector<32x32xf32>
    %802 = arith.mulf %781, %801 : vector<32x32xf32>
    %cst_381 = arith.constant dense<0.000000e+00> : vector<32xf32>
    %803 = vector.multi_reduction <add>, %802, %cst_381 [1] : vector<32x32xf32> to vector<32xf32>
    %804 = vector.shape_cast %803 : vector<32xf32> to vector<32x1xf32>
    %805 = tpu.concatenate %789, %794, %799, %804 in 1 : vector<32x1xf32>, vector<32x1xf32>, vector<32x1xf32>, vector<32x1xf32> -> vector<32x4xf32>
    %cst_382 = arith.constant dense<0.000000e+00> : vector<32x64xf32>
    %806 = tpu.matmul %805, %2, %cst_382 {dimension_numbers = #tpu.dot_dimension_numbers<[1], [0], [0], [1], [0, 0, 1, 1], [], []>} : vector<32x4xf32>, vector<4x64xf32>, vector<32x64xf32> -> vector<32x64xf32>
    %807 = arith.addf %784, %806 : vector<32x64xf32>
    %808 = arith.addf %807, %733 : vector<32x64xf32>
    %cst_383 = arith.constant 0.000000e+00 : f32
    %809 = vector.broadcast %cst_383 : f32 to vector<32x64xf32>
    %810 = arith.cmpf oge, %808, %809 : vector<32x64xf32>
    %cst_384 = arith.constant 0.00999999977 : f32
    %811 = vector.broadcast %cst_384 : f32 to vector<32x64xf32>
    %812 = arith.mulf %811, %808 : vector<32x64xf32>
    %813 = arith.select %810, %808, %812 : vector<32x64xi1>, vector<32x64xf32>
    %c9_i32 = arith.constant 9 : i32
    %814 = arith.truncf %813 : vector<32x64xf32> to vector<32x64xbf16>
    %cst_385 = arith.constant dense<0.000000e+00> : vector<32x256xf32>
    %815 = tpu.matmul %814, %20, %cst_385 {dimension_numbers = #tpu.dot_dimension_numbers<[1], [0], [0], [1], [0, 0, 1, 1], [], []>} : vector<32x64xbf16>, vector<64x256xbf16>, vector<32x256xf32> -> vector<32x256xf32>
    %816 = vector.broadcast %21 : vector<1x256xf32> to vector<32x256xf32>
    %817 = arith.addf %815, %816 : vector<32x256xf32>
    %818 = vector.extract_strided_slice %817 {offsets = [0, 0], sizes = [32, 64], strides = [1, 1]} : vector<32x256xf32> to vector<32x64xf32>
    %819 = vector.extract_strided_slice %817 {offsets = [0, 64], sizes = [32, 64], strides = [1, 1]} : vector<32x256xf32> to vector<32x64xf32>
    %820 = vector.extract_strided_slice %817 {offsets = [0, 128], sizes = [32, 64], strides = [1, 1]} : vector<32x256xf32> to vector<32x64xf32>
    %821 = vector.extract_strided_slice %817 {offsets = [0, 192], sizes = [32, 64], strides = [1, 1]} : vector<32x256xf32> to vector<32x64xf32>
    %822 = arith.truncf %818 : vector<32x64xf32> to vector<32x64xbf16>
    %823 = arith.truncf %819 : vector<32x64xf32> to vector<32x64xbf16>
    %cst_386 = arith.constant dense<0.000000e+00> : vector<32x32xf32>
    %824 = tpu.matmul %822, %823, %cst_386 {dimension_numbers = #tpu.dot_dimension_numbers<[1], [1], [0], [0], [0, 0, 1, 0], [], []>} : vector<32x64xbf16>, vector<32x64xbf16>, vector<32x32xf32> -> vector<32x32xf32>
    %cst_387 = arith.constant dense<0.000000e+00> : vector<32x4xf32>
    %825 = tpu.matmul %818, %3, %cst_387 {dimension_numbers = #tpu.dot_dimension_numbers<[1], [0], [0], [1], [0, 0, 1, 1], [], []>} : vector<32x64xf32>, vector<64x4xf32>, vector<32x4xf32> -> vector<32x4xf32>
    %c0_388 = arith.constant 0 : index
    %c0_389 = arith.constant 0 : index
    %c0_390 = arith.constant 0 : index
    %826 = vector.load %arg2[%c0_388, %c0_389, %c0_390] : memref<4x32x32xf32, #tpu.memory_space<vmem>>, vector<1x32x32xf32>
    %827 = vector.shape_cast %826 : vector<1x32x32xf32> to vector<32x32xf32>
    %828 = vector.extract_strided_slice %825 {offsets = [0, 0], sizes = [32, 1], strides = [1, 1]} : vector<32x4xf32> to vector<32x1xf32>
    %829 = vector.broadcast %828 : vector<32x1xf32> to vector<32x32xf32>
    %830 = arith.mulf %827, %829 : vector<32x32xf32>
    %831 = arith.addf %824, %830 : vector<32x32xf32>
    %c1_391 = arith.constant 1 : index
    %c0_392 = arith.constant 0 : index
    %c0_393 = arith.constant 0 : index
    %832 = vector.load %arg2[%c1_391, %c0_392, %c0_393] : memref<4x32x32xf32, #tpu.memory_space<vmem>>, vector<1x32x32xf32>
    %833 = vector.shape_cast %832 : vector<1x32x32xf32> to vector<32x32xf32>
    %834 = vector.extract_strided_slice %825 {offsets = [0, 1], sizes = [32, 1], strides = [1, 1]} : vector<32x4xf32> to vector<32x1xf32>
    %835 = vector.broadcast %834 : vector<32x1xf32> to vector<32x32xf32>
    %836 = arith.mulf %833, %835 : vector<32x32xf32>
    %837 = arith.addf %831, %836 : vector<32x32xf32>
    %c2_394 = arith.constant 2 : index
    %c0_395 = arith.constant 0 : index
    %c0_396 = arith.constant 0 : index
    %838 = vector.load %arg2[%c2_394, %c0_395, %c0_396] : memref<4x32x32xf32, #tpu.memory_space<vmem>>, vector<1x32x32xf32>
    %839 = vector.shape_cast %838 : vector<1x32x32xf32> to vector<32x32xf32>
    %840 = vector.extract_strided_slice %825 {offsets = [0, 2], sizes = [32, 1], strides = [1, 1]} : vector<32x4xf32> to vector<32x1xf32>
    %841 = vector.broadcast %840 : vector<32x1xf32> to vector<32x32xf32>
    %842 = arith.mulf %839, %841 : vector<32x32xf32>
    %843 = arith.addf %837, %842 : vector<32x32xf32>
    %c3_397 = arith.constant 3 : index
    %c0_398 = arith.constant 0 : index
    %c0_399 = arith.constant 0 : index
    %844 = vector.load %arg2[%c3_397, %c0_398, %c0_399] : memref<4x32x32xf32, #tpu.memory_space<vmem>>, vector<1x32x32xf32>
    %845 = vector.shape_cast %844 : vector<1x32x32xf32> to vector<32x32xf32>
    %846 = vector.extract_strided_slice %825 {offsets = [0, 3], sizes = [32, 1], strides = [1, 1]} : vector<32x4xf32> to vector<32x1xf32>
    %847 = vector.broadcast %846 : vector<32x1xf32> to vector<32x32xf32>
    %848 = arith.mulf %845, %847 : vector<32x32xf32>
    %849 = arith.addf %843, %848 : vector<32x32xf32>
    %cst_400 = arith.constant 1.250000e-01 : f32
    %850 = vector.broadcast %cst_400 : f32 to vector<32x32xf32>
    %851 = arith.mulf %849, %850 : vector<32x32xf32>
    %cst_401 = arith.constant 0.000000e+00 : f32
    %852 = vector.broadcast %cst_401 : f32 to vector<32x32xf32>
    %853 = arith.cmpf ogt, %1, %852 : vector<32x32xf32>
    %cst_402 = arith.constant -1.000000e+30 : f32
    %854 = vector.broadcast %cst_402 : f32 to vector<32x32xf32>
    %855 = arith.select %853, %851, %854 : vector<32x32xi1>, vector<32x32xf32>
    %cst_403 = arith.constant dense<0xFF800000> : vector<32xf32>
    %856 = vector.multi_reduction <maximumf>, %855, %cst_403 [1] : vector<32x32xf32> to vector<32xf32>
    %857 = vector.shape_cast %856 : vector<32xf32> to vector<32x1xf32>
    %858 = vector.broadcast %857 : vector<32x1xf32> to vector<32x32xf32>
    %859 = arith.subf %855, %858 : vector<32x32xf32>
    %860 = math.exp %859 : vector<32x32xf32>
    %cst_404 = arith.constant dense<0.000000e+00> : vector<32xf32>
    %861 = vector.multi_reduction <add>, %860, %cst_404 [1] : vector<32x32xf32> to vector<32xf32>
    %862 = vector.shape_cast %861 : vector<32xf32> to vector<32x1xf32>
    %cst_405 = arith.constant 1.000000e-30 : f32
    %863 = vector.broadcast %cst_405 : f32 to vector<32x1xf32>
    %864 = arith.maximumf %862, %863 : vector<32x1xf32>
    %865 = tpu.reciprocal %864 {approx = true} : vector<32x1xf32> -> vector<32x1xf32>
    %866 = vector.broadcast %865 : vector<32x1xf32> to vector<32x32xf32>
    %867 = arith.mulf %860, %866 : vector<32x32xf32>
    %868 = vector.broadcast %9 : vector<32x1xf32> to vector<32x32xf32>
    %869 = arith.mulf %867, %868 : vector<32x32xf32>
    %870 = arith.truncf %869 : vector<32x32xf32> to vector<32x32xbf16>
    %871 = arith.truncf %820 : vector<32x64xf32> to vector<32x64xbf16>
    %cst_406 = arith.constant dense<0.000000e+00> : vector<32x64xf32>
    %872 = tpu.matmul %870, %871, %cst_406 {dimension_numbers = #tpu.dot_dimension_numbers<[1], [0], [0], [1], [0, 0, 1, 1], [], []>} : vector<32x32xbf16>, vector<32x64xbf16>, vector<32x64xf32> -> vector<32x64xf32>
    %c0_407 = arith.constant 0 : index
    %c0_408 = arith.constant 0 : index
    %c0_409 = arith.constant 0 : index
    %873 = vector.load %arg2[%c0_407, %c0_408, %c0_409] : memref<4x32x32xf32, #tpu.memory_space<vmem>>, vector<1x32x32xf32>
    %874 = vector.shape_cast %873 : vector<1x32x32xf32> to vector<32x32xf32>
    %875 = arith.mulf %869, %874 : vector<32x32xf32>
    %cst_410 = arith.constant dense<0.000000e+00> : vector<32xf32>
    %876 = vector.multi_reduction <add>, %875, %cst_410 [1] : vector<32x32xf32> to vector<32xf32>
    %877 = vector.shape_cast %876 : vector<32xf32> to vector<32x1xf32>
    %c1_411 = arith.constant 1 : index
    %c0_412 = arith.constant 0 : index
    %c0_413 = arith.constant 0 : index
    %878 = vector.load %arg2[%c1_411, %c0_412, %c0_413] : memref<4x32x32xf32, #tpu.memory_space<vmem>>, vector<1x32x32xf32>
    %879 = vector.shape_cast %878 : vector<1x32x32xf32> to vector<32x32xf32>
    %880 = arith.mulf %869, %879 : vector<32x32xf32>
    %cst_414 = arith.constant dense<0.000000e+00> : vector<32xf32>
    %881 = vector.multi_reduction <add>, %880, %cst_414 [1] : vector<32x32xf32> to vector<32xf32>
    %882 = vector.shape_cast %881 : vector<32xf32> to vector<32x1xf32>
    %c2_415 = arith.constant 2 : index
    %c0_416 = arith.constant 0 : index
    %c0_417 = arith.constant 0 : index
    %883 = vector.load %arg2[%c2_415, %c0_416, %c0_417] : memref<4x32x32xf32, #tpu.memory_space<vmem>>, vector<1x32x32xf32>
    %884 = vector.shape_cast %883 : vector<1x32x32xf32> to vector<32x32xf32>
    %885 = arith.mulf %869, %884 : vector<32x32xf32>
    %cst_418 = arith.constant dense<0.000000e+00> : vector<32xf32>
    %886 = vector.multi_reduction <add>, %885, %cst_418 [1] : vector<32x32xf32> to vector<32xf32>
    %887 = vector.shape_cast %886 : vector<32xf32> to vector<32x1xf32>
    %c3_419 = arith.constant 3 : index
    %c0_420 = arith.constant 0 : index
    %c0_421 = arith.constant 0 : index
    %888 = vector.load %arg2[%c3_419, %c0_420, %c0_421] : memref<4x32x32xf32, #tpu.memory_space<vmem>>, vector<1x32x32xf32>
    %889 = vector.shape_cast %888 : vector<1x32x32xf32> to vector<32x32xf32>
    %890 = arith.mulf %869, %889 : vector<32x32xf32>
    %cst_422 = arith.constant dense<0.000000e+00> : vector<32xf32>
    %891 = vector.multi_reduction <add>, %890, %cst_422 [1] : vector<32x32xf32> to vector<32xf32>
    %892 = vector.shape_cast %891 : vector<32xf32> to vector<32x1xf32>
    %893 = tpu.concatenate %877, %882, %887, %892 in 1 : vector<32x1xf32>, vector<32x1xf32>, vector<32x1xf32>, vector<32x1xf32> -> vector<32x4xf32>
    %cst_423 = arith.constant dense<0.000000e+00> : vector<32x64xf32>
    %894 = tpu.matmul %893, %2, %cst_423 {dimension_numbers = #tpu.dot_dimension_numbers<[1], [0], [0], [1], [0, 0, 1, 1], [], []>} : vector<32x4xf32>, vector<4x64xf32>, vector<32x64xf32> -> vector<32x64xf32>
    %895 = arith.addf %872, %894 : vector<32x64xf32>
    %896 = arith.addf %895, %821 : vector<32x64xf32>
    %cst_424 = arith.constant 0.000000e+00 : f32
    %897 = vector.broadcast %cst_424 : f32 to vector<32x64xf32>
    %898 = arith.cmpf oge, %896, %897 : vector<32x64xf32>
    %cst_425 = arith.constant 0.00999999977 : f32
    %899 = vector.broadcast %cst_425 : f32 to vector<32x64xf32>
    %900 = arith.mulf %899, %896 : vector<32x64xf32>
    %901 = arith.select %898, %896, %900 : vector<32x64xi1>, vector<32x64xf32>
    %c10_i32 = arith.constant 10 : i32
    %902 = arith.truncf %901 : vector<32x64xf32> to vector<32x64xbf16>
    %cst_426 = arith.constant dense<0.000000e+00> : vector<32x256xf32>
    %903 = tpu.matmul %902, %20, %cst_426 {dimension_numbers = #tpu.dot_dimension_numbers<[1], [0], [0], [1], [0, 0, 1, 1], [], []>} : vector<32x64xbf16>, vector<64x256xbf16>, vector<32x256xf32> -> vector<32x256xf32>
    %904 = vector.broadcast %21 : vector<1x256xf32> to vector<32x256xf32>
    %905 = arith.addf %903, %904 : vector<32x256xf32>
    %906 = vector.extract_strided_slice %905 {offsets = [0, 0], sizes = [32, 64], strides = [1, 1]} : vector<32x256xf32> to vector<32x64xf32>
    %907 = vector.extract_strided_slice %905 {offsets = [0, 64], sizes = [32, 64], strides = [1, 1]} : vector<32x256xf32> to vector<32x64xf32>
    %908 = vector.extract_strided_slice %905 {offsets = [0, 128], sizes = [32, 64], strides = [1, 1]} : vector<32x256xf32> to vector<32x64xf32>
    %909 = vector.extract_strided_slice %905 {offsets = [0, 192], sizes = [32, 64], strides = [1, 1]} : vector<32x256xf32> to vector<32x64xf32>
    %910 = arith.truncf %906 : vector<32x64xf32> to vector<32x64xbf16>
    %911 = arith.truncf %907 : vector<32x64xf32> to vector<32x64xbf16>
    %cst_427 = arith.constant dense<0.000000e+00> : vector<32x32xf32>
    %912 = tpu.matmul %910, %911, %cst_427 {dimension_numbers = #tpu.dot_dimension_numbers<[1], [1], [0], [0], [0, 0, 1, 0], [], []>} : vector<32x64xbf16>, vector<32x64xbf16>, vector<32x32xf32> -> vector<32x32xf32>
    %cst_428 = arith.constant dense<0.000000e+00> : vector<32x4xf32>
    %913 = tpu.matmul %906, %3, %cst_428 {dimension_numbers = #tpu.dot_dimension_numbers<[1], [0], [0], [1], [0, 0, 1, 1], [], []>} : vector<32x64xf32>, vector<64x4xf32>, vector<32x4xf32> -> vector<32x4xf32>
    %c0_429 = arith.constant 0 : index
    %c0_430 = arith.constant 0 : index
    %c0_431 = arith.constant 0 : index
    %914 = vector.load %arg2[%c0_429, %c0_430, %c0_431] : memref<4x32x32xf32, #tpu.memory_space<vmem>>, vector<1x32x32xf32>
    %915 = vector.shape_cast %914 : vector<1x32x32xf32> to vector<32x32xf32>
    %916 = vector.extract_strided_slice %913 {offsets = [0, 0], sizes = [32, 1], strides = [1, 1]} : vector<32x4xf32> to vector<32x1xf32>
    %917 = vector.broadcast %916 : vector<32x1xf32> to vector<32x32xf32>
    %918 = arith.mulf %915, %917 : vector<32x32xf32>
    %919 = arith.addf %912, %918 : vector<32x32xf32>
    %c1_432 = arith.constant 1 : index
    %c0_433 = arith.constant 0 : index
    %c0_434 = arith.constant 0 : index
    %920 = vector.load %arg2[%c1_432, %c0_433, %c0_434] : memref<4x32x32xf32, #tpu.memory_space<vmem>>, vector<1x32x32xf32>
    %921 = vector.shape_cast %920 : vector<1x32x32xf32> to vector<32x32xf32>
    %922 = vector.extract_strided_slice %913 {offsets = [0, 1], sizes = [32, 1], strides = [1, 1]} : vector<32x4xf32> to vector<32x1xf32>
    %923 = vector.broadcast %922 : vector<32x1xf32> to vector<32x32xf32>
    %924 = arith.mulf %921, %923 : vector<32x32xf32>
    %925 = arith.addf %919, %924 : vector<32x32xf32>
    %c2_435 = arith.constant 2 : index
    %c0_436 = arith.constant 0 : index
    %c0_437 = arith.constant 0 : index
    %926 = vector.load %arg2[%c2_435, %c0_436, %c0_437] : memref<4x32x32xf32, #tpu.memory_space<vmem>>, vector<1x32x32xf32>
    %927 = vector.shape_cast %926 : vector<1x32x32xf32> to vector<32x32xf32>
    %928 = vector.extract_strided_slice %913 {offsets = [0, 2], sizes = [32, 1], strides = [1, 1]} : vector<32x4xf32> to vector<32x1xf32>
    %929 = vector.broadcast %928 : vector<32x1xf32> to vector<32x32xf32>
    %930 = arith.mulf %927, %929 : vector<32x32xf32>
    %931 = arith.addf %925, %930 : vector<32x32xf32>
    %c3_438 = arith.constant 3 : index
    %c0_439 = arith.constant 0 : index
    %c0_440 = arith.constant 0 : index
    %932 = vector.load %arg2[%c3_438, %c0_439, %c0_440] : memref<4x32x32xf32, #tpu.memory_space<vmem>>, vector<1x32x32xf32>
    %933 = vector.shape_cast %932 : vector<1x32x32xf32> to vector<32x32xf32>
    %934 = vector.extract_strided_slice %913 {offsets = [0, 3], sizes = [32, 1], strides = [1, 1]} : vector<32x4xf32> to vector<32x1xf32>
    %935 = vector.broadcast %934 : vector<32x1xf32> to vector<32x32xf32>
    %936 = arith.mulf %933, %935 : vector<32x32xf32>
    %937 = arith.addf %931, %936 : vector<32x32xf32>
    %cst_441 = arith.constant 1.250000e-01 : f32
    %938 = vector.broadcast %cst_441 : f32 to vector<32x32xf32>
    %939 = arith.mulf %937, %938 : vector<32x32xf32>
    %cst_442 = arith.constant 0.000000e+00 : f32
    %940 = vector.broadcast %cst_442 : f32 to vector<32x32xf32>
    %941 = arith.cmpf ogt, %1, %940 : vector<32x32xf32>
    %cst_443 = arith.constant -1.000000e+30 : f32
    %942 = vector.broadcast %cst_443 : f32 to vector<32x32xf32>
    %943 = arith.select %941, %939, %942 : vector<32x32xi1>, vector<32x32xf32>
    %cst_444 = arith.constant dense<0xFF800000> : vector<32xf32>
    %944 = vector.multi_reduction <maximumf>, %943, %cst_444 [1] : vector<32x32xf32> to vector<32xf32>
    %945 = vector.shape_cast %944 : vector<32xf32> to vector<32x1xf32>
    %946 = vector.broadcast %945 : vector<32x1xf32> to vector<32x32xf32>
    %947 = arith.subf %943, %946 : vector<32x32xf32>
    %948 = math.exp %947 : vector<32x32xf32>
    %cst_445 = arith.constant dense<0.000000e+00> : vector<32xf32>
    %949 = vector.multi_reduction <add>, %948, %cst_445 [1] : vector<32x32xf32> to vector<32xf32>
    %950 = vector.shape_cast %949 : vector<32xf32> to vector<32x1xf32>
    %cst_446 = arith.constant 1.000000e-30 : f32
    %951 = vector.broadcast %cst_446 : f32 to vector<32x1xf32>
    %952 = arith.maximumf %950, %951 : vector<32x1xf32>
    %953 = tpu.reciprocal %952 {approx = true} : vector<32x1xf32> -> vector<32x1xf32>
    %954 = vector.broadcast %953 : vector<32x1xf32> to vector<32x32xf32>
    %955 = arith.mulf %948, %954 : vector<32x32xf32>
    %956 = vector.broadcast %9 : vector<32x1xf32> to vector<32x32xf32>
    %957 = arith.mulf %955, %956 : vector<32x32xf32>
    %958 = arith.truncf %957 : vector<32x32xf32> to vector<32x32xbf16>
    %959 = arith.truncf %908 : vector<32x64xf32> to vector<32x64xbf16>
    %cst_447 = arith.constant dense<0.000000e+00> : vector<32x64xf32>
    %960 = tpu.matmul %958, %959, %cst_447 {dimension_numbers = #tpu.dot_dimension_numbers<[1], [0], [0], [1], [0, 0, 1, 1], [], []>} : vector<32x32xbf16>, vector<32x64xbf16>, vector<32x64xf32> -> vector<32x64xf32>
    %c0_448 = arith.constant 0 : index
    %c0_449 = arith.constant 0 : index
    %c0_450 = arith.constant 0 : index
    %961 = vector.load %arg2[%c0_448, %c0_449, %c0_450] : memref<4x32x32xf32, #tpu.memory_space<vmem>>, vector<1x32x32xf32>
    %962 = vector.shape_cast %961 : vector<1x32x32xf32> to vector<32x32xf32>
    %963 = arith.mulf %957, %962 : vector<32x32xf32>
    %cst_451 = arith.constant dense<0.000000e+00> : vector<32xf32>
    %964 = vector.multi_reduction <add>, %963, %cst_451 [1] : vector<32x32xf32> to vector<32xf32>
    %965 = vector.shape_cast %964 : vector<32xf32> to vector<32x1xf32>
    %c1_452 = arith.constant 1 : index
    %c0_453 = arith.constant 0 : index
    %c0_454 = arith.constant 0 : index
    %966 = vector.load %arg2[%c1_452, %c0_453, %c0_454] : memref<4x32x32xf32, #tpu.memory_space<vmem>>, vector<1x32x32xf32>
    %967 = vector.shape_cast %966 : vector<1x32x32xf32> to vector<32x32xf32>
    %968 = arith.mulf %957, %967 : vector<32x32xf32>
    %cst_455 = arith.constant dense<0.000000e+00> : vector<32xf32>
    %969 = vector.multi_reduction <add>, %968, %cst_455 [1] : vector<32x32xf32> to vector<32xf32>
    %970 = vector.shape_cast %969 : vector<32xf32> to vector<32x1xf32>
    %c2_456 = arith.constant 2 : index
    %c0_457 = arith.constant 0 : index
    %c0_458 = arith.constant 0 : index
    %971 = vector.load %arg2[%c2_456, %c0_457, %c0_458] : memref<4x32x32xf32, #tpu.memory_space<vmem>>, vector<1x32x32xf32>
    %972 = vector.shape_cast %971 : vector<1x32x32xf32> to vector<32x32xf32>
    %973 = arith.mulf %957, %972 : vector<32x32xf32>
    %cst_459 = arith.constant dense<0.000000e+00> : vector<32xf32>
    %974 = vector.multi_reduction <add>, %973, %cst_459 [1] : vector<32x32xf32> to vector<32xf32>
    %975 = vector.shape_cast %974 : vector<32xf32> to vector<32x1xf32>
    %c3_460 = arith.constant 3 : index
    %c0_461 = arith.constant 0 : index
    %c0_462 = arith.constant 0 : index
    %976 = vector.load %arg2[%c3_460, %c0_461, %c0_462] : memref<4x32x32xf32, #tpu.memory_space<vmem>>, vector<1x32x32xf32>
    %977 = vector.shape_cast %976 : vector<1x32x32xf32> to vector<32x32xf32>
    %978 = arith.mulf %957, %977 : vector<32x32xf32>
    %cst_463 = arith.constant dense<0.000000e+00> : vector<32xf32>
    %979 = vector.multi_reduction <add>, %978, %cst_463 [1] : vector<32x32xf32> to vector<32xf32>
    %980 = vector.shape_cast %979 : vector<32xf32> to vector<32x1xf32>
    %981 = tpu.concatenate %965, %970, %975, %980 in 1 : vector<32x1xf32>, vector<32x1xf32>, vector<32x1xf32>, vector<32x1xf32> -> vector<32x4xf32>
    %cst_464 = arith.constant dense<0.000000e+00> : vector<32x64xf32>
    %982 = tpu.matmul %981, %2, %cst_464 {dimension_numbers = #tpu.dot_dimension_numbers<[1], [0], [0], [1], [0, 0, 1, 1], [], []>} : vector<32x4xf32>, vector<4x64xf32>, vector<32x64xf32> -> vector<32x64xf32>
    %983 = arith.addf %960, %982 : vector<32x64xf32>
    %984 = arith.addf %983, %909 : vector<32x64xf32>
    %cst_465 = arith.constant 0.000000e+00 : f32
    %985 = vector.broadcast %cst_465 : f32 to vector<32x64xf32>
    %986 = arith.cmpf oge, %984, %985 : vector<32x64xf32>
    %cst_466 = arith.constant 0.00999999977 : f32
    %987 = vector.broadcast %cst_466 : f32 to vector<32x64xf32>
    %988 = arith.mulf %987, %984 : vector<32x64xf32>
    %989 = arith.select %986, %984, %988 : vector<32x64xi1>, vector<32x64xf32>
    %c11_i32 = arith.constant 11 : i32
    %990 = arith.truncf %989 : vector<32x64xf32> to vector<32x64xbf16>
    %cst_467 = arith.constant dense<0.000000e+00> : vector<32x256xf32>
    %991 = tpu.matmul %990, %20, %cst_467 {dimension_numbers = #tpu.dot_dimension_numbers<[1], [0], [0], [1], [0, 0, 1, 1], [], []>} : vector<32x64xbf16>, vector<64x256xbf16>, vector<32x256xf32> -> vector<32x256xf32>
    %992 = vector.broadcast %21 : vector<1x256xf32> to vector<32x256xf32>
    %993 = arith.addf %991, %992 : vector<32x256xf32>
    %994 = vector.extract_strided_slice %993 {offsets = [0, 0], sizes = [32, 64], strides = [1, 1]} : vector<32x256xf32> to vector<32x64xf32>
    %995 = vector.extract_strided_slice %993 {offsets = [0, 64], sizes = [32, 64], strides = [1, 1]} : vector<32x256xf32> to vector<32x64xf32>
    %996 = vector.extract_strided_slice %993 {offsets = [0, 128], sizes = [32, 64], strides = [1, 1]} : vector<32x256xf32> to vector<32x64xf32>
    %997 = vector.extract_strided_slice %993 {offsets = [0, 192], sizes = [32, 64], strides = [1, 1]} : vector<32x256xf32> to vector<32x64xf32>
    %998 = arith.truncf %994 : vector<32x64xf32> to vector<32x64xbf16>
    %999 = arith.truncf %995 : vector<32x64xf32> to vector<32x64xbf16>
    %cst_468 = arith.constant dense<0.000000e+00> : vector<32x32xf32>
    %1000 = tpu.matmul %998, %999, %cst_468 {dimension_numbers = #tpu.dot_dimension_numbers<[1], [1], [0], [0], [0, 0, 1, 0], [], []>} : vector<32x64xbf16>, vector<32x64xbf16>, vector<32x32xf32> -> vector<32x32xf32>
    %cst_469 = arith.constant dense<0.000000e+00> : vector<32x4xf32>
    %1001 = tpu.matmul %994, %3, %cst_469 {dimension_numbers = #tpu.dot_dimension_numbers<[1], [0], [0], [1], [0, 0, 1, 1], [], []>} : vector<32x64xf32>, vector<64x4xf32>, vector<32x4xf32> -> vector<32x4xf32>
    %c0_470 = arith.constant 0 : index
    %c0_471 = arith.constant 0 : index
    %c0_472 = arith.constant 0 : index
    %1002 = vector.load %arg2[%c0_470, %c0_471, %c0_472] : memref<4x32x32xf32, #tpu.memory_space<vmem>>, vector<1x32x32xf32>
    %1003 = vector.shape_cast %1002 : vector<1x32x32xf32> to vector<32x32xf32>
    %1004 = vector.extract_strided_slice %1001 {offsets = [0, 0], sizes = [32, 1], strides = [1, 1]} : vector<32x4xf32> to vector<32x1xf32>
    %1005 = vector.broadcast %1004 : vector<32x1xf32> to vector<32x32xf32>
    %1006 = arith.mulf %1003, %1005 : vector<32x32xf32>
    %1007 = arith.addf %1000, %1006 : vector<32x32xf32>
    %c1_473 = arith.constant 1 : index
    %c0_474 = arith.constant 0 : index
    %c0_475 = arith.constant 0 : index
    %1008 = vector.load %arg2[%c1_473, %c0_474, %c0_475] : memref<4x32x32xf32, #tpu.memory_space<vmem>>, vector<1x32x32xf32>
    %1009 = vector.shape_cast %1008 : vector<1x32x32xf32> to vector<32x32xf32>
    %1010 = vector.extract_strided_slice %1001 {offsets = [0, 1], sizes = [32, 1], strides = [1, 1]} : vector<32x4xf32> to vector<32x1xf32>
    %1011 = vector.broadcast %1010 : vector<32x1xf32> to vector<32x32xf32>
    %1012 = arith.mulf %1009, %1011 : vector<32x32xf32>
    %1013 = arith.addf %1007, %1012 : vector<32x32xf32>
    %c2_476 = arith.constant 2 : index
    %c0_477 = arith.constant 0 : index
    %c0_478 = arith.constant 0 : index
    %1014 = vector.load %arg2[%c2_476, %c0_477, %c0_478] : memref<4x32x32xf32, #tpu.memory_space<vmem>>, vector<1x32x32xf32>
    %1015 = vector.shape_cast %1014 : vector<1x32x32xf32> to vector<32x32xf32>
    %1016 = vector.extract_strided_slice %1001 {offsets = [0, 2], sizes = [32, 1], strides = [1, 1]} : vector<32x4xf32> to vector<32x1xf32>
    %1017 = vector.broadcast %1016 : vector<32x1xf32> to vector<32x32xf32>
    %1018 = arith.mulf %1015, %1017 : vector<32x32xf32>
    %1019 = arith.addf %1013, %1018 : vector<32x32xf32>
    %c3_479 = arith.constant 3 : index
    %c0_480 = arith.constant 0 : index
    %c0_481 = arith.constant 0 : index
    %1020 = vector.load %arg2[%c3_479, %c0_480, %c0_481] : memref<4x32x32xf32, #tpu.memory_space<vmem>>, vector<1x32x32xf32>
    %1021 = vector.shape_cast %1020 : vector<1x32x32xf32> to vector<32x32xf32>
    %1022 = vector.extract_strided_slice %1001 {offsets = [0, 3], sizes = [32, 1], strides = [1, 1]} : vector<32x4xf32> to vector<32x1xf32>
    %1023 = vector.broadcast %1022 : vector<32x1xf32> to vector<32x32xf32>
    %1024 = arith.mulf %1021, %1023 : vector<32x32xf32>
    %1025 = arith.addf %1019, %1024 : vector<32x32xf32>
    %cst_482 = arith.constant 1.250000e-01 : f32
    %1026 = vector.broadcast %cst_482 : f32 to vector<32x32xf32>
    %1027 = arith.mulf %1025, %1026 : vector<32x32xf32>
    %cst_483 = arith.constant 0.000000e+00 : f32
    %1028 = vector.broadcast %cst_483 : f32 to vector<32x32xf32>
    %1029 = arith.cmpf ogt, %1, %1028 : vector<32x32xf32>
    %cst_484 = arith.constant -1.000000e+30 : f32
    %1030 = vector.broadcast %cst_484 : f32 to vector<32x32xf32>
    %1031 = arith.select %1029, %1027, %1030 : vector<32x32xi1>, vector<32x32xf32>
    %cst_485 = arith.constant dense<0xFF800000> : vector<32xf32>
    %1032 = vector.multi_reduction <maximumf>, %1031, %cst_485 [1] : vector<32x32xf32> to vector<32xf32>
    %1033 = vector.shape_cast %1032 : vector<32xf32> to vector<32x1xf32>
    %1034 = vector.broadcast %1033 : vector<32x1xf32> to vector<32x32xf32>
    %1035 = arith.subf %1031, %1034 : vector<32x32xf32>
    %1036 = math.exp %1035 : vector<32x32xf32>
    %cst_486 = arith.constant dense<0.000000e+00> : vector<32xf32>
    %1037 = vector.multi_reduction <add>, %1036, %cst_486 [1] : vector<32x32xf32> to vector<32xf32>
    %1038 = vector.shape_cast %1037 : vector<32xf32> to vector<32x1xf32>
    %cst_487 = arith.constant 1.000000e-30 : f32
    %1039 = vector.broadcast %cst_487 : f32 to vector<32x1xf32>
    %1040 = arith.maximumf %1038, %1039 : vector<32x1xf32>
    %1041 = tpu.reciprocal %1040 {approx = true} : vector<32x1xf32> -> vector<32x1xf32>
    %1042 = vector.broadcast %1041 : vector<32x1xf32> to vector<32x32xf32>
    %1043 = arith.mulf %1036, %1042 : vector<32x32xf32>
    %1044 = vector.broadcast %9 : vector<32x1xf32> to vector<32x32xf32>
    %1045 = arith.mulf %1043, %1044 : vector<32x32xf32>
    %1046 = arith.truncf %1045 : vector<32x32xf32> to vector<32x32xbf16>
    %1047 = arith.truncf %996 : vector<32x64xf32> to vector<32x64xbf16>
    %cst_488 = arith.constant dense<0.000000e+00> : vector<32x64xf32>
    %1048 = tpu.matmul %1046, %1047, %cst_488 {dimension_numbers = #tpu.dot_dimension_numbers<[1], [0], [0], [1], [0, 0, 1, 1], [], []>} : vector<32x32xbf16>, vector<32x64xbf16>, vector<32x64xf32> -> vector<32x64xf32>
    %c0_489 = arith.constant 0 : index
    %c0_490 = arith.constant 0 : index
    %c0_491 = arith.constant 0 : index
    %1049 = vector.load %arg2[%c0_489, %c0_490, %c0_491] : memref<4x32x32xf32, #tpu.memory_space<vmem>>, vector<1x32x32xf32>
    %1050 = vector.shape_cast %1049 : vector<1x32x32xf32> to vector<32x32xf32>
    %1051 = arith.mulf %1045, %1050 : vector<32x32xf32>
    %cst_492 = arith.constant dense<0.000000e+00> : vector<32xf32>
    %1052 = vector.multi_reduction <add>, %1051, %cst_492 [1] : vector<32x32xf32> to vector<32xf32>
    %1053 = vector.shape_cast %1052 : vector<32xf32> to vector<32x1xf32>
    %c1_493 = arith.constant 1 : index
    %c0_494 = arith.constant 0 : index
    %c0_495 = arith.constant 0 : index
    %1054 = vector.load %arg2[%c1_493, %c0_494, %c0_495] : memref<4x32x32xf32, #tpu.memory_space<vmem>>, vector<1x32x32xf32>
    %1055 = vector.shape_cast %1054 : vector<1x32x32xf32> to vector<32x32xf32>
    %1056 = arith.mulf %1045, %1055 : vector<32x32xf32>
    %cst_496 = arith.constant dense<0.000000e+00> : vector<32xf32>
    %1057 = vector.multi_reduction <add>, %1056, %cst_496 [1] : vector<32x32xf32> to vector<32xf32>
    %1058 = vector.shape_cast %1057 : vector<32xf32> to vector<32x1xf32>
    %c2_497 = arith.constant 2 : index
    %c0_498 = arith.constant 0 : index
    %c0_499 = arith.constant 0 : index
    %1059 = vector.load %arg2[%c2_497, %c0_498, %c0_499] : memref<4x32x32xf32, #tpu.memory_space<vmem>>, vector<1x32x32xf32>
    %1060 = vector.shape_cast %1059 : vector<1x32x32xf32> to vector<32x32xf32>
    %1061 = arith.mulf %1045, %1060 : vector<32x32xf32>
    %cst_500 = arith.constant dense<0.000000e+00> : vector<32xf32>
    %1062 = vector.multi_reduction <add>, %1061, %cst_500 [1] : vector<32x32xf32> to vector<32xf32>
    %1063 = vector.shape_cast %1062 : vector<32xf32> to vector<32x1xf32>
    %c3_501 = arith.constant 3 : index
    %c0_502 = arith.constant 0 : index
    %c0_503 = arith.constant 0 : index
    %1064 = vector.load %arg2[%c3_501, %c0_502, %c0_503] : memref<4x32x32xf32, #tpu.memory_space<vmem>>, vector<1x32x32xf32>
    %1065 = vector.shape_cast %1064 : vector<1x32x32xf32> to vector<32x32xf32>
    %1066 = arith.mulf %1045, %1065 : vector<32x32xf32>
    %cst_504 = arith.constant dense<0.000000e+00> : vector<32xf32>
    %1067 = vector.multi_reduction <add>, %1066, %cst_504 [1] : vector<32x32xf32> to vector<32xf32>
    %1068 = vector.shape_cast %1067 : vector<32xf32> to vector<32x1xf32>
    %1069 = tpu.concatenate %1053, %1058, %1063, %1068 in 1 : vector<32x1xf32>, vector<32x1xf32>, vector<32x1xf32>, vector<32x1xf32> -> vector<32x4xf32>
    %cst_505 = arith.constant dense<0.000000e+00> : vector<32x64xf32>
    %1070 = tpu.matmul %1069, %2, %cst_505 {dimension_numbers = #tpu.dot_dimension_numbers<[1], [0], [0], [1], [0, 0, 1, 1], [], []>} : vector<32x4xf32>, vector<4x64xf32>, vector<32x64xf32> -> vector<32x64xf32>
    %1071 = arith.addf %1048, %1070 : vector<32x64xf32>
    %1072 = arith.addf %1071, %997 : vector<32x64xf32>
    %cst_506 = arith.constant 0.000000e+00 : f32
    %1073 = vector.broadcast %cst_506 : f32 to vector<32x64xf32>
    %1074 = arith.cmpf oge, %1072, %1073 : vector<32x64xf32>
    %cst_507 = arith.constant 0.00999999977 : f32
    %1075 = vector.broadcast %cst_507 : f32 to vector<32x64xf32>
    %1076 = arith.mulf %1075, %1072 : vector<32x64xf32>
    %1077 = arith.select %1074, %1072, %1076 : vector<32x64xi1>, vector<32x64xf32>
    %c0_508 = arith.constant 0 : index
    %c0_509 = arith.constant 0 : index
    %1078 = vector.load %arg3[%c0_508, %c0_509] : memref<2x32xf32, #tpu.memory_space<vmem>>, vector<2x32xf32>
    %cst_510 = arith.constant dense<0.000000e+00> : vector<2x64xf32>
    %1079 = tpu.matmul %1078, %1077, %cst_510 {dimension_numbers = #tpu.dot_dimension_numbers<[1], [0], [0], [1], [0, 0, 1, 1], [], []>} : vector<2x32xf32>, vector<32x64xf32>, vector<2x64xf32> -> vector<2x64xf32>
    %c0_511 = arith.constant 0 : index
    %c0_512 = arith.constant 0 : index
    %1080 = vector.load %arg4[%c0_511, %c0_512] : memref<8x32xf32, #tpu.memory_space<vmem>>, vector<8x32xf32>
    %cst_513 = arith.constant dense<0.000000e+00> : vector<8x64xf32>
    %1081 = tpu.matmul %1080, %1077, %cst_513 {dimension_numbers = #tpu.dot_dimension_numbers<[1], [0], [0], [1], [0, 0, 1, 1], [], []>} : vector<8x32xf32>, vector<32x64xf32>, vector<8x64xf32> -> vector<8x64xf32>
    %c0_514 = arith.constant 0 : index
    %c0_515 = arith.constant 0 : index
    %1082 = vector.load %arg5[%c0_514, %c0_515] : memref<8x2xf32, #tpu.memory_space<vmem>>, vector<8x2xf32>
    %cst_516 = arith.constant dense<0.000000e+00> : vector<8x64xf32>
    %1083 = tpu.matmul %1082, %1079, %cst_516 {dimension_numbers = #tpu.dot_dimension_numbers<[1], [0], [0], [1], [0, 0, 1, 1], [], []>} : vector<8x2xf32>, vector<2x64xf32>, vector<8x64xf32> -> vector<8x64xf32>
    %c0_517 = arith.constant 0 : index
    %c0_518 = arith.constant 0 : index
    %1084 = vector.load %arg12[%c0_517, %c0_518] : memref<128x64xf32, #tpu.memory_space<vmem>>, vector<128x64xf32>
    %1085 = vector.extract_strided_slice %1084 {offsets = [0, 0], sizes = [64, 64], strides = [1, 1]} : vector<128x64xf32> to vector<64x64xf32>
    %cst_519 = arith.constant dense<0.000000e+00> : vector<8x64xf32>
    %1086 = tpu.matmul %1081, %1085, %cst_519 {dimension_numbers = #tpu.dot_dimension_numbers<[1], [0], [0], [1], [0, 0, 1, 1], [], []>} : vector<8x64xf32>, vector<64x64xf32>, vector<8x64xf32> -> vector<8x64xf32>
    %1087 = vector.extract_strided_slice %1084 {offsets = [64, 0], sizes = [64, 64], strides = [1, 1]} : vector<128x64xf32> to vector<64x64xf32>
    %cst_520 = arith.constant dense<0.000000e+00> : vector<8x64xf32>
    %1088 = tpu.matmul %1083, %1087, %cst_520 {dimension_numbers = #tpu.dot_dimension_numbers<[1], [0], [0], [1], [0, 0, 1, 1], [], []>} : vector<8x64xf32>, vector<64x64xf32>, vector<8x64xf32> -> vector<8x64xf32>
    %1089 = arith.addf %1086, %1088 : vector<8x64xf32>
    %c0_521 = arith.constant 0 : index
    %c0_522 = arith.constant 0 : index
    %1090 = vector.load %arg13[%c0_521, %c0_522] : memref<1x64xf32, #tpu.memory_space<vmem>>, vector<1x64xf32>
    %1091 = vector.broadcast %1090 : vector<1x64xf32> to vector<8x64xf32>
    %1092 = arith.addf %1089, %1091 : vector<8x64xf32>
    %cst_523 = arith.constant 0.000000e+00 : f32
    %1093 = vector.broadcast %cst_523 : f32 to vector<8x64xf32>
    %1094 = arith.cmpf oge, %1092, %1093 : vector<8x64xf32>
    %cst_524 = arith.constant 0.00999999977 : f32
    %1095 = vector.broadcast %cst_524 : f32 to vector<8x64xf32>
    %1096 = arith.mulf %1095, %1092 : vector<8x64xf32>
    %1097 = arith.select %1094, %1092, %1096 : vector<8x64xi1>, vector<8x64xf32>
    %c0_525 = arith.constant 0 : index
    %c0_526 = arith.constant 0 : index
    %1098 = vector.load %arg14[%c0_525, %c0_526] : memref<64x64xf32, #tpu.memory_space<vmem>>, vector<64x64xf32>
    %cst_527 = arith.constant dense<0.000000e+00> : vector<8x64xf32>
    %1099 = tpu.matmul %1097, %1098, %cst_527 {dimension_numbers = #tpu.dot_dimension_numbers<[1], [0], [0], [1], [0, 0, 1, 1], [], []>} : vector<8x64xf32>, vector<64x64xf32>, vector<8x64xf32> -> vector<8x64xf32>
    %c0_528 = arith.constant 0 : index
    %c0_529 = arith.constant 0 : index
    %1100 = vector.load %arg15[%c0_528, %c0_529] : memref<1x64xf32, #tpu.memory_space<vmem>>, vector<1x64xf32>
    %1101 = vector.broadcast %1100 : vector<1x64xf32> to vector<8x64xf32>
    %1102 = arith.addf %1099, %1101 : vector<8x64xf32>
    %cst_530 = arith.constant 0.000000e+00 : f32
    %1103 = vector.broadcast %cst_530 : f32 to vector<8x64xf32>
    %1104 = arith.cmpf oge, %1102, %1103 : vector<8x64xf32>
    %cst_531 = arith.constant 0.00999999977 : f32
    %1105 = vector.broadcast %cst_531 : f32 to vector<8x64xf32>
    %1106 = arith.mulf %1105, %1102 : vector<8x64xf32>
    %1107 = arith.select %1104, %1102, %1106 : vector<8x64xi1>, vector<8x64xf32>
    %c0_532 = arith.constant 0 : index
    %c0_533 = arith.constant 0 : index
    %1108 = vector.load %arg16[%c0_532, %c0_533] : memref<64x128xf32, #tpu.memory_space<vmem>>, vector<64x128xf32>
    %cst_534 = arith.constant dense<0.000000e+00> : vector<8x128xf32>
    %1109 = tpu.matmul %1107, %1108, %cst_534 {dimension_numbers = #tpu.dot_dimension_numbers<[1], [0], [0], [1], [0, 0, 1, 1], [], []>} : vector<8x64xf32>, vector<64x128xf32>, vector<8x128xf32> -> vector<8x128xf32>
    %c0_535 = arith.constant 0 : index
    %c0_536 = arith.constant 0 : index
    %1110 = vector.load %arg17[%c0_535, %c0_536] : memref<1x128xf32, #tpu.memory_space<vmem>>, vector<1x128xf32>
    %1111 = vector.broadcast %1110 : vector<1x128xf32> to vector<8x128xf32>
    %1112 = arith.addf %1109, %1111 : vector<8x128xf32>
    %c0_537 = arith.constant 0 : index
    %c0_538 = arith.constant 0 : index
    %1113 = vector.load %arg24[%c0_537, %c0_538] : memref<8x128xf32, #tpu.memory_space<vmem>>, vector<8x128xf32>
    tpu.vector_store %arg24[%c0_537, %c0_538], %1112 {strides = array<i32>} : memref<8x128xf32, #tpu.memory_space<vmem>>, vector<8x128xf32>,
    %c0_539 = arith.constant 0 : index
    %c0_540 = arith.constant 0 : index
    %1114 = vector.load %arg18[%c0_539, %c0_540] : memref<64x64xf32, #tpu.memory_space<vmem>>, vector<64x64xf32>
    %cst_541 = arith.constant dense<0.000000e+00> : vector<2x64xf32>
    %1115 = tpu.matmul %1079, %1114, %cst_541 {dimension_numbers = #tpu.dot_dimension_numbers<[1], [0], [0], [1], [0, 0, 1, 1], [], []>} : vector<2x64xf32>, vector<64x64xf32>, vector<2x64xf32> -> vector<2x64xf32>
    %c0_542 = arith.constant 0 : index
    %c0_543 = arith.constant 0 : index
    %1116 = vector.load %arg19[%c0_542, %c0_543] : memref<1x64xf32, #tpu.memory_space<vmem>>, vector<1x64xf32>
    %1117 = vector.broadcast %1116 : vector<1x64xf32> to vector<2x64xf32>
    %1118 = arith.addf %1115, %1117 : vector<2x64xf32>
    %cst_544 = arith.constant 0.000000e+00 : f32
    %1119 = vector.broadcast %cst_544 : f32 to vector<2x64xf32>
    %1120 = arith.cmpf oge, %1118, %1119 : vector<2x64xf32>
    %cst_545 = arith.constant 0.00999999977 : f32
    %1121 = vector.broadcast %cst_545 : f32 to vector<2x64xf32>
    %1122 = arith.mulf %1121, %1118 : vector<2x64xf32>
    %1123 = arith.select %1120, %1118, %1122 : vector<2x64xi1>, vector<2x64xf32>
    %c0_546 = arith.constant 0 : index
    %c0_547 = arith.constant 0 : index
    %1124 = vector.load %arg20[%c0_546, %c0_547] : memref<64x64xf32, #tpu.memory_space<vmem>>, vector<64x64xf32>
    %cst_548 = arith.constant dense<0.000000e+00> : vector<2x64xf32>
    %1125 = tpu.matmul %1123, %1124, %cst_548 {dimension_numbers = #tpu.dot_dimension_numbers<[1], [0], [0], [1], [0, 0, 1, 1], [], []>} : vector<2x64xf32>, vector<64x64xf32>, vector<2x64xf32> -> vector<2x64xf32>
    %c0_549 = arith.constant 0 : index
    %c0_550 = arith.constant 0 : index
    %1126 = vector.load %arg21[%c0_549, %c0_550] : memref<1x64xf32, #tpu.memory_space<vmem>>, vector<1x64xf32>
    %1127 = vector.broadcast %1126 : vector<1x64xf32> to vector<2x64xf32>
    %1128 = arith.addf %1125, %1127 : vector<2x64xf32>
    %cst_551 = arith.constant 0.000000e+00 : f32
    %1129 = vector.broadcast %cst_551 : f32 to vector<2x64xf32>
    %1130 = arith.cmpf oge, %1128, %1129 : vector<2x64xf32>
    %cst_552 = arith.constant 0.00999999977 : f32
    %1131 = vector.broadcast %cst_552 : f32 to vector<2x64xf32>
    %1132 = arith.mulf %1131, %1128 : vector<2x64xf32>
    %1133 = arith.select %1130, %1128, %1132 : vector<2x64xi1>, vector<2x64xf32>
    %c0_553 = arith.constant 0 : index
    %c0_554 = arith.constant 0 : index
    %1134 = vector.load %arg22[%c0_553, %c0_554] : memref<64x1xf32, #tpu.memory_space<vmem>>, vector<64x1xf32>
    %cst_555 = arith.constant dense<0.000000e+00> : vector<2x1xf32>
    %1135 = tpu.matmul %1133, %1134, %cst_555 {dimension_numbers = #tpu.dot_dimension_numbers<[1], [0], [0], [1], [0, 0, 1, 1], [], []>} : vector<2x64xf32>, vector<64x1xf32>, vector<2x1xf32> -> vector<2x1xf32>
    %c0_556 = arith.constant 0 : index
    %c0_557 = arith.constant 0 : index
    %1136 = vector.load %arg23[%c0_556, %c0_557] : memref<1x1xf32, #tpu.memory_space<vmem>>, vector<1x1xf32>
    %1137 = vector.broadcast %1136 : vector<1x1xf32> to vector<2x1xf32>
    %1138 = arith.addf %1135, %1137 : vector<2x1xf32>
    %c0_558 = arith.constant 0 : index
    %c0_559 = arith.constant 0 : index
    %1139 = vector.load %arg25[%c0_558, %c0_559] : memref<2x1xf32, #tpu.memory_space<vmem>>, vector<2x1xf32>
    tpu.vector_store %arg25[%c0_558, %c0_559], %1138 {strides = array<i32>} : memref<2x1xf32, #tpu.memory_space<vmem>>, vector<2x1xf32>,
    return
  }
}

</mosaic_0001>

<bundles_post_ra>
// kernel: tpu_custom_call.1
= control target key start
LH: loop header
LB: loop body
LE: loop exit
PB: predicated region body
PF: predicated region fallthrough
CT: control target
= control target key end

     0   :  { %s15289_s0 = inlined_call_operand.hbm [shape: f32[32,32], index: 0, kind: input, shape index: {}]   ;;  %s15290_s1 = inlined_call_operand.hbm [shape: f32[32,32], index: 1, kind: input, shape index: {}]   ;;  %s15291_s2 = inlined_call_operand.vmem [shape: f32[4,32,32], index: 2, kind: input, shape index: {}]   ;;  %s15292_s3 = inlined_call_operand.hbm [shape: f32[2,32], index: 3, kind: input, shape index: {}]   ;;  %s15293_s4 = inlined_call_operand.hbm [shape: f32[8,32], index: 4, kind: input, shape index: {}]   ;;  %s15294_s5 = inlined_call_operand.vmem [shape: f32[8,2], index: 5, kind: input, shape index: {}]   ;;  %s15295_s6 = inlined_call_operand.hbm [shape: f32[32,64], index: 6, kind: input, shape index: {}]   ;;  %s15296_s7 = inlined_call_operand.hbm [shape: f32[1,64], index: 7, kind: input, shape index: {}]   ;;  %s15297_s8 = inlined_call_operand.vmem [shape: bf16[64,256], index: 8, kind: input, shape index: {}]   ;;  %s15298_s9 = inlined_call_operand.hbm [shape: f32[1,256], index: 9, kind: input, shape index: {}]   ;;  %s15299_s10 = inlined_call_operand.vmem [shape: f32[4,64], index: 10, kind: input, shape index: {}]   ;;  %s15300_s11 = inlined_call_operand.vmem [shape: f32[64,4], index: 11, kind: input, shape index: {}]   ;;  %s15301_s12 = inlined_call_operand.vmem [shape: f32[128,64], index: 12, kind: input, shape index: {}]   ;;  %s15302_s13 = inlined_call_operand.hbm [shape: f32[1,64], index: 13, kind: input, shape index: {}]   ;;  %s15303_s14 = inlined_call_operand.vmem [shape: f32[64,64], index: 14, kind: input, shape index: {}]   ;;  %s15304_s15 = inlined_call_operand.vmem [shape: f32[1,64], index: 15, kind: input, shape index: {}]   ;;  %s15305_s16 = inlined_call_operand.vmem [shape: f32[64,128], index: 16, kind: input, shape index: {}]   ;;  %s15306_s17 = inlined_call_operand.vmem [shape: f32[1,128], index: 17, kind: input, shape index: {}]   ;;  %s15307_s18 = inlined_call_operand.hbm [shape: f32[64,64], index: 18, kind: input, shape index: {}]   ;;  %s15308_s19 = inlined_call_operand.vmem [shape: f32[1,64], index: 19, kind: input, shape index: {}]   ;;  %s15309_s20 = inlined_call_operand.hbm [shape: f32[64,64], index: 20, kind: input, shape index: {}]   ;;  %s15310_s21 = inlined_call_operand.vmem [shape: f32[1,64], index: 21, kind: input, shape index: {}]   ;;  %s15311_s22 = inlined_call_operand.vmem [shape: f32[64,1], index: 22, kind: input, shape index: {}]   ;;  %s15312_s23 = inlined_call_operand.<no memory space> [shape: f32[1,1], index: 23, kind: input, shape index: {}]   ;;  %s15313_s24 = inlined_call_operand.hbm [shape: f32[8,128], index: 24, kind: output, shape index: {0}]   ;;  %s15314_s25 = inlined_call_operand.vmem [shape: f32[2,1], index: 25, kind: output, shape index: {1}]  }
   0x1   :  { %15344 = sst [smem:[#allocation28_spill]] %s15289_s0  ;;  %v31_v0 = vstv %s15312_s23 }
   0x2   :  { %15345 = sst [smem:[#allocation29_spill]] %s15290_s1  ;;  %32 = vst [vmem:[#allocation2] sm:$0x1] %v31_v0 }
   0x3   :  { %15346 = sst [smem:[#allocation30_spill]] %s15291_s2 }
   0x4   :  { %15347 = sst [smem:[#allocation31_spill]] %s15292_s3 }
   0x5   :  { %15348 = sst [smem:[#allocation32_spill]] %s15293_s4 }
   0x6   :  { %15349 = sst [smem:[#allocation33_spill]] %s15294_s5 }
   0x7   :  { %15350 = sst [smem:[#allocation34_spill]] %s15295_s6 }
   0x8   :  { %15351 = sst [smem:[#allocation35_spill]] %s15296_s7 }
   0x9   :  { %15352 = sst [smem:[#allocation36_spill]] %s15297_s8 }
   0xa   :  { %15353 = sst [smem:[#allocation37_spill]] %s15298_s9 }
   0xb   :  { %15354 = sst [smem:[#allocation38_spill]] %s15314_s25 }
   0xc   :  { %33 = vsyncpa [#allocation4], 0 }
   0xd   :  { %34 = vsyncpa [#allocation7], 0 }
   0xe   :  { %35 = vsyncpa [#allocation10], 0 }
   0xf   :  { %36 = vsyncpa [#allocation13], 0 }
  0x10   :  { %37 = vsyncpa [#allocation16], 0 }
  0x11   :  { %38 = vsyncpa [#allocation19], 0 }
  0x12   :  { %39 = vsyncpa [#allocation5], 0  ;;  %s11555_s6 = smov [#allocation6]   ;;  %s11556_s7 = smov [#allocation9]  }
  0x13   :  { %s57_s30 = sshll.u32 %s11555_s6, 4  ;;  %s82_s3 = sshll.u32 %s11556_s7, 4  ;;  %s58_s30 = int_to_ptr.vmem [resolvable:$true] %s57_s30  ;;  %s83_s3 = int_to_ptr.vmem [resolvable:$true] %s82_s3 }
  0x14   :  { %s15355_s8 = sld [smem:[#allocation29_spill]] }
  0x1a   :  { %s11299_s27 = scalar_lea.hbm %s15355_s8, 512 }
  0x1b   :  { %p11300_p0 = scmp.ne.s32.totalorder %s15355_s8, %s11299_s27  ;;  %p11303_p1 = scmp.lt.u32.totalorder %s11299_s27, %s15355_s8 }
  0x1d   :  { %p11305_p2 = pnand %p11303_p1, %p11300_p0 }
  0x1f   :  { %11308 = shalt.err (!%p11305_p2)
}
  0x20   :  { %s11309_s5 = scalar_lea.vmem %s58_s30, 512  ;;  %p11314_p4 = scmp.lt.s32.totalorder %s58_s30, %s58_s30 }
  0x21   :  { %p11310_p3 = scmp.ne.s32.totalorder %s58_s30, %s11309_s5  ;;  %p11315_p5 = scmp.lt.s32.totalorder %s11309_s5, %s11309_s5 }
  0x23   :  { %p11316_p6 = por %p11315_p5, %p11314_p4 }
  0x25   :  { %p11317_p7 = pnand %p11316_p6, %p11310_p3 }
  0x27   :  { %11320 = shalt.err (!%p11317_p7)
}
  0x28   :  { %s15324_s0 = smov 128   ;;  %s15326_s29 = smov 8  }
  0x29   :  { %63 = dma.hbm_to_vmem [thread:$0]  %s15355_s8, 512, %s58_s30, [#allocation7], %s15324_s0, %s15324_s0, %s15326_s29  }
  0x2a   :  { %s15356_s1 = sld [smem:[#allocation32_spill]] }
  0x30   :  { %s11321_s27 = scalar_lea.hbm %s15356_s1, 128 }
  0x31   :  { %p11322_p8 = scmp.ne.s32.totalorder %s15356_s1, %s11321_s27  ;;  %p11325_p9 = scmp.lt.u32.totalorder %s11321_s27, %s15356_s1 }
  0x33   :  { %p11327_p10 = pnand %p11325_p9, %p11322_p8 }
  0x35   :  { %11330 = shalt.err (!%p11327_p10)
}
  0x36   :  { %s11331_s5 = scalar_lea.vmem %s83_s3, 128  ;;  %p11336_p12 = scmp.lt.s32.totalorder %s83_s3, %s83_s3 }
  0x37   :  { %p11332_p11 = scmp.ne.s32.totalorder %s83_s3, %s11331_s5  ;;  %p11337_p13 = scmp.lt.s32.totalorder %s11331_s5, %s11331_s5 }
  0x39   :  { %p11338_p0 = por %p11337_p13, %p11336_p12 }
  0x3b   :  { %p11339_p1 = pnand %p11338_p0, %p11332_p11 }
  0x3d   :  { %11342 = shalt.err (!%p11339_p1)
}
  0x3e   :  { %85 = dma.hbm_to_vmem [thread:$0]  %s15356_s1, 128, %s83_s3, [#allocation10]  }
  0x3f   :  { %s11559_s2 = smov [#allocation12]   ;;  %s11560_s7 = smov [#allocation15]  }
  0x40   :  { %s106_s6 = sshll.u32 %s11559_s2, 4  ;;  %s134_s26 = sshll.u32 %s11560_s7, 4  ;;  %s107_s6 = int_to_ptr.vmem [resolvable:$true] %s106_s6  ;;  %s135_s26 = int_to_ptr.vmem [resolvable:$true] %s134_s26 }
  0x41   :  { %s15357_s23 = sld [smem:[#allocation35_spill]] }
  0x47   :  { %s11343_s28 = scalar_lea.hbm %s15357_s23, 16 }
  0x48   :  { %p11344_p2 = scmp.ne.s32.totalorder %s15357_s23, %s11343_s28  ;;  %p11347_p3 = scmp.lt.u32.totalorder %s11343_s28, %s15357_s23 }
  0x4a   :  { %p11349_p4 = pnand %p11347_p3, %p11344_p2 }
  0x4c   :  { %11352 = shalt.err (!%p11349_p4)
}
  0x4d   :  { %s11353_s3 = scalar_lea.vmem %s107_s6, 16  ;;  %s11357_s1 = scalar_lea.vmem %s107_s6, 32 }
  0x4e   :  { %p11354_p5 = scmp.ne.s32.totalorder %s107_s6, %s11353_s3  ;;  %p11358_p6 = scmp.lt.s32.totalorder %s107_s6, %s107_s6 }
  0x4f   :  { %p11359_p7 = scmp.lt.s32.totalorder %s11357_s1, %s11353_s3 }
  0x51   :  { %p11360_p8 = por %p11359_p7, %p11358_p6 }
  0x53   :  { %p11361_p9 = pnand %p11360_p8, %p11354_p5 }
  0x55   :  { %11364 = shalt.err (!%p11361_p9)
}
  0x56   :  { %109 = dma.hbm_to_vmem [thread:$0]  %s15357_s23, 16, %s107_s6, [#allocation13]  }
  0x57   :  { %s11365_s7 = scalar_lea.hbm %s15302_s13, 16 }
  0x58   :  { %p11366_p10 = scmp.ne.s32.totalorder %s15302_s13, %s11365_s7  ;;  %p11369_p11 = scmp.lt.u32.totalorder %s11365_s7, %s15302_s13 }
  0x5a   :  { %p11371_p12 = pnand %p11369_p11, %p11366_p10 }
  0x5c   :  { %11374 = shalt.err (!%p11371_p12)
}
  0x5d   :  { %s11375_s9 = scalar_lea.vmem %s135_s26, 16  ;;  %s11379_s5 = scalar_lea.vmem %s135_s26, 32 }
  0x5e   :  { %p11376_p13 = scmp.ne.s32.totalorder %s135_s26, %s11375_s9  ;;  %p11380_p0 = scmp.lt.s32.totalorder %s135_s26, %s135_s26 }
  0x5f   :  { %p11381_p1 = scmp.lt.s32.totalorder %s11379_s5, %s11375_s9 }
  0x61   :  { %p11382_p2 = por %p11381_p1, %p11380_p0 }
  0x63   :  { %p11383_p3 = pnand %p11382_p2, %p11376_p13 }
  0x65   :  { %11386 = shalt.err (!%p11383_p3)
}
  0x66   :  { %137 = dma.hbm_to_vmem [thread:$0]  %s15302_s13, 16, %s135_s26, [#allocation16]  }
  0x67   :  { %s11561_s3 = smov [#allocation3]   ;;  %s11562_s30 = smov [#allocation8]  }
  0x68   :  { %s45_s1 = sshll.u32 %s11561_s3, 4  ;;  %s72_s8 = sshll.u32 %s11562_s30, 4  ;;  %s46_s1 = int_to_ptr.vmem [resolvable:$true] %s45_s1  ;;  %s73_s8 = int_to_ptr.vmem [resolvable:$true] %s72_s8 }
  0x69   :  { %s15358_s7 = sld [smem:[#allocation28_spill]] }
  0x6f   :  { %s11387_s29 = scalar_lea.hbm %s15358_s7, 512 }
  0x70   :  { %p11388_p4 = scmp.ne.s32.totalorder %s15358_s7, %s11387_s29  ;;  %p11391_p5 = scmp.lt.u32.totalorder %s11387_s29, %s15358_s7 }
  0x72   :  { %p11393_p6 = pnand %p11391_p5, %p11388_p4 }
  0x74   :  { %11396 = shalt.err (!%p11393_p6)
}
  0x75   :  { %s11397_s13 = scalar_lea.vmem %s46_s1, 512  ;;  %p11402_p8 = scmp.lt.s32.totalorder %s46_s1, %s46_s1 }
  0x76   :  { %p11398_p7 = scmp.ne.s32.totalorder %s46_s1, %s11397_s13  ;;  %p11403_p9 = scmp.lt.s32.totalorder %s11397_s13, %s11397_s13 }
  0x78   :  { %p11404_p10 = por %p11403_p9, %p11402_p8 }
  0x7a   :  { %p11405_p11 = pnand %p11404_p10, %p11398_p7 }
  0x7c   :  { %11408 = shalt.err (!%p11405_p11)
}
  0x7d   :  { %s15359_s26 = smov 8   ;;  %s15360_s5 = smov 128  }
  0x7e   :  { %51 = dma.hbm_to_vmem [thread:$0]  %s15358_s7, 512, %s46_s1, [#allocation4], %s15360_s5, %s15360_s5, %s15359_s26  }
  0x7f   :  { %s15361_s0 = sld [smem:[#allocation31_spill]] }
  0x85   :  { %s11409_s2 = scalar_lea.hbm %s15361_s0, 32 }
  0x86   :  { %p11410_p12 = scmp.ne.s32.totalorder %s15361_s0, %s11409_s2  ;;  %p11413_p13 = scmp.lt.u32.totalorder %s11409_s2, %s15361_s0 }
  0x88   :  { %p11415_p0 = pnand %p11413_p13, %p11410_p12 }
  0x8a   :  { %11418 = shalt.err (!%p11415_p0)
}
  0x8b   :  { %s11419_s9 = scalar_lea.vmem %s73_s8, 32  ;;  %p11424_p2 = scmp.lt.s32.totalorder %s73_s8, %s73_s8 }
  0x8c   :  { %p11420_p1 = scmp.ne.s32.totalorder %s73_s8, %s11419_s9  ;;  %p11425_p3 = scmp.lt.s32.totalorder %s11419_s9, %s11419_s9 }
  0x8e   :  { %p11426_p4 = por %p11425_p3, %p11424_p2 }
  0x90   :  { %p11427_p5 = pnand %p11426_p4, %p11420_p1 }
  0x92   :  { %11430 = shalt.err (!%p11427_p5)
}
  0x93   :  { %75 = dma.hbm_to_vmem [thread:$0]  %s15361_s0, 32, %s73_s8, [#allocation7]  }
  0x94   :  { %s11563_s13 = smov [#allocation11]   ;;  %s11564_s23 = smov [#allocation14]  }
  0x95   :  { %s93_s6 = sshll.u32 %s11563_s13, 4  ;;  %s118_s3 = sshll.u32 %s11564_s23, 4  ;;  %s94_s6 = int_to_ptr.vmem [resolvable:$true] %s93_s6  ;;  %s119_s3 = int_to_ptr.vmem [resolvable:$true] %s118_s3 }
  0x96   :  { %s15362_s29 = sld [smem:[#allocation34_spill]] }
  0x9c   :  { %s11431_s27 = scalar_lea.hbm %s15362_s29, 512 }
  0x9d   :  { %p11432_p6 = scmp.ne.s32.totalorder %s15362_s29, %s11431_s27  ;;  %p11435_p7 = scmp.lt.u32.totalorder %s11431_s27, %s15362_s29 }
  0x9f   :  { %p11437_p8 = pnand %p11435_p7, %p11432_p6 }
  0xa1   :  { %11440 = shalt.err (!%p11437_p8)
}
  0xa2   :  { %s11441_s8 = scalar_lea.vmem %s94_s6, 512  ;;  %p11446_p10 = scmp.lt.s32.totalorder %s94_s6, %s94_s6 }
  0xa3   :  { %p11442_p9 = scmp.ne.s32.totalorder %s94_s6, %s11441_s8  ;;  %p11447_p11 = scmp.lt.s32.totalorder %s11441_s8, %s11441_s8 }
  0xa5   :  { %p11448_p12 = por %p11447_p11, %p11446_p10 }
  0xa7   :  { %p11449_p13 = pnand %p11448_p12, %p11442_p9 }
  0xa9   :  { %11452 = shalt.err (!%p11449_p13)
}
  0xaa   :  { %99 = dma.hbm_to_vmem [thread:$0]  %s15362_s29, 512, %s94_s6, [#allocation10], %s15360_s5, %s15360_s5, %s15359_s26  }
  0xab   :  { %s15363_s25 = sld [smem:[#allocation37_spill]] }
  0xb1   :  { %s11453_s23 = scalar_lea.hbm %s15363_s25, 32 }
  0xb2   :  { %p11454_p0 = scmp.ne.s32.totalorder %s15363_s25, %s11453_s23  ;;  %p11457_p1 = scmp.lt.u32.totalorder %s11453_s23, %s15363_s25 }
  0xb4   :  { %p11459_p2 = pnand %p11457_p1, %p11454_p0 }
  0xb6   :  { %11462 = shalt.err (!%p11459_p2)
}
  0xb7   :  { %s11463_s28 = scalar_lea.vmem %s119_s3, 32  ;;  %p11468_p4 = scmp.lt.s32.totalorder %s119_s3, %s119_s3 }
  0xb8   :  { %p11464_p3 = scmp.ne.s32.totalorder %s119_s3, %s11463_s28  ;;  %p11469_p5 = scmp.lt.s32.totalorder %s11463_s28, %s11463_s28 }
  0xba   :  { %p11470_p6 = por %p11469_p5, %p11468_p4 }
  0xbc   :  { %p11471_p7 = pnand %p11470_p6, %p11464_p3 }
  0xbe   :  { %11474 = shalt.err (!%p11471_p7)
}
  0xbf   :  { %121 = dma.hbm_to_vmem [thread:$0]  %s15363_s25, 32, %s119_s3, [#allocation13]  }
  0xc0   :  { %s11565_s9 = smov [#allocation17]   ;;  %s11566_s0 = smov [#allocation18]  }
  0xc1   :  { %s151_s8 = sshll.u32 %s11565_s9, 4  ;;  %s165_s1 = sshll.u32 %s11566_s0, 4  ;;  %s152_s8 = int_to_ptr.vmem [resolvable:$true] %s151_s8  ;;  %s11814_s1 = int_to_ptr.vmem [resolvable:$true] %s165_s1 }
  0xc2   :  { %s11475_s23 = scalar_lea.hbm %s15307_s18, 1024 }
  0xc3   :  { %p11476_p8 = scmp.ne.s32.totalorder %s15307_s18, %s11475_s23  ;;  %p11479_p9 = scmp.lt.u32.totalorder %s11475_s23, %s15307_s18 }
  0xc5   :  { %p11481_p10 = pnand %p11479_p9, %p11476_p8 }
  0xc7   :  { %11484 = shalt.err (!%p11481_p10)
}
  0xc8   :  { %s11485_s3 = scalar_lea.vmem %s152_s8, 1024  ;;  %p11490_p12 = scmp.lt.s32.totalorder %s152_s8, %s152_s8 }
  0xc9   :  { %p11486_p11 = scmp.ne.s32.totalorder %s152_s8, %s11485_s3  ;;  %p11491_p13 = scmp.lt.s32.totalorder %s11485_s3, %s11485_s3 }
  0xcb   :  { %p11492_p0 = por %p11491_p13, %p11490_p12 }
  0xcd   :  { %p11493_p1 = pnand %p11492_p0, %p11486_p11 }
  0xcf   :  { %11496 = shalt.err (!%p11493_p1)
}
  0xd0   :  { %157 = dma.hbm_to_vmem [thread:$0]  %s15307_s18, 1024, %s152_s8, [#allocation16], %s15360_s5, %s15360_s5, %s15359_s26  }
  0xd1   :  { %s11497_s9 = scalar_lea.hbm %s15309_s20, 1024 }
  0xd2   :  { %p11498_p2 = scmp.ne.s32.totalorder %s15309_s20, %s11497_s9  ;;  %p11501_p3 = scmp.lt.u32.totalorder %s11497_s9, %s15309_s20 }
  0xd4   :  { %p11503_p4 = pnand %p11501_p3, %p11498_p2 }
  0xd6   :  { %11506 = shalt.err (!%p11503_p4)
}
  0xd7   :  { %s11507_s30 = scalar_lea.vmem %s11814_s1, 1024  ;;  %p11512_p6 = scmp.lt.s32.totalorder %s11814_s1, %s11814_s1 }
  0xd8   :  { %p11508_p5 = scmp.ne.s32.totalorder %s11814_s1, %s11507_s30  ;;  %p11513_p7 = scmp.lt.s32.totalorder %s11507_s30, %s11507_s30 }
  0xda   :  { %p11514_p8 = por %p11513_p7, %p11512_p6 }
  0xdc   :  { %p11515_p9 = pnand %p11514_p8, %p11508_p5 }
  0xde   :  { %11518 = shalt.err (!%p11515_p9)
}
  0xdf   :  { %171 = dma.hbm_to_vmem [thread:$0]  %s15309_s20, 1024, %s11814_s1, [#allocation19], %s15360_s5, %s15360_s5, %s15359_s26  }
  0xe0   :  { %11541 = dma.done.wait [#allocation4], 512  }
  0xe1   :  { %11542 = vsyncadd [#allocation4], 4294966784 }
  0xe2   :  { %11543 = dma.done.wait [#allocation7], 544  }
  0xe3   :  { %11544 = vsyncadd [#allocation7], 4294966752 }
  0xe4   :  { %11545 = dma.done.wait [#allocation10], 640  }
  0xe5   :  { %11546 = vsyncadd [#allocation10], 4294966656 }
  0xe6   :  { %11547 = dma.done.wait [#allocation13], 48  }
  0xe7   :  { %11548 = vsyncadd [#allocation13], 4294967248 }
  0xe8   :  { %11549 = dma.done.wait [#allocation16], 1040  }
  0xe9   :  { %11550 = vsyncadd [#allocation16], 4294966256 }
  0xea   :  { %11551 = dma.done.wait [#allocation19], 1024  }
  0xeb   :  { %11552 = vsyncadd [#allocation19], 4294966272  ;;  %vm226_vm0 = vcmask 261120   ;;  %v251_v1 = vld [vmem:[#allocation11] sm:$0xff]  ;;  %v252_v2 = vld [vmem:[#allocation11 + $0x8] sm:$0xff]  ;;  %s15364_s5 = sld [smem:[#allocation36_spill]]  ;;  %v383_v52 = vlaneseq }
  0xec   :  { %v253_v3 = vld [vmem:[#allocation11 + $0x10] sm:$0xff]  ;;  %v10436_v4 = vpack.c.bf16 %v252_v2, %v251_v1  ;;  %v254_v5 = vld [vmem:[#allocation11 + $0x18] sm:$0xff]  ;;  %v211_v13 = vld [vmem:[#allocation3 + $0x10] sm:$0xff]  ;;  %v15336_v19 = vmov 0   ;;  %vm433_vm3 = vcmask 523264   ;;  %vm934_vm6 = vcmask 1043456  }
  0xed   :  { %v209_v6 = vld [vmem:[#allocation3] sm:$0xff]  ;;  %v10440_v7 = vpack.c.bf16 %v254_v5, %v253_v3  ;;  %v210_v12 = vld [vmem:[#allocation3 + $0x8] sm:$0xff]  ;;  %v212_v14 = vld [vmem:[#allocation3 + $0x18] sm:$0xff]  ;;  %472 = vmatprep.mubr.bf16.mxu1 %v15336_v19  ;;  %10777 = vset.pattern.permute.xlu1 %v15336_v19  ;;  %v384_v53 = vshrl.u32 %v383_v52, 7  ;;  %s15365_s18 = sld [smem:[#allocation30_spill]]  ;;  %vm906_vm15 = vcmask 7168  }
  0xee   :  { %9718 = vmatprep.mubr.msk.f32.mxu0 %vm226_vm0, %v209_v6  ;;  %10437 = vmatprep.subr.bf16.mxu0 %v10436_v4  ;;  %v218_v20 = vld [vmem:[%s15300_s11] sm:$0xff]  ;;  %v219_v21 = vld [vmem:[%s15300_s11 + $0x8] sm:$0xff]  ;;  %v220_v22 = vld [vmem:[%s15300_s11 + $0x10] sm:$0xff] }
  0xef   :  { %10439 = vmatpush3.bf16.msra.mxu0 %v10436_v4  ;;  %v11914_v23 = vpack.c.bf16 %v219_v21, %v218_v20  ;;  %v221_v24 = vld [vmem:[%s15300_s11 + $0x18] sm:$0xff]  ;;  %v222_v26 = vld [vmem:[%s15300_s11 + $0x20] sm:$0xff]  ;;  %v223_v27 = vld [vmem:[%s15300_s11 + $0x28] sm:$0xff]  ;;  %v385_v54 = vsub.s32 0, %v384_v53  ;;  %v389_v56 = vsub.s32 1, %v384_v53  ;;  %v15332_v20 = vmov 3  }
  0xf0   :  { %10441 = vmatprep.subr.bf16.mxu0 %v10440_v7  ;;  %v11919_v25 = vpack.c.bf16 %v221_v24, %v220_v22  ;;  %v11930_v28 = vpack.c.bf16 %v223_v27, %v222_v26  ;;  %v9105_v29 = vld [vmem:[#allocation12] ss:$0 sm:$0xff]  ;;  %v224_v48 = vld [vmem:[%s15300_s11 + $0x30] sm:$0xff]  ;;  %v225_v49 = vld [vmem:[%s15300_s11 + $0x38] sm:$0xff]  ;;  %s11568_s11 = smov 64   ;;  %10780 = vset.pattern.permute.xlu0 %v15332_v20 }
  0xf1   :  { %v11855_v8 = vld [vmem:[%s15364_s5 + $0x4] ss:$8 sps:$4 sm:$0xff]   ;;  %v11860_v9 = vld [vmem:[%s15364_s5] ss:$8 sps:$4 sm:$0xff]   ;;  %v11865_v10 = vld [vmem:[%s15364_s5 + $0x14] ss:$8 sps:$4 sm:$0xff]   ;;  %v11944_v50 = vpack.c.bf16 %v225_v49, %v224_v48 }
  0xf2   :  { %440 = vmatprep.subr.bf16.mxu1 %v11855_v8  ;;  %v11872_v11 = vld [vmem:[%s15364_s5 + $0x10] ss:$8 sps:$4 sm:$0xff]   ;;  %v11882_v15 = vld [vmem:[%s15364_s5 + $0x24] ss:$8 sps:$4 sm:$0xff]   ;;  %v11887_v16 = vld [vmem:[%s15364_s5 + $0x20] ss:$8 sps:$4 sm:$0xff]  }
  0xf3   :  { %441 = vmatpush1.bf16.msra.mxu1 %v11860_v9  ;;  %10443 = vmatpush3.bf16.msra.mxu0 %v10440_v7  ;;  %v11894_v17 = vld [vmem:[%s15364_s5 + $0x34] ss:$8 sps:$4 sm:$0xff]   ;;  %v11899_v18 = vld [vmem:[%s15364_s5 + $0x30] ss:$8 sps:$4 sm:$0xff]   ;;  %v11951_v51 = vld [vmem:[%s15299_s10] sm:$0xf] }
  0xf4   :  { %442 = vmatprep.subr.bf16.mxu1 %v11865_v10  ;;  %10445 = vmatprep.subr.bf16.mxu0 %v11914_v23  ;;  %v379_v55 = vld [vmem:[#allocation14] sm:$0x3]  ;;  %v12044_v49 = vld [vmem:[%s15365_s18] sm:$0xff] }
  0xf5   :  { %v11955_v57 = vrot.slane %v379_v55, %v385_v54  ;;  %v11957_v59 = vrot.slane %v379_v55, %v389_v56  ;;  %v12047_v54 = vld [vmem:[#allocation6 + $0x8] sm:$0xff]  ;;  %v12052_v55 = vld [vmem:[%s15365_s18 + $0x20] sm:$0xff] }
  0xf6   :  { %9719 = vmatmul.mubr.msk.f32.vlgmr.msra.gmra.mrb[0].mxu0 %vm226_vm0, %v210_v12  ;;  %vm779_vm7 = vcmp.gt.f32.partialorder %v12047_v54, 0.0 }
  0xf7   :  { %443 = vmatpush1.bf16.msra.mxu1 %v11872_v11  ;;  %9721 = vmatprep.mubr.msk.f32.mxu0 %vm226_vm0, %v211_v13 }
  0xf8   :  { %444 = vmatprep.subr.bf16.mxu1 %v11882_v15  ;;  %10447 = vmatpush3.bf16.msra.mxu0 %v11914_v23 }
  0xf9   :  { %10449 = vmatprep.subr.bf16.mxu0 %v11919_v25 }
  0xfa   :  { %9722 = vmatmul.mubr.msk.f32.gmra.mrb[2].mxu0 %vm226_vm0, %v212_v14 }
  0xfb   :  { %445 = vmatpush1.bf16.msra.mxu1 %v11887_v16 }
  0xfc   :  { %446 = vmatprep.subr.bf16.mxu1 %v11894_v17  ;;  %10451 = vmatpush3.bf16.msra.mxu0 %v11919_v25 }
  0xfd   :  { %10453 = vmatprep.subr.bf16.mxu0 %v11930_v28 }
  0xff   :  { %447 = vmatpush1.bf16.msra.mxu1 %v11899_v18 }
 0x100   :  { %10455 = vmatpush3.bf16.msra.mxu0 %v11930_v28 }
 0x101   :  { %10457 = vmatprep.subr.bf16.mxu0 %v11944_v50 }
 0x104   :  { %10459 = vmatpush3.bf16.msra.mxu0 %v11944_v50 }
 0x105   :  { %9754 = vmatprep.subr.msk.mxu0 %vm934_vm6, %v11951_v51 }
 0x1c9   :  { %v9720_v30 = vpop.f32.mrb[0].mxu0 }
 0x1ca   :  { %v346_v31 = vadd.f32 %v9720_v30, %v9105_v29  ;;  %v340_v32 = vpop.f32.mrb[1].mxu0  ;;  %v15330_v30 = vmov 1  }
 0x1cb   :  { %v341_v33 = vadd.f32 %v9105_v29, %v340_v32  ;;  %v12021_v32 = vld [vmem:[%s15365_s18 + $0x8] sm:$0xff] }
 0x1cc   :  { %vm360_vm1 = vcmp.ge.f32.partialorder %v346_v31, 0.0  ;;  %v364_v34 = vmul.f32 0.01, %v346_v31 }
 0x1cd   :  { %vm359_vm2 = vcmp.ge.f32.partialorder %v341_v33, 0.0  ;;  %v363_v35 = vmul.f32 0.01, %v341_v33  ;;  %v9723_v36 = vpop.f32.mrb[2].mxu0 }
 0x1ce   :  { %v368_v37 = vsel %vm360_vm1, %v346_v31, %v364_v34  ;;  %v356_v38 = vadd.f32 %v9723_v36, %v9105_v29  ;;  %v350_v39 = vpop.f32.mrb[3].mxu0  ;;  %v12026_v36 = vld [vmem:[%s15365_s18 + $0x28] sm:$0xff]  ;;  %vm911_vm1 = vcmask 15360  }
 0x1cf   :  { %v367_v40 = vsel %vm359_vm2, %v341_v33, %v363_v35  ;;  %v351_v41 = vadd.f32 %v9105_v29, %v350_v39  ;;  %vm916_vm2 = vcmask 23552  }
 0x1d0   :  { %v380_v42 = vpack.c.bf16 %v368_v37, %v367_v40  ;;  %vm362_vm4 = vcmp.ge.f32.partialorder %v356_v38, 0.0  ;;  %v366_v43 = vmul.f32 0.01, %v356_v38  ;;  %v12032_v40 = vld [vmem:[%s15365_s18 + $0x48] sm:$0xff] }
 0x1d1   :  { %vm361_vm5 = vcmp.ge.f32.partialorder %v351_v41, 0.0  ;;  %v365_v44 = vmul.f32 0.01, %v351_v41 }
 0x1d2   :  { %v370_v45 = vsel %vm362_vm4, %v356_v38, %v366_v43  ;;  %9118 = vmatmul.mubr.msk.bf16.vlgmr.msra.gmra.mrb[0].mxu1 %vm433_vm3, %v380_v42  ;;  %vm921_vm4 = vcmask 31744  }
 0x1d3   :  { %v369_v46 = vsel %vm361_vm5, %v351_v41, %v365_v44  ;;  %482 = vmatprep.mubr.bf16.mxu1 %v15336_v19 }
 0x1d4   :  { %v381_v47 = vpack.c.bf16 %v370_v45, %v369_v46  ;;  %v12038_v45 = vld [vmem:[%s15365_s18 + $0x68] sm:$0xff] }
 0x1da   :  { %9119 = vmatmul.mubr.msk.bf16.gmra.mrb[4].mxu1 %vm433_vm3, %v381_v47 }
 0x2a5   :  { %v474_v58 = vpop.f32.mrb[0].mxu1 }
 0x2a6   :  { %v475_v60 = vadd.f32 %v474_v58, %v11955_v57  ;;  %v476_v61 = vpop.f32.mrb[1].mxu1 }
 0x2a7   :  { %v478_v62 = vpop.f32.mrb[2].mxu1  ;;  %v11963_v1 = vadd.f32 %v476_v61, %v11957_v59  ;;  %v12058_v61 = vld [vmem:[%s15365_s18 + $0x40] sm:$0xff] }
 0x2a8   :  { %v479_v63 = vadd.f32 %v478_v62, %v11955_v57  ;;  %v480_v0 = vpop.f32.mrb[3].mxu1  ;;  %9740 = vmatprep.mubr.msk.f32.mxu0 %vm433_vm3, %v475_v60 }
 0x2a9   :  { %v11966_v2 = vadd.f32 %v480_v0, %v11957_v59 }
 0x2aa   :  { %9741 = vmatmul.mubr.msk.f32.vlgmr.msra.gmra.mrb[4].mxu0 %vm433_vm3, %v479_v63  ;;  %v493_v3 = vpack.c.bf16 %v479_v63, %v475_v60 }
 0x2ab   :  { %v11971_v4 = vpack.c.bf16 %v11966_v2, %v11963_v1  ;;  %9755 = vmatpush3.msk.msra.mxu0 %vm934_vm6, %v11951_v51 }
 0x2ac   :  { %622 = vrot.lane.b32.xlu0 %v493_v3, %s11568_s11  ;;  %9750 = vmatprep.mubr.msk.bf16.mxu1 %vm433_vm3, %v493_v3  ;;  %v12065_v3 = vld [vmem:[%s15365_s18 + $0x60] sm:$0xff] }
 0x2ad   :  { %v484_v5 = vpop.f32.mrb[4].mxu1  ;;  %9762 = vmatprep.subr.bf16.mxu0 %v11971_v4 }
 0x2ae   :  { %v485_v6 = vadd.f32 %v484_v5, %v11955_v57  ;;  %v11979_v7 = vpop.f32.mrb[5].mxu1 }
 0x2af   :  { %v488_v12 = vpop.f32.mrb[6].mxu1 }
 0x2b0   :  { %v489_v13 = vadd.f32 %v488_v12, %v11955_v57  ;;  %9743 = vmatprep.mubr.msk.f32.mxu0 %vm433_vm3, %v485_v6  ;;  %v11983_v14 = vpop.f32.mrb[7].mxu1 }
 0x2b2   :  { %v494_v21 = vpack.c.bf16 %v489_v13, %v485_v6  ;;  %9744 = vmatmul.mubr.msk.f32.gmra.mrb[6].mxu0 %vm433_vm3, %v489_v13 }
 0x2b4   :  { %624 = vrot.lane.b32.xlu0 %v494_v21, %s11568_s11 }
 0x31e   :  { %v623_v22 = vpop.permute.xlu0 %622 }
 0x31f   :  { %10732 = vmatprep.subr.msk.bf16.mxu1 %vm433_vm3, %v623_v22  ;;  %v633_v24 = vsel %vm433_vm3, %v623_v22, 0 }
 0x320   :  { %9747 = vmatpush3.bf16.xpose.msra.mxu1 %v633_v24 }
 0x326   :  { %v625_v26 = vpop.permute.xlu0 %624 }
 0x327   :  { %10733 = vmatprep.subr.msk.bf16.mxu1 %vm433_vm3, %v625_v26  ;;  %v636_v27 = vsel %vm433_vm3, %v625_v26, 0 }
 0x328   :  { %9749 = vmatpush3.bf16.xpose.msra.mxu1 %v636_v27  ;;  %v12072_v27 = vld [vmem:[#allocation6] sm:$0xff] }
 0x329   :  { %1118 = vmatprep.subr.bf16.mxu1 %v11855_v8  ;;  %vm778_vm8 = vcmp.gt.f32.partialorder %v12072_v27, 0.0 }
 0x32f   :  { %9751 = vmatmul.mubr.msk.bf16.vlgmr.msra.gmra.mrb[8].mxu1 %vm433_vm3, %v494_v21 }
 0x330   :  { %1119 = vmatpush1.bf16.msra.mxu1 %v11860_v9  ;;  %1150 = vmatprep.mubr.bf16.mxu1 %v15336_v19 }
 0x331   :  { %1120 = vmatprep.subr.bf16.mxu1 %v11865_v10 }
 0x334   :  { %1121 = vmatpush1.bf16.msra.mxu1 %v11872_v11  ;;  %v15334_v11 = vmov 2  }
 0x335   :  { %1122 = vmatprep.subr.bf16.mxu1 %v11882_v15 }
 0x338   :  { %1123 = vmatpush1.bf16.msra.mxu1 %v11887_v16 }
 0x339   :  { %1124 = vmatprep.subr.bf16.mxu1 %v11894_v17 }
 0x33c   :  { %1125 = vmatpush1.bf16.msra.mxu1 %v11899_v18 }
 0x37d   :  { %v9742_v29 = vpop.f32.mrb[4].mxu0 }
 0x37e   :  { %603 = vperm.xlu1 %10777, %v9742_v29   ;;  %v573_v8 = vpop.f32.mrb[5].mxu0  ;;  %755 = vperm.xlu0 %10780, %v9742_v29  }
 0x382   :  { %10778 = vset.pattern.permute.xlu1 %v15330_v30  ;;  %10782 = vset.pattern.permute.xlu0 %v15330_v30 }
 0x383   :  { %697 = vperm.xlu1 %10778, %v9742_v29   ;;  %693 = vperm.xlu0 %10782, %v573_v8  }
 0x385   :  { %v9745_v9 = vpop.f32.mrb[6].mxu0 }
 0x386   :  { %v583_v10 = vpop.f32.mrb[7].mxu0 }
 0x387   :  { %10779 = vset.pattern.permute.xlu1 %v15334_v11  ;;  %10783 = vset.pattern.permute.xlu0 %v15334_v11 }
 0x388   :  { %726 = vperm.xlu1 %10779, %v9742_v29   ;;  %722 = vperm.xlu0 %10783, %v573_v8  }
 0x38c   :  { %10781 = vset.pattern.permute.xlu1 %v15336_v19  ;;  %10789 = vset.pattern.permute.xlu0 %v15330_v30 }
 0x38d   :  { %598 = vperm.xlu1 %10781, %v573_v8   ;;  %701 = vperm.xlu0 %10789, %v583_v10  }
 0x391   :  { %10784 = vset.pattern.permute.xlu1 %v15332_v20  ;;  %10791 = vset.pattern.permute.xlu0 %v15332_v20 }
 0x392   :  { %751 = vperm.xlu1 %10784, %v573_v8   ;;  %759 = vperm.xlu0 %10791, %v583_v10  }
 0x396   :  { %10785 = vset.pattern.permute.xlu1 %v15336_v19  ;;  %10794 = vset.pattern.permute.xlu0 %v15330_v30 }
 0x397   :  { %613 = vperm.xlu1 %10785, %v9745_v9  }
 0x39b   :  { %10786 = vset.pattern.permute.xlu1 %v15330_v30 }
 0x39c   :  { %705 = vperm.xlu1 %10786, %v9745_v9  }
 0x3a0   :  { %10787 = vset.pattern.permute.xlu1 %v15334_v11 }
 0x3a1   :  { %734 = vperm.xlu1 %10787, %v9745_v9  }
 0x3a5   :  { %10788 = vset.pattern.permute.xlu1 %v15336_v19 }
 0x3a6   :  { %608 = vperm.xlu1 %10788, %v583_v10  }
 0x3aa   :  { %10790 = vset.pattern.permute.xlu1 %v15334_v11 }
 0x3ab   :  { %730 = vperm.xlu1 %10790, %v583_v10  }
 0x3af   :  { %10792 = vset.pattern.permute.xlu1 %v15332_v20 }
 0x3b0   :  { %763 = vperm.xlu1 %10792, %v9745_v9  }
 0x3b4   :  { %10793 = vset.pattern.permute.xlu1 %v15336_v19 }
 0x3fd   :  { %v604_v31 = vpop.permute.xlu1 %603  ;;  %v756_v33 = vpop.permute.xlu0 %755 }
 0x3fe   :  { %v617_v38 = vmul.f32 %v604_v31, %v12021_v32  ;;  %v767_v52 = vmul.f32 %v12038_v45, %v756_v33 }
 0x402   :  { %v698_v34 = vpop.permute.xlu1 %697  ;;  %v9752_v35 = vpop.f32.mrb[8].mxu1 }
 0x403   :  { %v672_v37 = vpop.f32.mrb[9].mxu1  ;;  %v709_v42 = vmul.f32 %v12026_v36, %v698_v34  ;;  %v694_v46 = vpop.permute.xlu0 %693 }
 0x404   :  { %v9753_v39 = vpop.f32.mrb[10].mxu1  ;;  %v708_v63 = vmul.f32 %v12052_v55, %v694_v46  ;;  %v12097_v46 = vld [vmem:[%s15365_s18 + $0x38] sm:$0xff] }
 0x405   :  { %v675_v41 = vpop.f32.mrb[11].mxu1 }
 0x406   :  { %v676_v43 = vadd.f32 %v675_v41, %v617_v38  ;;  %v12086_v41 = vld [vmem:[%s15365_s18 + $0x30] sm:$0xff] }
 0x407   :  { %v727_v44 = vpop.permute.xlu1 %726  ;;  %v723_v62 = vpop.permute.xlu0 %722 }
 0x408   :  { %v738_v47 = vmul.f32 %v12032_v40, %v727_v44  ;;  %v713_v48 = vadd.f32 %v709_v42, %v676_v43  ;;  %v737_v6 = vmul.f32 %v12058_v61, %v723_v62  ;;  %v12091_v42 = vld [vmem:[%s15365_s18 + $0x18] sm:$0xff] }
 0x40a   :  { %v742_v53 = vadd.f32 %v738_v47, %v713_v48 }
 0x40c   :  { %v599_v56 = vpop.permute.xlu1 %598  ;;  %v771_v60 = vadd.f32 %v767_v52, %v742_v53  ;;  %v702_v38 = vpop.permute.xlu0 %701  ;;  %v12104_v53 = vld [vmem:[%s15365_s18 + $0x50] sm:$0xff] }
 0x40d   :  { %v616_v58 = vmul.f32 %v599_v56, %v12044_v49  ;;  %v710_v47 = vmul.f32 %v12086_v41, %v702_v38  ;;  %v12109_v56 = vld [vmem:[%s15365_s18 + $0x58] sm:$0xff] }
 0x40e   :  { %v775_v5 = vmul.f32 0.125, %v771_v60 }
 0x40f   :  { %v673_v0 = vadd.f32 %v672_v37, %v616_v58  ;;  %v12081_v37 = vld [vmem:[%s15365_s18 + $0x10] sm:$0xff] }
 0x410   :  { %v783_v21 = vsel %vm779_vm7, %v775_v5, -1e+30  ;;  %v12114_v58 = vld [vmem:[%s15365_s18 + $0x70] sm:$0xff] }
 0x411   :  { %v712_v12 = vadd.f32 %v708_v63, %v673_v0  ;;  %v752_v13 = vpop.permute.xlu1 %751  ;;  %v789_v24 = vsel %vm226_vm0, %v783_v21, -inf  ;;  %v760_v60 = vpop.permute.xlu0 %759 }
 0x412   :  { %v766_v22 = vmul.f32 %v12065_v3, %v752_v13  ;;  %790 = vmax.xlane.f32.xlu1 %v789_v24  ;;  %v12125_v24 = vld [vmem:[#allocation6 + $0x10] sm:$0xff] }
 0x413   :  { %v741_v26 = vadd.f32 %v737_v6, %v712_v12  ;;  %v768_v12 = vmul.f32 %v12114_v58, %v760_v60  ;;  %vm780_vm9 = vcmp.gt.f32.partialorder %v12125_v24, 0.0 }
 0x415   :  { %v770_v29 = vadd.f32 %v766_v22, %v741_v26  ;;  %v12123_v22 = vld [vmem:[%s15365_s18 + $0x78] sm:$0xff] }
 0x416   :  { %v614_v8 = vpop.permute.xlu1 %613 }
 0x417   :  { %v774_v9 = vmul.f32 0.125, %v770_v29  ;;  %v619_v48 = vmul.f32 %v614_v8, %v12091_v42 }
 0x419   :  { %v782_v10 = vsel %vm778_vm8, %v774_v9, -1e+30  ;;  %v684_v5 = vadd.f32 %v9753_v39, %v619_v48  ;;  %v12129_v39 = vld [vmem:[#allocation6 + $0x18] sm:$0xff] }
 0x41a   :  { %v786_v31 = vsel %vm226_vm0, %v782_v10, -inf  ;;  %vm781_vm10 = vcmp.gt.f32.partialorder %v12129_v39, 0.0 }
 0x41b   :  { %v706_v33 = vpop.permute.xlu1 %705  ;;  %787 = vmax.xlane.f32.xlu0 %v786_v31 }
 0x41c   :  { %v711_v62 = vmul.f32 %v12097_v46, %v706_v33 }
 0x41e   :  { %v715_v26 = vadd.f32 %v711_v62, %v684_v5 }
 0x420   :  { %v735_v34 = vpop.permute.xlu1 %734 }
 0x421   :  { %v740_v6 = vmul.f32 %v12109_v56, %v735_v34 }
 0x423   :  { %v744_v9 = vadd.f32 %v740_v6, %v715_v26 }
 0x425   :  { %v609_v43 = vpop.permute.xlu1 %608 }
 0x426   :  { %v618_v44 = vmul.f32 %v609_v43, %v12081_v37 }
 0x428   :  { %v681_v52 = vadd.f32 %v9752_v35, %v618_v44 }
 0x42a   :  { %v731_v63 = vpop.permute.xlu1 %730  ;;  %v714_v35 = vadd.f32 %v710_v47, %v681_v52 }
 0x42b   :  { %v739_v0 = vmul.f32 %v12104_v53, %v731_v63 }
 0x42d   :  { %v743_v13 = vadd.f32 %v739_v0, %v714_v35 }
 0x42f   :  { %v764_v29 = vpop.permute.xlu1 %763  ;;  %v772_v8 = vadd.f32 %v768_v12, %v743_v13 }
 0x430   :  { %v769_v31 = vmul.f32 %v12123_v22, %v764_v29 }
 0x431   :  { %v776_v33 = vmul.f32 0.125, %v772_v8 }
 0x432   :  { %v773_v34 = vadd.f32 %v769_v31, %v744_v9 }
 0x433   :  { %v784_v38 = vsel %vm780_vm9, %v776_v33, -1e+30 }
 0x434   :  { %v792_v43 = vsel %vm226_vm0, %v784_v38, -inf  ;;  %v777_v44 = vmul.f32 0.125, %v773_v34  ;;  %v227_v34 = vsel %vm226_vm0, %v12072_v27, 0.0 }
 0x435   :  { %793 = vmax.xlane.f32.xlu0 %v792_v43 }
 0x436   :  { %v785_v47 = vsel %vm781_vm10, %v777_v44, -1e+30 }
 0x437   :  { %v795_v48 = vsel %vm226_vm0, %v785_v47, -inf }
 0x439   :  { %796 = vmax.xlane.f32.xlu0 %v795_v48  ;;  %v236_v48 = vsel %vm226_vm0, %v12129_v39, 0.0 }
 0x49f   :  { %v791_v52 = vpop.xlane.xlu1 %790 }
 0x4a0   :  { %v799_v60 = vsub.f32 %v783_v21, %v791_v52 }
 0x4a2   :  { %v804_v62 = vmul.f32 1.442695, %v799_v60 }
 0x4a4   :  { %10981 = vpow2.f32 %v804_v62 }
 0x4a8   :  { %v788_v63 = vpop.xlane.xlu0 %787 }
 0x4a9   :  { %v798_v35 = vsub.f32 %v782_v10, %v788_v63 }
 0x4ab   :  { %v802_v0 = vmul.f32 1.442695, %v798_v35 }
 0x4ad   :  { %10983 = vpow2.f32 %v802_v0 }
 0x4ae   :  { %v10982_v5 = vpop.eup %10981 }
 0x4af   :  { %v813_v6 = vsel %vm226_vm0, %v10982_v5, 0.0 }
 0x4b0   :  { %814 = vadd.xlane.f32.xlu0 %v813_v6 }
 0x4b7   :  { %v10984_v12 = vpop.eup %10983 }
 0x4b8   :  { %v810_v13 = vsel %vm226_vm0, %v10984_v12, 0.0 }
 0x4b9   :  { %811 = vadd.xlane.f32.xlu1 %v810_v13 }
 0x4c2   :  { %v794_v26 = vpop.xlane.xlu0 %793 }
 0x4c3   :  { %v800_v29 = vsub.f32 %v784_v38, %v794_v26  ;;  %v230_v38 = vsel %vm226_vm0, %v12047_v54, 0.0 }
 0x4c5   :  { %v806_v8 = vmul.f32 1.442695, %v800_v29 }
 0x4c6   :  { %v797_v9 = vpop.xlane.xlu0 %796 }
 0x4c7   :  { %10985 = vpow2.f32 %v806_v8  ;;  %v801_v21 = vsub.f32 %v785_v47, %v797_v9  ;;  %v233_v47 = vsel %vm226_vm0, %v12125_v24, 0.0 }
 0x4c9   :  { %v808_v31 = vmul.f32 1.442695, %v801_v21  ;;  %v15328_v21 = vmov 0.0  }
 0x4cb   :  { %10987 = vpow2.f32 %v808_v31 }
 0x4d1   :  { %v10986_v33 = vpop.eup %10985 }
 0x4d2   :  { %v816_v10 = vsel %vm226_vm0, %v10986_v33, 0.0 }
 0x4d3   :  { %817 = vadd.xlane.f32.xlu1 %v816_v10 }
 0x4d5   :  { %v10988_v43 = vpop.eup %10987 }
 0x4d6   :  { %v819_v44 = vsel %vm226_vm0, %v10988_v43, 0.0 }
 0x4d7   :  { %228 = vadd.xlane.f32.xlu1 %v227_v34  ;;  %820 = vadd.xlane.f32.xlu0 %v819_v44 }
 0x4db   :  { %231 = vadd.xlane.f32.xlu0 %v230_v38  ;;  %234 = vadd.xlane.f32.xlu1 %v233_v47 }
 0x4df   :  { %237 = vadd.xlane.f32.xlu0 %v236_v48 }
 0x53d   :  { %v815_v62 = vpop.xlane.xlu0 %814 }
 0x53e   :  { %v823_v63 = vmax.f32 %v815_v62, 1e-30 }
 0x546   :  { %v812_v52 = vpop.xlane.xlu1 %811 }
 0x547   :  { %v822_v60 = vmax.f32 %v812_v52, 1e-30 }
 0x549   :  { %10989 = vrcp.f32 %v822_v60 }
 0x54a   :  { %10991 = vrcp.f32 %v823_v63 }
 0x553   :  { %v10990_v6 = vpop.eup %10989 }
 0x554   :  { %v830_v29 = vmul.f32 %v10990_v6, %v10984_v12  ;;  %v10992_v9 = vpop.eup %10991 }
 0x555   :  { %v831_v44 = vmul.f32 %v10992_v9, %v10982_v5 }
 0x560   :  { %v818_v35 = vpop.xlane.xlu1 %817 }
 0x561   :  { %v824_v0 = vmax.f32 %v818_v35, 1e-30 }
 0x563   :  { %10993 = vrcp.f32 %v824_v0 }
 0x564   :  { %v229_v13 = vpop.xlane.xlu1 %228  ;;  %v821_v26 = vpop.xlane.xlu0 %820 }
 0x565   :  { %vm239_vm11 = vcmp.gt.f32.partialorder %v229_v13, 0.0  ;;  %v825_v8 = vmax.f32 %v821_v26, 1e-30 }
 0x566   :  { %v12151_v31 = vsel %vm239_vm11, 1.0, %v15328_v21 }
 0x567   :  { %10995 = vrcp.f32 %v825_v8  ;;  %v12154_v10 = vmul.f32 %v12151_v31, %v830_v29 }
 0x568   :  { %v232_v34 = vpop.xlane.xlu0 %231  ;;  %v235_v60 = vpop.xlane.xlu1 %234 }
 0x569   :  { %vm240_vm12 = vcmp.gt.f32.partialorder %v232_v34, 0.0  ;;  %v842_v38 = vmul.f32 %v12154_v10, %v12044_v49  ;;  %v858_v12 = vmul.f32 %v12052_v55, %v12154_v10  ;;  %v874_v62 = vmul.f32 %v12058_v61, %v12154_v10 }
 0x56a   :  { %v12161_v47 = vsel %vm240_vm12, 1.0, %v15328_v21  ;;  %vm241_vm13 = vcmp.gt.f32.partialorder %v235_v60, 0.0  ;;  %v890_v29 = vmul.f32 %v12065_v3, %v12154_v10 }
 0x56b   :  { %v846_v48 = vsel %vm226_vm0, %v842_v38, 0.0  ;;  %v862_v52 = vsel %vm226_vm0, %v858_v12, 0.0  ;;  %v12168_v5 = vmul.f32 %v12161_v47, %v831_v44  ;;  %v878_v13 = vsel %vm226_vm0, %v874_v62, 0.0 }
 0x56c   :  { %847 = vadd.xlane.f32.xlu1 %v846_v48  ;;  %863 = vadd.xlane.f32.xlu0 %v862_v52  ;;  %v238_v63 = vpop.xlane.xlu0 %237  ;;  %v12184_v12 = vsel %vm241_vm13, 1.0, %v15328_v21  ;;  %v894_v52 = vsel %vm226_vm0, %v890_v29, 0.0 }
 0x56d   :  { %v859_v35 = vmul.f32 %v12026_v36, %v12168_v5  ;;  %v10994_v0 = vpop.eup %10993  ;;  %vm242_vm14 = vcmp.gt.f32.partialorder %v238_v63, 0.0  ;;  %v838_v6 = vpack.c.bf16 %v12168_v5, %v12154_v10  ;;  %v875_v8 = vmul.f32 %v12032_v40, %v12168_v5 }
 0x56e   :  { %v832_v34 = vmul.f32 %v10994_v0, %v10986_v33  ;;  %v12181_v44 = vsel %vm242_vm14, 1.0, %v15328_v21  ;;  %v891_v48 = vmul.f32 %v12038_v45, %v12168_v5  ;;  %v843_v62 = vmul.f32 %v12168_v5, %v12021_v32 }
 0x56f   :  { %v865_v26 = vsel %vm226_vm0, %v859_v35, 0.0  ;;  %v881_v60 = vsel %vm226_vm0, %v875_v8, 0.0 }
 0x570   :  { %879 = vadd.xlane.f32.xlu1 %v878_v13  ;;  %866 = vadd.xlane.f32.xlu0 %v865_v26  ;;  %v897_v63 = vsel %vm226_vm0, %v891_v48, 0.0  ;;  %v849_v35 = vsel %vm226_vm0, %v843_v62, 0.0 }
 0x571   :  { %v10996_v9 = vpop.eup %10995 }
 0x572   :  { %v833_v38 = vmul.f32 %v10996_v9, %v10988_v43  ;;  %v12196_v43 = vmul.f32 %v12184_v12, %v832_v34 }
 0x574   :  { %895 = vadd.xlane.f32.xlu1 %v894_v52  ;;  %882 = vadd.xlane.f32.xlu0 %v881_v60  ;;  %v12193_v33 = vmul.f32 %v12181_v44, %v833_v38  ;;  %v844_v34 = vmul.f32 %v12196_v43, %v12081_v37  ;;  %v860_v52 = vmul.f32 %v12086_v41, %v12196_v43 }
 0x575   :  { %v876_v60 = vmul.f32 %v12104_v53, %v12196_v43 }
 0x576   :  { %v861_v0 = vmul.f32 %v12097_v46, %v12193_v33  ;;  %v845_v13 = vmul.f32 %v12193_v33, %v12091_v42  ;;  %v839_v26 = vpack.c.bf16 %v12193_v33, %v12196_v43  ;;  %v877_v9 = vmul.f32 %v12109_v56, %v12193_v33 }
 0x577   :  { %v852_v48 = vsel %vm226_vm0, %v844_v34, 0.0  ;;  %v868_v62 = vsel %vm226_vm0, %v860_v52, 0.0 }
 0x578   :  { %898 = vadd.xlane.f32.xlu0 %v897_v63  ;;  %850 = vadd.xlane.f32.xlu1 %v849_v35  ;;  %v871_v29 = vsel %vm226_vm0, %v861_v0, 0.0  ;;  %v855_v8 = vsel %vm226_vm0, %v845_v13, 0.0  ;;  %v887_v38 = vsel %vm226_vm0, %v877_v9, 0.0  ;;  %v884_v63 = vsel %vm226_vm0, %v876_v60, 0.0 }
 0x579   :  { %v893_v35 = vmul.f32 %v12123_v22, %v12193_v33  ;;  %v892_v0 = vmul.f32 %v12114_v58, %v12196_v43  ;;  %v491_v9 = vadd.f32 %v11983_v14, %v11957_v59 }
 0x57b   :  { %v903_v13 = vsel %vm226_vm0, %v893_v35, 0.0 }
 0x57c   :  { %872 = vadd.xlane.f32.xlu0 %v871_v29  ;;  %856 = vadd.xlane.f32.xlu1 %v855_v8  ;;  %v900_v29 = vsel %vm226_vm0, %v892_v0, 0.0  ;;  %v487_v8 = vadd.f32 %v11979_v7, %v11957_v59 }
 0x580   :  { %888 = vadd.xlane.f32.xlu0 %v887_v38  ;;  %853 = vadd.xlane.f32.xlu1 %v852_v48 }
 0x584   :  { %869 = vadd.xlane.f32.xlu0 %v868_v62  ;;  %885 = vadd.xlane.f32.xlu1 %v884_v63 }
 0x588   :  { %904 = vadd.xlane.f32.xlu0 %v903_v13  ;;  %901 = vadd.xlane.f32.xlu1 %v900_v29  ;;  %v841_v29 = vpack.c.bf16 %v491_v9, %v487_v8 }
 0x599   :  { %1082 = vrot.lane.b32.xlu1 %v11963_v1, %s11568_s11 }
 0x59d   :  { %1086 = vrot.lane.b32.xlu1 %v487_v8, %s11568_s11 }
 0x59e   :  { %1084 = vrot.lane.b32.xlu0 %v11966_v2, %s11568_s11 }
 0x5a1   :  { %1088 = vrot.lane.b32.xlu1 %v491_v9, %s11568_s11 }
 0x5f9   :  { %v848_v34 = vpop.xlane.xlu1 %847  ;;  %v864_v38 = vpop.xlane.xlu0 %863 }
 0x5fa   :  { %v907_v1 = vsel %vm906_vm15, %v848_v34, %v864_v38 }
 0x5fd   :  { %v880_v48 = vpop.xlane.xlu1 %879  ;;  %v867_v52 = vpop.xlane.xlu0 %866 }
 0x5fe   :  { %v912_v7 = vsel %vm911_vm1, %v907_v1, %v880_v48 }
 0x601   :  { %v896_v60 = vpop.xlane.xlu1 %895  ;;  %v883_v62 = vpop.xlane.xlu0 %882 }
 0x602   :  { %v917_v2 = vsel %vm916_vm2, %v912_v7, %v896_v60 }
 0x603   :  { %9756 = vmatprep.mubr.msk.f32.mxu0 %vm921_vm4, %v917_v2 }
 0x605   :  { %v851_v14 = vpop.xlane.xlu1 %850  ;;  %v899_v63 = vpop.xlane.xlu0 %898 }
 0x606   :  { %v908_v35 = vsel %vm906_vm15, %v851_v14, %v867_v52 }
 0x607   :  { %v913_v0 = vsel %vm911_vm1, %v908_v35, %v883_v62 }
 0x608   :  { %v918_v13 = vsel %vm916_vm2, %v913_v0, %v899_v63 }
 0x609   :  { %v857_v21 = vpop.xlane.xlu1 %856  ;;  %9757 = vmatmul.mubr.msk.f32.vlgmr.msra.gmra.mrb[8].mxu0 %vm921_vm4, %v918_v13  ;;  %v873_v34 = vpop.xlane.xlu0 %872 }
 0x60a   :  { %9763 = vmatpush3.bf16.msra.mxu0 %v11971_v4  ;;  %v910_v60 = vsel %vm906_vm15, %v857_v21, %v873_v34 }
 0x60b   :  { %9764 = vmatprep.subr.bf16.mxu0 %v841_v29 }
 0x60d   :  { %v854_v38 = vpop.xlane.xlu1 %853  ;;  %v889_v48 = vpop.xlane.xlu0 %888 }
 0x60e   :  { %9765 = vmatpush3.bf16.msra.mxu0 %v841_v29  ;;  %v915_v8 = vsel %vm911_vm1, %v910_v60, %v889_v48 }
 0x60f   :  { %10461 = vmatprep.subr.bf16.mxu0 %v11914_v23 }
 0x611   :  { %v886_v1 = vpop.xlane.xlu1 %885  ;;  %v870_v7 = vpop.xlane.xlu0 %869 }
 0x612   :  { %v909_v52 = vsel %vm906_vm15, %v854_v38, %v870_v7 }
 0x613   :  { %v914_v62 = vsel %vm911_vm1, %v909_v52, %v886_v1 }
 0x615   :  { %v902_v9 = vpop.xlane.xlu1 %901  ;;  %v905_v2 = vpop.xlane.xlu0 %904 }
 0x616   :  { %v919_v4 = vsel %vm916_vm2, %v914_v62, %v902_v9  ;;  %v920_v14 = vsel %vm916_vm2, %v915_v8, %v905_v2 }
 0x617   :  { %9759 = vmatprep.mubr.msk.f32.mxu0 %vm921_vm4, %v919_v4 }
 0x618   :  { %9760 = vmatmul.mubr.msk.f32.gmra.mrb[10].mxu0 %vm921_vm4, %v920_v14 }
 0x619   :  { %9766 = vmatprep.mubr.msk.bf16.mxu0 %vm226_vm0, %v838_v6  ;;  %v1083_v5 = vpop.permute.xlu1 %1082  ;;  %v1085_v52 = vpop.permute.xlu0 %1084 }
 0x61c   :  { %9767 = vmatmul.mubr.msk.bf16.vlgmr.msra.gmra.mrb[12].mxu0 %vm226_vm0, %v839_v26 }
 0x61d   :  { %10463 = vmatpush3.bf16.msra.mxu0 %v11914_v23  ;;  %v1087_v43 = vpop.permute.xlu1 %1086 }
 0x61e   :  { %10465 = vmatprep.subr.bf16.mxu0 %v11919_v25 }
 0x621   :  { %10467 = vmatpush3.bf16.msra.mxu0 %v11919_v25  ;;  %v1089_v48 = vpop.permute.xlu1 %1088 }
 0x622   :  { %10469 = vmatprep.subr.bf16.mxu0 %v11930_v28 }
 0x625   :  { %10471 = vmatpush3.bf16.msra.mxu0 %v11930_v28 }
 0x626   :  { %10473 = vmatprep.subr.bf16.mxu0 %v11944_v50 }
 0x629   :  { %10475 = vmatpush3.bf16.msra.mxu0 %v11944_v50 }
 0x62a   :  { %9800 = vmatprep.subr.msk.mxu0 %vm934_vm6, %v11951_v51 }
 0x6dc   :  { %v9758_v21 = vpop.f32.mrb[8].mxu0 }
 0x6dd   :  { %v1004_v10 = vpop.f32.mrb[9].mxu0 }
 0x6eb   :  { %v9761_v6 = vpop.f32.mrb[10].mxu0 }
 0x6ec   :  { %v1014_v33 = vpop.f32.mrb[11].mxu0 }
 0x6ef   :  { %v9768_v26 = vpop.f32.mrb[12].mxu0 }
 0x6f0   :  { %v1072_v63 = vadd.f32 %v9768_v26, %v1014_v33  ;;  %v1063_v35 = vpop.f32.mrb[13].mxu0 }
 0x6f1   :  { %v1064_v0 = vadd.f32 %v1063_v35, %v1004_v10  ;;  %v9769_v13 = vpop.f32.mrb[14].mxu0 }
 0x6f2   :  { %v1096_v29 = vadd.f32 %v1087_v43, %v1072_v63  ;;  %v1075_v34 = vadd.f32 %v9769_v13, %v9761_v6  ;;  %v1066_v38 = vpop.f32.mrb[15].mxu0 }
 0x6f3   :  { %v1094_v1 = vadd.f32 %v1083_v5, %v1064_v0  ;;  %v1067_v7 = vadd.f32 %v9758_v21, %v1066_v38 }
 0x6f4   :  { %v1104_v60 = vmul.f32 0.01, %v1096_v29  ;;  %v1097_v8 = vadd.f32 %v1089_v48, %v1075_v34  ;;  %vm1100_vm5 = vcmp.ge.f32.partialorder %v1096_v29, 0.0 }
 0x6f5   :  { %v1102_v9 = vmul.f32 0.01, %v1094_v1  ;;  %v1095_v62 = vadd.f32 %v1085_v52, %v1067_v7  ;;  %vm1098_vm11 = vcmp.ge.f32.partialorder %v1094_v1, 0.0 }
 0x6f6   :  { %vm1101_vm12 = vcmp.ge.f32.partialorder %v1097_v8, 0.0  ;;  %v1105_v2 = vmul.f32 0.01, %v1097_v8  ;;  %v1108_v14 = vsel %vm1100_vm5, %v1096_v29, %v1104_v60 }
 0x6f7   :  { %vm1099_vm13 = vcmp.ge.f32.partialorder %v1095_v62, 0.0  ;;  %v1103_v4 = vmul.f32 0.01, %v1095_v62  ;;  %v1106_v33 = vsel %vm1098_vm11, %v1094_v1, %v1102_v9 }
 0x6f8   :  { %v1109_v10 = vsel %vm1101_vm12, %v1097_v8, %v1105_v2 }
 0x6f9   :  { %v1107_v43 = vsel %vm1099_vm13, %v1095_v62, %v1103_v4  ;;  %v1111_v6 = vpack.c.bf16 %v1109_v10, %v1108_v14  ;;  %v12309_v10 = vld [vmem:[%s15364_s5 + $0x4] ss:$8 sps:$4 sm:$0xff]  }
 0x6fa   :  { %v1110_v26 = vpack.c.bf16 %v1107_v43, %v1106_v33  ;;  %v12316_v33 = vld [vmem:[%s15364_s5] ss:$8 sps:$4 sm:$0xff]   ;;  %v12323_v43 = vld [vmem:[%s15364_s5 + $0x14] ss:$8 sps:$4 sm:$0xff]  }
 0x6fc   :  { %9145 = vmatmul.mubr.msk.bf16.vlgmr.msra.gmra.mrb[12].mxu1 %vm433_vm3, %v1110_v26 }
 0x6fd   :  { %1160 = vmatprep.mubr.bf16.mxu1 %v15336_v19 }
 0x704   :  { %9146 = vmatmul.mubr.msk.bf16.gmra.mrb[16].mxu1 %vm433_vm3, %v1111_v6  ;;  %v12329_v6 = vld [vmem:[%s15364_s5 + $0x10] ss:$8 sps:$4 sm:$0xff]  }
 0x7cf   :  { %v1152_v21 = vpop.f32.mrb[12].mxu1 }
 0x7d0   :  { %v1153_v5 = vadd.f32 %v1152_v21, %v11955_v57  ;;  %v1154_v63 = vpop.f32.mrb[13].mxu1 }
 0x7d1   :  { %v1156_v35 = vpop.f32.mrb[14].mxu1  ;;  %v12278_v29 = vadd.f32 %v1154_v63, %v11957_v59 }
 0x7d2   :  { %v1157_v0 = vadd.f32 %v1156_v35, %v11955_v57  ;;  %v1158_v13 = vpop.f32.mrb[15].mxu1  ;;  %9786 = vmatprep.mubr.msk.f32.mxu0 %vm433_vm3, %v1153_v5 }
 0x7d3   :  { %v12281_v34 = vadd.f32 %v1158_v13, %v11957_v59 }
 0x7d4   :  { %v1171_v38 = vpack.c.bf16 %v1157_v0, %v1153_v5  ;;  %9787 = vmatmul.mubr.msk.f32.vlgmr.msra.gmra.mrb[16].mxu0 %vm433_vm3, %v1157_v0 }
 0x7d5   :  { %v12286_v48 = vpack.c.bf16 %v12281_v34, %v12278_v29  ;;  %9801 = vmatpush3.msk.msra.mxu0 %vm934_vm6, %v11951_v51 }
 0x7d6   :  { %1296 = vrot.lane.b32.xlu0 %v1171_v38, %s11568_s11  ;;  %9796 = vmatprep.mubr.msk.bf16.mxu1 %vm433_vm3, %v1171_v38 }
 0x7d7   :  { %v1162_v1 = vpop.f32.mrb[16].mxu1  ;;  %9808 = vmatprep.subr.bf16.mxu0 %v12286_v48 }
 0x7d8   :  { %v1163_v7 = vadd.f32 %v1162_v1, %v11955_v57  ;;  %v12294_v52 = vpop.f32.mrb[17].mxu1 }
 0x7d9   :  { %v1166_v60 = vpop.f32.mrb[18].mxu1 }
 0x7da   :  { %v1167_v8 = vadd.f32 %v1166_v60, %v11955_v57  ;;  %v12297_v9 = vpop.f32.mrb[19].mxu1  ;;  %9789 = vmatprep.mubr.msk.f32.mxu0 %vm433_vm3, %v1163_v7 }
 0x7dc   :  { %v1172_v62 = vpack.c.bf16 %v1167_v8, %v1163_v7  ;;  %9790 = vmatmul.mubr.msk.f32.gmra.mrb[18].mxu0 %vm433_vm3, %v1167_v8 }
 0x7de   :  { %1298 = vrot.lane.b32.xlu1 %v1172_v62, %s11568_s11 }
 0x848   :  { %v1297_v51 = vpop.permute.xlu0 %1296 }
 0x849   :  { %10734 = vmatprep.subr.msk.bf16.mxu1 %vm433_vm3, %v1297_v51  ;;  %v1307_v2 = vsel %vm433_vm3, %v1297_v51, 0 }
 0x84a   :  { %9793 = vmatpush3.bf16.xpose.msra.mxu1 %v1307_v2 }
 0x850   :  { %v1299_v4 = vpop.permute.xlu1 %1298 }
 0x851   :  { %10735 = vmatprep.subr.msk.bf16.mxu1 %vm433_vm3, %v1299_v4  ;;  %v1310_v14 = vsel %vm433_vm3, %v1299_v4, 0 }
 0x852   :  { %9795 = vmatpush3.bf16.xpose.msra.mxu1 %v1310_v14 }
 0x853   :  { %1765 = vmatprep.subr.bf16.mxu1 %v12309_v10 }
 0x859   :  { %9797 = vmatmul.mubr.msk.bf16.vlgmr.msra.gmra.mrb[20].mxu1 %vm433_vm3, %v1172_v62 }
 0x85a   :  { %1766 = vmatpush1.bf16.msra.mxu1 %v12316_v33  ;;  %1797 = vmatprep.mubr.bf16.mxu1 %v15336_v19 }
 0x85b   :  { %1767 = vmatprep.subr.bf16.mxu1 %v12323_v43 }
 0x85e   :  { %1768 = vmatpush1.bf16.msra.mxu1 %v12329_v6 }
 0x85f   :  { %1769 = vmatprep.subr.bf16.mxu1 %v11882_v15 }
 0x862   :  { %1770 = vmatpush1.bf16.msra.mxu1 %v11887_v16 }
 0x863   :  { %1771 = vmatprep.subr.bf16.mxu1 %v11894_v17 }
 0x866   :  { %1772 = vmatpush1.bf16.msra.mxu1 %v11899_v18 }
 0x8a7   :  { %v9788_v26 = vpop.f32.mrb[16].mxu0 }
 0x8a8   :  { %1277 = vperm.xlu1 %10793, %v9788_v26   ;;  %v1251_v21 = vpop.f32.mrb[17].mxu0  ;;  %1366 = vperm.xlu0 %10794, %v9788_v26  }
 0x8ac   :  { %10795 = vset.pattern.permute.xlu1 %v15334_v11  ;;  %10797 = vset.pattern.permute.xlu0 %v15336_v19 }
 0x8ad   :  { %1390 = vperm.xlu1 %10795, %v9788_v26   ;;  %1272 = vperm.xlu0 %10797, %v1251_v21  }
 0x8af   :  { %v9791_v5 = vpop.f32.mrb[18].mxu0 }
 0x8b0   :  { %v1261_v63 = vpop.f32.mrb[19].mxu0 }
 0x8b1   :  { %10796 = vset.pattern.permute.xlu1 %v15332_v20  ;;  %10800 = vset.pattern.permute.xlu0 %v15332_v20 }
 0x8b2   :  { %1414 = vperm.xlu1 %10796, %v9788_v26   ;;  %1410 = vperm.xlu0 %10800, %v1251_v21  }
 0x8b6   :  { %10798 = vset.pattern.permute.xlu1 %v15330_v30  ;;  %10801 = vset.pattern.permute.xlu0 %v15336_v19 }
 0x8b7   :  { %1362 = vperm.xlu1 %10798, %v1251_v21   ;;  %1287 = vperm.xlu0 %10801, %v9791_v5  }
 0x8bb   :  { %10799 = vset.pattern.permute.xlu1 %v15334_v11  ;;  %10806 = vset.pattern.permute.xlu0 %v15334_v11 }
 0x8bc   :  { %1386 = vperm.xlu1 %10799, %v1251_v21   ;;  %1394 = vperm.xlu0 %10806, %v1261_v63  }
 0x8c0   :  { %10802 = vset.pattern.permute.xlu1 %v15330_v30  ;;  %10808 = vset.pattern.permute.xlu0 %v15332_v20 }
 0x8c1   :  { %1374 = vperm.xlu1 %10802, %v9791_v5   ;;  %1422 = vperm.xlu0 %10808, %v9791_v5  }
 0x8c5   :  { %10803 = vset.pattern.permute.xlu1 %v15334_v11  ;;  %10810 = vset.pattern.permute.xlu0 %v15330_v30 }
 0x8c6   :  { %1398 = vperm.xlu1 %10803, %v9791_v5  }
 0x8ca   :  { %10804 = vset.pattern.permute.xlu1 %v15336_v19 }
 0x8cb   :  { %1282 = vperm.xlu1 %10804, %v1261_v63  }
 0x8cf   :  { %10805 = vset.pattern.permute.xlu1 %v15330_v30 }
 0x8d0   :  { %1370 = vperm.xlu1 %10805, %v1261_v63  }
 0x8d4   :  { %10807 = vset.pattern.permute.xlu1 %v15332_v20 }
 0x8d5   :  { %1418 = vperm.xlu1 %10807, %v1261_v63  }
 0x8d9   :  { %10809 = vset.pattern.permute.xlu1 %v15336_v19 }
 0x927   :  { %v1278_v15 = vpop.permute.xlu1 %1277  ;;  %v1367_v16 = vpop.permute.xlu0 %1366 }
 0x928   :  { %v1291_v13 = vmul.f32 %v1278_v15, %v12021_v32  ;;  %v1378_v7 = vmul.f32 %v12026_v36, %v1367_v16 }
 0x92c   :  { %v1391_v17 = vpop.permute.xlu1 %1390  ;;  %v1273_v18 = vpop.permute.xlu0 %1272 }
 0x92d   :  { %v9798_v35 = vpop.f32.mrb[20].mxu1  ;;  %v1402_v62 = vmul.f32 %v12032_v40, %v1391_v17  ;;  %v1290_v26 = vmul.f32 %v1273_v18, %v12044_v49 }
 0x92e   :  { %v1346_v0 = vpop.f32.mrb[21].mxu1 }
 0x92f   :  { %v9799_v38 = vpop.f32.mrb[22].mxu1  ;;  %v1347_v30 = vadd.f32 %v1346_v0, %v1290_v26 }
 0x930   :  { %v1349_v1 = vpop.f32.mrb[23].mxu1 }
 0x931   :  { %v1350_v60 = vadd.f32 %v1349_v1, %v1291_v13  ;;  %v1415_v8 = vpop.permute.xlu1 %1414  ;;  %v1411_v2 = vpop.permute.xlu0 %1410 }
 0x932   :  { %v1426_v14 = vmul.f32 %v12038_v45, %v1415_v8 }
 0x933   :  { %v1382_v51 = vadd.f32 %v1378_v7, %v1350_v60  ;;  %v1425_v7 = vmul.f32 %v12065_v3, %v1411_v2 }
 0x935   :  { %v1406_v4 = vadd.f32 %v1402_v62, %v1382_v51 }
 0x936   :  { %v1363_v21 = vpop.permute.xlu1 %1362  ;;  %v1288_v32 = vpop.permute.xlu0 %1287 }
 0x937   :  { %v1430_v5 = vadd.f32 %v1426_v14, %v1406_v4  ;;  %v1377_v63 = vmul.f32 %v12052_v55, %v1363_v21  ;;  %v1293_v8 = vmul.f32 %v1288_v32, %v12091_v42 }
 0x939   :  { %v1434_v15 = vmul.f32 0.125, %v1430_v5  ;;  %v1381_v13 = vadd.f32 %v1377_v63, %v1347_v30  ;;  %v1358_v14 = vadd.f32 %v9799_v38, %v1293_v8 }
 0x93b   :  { %v1387_v20 = vpop.permute.xlu1 %1386  ;;  %v1438_v16 = vsel %vm779_vm7, %v1434_v15, -1e+30  ;;  %v1395_v60 = vpop.permute.xlu0 %1394 }
 0x93c   :  { %v1401_v17 = vmul.f32 %v12058_v61, %v1387_v20  ;;  %v1444_v1 = vsel %vm226_vm0, %v1438_v16, -inf }
 0x93d   :  { %1445 = vmax.xlane.f32.xlu0 %v1444_v1 }
 0x93e   :  { %v1405_v18 = vadd.f32 %v1401_v17, %v1381_v13 }
 0x940   :  { %v1375_v62 = vpop.permute.xlu1 %1374  ;;  %v1429_v51 = vadd.f32 %v1425_v7, %v1405_v18  ;;  %v1423_v26 = vpop.permute.xlu0 %1422 }
 0x941   :  { %v1380_v0 = vmul.f32 %v12097_v46, %v1375_v62  ;;  %v1428_v63 = vmul.f32 %v12123_v22, %v1423_v26 }
 0x942   :  { %v1433_v4 = vmul.f32 0.125, %v1429_v51  ;;  %v1403_v51 = vmul.f32 %v12104_v53, %v1395_v60 }
 0x943   :  { %v1384_v5 = vadd.f32 %v1380_v0, %v1358_v14 }
 0x944   :  { %v1437_v30 = vsel %vm778_vm8, %v1433_v4, -1e+30 }
 0x945   :  { %v1399_v20 = vpop.permute.xlu1 %1398  ;;  %v1441_v21 = vsel %vm226_vm0, %v1437_v30, -inf }
 0x946   :  { %v1404_v2 = vmul.f32 %v12109_v56, %v1399_v20  ;;  %1442 = vmax.xlane.f32.xlu1 %v1441_v21 }
 0x948   :  { %v1408_v32 = vadd.f32 %v1404_v2, %v1384_v5 }
 0x94a   :  { %v1283_v15 = vpop.permute.xlu1 %1282  ;;  %v1432_v13 = vadd.f32 %v1428_v63, %v1408_v32 }
 0x94b   :  { %v1292_v17 = vmul.f32 %v1283_v15, %v12081_v37 }
 0x94c   :  { %v1436_v1 = vmul.f32 0.125, %v1432_v13 }
 0x94d   :  { %v1355_v8 = vadd.f32 %v9798_v35, %v1292_v17 }
 0x94e   :  { %v1440_v38 = vsel %vm781_vm10, %v1436_v1, -1e+30 }
 0x94f   :  { %v1371_v7 = vpop.permute.xlu1 %1370  ;;  %v1450_v18 = vsel %vm226_vm0, %v1440_v38, -inf }
 0x950   :  { %v1379_v62 = vmul.f32 %v12086_v41, %v1371_v7  ;;  %1451 = vmax.xlane.f32.xlu0 %v1450_v18 }
 0x952   :  { %v1383_v0 = vadd.f32 %v1379_v62, %v1355_v8 }
 0x954   :  { %v1419_v4 = vpop.permute.xlu1 %1418  ;;  %v1407_v14 = vadd.f32 %v1403_v51, %v1383_v0 }
 0x955   :  { %v1427_v26 = vmul.f32 %v12114_v58, %v1419_v4 }
 0x957   :  { %v1431_v20 = vadd.f32 %v1427_v26, %v1407_v14 }
 0x959   :  { %v1435_v21 = vmul.f32 0.125, %v1431_v20 }
 0x95b   :  { %v1439_v5 = vsel %vm780_vm9, %v1435_v21, -1e+30 }
 0x95c   :  { %v1447_v2 = vsel %vm226_vm0, %v1439_v5, -inf }
 0x95d   :  { %1448 = vmax.xlane.f32.xlu1 %v1447_v2 }
 0x9ca   :  { %v1446_v63 = vpop.xlane.xlu0 %1445 }
 0x9cb   :  { %v1454_v35 = vsub.f32 %v1438_v16, %v1446_v63 }
 0x9cd   :  { %v1459_v32 = vmul.f32 1.442695, %v1454_v35 }
 0x9cf   :  { %10997 = vpow2.f32 %v1459_v32 }
 0x9d3   :  { %v1443_v15 = vpop.xlane.xlu1 %1442 }
 0x9d4   :  { %v1453_v13 = vsub.f32 %v1437_v30, %v1443_v15 }
 0x9d6   :  { %v1457_v60 = vmul.f32 1.442695, %v1453_v13 }
 0x9d8   :  { %10999 = vpow2.f32 %v1457_v60 }
 0x9d9   :  { %v10998_v17 = vpop.eup %10997 }
 0x9da   :  { %v1468_v1 = vsel %vm226_vm0, %v10998_v17, 0.0 }
 0x9db   :  { %1469 = vadd.xlane.f32.xlu0 %v1468_v1 }
 0x9dd   :  { %v1452_v7 = vpop.xlane.xlu0 %1451 }
 0x9de   :  { %v1456_v18 = vsub.f32 %v1440_v38, %v1452_v7 }
 0x9e0   :  { %v1463_v8 = vmul.f32 1.442695, %v1456_v18 }
 0x9e2   :  { %v11000_v62 = vpop.eup %10999  ;;  %11001 = vpow2.f32 %v1463_v8 }
 0x9e3   :  { %v1465_v51 = vsel %vm226_vm0, %v11000_v62, 0.0 }
 0x9e4   :  { %1466 = vadd.xlane.f32.xlu1 %v1465_v51 }
 0x9ea   :  { %v1449_v0 = vpop.xlane.xlu1 %1448 }
 0x9eb   :  { %v1455_v16 = vsub.f32 %v1439_v5, %v1449_v0 }
 0x9ec   :  { %v11002_v4 = vpop.eup %11001 }
 0x9ed   :  { %v1461_v14 = vmul.f32 1.442695, %v1455_v16  ;;  %v1474_v30 = vsel %vm226_vm0, %v11002_v4, 0.0 }
 0x9ee   :  { %1475 = vadd.xlane.f32.xlu0 %v1474_v30 }
 0x9ef   :  { %11003 = vpow2.f32 %v1461_v14 }
 0x9f9   :  { %v11004_v26 = vpop.eup %11003 }
 0x9fa   :  { %v1471_v20 = vsel %vm226_vm0, %v11004_v26, 0.0 }
 0x9fb   :  { %1472 = vadd.xlane.f32.xlu1 %v1471_v20 }
 0xa68   :  { %v1470_v21 = vpop.xlane.xlu0 %1469 }
 0xa69   :  { %v1478_v38 = vmax.f32 %v1470_v21, 1e-30 }
 0xa6b   :  { %11005 = vrcp.f32 %v1478_v38 }
 0xa71   :  { %v1467_v2 = vpop.xlane.xlu1 %1466 }
 0xa72   :  { %v1477_v63 = vmax.f32 %v1467_v2, 1e-30 }
 0xa74   :  { %11007 = vrcp.f32 %v1477_v63 }
 0xa75   :  { %v11006_v35 = vpop.eup %11005 }
 0xa76   :  { %v1486_v15 = vmul.f32 %v11006_v35, %v10998_v17 }
 0xa78   :  { %v12385_v1 = vmul.f32 %v12161_v47, %v1486_v15 }
 0xa7a   :  { %v1514_v51 = vmul.f32 %v12026_v36, %v12385_v1 }
 0xa7b   :  { %v1476_v32 = vpop.xlane.xlu0 %1475 }
 0xa7c   :  { %v1480_v5 = vmax.f32 %v1476_v32, 1e-30  ;;  %v1520_v30 = vsel %vm226_vm0, %v1514_v51, 0.0 }
 0xa7e   :  { %v11008_v13 = vpop.eup %11007  ;;  %11009 = vrcp.f32 %v1480_v5 }
 0xa7f   :  { %v1485_v60 = vmul.f32 %v11008_v13, %v11000_v62 }
 0xa81   :  { %v12388_v7 = vmul.f32 %v12151_v31, %v1485_v60 }
 0xa83   :  { %v1513_v18 = vmul.f32 %v12052_v55, %v12388_v7  ;;  %v1497_v8 = vmul.f32 %v12388_v7, %v12044_v49  ;;  %v1493_v17 = vpack.c.bf16 %v12385_v1, %v12388_v7  ;;  %v1529_v16 = vmul.f32 %v12058_v61, %v12388_v7 }
 0xa84   :  { %v1530_v49 = vmul.f32 %v12032_v40, %v12385_v1  ;;  %v1545_v38 = vmul.f32 %v12065_v3, %v12388_v7  ;;  %v1546_v61 = vmul.f32 %v12038_v45, %v12385_v1  ;;  %v12415_v40 = vld [vmem:[%s15365_s18 + $0x8] sm:$0xff] }
 0xa85   :  { %v1517_v62 = vsel %vm226_vm0, %v1513_v18, 0.0  ;;  %v1501_v0 = vsel %vm226_vm0, %v1497_v8, 0.0  ;;  %v1533_v21 = vsel %vm226_vm0, %v1529_v16, 0.0 }
 0xa86   :  { %1518 = vadd.xlane.f32.xlu0 %v1517_v62  ;;  %1502 = vadd.xlane.f32.xlu1 %v1501_v0  ;;  %v1536_v2 = vsel %vm226_vm0, %v1530_v49, 0.0  ;;  %v1549_v63 = vsel %vm226_vm0, %v1545_v38, 0.0  ;;  %v1552_v35 = vsel %vm226_vm0, %v1546_v61, 0.0 }
 0xa88   :  { %v11010_v14 = vpop.eup %11009  ;;  %v1473_v55 = vpop.xlane.xlu1 %1472 }
 0xa89   :  { %v1488_v36 = vmul.f32 %v11010_v14, %v11002_v4  ;;  %v1479_v20 = vmax.f32 %v1473_v55, 1e-30  ;;  %v1498_v4 = vmul.f32 %v12415_v40, %v12385_v1  ;;  %v12496_v1 = vld [vmem:[%s15299_s10] sm:$0xf] }
 0xa8a   :  { %1521 = vadd.xlane.f32.xlu0 %v1520_v30  ;;  %1534 = vadd.xlane.f32.xlu1 %v1533_v21 }
 0xa8b   :  { %11011 = vrcp.f32 %v1479_v20  ;;  %v12420_v3 = vmul.f32 %v12181_v44, %v1488_v36  ;;  %v1504_v45 = vsel %vm226_vm0, %v1498_v4, 0.0 }
 0xa8d   :  { %v1516_v32 = vmul.f32 %v12097_v46, %v12420_v3  ;;  %v1500_v15 = vmul.f32 %v12420_v3, %v12091_v42  ;;  %v1532_v18 = vmul.f32 %v12109_v56, %v12420_v3  ;;  %v1548_v14 = vmul.f32 %v12123_v22, %v12420_v3 }
 0xa8e   :  { %1537 = vadd.xlane.f32.xlu0 %v1536_v2  ;;  %1550 = vadd.xlane.f32.xlu1 %v1549_v63 }
 0xa8f   :  { %v1526_v13 = vsel %vm226_vm0, %v1516_v32, 0.0  ;;  %v1510_v60 = vsel %vm226_vm0, %v1500_v15, 0.0  ;;  %v1542_v46 = vsel %vm226_vm0, %v1532_v18, 0.0  ;;  %v1558_v55 = vsel %vm226_vm0, %v1548_v14, 0.0 }
 0xa92   :  { %1553 = vadd.xlane.f32.xlu0 %v1552_v35  ;;  %1505 = vadd.xlane.f32.xlu1 %v1504_v45 }
 0xa95   :  { %v11012_v5 = vpop.eup %11011 }
 0xa96   :  { %v1487_v8 = vmul.f32 %v11012_v5, %v11004_v26  ;;  %1527 = vadd.xlane.f32.xlu0 %v1526_v13  ;;  %1511 = vadd.xlane.f32.xlu1 %v1510_v60 }
 0xa98   :  { %v12433_v51 = vmul.f32 %v12184_v12, %v1487_v8 }
 0xa9a   :  { %1543 = vadd.xlane.f32.xlu0 %v1542_v46  ;;  %v1499_v42 = vmul.f32 %v12433_v51, %v12081_v37  ;;  %v1515_v62 = vmul.f32 %v12086_v41, %v12433_v51  ;;  %v1494_v0 = vpack.c.bf16 %v12420_v3, %v12433_v51  ;;  %v1531_v16 = vmul.f32 %v12104_v53, %v12433_v51 }
 0xa9b   :  { %v1547_v41 = vmul.f32 %v12114_v58, %v12433_v51  ;;  %v1165_v53 = vadd.f32 %v12294_v52, %v11957_v59  ;;  %v1169_v58 = vadd.f32 %v12297_v9, %v11957_v59 }
 0xa9c   :  { %v1507_v56 = vsel %vm226_vm0, %v1499_v42, 0.0  ;;  %v1523_v26 = vsel %vm226_vm0, %v1515_v62, 0.0  ;;  %v1539_v37 = vsel %vm226_vm0, %v1531_v16, 0.0 }
 0xa9d   :  { %1508 = vadd.xlane.f32.xlu1 %v1507_v56  ;;  %v1555_v30 = vsel %vm226_vm0, %v1547_v41, 0.0  ;;  %v1496_v3 = vpack.c.bf16 %v1169_v58, %v1165_v53 }
 0xa9e   :  { %1524 = vadd.xlane.f32.xlu0 %v1523_v26 }
 0xaa1   :  { %1540 = vadd.xlane.f32.xlu1 %v1539_v37 }
 0xaa2   :  { %1559 = vadd.xlane.f32.xlu0 %v1558_v55 }
 0xaa5   :  { %1556 = vadd.xlane.f32.xlu1 %v1555_v30 }
 0xab6   :  { %1729 = vrot.lane.b32.xlu1 %v12278_v29, %s11568_s11 }
 0xab8   :  { %1731 = vrot.lane.b32.xlu0 %v12281_v34, %s11568_s11 }
 0xaba   :  { %1733 = vrot.lane.b32.xlu1 %v1165_v53, %s11568_s11 }
 0xabe   :  { %1735 = vrot.lane.b32.xlu1 %v1169_v58, %s11568_s11 }
 0xb13   :  { %v1519_v22 = vpop.xlane.xlu0 %1518  ;;  %v1503_v49 = vpop.xlane.xlu1 %1502 }
 0xb14   :  { %v1561_v21 = vsel %vm906_vm15, %v1503_v49, %v1519_v22 }
 0xb17   :  { %v1522_v36 = vpop.xlane.xlu0 %1521  ;;  %v1535_v20 = vpop.xlane.xlu1 %1534 }
 0xb18   :  { %v1565_v29 = vsel %vm911_vm1, %v1561_v21, %v1535_v20 }
 0xb1b   :  { %v1538_v38 = vpop.xlane.xlu0 %1537  ;;  %v1551_v52 = vpop.xlane.xlu1 %1550 }
 0xb1c   :  { %v1569_v61 = vsel %vm916_vm2, %v1565_v29, %v1551_v52 }
 0xb1d   :  { %9802 = vmatprep.mubr.msk.f32.mxu0 %vm921_vm4, %v1569_v61 }
 0xb1f   :  { %v1554_v34 = vpop.xlane.xlu0 %1553  ;;  %v1506_v2 = vpop.xlane.xlu1 %1505 }
 0xb20   :  { %v1562_v9 = vsel %vm906_vm15, %v1506_v2, %v1522_v36 }
 0xb21   :  { %v1566_v63 = vsel %vm911_vm1, %v1562_v9, %v1538_v38 }
 0xb22   :  { %v1570_v4 = vsel %vm916_vm2, %v1566_v63, %v1554_v34 }
 0xb23   :  { %v1528_v35 = vpop.xlane.xlu0 %1527  ;;  %9803 = vmatmul.mubr.msk.f32.vlgmr.msra.gmra.mrb[20].mxu0 %vm921_vm4, %v1570_v4  ;;  %v1512_v45 = vpop.xlane.xlu1 %1511 }
 0xb24   :  { %9809 = vmatpush3.bf16.msra.mxu0 %v12286_v48  ;;  %v1564_v8 = vsel %vm906_vm15, %v1512_v45, %v1528_v35 }
 0xb25   :  { %9810 = vmatprep.subr.bf16.mxu0 %v1496_v3 }
 0xb27   :  { %v1544_v32 = vpop.xlane.xlu0 %1543 }
 0xb28   :  { %9811 = vmatpush3.bf16.msra.mxu0 %v1496_v3  ;;  %v1568_v42 = vsel %vm911_vm1, %v1564_v8, %v1544_v32 }
 0xb29   :  { %10477 = vmatprep.subr.bf16.mxu0 %v11914_v23 }
 0xb2a   :  { %v1509_v15 = vpop.xlane.xlu1 %1508 }
 0xb2b   :  { %v1525_v5 = vpop.xlane.xlu0 %1524 }
 0xb2c   :  { %v1563_v60 = vsel %vm906_vm15, %v1509_v15, %v1525_v5 }
 0xb2e   :  { %v1541_v13 = vpop.xlane.xlu1 %1540 }
 0xb2f   :  { %v1560_v18 = vpop.xlane.xlu0 %1559  ;;  %v1567_v51 = vsel %vm911_vm1, %v1563_v60, %v1541_v13 }
 0xb30   :  { %v1572_v62 = vsel %vm916_vm2, %v1568_v42, %v1560_v18 }
 0xb32   :  { %v1557_v46 = vpop.xlane.xlu1 %1556 }
 0xb33   :  { %v1571_v48 = vsel %vm916_vm2, %v1567_v51, %v1557_v46  ;;  %v1732_v21 = vpop.permute.xlu0 %1731 }
 0xb34   :  { %9805 = vmatprep.mubr.msk.f32.mxu0 %vm921_vm4, %v1571_v48 }
 0xb35   :  { %9806 = vmatmul.mubr.msk.f32.gmra.mrb[22].mxu0 %vm921_vm4, %v1572_v62 }
 0xb36   :  { %9812 = vmatprep.mubr.msk.bf16.mxu0 %vm226_vm0, %v1493_v17 }
 0xb39   :  { %9813 = vmatmul.mubr.msk.bf16.vlgmr.msra.gmra.mrb[24].mxu0 %vm226_vm0, %v1494_v0  ;;  %v1730_v0 = vpop.permute.xlu1 %1729 }
 0xb3a   :  { %10479 = vmatpush3.bf16.msra.mxu0 %v11914_v23 }
 0xb3b   :  { %10481 = vmatprep.subr.bf16.mxu0 %v11919_v25 }
 0xb3d   :  { %v1734_v16 = vpop.permute.xlu1 %1733 }
 0xb3e   :  { %10483 = vmatpush3.bf16.msra.mxu0 %v11919_v25 }
 0xb3f   :  { %10485 = vmatprep.subr.bf16.mxu0 %v11930_v28 }
 0xb41   :  { %v1736_v49 = vpop.permute.xlu1 %1735 }
 0xb42   :  { %10487 = vmatpush3.bf16.msra.mxu0 %v11930_v28 }
 0xb43   :  { %10489 = vmatprep.subr.bf16.mxu0 %v11944_v50 }
 0xb46   :  { %10491 = vmatpush3.bf16.msra.mxu0 %v11944_v50 }
 0xb47   :  { %9846 = vmatprep.subr.msk.mxu0 %vm934_vm6, %v12496_v1 }
 0xbf6   :  { %v9804_v7 = vpop.f32.mrb[20].mxu0 }
 0xbf7   :  { %v1651_v17 = vpop.f32.mrb[21].mxu0 }
 0xc08   :  { %v9807_v56 = vpop.f32.mrb[22].mxu0 }
 0xc09   :  { %v1661_v26 = vpop.f32.mrb[23].mxu0 }
 0xc0c   :  { %v9814_v14 = vpop.f32.mrb[24].mxu0 }
 0xc0d   :  { %v1719_v37 = vadd.f32 %v9814_v14, %v1661_v26  ;;  %v1710_v41 = vpop.f32.mrb[25].mxu0 }
 0xc0e   :  { %v1711_v55 = vadd.f32 %v1710_v41, %v1651_v17  ;;  %v9815_v30 = vpop.f32.mrb[26].mxu0 }
 0xc0f   :  { %v1743_v53 = vadd.f32 %v1734_v16, %v1719_v37  ;;  %v1722_v58 = vadd.f32 %v9815_v30, %v9807_v56  ;;  %v1713_v22 = vpop.f32.mrb[27].mxu0 }
 0xc10   :  { %v1741_v36 = vadd.f32 %v1730_v0, %v1711_v55  ;;  %v1714_v20 = vadd.f32 %v9804_v7, %v1713_v22  ;;  %v12544_v55 = vld [vmem:[%s15364_s5 + $0x24] ss:$8 sps:$4 sm:$0xff]   ;;  %v15366_v22 = vmov 3  }
 0xc11   :  { %v1751_v29 = vmul.f32 0.01, %v1743_v53  ;;  %v1744_v38 = vadd.f32 %v1736_v49, %v1722_v58  ;;  %vm1747_vm14 = vcmp.ge.f32.partialorder %v1743_v53, 0.0  ;;  %v15367_v49 = vmov 1  }
 0xc12   :  { %v1749_v52 = vmul.f32 0.01, %v1741_v36  ;;  %v1742_v61 = vadd.f32 %v1732_v21, %v1714_v20  ;;  %vm1745_vm5 = vcmp.ge.f32.partialorder %v1741_v36, 0.0 }
 0xc13   :  { %vm1748_vm11 = vcmp.ge.f32.partialorder %v1744_v38, 0.0  ;;  %v1752_v34 = vmul.f32 0.01, %v1744_v38  ;;  %v1755_v9 = vsel %vm1747_vm14, %v1743_v53, %v1751_v29 }
 0xc14   :  { %vm1746_vm12 = vcmp.ge.f32.partialorder %v1742_v61, 0.0  ;;  %v1750_v2 = vmul.f32 0.01, %v1742_v61  ;;  %v1753_v4 = vsel %vm1745_vm5, %v1741_v36, %v1749_v52 }
 0xc15   :  { %v1756_v63 = vsel %vm1748_vm11, %v1744_v38, %v1752_v34 }
 0xc16   :  { %v1754_v3 = vsel %vm1746_vm12, %v1742_v61, %v1750_v2  ;;  %v1758_v35 = vpack.c.bf16 %v1756_v63, %v1755_v9  ;;  %v12587_v9 = vld [vmem:[%s15365_s18 + $0x28] sm:$0xff] }
 0xc17   :  { %v1757_v45 = vpack.c.bf16 %v1754_v3, %v1753_v4 }
 0xc19   :  { %9160 = vmatmul.mubr.msk.bf16.vlgmr.msra.gmra.mrb[24].mxu1 %vm433_vm3, %v1757_v45 }
 0xc1a   :  { %1807 = vmatprep.mubr.bf16.mxu1 %v15336_v19 }
 0xc21   :  { %9161 = vmatmul.mubr.msk.bf16.gmra.mrb[28].mxu1 %vm433_vm3, %v1758_v35  ;;  %v12593_v35 = vld [vmem:[%s15365_s18 + $0x48] sm:$0xff] }
 0xcec   :  { %v1799_v32 = vpop.f32.mrb[24].mxu1 }
 0xced   :  { %v1800_v15 = vadd.f32 %v1799_v32, %v11955_v57  ;;  %v1801_v5 = vpop.f32.mrb[25].mxu1 }
 0xcee   :  { %v1803_v13 = vpop.f32.mrb[26].mxu1  ;;  %v12507_v8 = vadd.f32 %v1801_v5, %v11957_v59 }
 0xcef   :  { %v1804_v60 = vadd.f32 %v1803_v13, %v11955_v57  ;;  %v1805_v18 = vpop.f32.mrb[27].mxu1  ;;  %9832 = vmatprep.mubr.msk.f32.mxu0 %vm433_vm3, %v1800_v15  ;;  %v12599_v13 = vld [vmem:[%s15365_s18 + $0x68] sm:$0xff] }
 0xcf0   :  { %v12510_v51 = vadd.f32 %v1805_v18, %v11957_v59  ;;  %v12605_v18 = vld [vmem:[%s15365_s18] sm:$0xff] }
 0xcf1   :  { %v1818_v46 = vpack.c.bf16 %v1804_v60, %v1800_v15  ;;  %9833 = vmatmul.mubr.msk.f32.vlgmr.msra.gmra.mrb[28].mxu0 %vm433_vm3, %v1804_v60 }
 0xcf2   :  { %v12515_v42 = vpack.c.bf16 %v12510_v51, %v12507_v8  ;;  %9847 = vmatpush3.msk.msra.mxu0 %vm934_vm6, %v12496_v1 }
 0xcf3   :  { %1943 = vrot.lane.b32.xlu0 %v1818_v46, %s11568_s11  ;;  %9842 = vmatprep.mubr.msk.bf16.mxu1 %vm433_vm3, %v1818_v46 }
 0xcf4   :  { %v1809_v48 = vpop.f32.mrb[28].mxu1  ;;  %9854 = vmatprep.subr.bf16.mxu0 %v12515_v42 }
 0xcf5   :  { %v1810_v62 = vadd.f32 %v1809_v48, %v11955_v57  ;;  %v12523_v7 = vpop.f32.mrb[29].mxu1 }
 0xcf6   :  { %v1813_v17 = vpop.f32.mrb[30].mxu1 }
 0xcf7   :  { %v1814_v0 = vadd.f32 %v1813_v17, %v11955_v57  ;;  %v12526_v56 = vpop.f32.mrb[31].mxu1  ;;  %9835 = vmatprep.mubr.msk.f32.mxu0 %vm433_vm3, %v1810_v62 }
 0xcf9   :  { %v1819_v26 = vpack.c.bf16 %v1814_v0, %v1810_v62  ;;  %9836 = vmatmul.mubr.msk.f32.gmra.mrb[30].mxu0 %vm433_vm3, %v1814_v0  ;;  %v12611_v0 = vld [vmem:[%s15365_s18 + $0x20] sm:$0xff] }
 0xcfb   :  { %1945 = vrot.lane.b32.xlu1 %v1819_v26, %s11568_s11 }
 0xd65   :  { %v1944_v16 = vpop.permute.xlu0 %1943 }
 0xd66   :  { %10736 = vmatprep.subr.msk.bf16.mxu1 %vm433_vm3, %v1944_v16  ;;  %v1954_v14 = vsel %vm433_vm3, %v1944_v16, 0 }
 0xd67   :  { %9839 = vmatpush3.bf16.xpose.msra.mxu1 %v1954_v14 }
 0xd6d   :  { %v1946_v37 = vpop.permute.xlu1 %1945 }
 0xd6e   :  { %10737 = vmatprep.subr.msk.bf16.mxu1 %vm433_vm3, %v1946_v37  ;;  %v1957_v41 = vsel %vm433_vm3, %v1946_v37, 0 }
 0xd6f   :  { %9841 = vmatpush3.bf16.xpose.msra.mxu1 %v1957_v41 }
 0xd70   :  { %2412 = vmatprep.subr.bf16.mxu1 %v12309_v10  ;;  %v12550_v10 = vld [vmem:[%s15364_s5 + $0x20] ss:$8 sps:$4 sm:$0xff]  }
 0xd76   :  { %9843 = vmatmul.mubr.msk.bf16.vlgmr.msra.gmra.mrb[32].mxu1 %vm433_vm3, %v1819_v26 }
 0xd77   :  { %2413 = vmatpush1.bf16.msra.mxu1 %v12316_v33  ;;  %2444 = vmatprep.mubr.bf16.mxu1 %v15336_v19  ;;  %v12556_v33 = vld [vmem:[%s15364_s5 + $0x34] ss:$8 sps:$4 sm:$0xff]  }
 0xd78   :  { %2414 = vmatprep.subr.bf16.mxu1 %v12323_v43  ;;  %v12562_v43 = vld [vmem:[%s15364_s5 + $0x30] ss:$8 sps:$4 sm:$0xff]  }
 0xd7b   :  { %2415 = vmatpush1.bf16.msra.mxu1 %v12329_v6 }
 0xd7c   :  { %2416 = vmatprep.subr.bf16.mxu1 %v12544_v55 }
 0xd7f   :  { %2417 = vmatpush1.bf16.msra.mxu1 %v12550_v10 }
 0xd80   :  { %2418 = vmatprep.subr.bf16.mxu1 %v12556_v33 }
 0xd83   :  { %2419 = vmatpush1.bf16.msra.mxu1 %v12562_v43 }
 0xdc4   :  { %v9834_v6 = vpop.f32.mrb[28].mxu0 }
 0xdc5   :  { %v1898_v30 = vpop.f32.mrb[29].mxu0  ;;  %2013 = vperm.xlu0 %10810, %v9834_v6   ;;  %1924 = vperm.xlu1 %10809, %v9834_v6  }
 0xdc9   :  { %10813 = vset.pattern.permute.xlu0 %v15336_v19  ;;  %10811 = vset.pattern.permute.xlu1 %v15334_v11 }
 0xdca   :  { %1919 = vperm.xlu0 %10813, %v1898_v30   ;;  %2037 = vperm.xlu1 %10811, %v9834_v6  }
 0xdcc   :  { %v9837_v53 = vpop.f32.mrb[30].mxu0 }
 0xdcd   :  { %v1908_v58 = vpop.f32.mrb[31].mxu0 }
 0xdce   :  { %10816 = vset.pattern.permute.xlu0 %v15366_v22  ;;  %10812 = vset.pattern.permute.xlu1 %v15366_v22 }
 0xdcf   :  { %2057 = vperm.xlu0 %10816, %v1898_v30   ;;  %2061 = vperm.xlu1 %10812, %v9834_v6  }
 0xdd3   :  { %10817 = vset.pattern.permute.xlu0 %v15336_v19  ;;  %10814 = vset.pattern.permute.xlu1 %v15367_v49 }
 0xdd4   :  { %1934 = vperm.xlu0 %10817, %v9837_v53   ;;  %2009 = vperm.xlu1 %10814, %v1898_v30  }
 0xdd8   :  { %10822 = vset.pattern.permute.xlu0 %v15334_v11  ;;  %10815 = vset.pattern.permute.xlu1 %v15334_v11 }
 0xdd9   :  { %2041 = vperm.xlu0 %10822, %v1908_v58   ;;  %2033 = vperm.xlu1 %10815, %v1898_v30  }
 0xddd   :  { %10824 = vset.pattern.permute.xlu0 %v15366_v22  ;;  %10818 = vset.pattern.permute.xlu1 %v15367_v49 }
 0xdde   :  { %2069 = vperm.xlu0 %10824, %v9837_v53   ;;  %2021 = vperm.xlu1 %10818, %v9837_v53  }
 0xde2   :  { %10819 = vset.pattern.permute.xlu1 %v15334_v11  ;;  %10826 = vset.pattern.permute.xlu0 %v15367_v49 }
 0xde3   :  { %2045 = vperm.xlu1 %10819, %v9837_v53   ;;  %v12620_v53 = vld [vmem:[%s15365_s18 + $0x40] sm:$0xff] }
 0xde7   :  { %10820 = vset.pattern.permute.xlu1 %v15336_v19 }
 0xde8   :  { %1929 = vperm.xlu1 %10820, %v1908_v58  }
 0xdec   :  { %10821 = vset.pattern.permute.xlu1 %v15367_v49 }
 0xded   :  { %2017 = vperm.xlu1 %10821, %v1908_v58  }
 0xdf1   :  { %10823 = vset.pattern.permute.xlu1 %v15366_v22 }
 0xdf2   :  { %2065 = vperm.xlu1 %10823, %v1908_v58  }
 0xdf6   :  { %10825 = vset.pattern.permute.xlu1 %v15336_v19 }
 0xe44   :  { %v2014_v36 = vpop.permute.xlu0 %2013  ;;  %v1925_v20 = vpop.permute.xlu1 %1924 }
 0xe45   :  { %v1938_v61 = vmul.f32 %v12415_v40, %v1925_v20  ;;  %v2025_v63 = vmul.f32 %v12587_v9, %v2014_v36  ;;  %v12626_v36 = vld [vmem:[%s15365_s18 + $0x60] sm:$0xff] }
 0xe49   :  { %v1920_v21 = vpop.permute.xlu0 %1919  ;;  %v12581_v29 = vpop.f32.mrb[32].mxu1 }
 0xe4a   :  { %v2038_v38 = vpop.permute.xlu1 %2037  ;;  %v1993_v52 = vpop.f32.mrb[33].mxu1  ;;  %v1937_v46 = vmul.f32 %v12605_v18, %v1920_v21 }
 0xe4b   :  { %v9845_v34 = vpop.f32.mrb[34].mxu1  ;;  %v2049_v45 = vmul.f32 %v12593_v35, %v2038_v38 }
 0xe4c   :  { %v1996_v2 = vpop.f32.mrb[35].mxu1  ;;  %v1994_v14 = vadd.f32 %v1993_v52, %v1937_v46  ;;  %v12632_v52 = vld [vmem:[%s15365_s18 + $0x18] sm:$0xff] }
 0xe4d   :  { %v1997_v4 = vadd.f32 %v1996_v2, %v1938_v61 }
 0xe4e   :  { %v2062_v3 = vpop.permute.xlu1 %2061  ;;  %v2058_v15 = vpop.permute.xlu0 %2057 }
 0xe4f   :  { %v2029_v32 = vadd.f32 %v2025_v63, %v1997_v4  ;;  %v2073_v60 = vmul.f32 %v12599_v13, %v2062_v3  ;;  %v2072_v20 = vmul.f32 %v12626_v36, %v2058_v15  ;;  %v12638_v4 = vld [vmem:[%s15365_s18 + $0x38] sm:$0xff] }
 0xe51   :  { %v2053_v5 = vadd.f32 %v2049_v45, %v2029_v32 }
 0xe53   :  { %v2077_v48 = vadd.f32 %v2073_v60, %v2053_v5  ;;  %v2010_v62 = vpop.permute.xlu1 %2009  ;;  %v1935_v16 = vpop.permute.xlu0 %1934 }
 0xe54   :  { %v2024_v26 = vmul.f32 %v12611_v0, %v2010_v62  ;;  %v1940_v61 = vmul.f32 %v12632_v52, %v1935_v16  ;;  %v12647_v62 = vld [vmem:[%s15365_s18 + $0x58] sm:$0xff] }
 0xe55   :  { %v2081_v17 = vmul.f32 0.125, %v2077_v48 }
 0xe56   :  { %v2028_v30 = vadd.f32 %v2024_v26, %v1994_v14  ;;  %v2005_v32 = vadd.f32 %v9845_v34, %v1940_v61  ;;  %v12653_v34 = vld [vmem:[%s15365_s18 + $0x78] sm:$0xff] }
 0xe57   :  { %v2085_v37 = vsel %vm779_vm7, %v2081_v17, -1e+30 }
 0xe58   :  { %v2034_v41 = vpop.permute.xlu1 %2033  ;;  %v2091_v6 = vsel %vm226_vm0, %v2085_v37, -inf  ;;  %v2042_v38 = vpop.permute.xlu0 %2041 }
 0xe59   :  { %v2048_v58 = vmul.f32 %v12620_v53, %v2034_v41  ;;  %2092 = vmax.xlane.f32.xlu0 %v2091_v6  ;;  %v12659_v6 = vld [vmem:[%s15365_s18 + $0x10] sm:$0xff] }
 0xe5b   :  { %v2052_v21 = vadd.f32 %v2048_v58, %v2028_v30 }
 0xe5d   :  { %v2022_v2 = vpop.permute.xlu1 %2021  ;;  %v2076_v63 = vadd.f32 %v2072_v20, %v2052_v21  ;;  %v2070_v5 = vpop.permute.xlu0 %2069 }
 0xe5e   :  { %v2027_v3 = vmul.f32 %v12638_v4, %v2022_v2  ;;  %v2075_v26 = vmul.f32 %v12653_v34, %v2070_v5 }
 0xe5f   :  { %v2080_v45 = vmul.f32 0.125, %v2076_v63  ;;  %v12669_v63 = vld [vmem:[%s15365_s18 + $0x30] sm:$0xff] }
 0xe60   :  { %v2031_v48 = vadd.f32 %v2027_v3, %v2005_v32 }
 0xe61   :  { %v2084_v15 = vsel %vm778_vm8, %v2080_v45, -1e+30  ;;  %v12675_v45 = vld [vmem:[%s15365_s18 + $0x50] sm:$0xff] }
 0xe62   :  { %v2046_v60 = vpop.permute.xlu1 %2045  ;;  %v2088_v46 = vsel %vm226_vm0, %v2084_v15, -inf  ;;  %v2050_v32 = vmul.f32 %v12675_v45, %v2042_v38 }
 0xe63   :  { %v2051_v17 = vmul.f32 %v12647_v62, %v2046_v60  ;;  %2089 = vmax.xlane.f32.xlu1 %v2088_v46 }
 0xe65   :  { %v2055_v16 = vadd.f32 %v2051_v17, %v2031_v48 }
 0xe67   :  { %v1930_v14 = vpop.permute.xlu1 %1929  ;;  %v2079_v41 = vadd.f32 %v2075_v26, %v2055_v16 }
 0xe68   :  { %v1939_v30 = vmul.f32 %v12659_v6, %v1930_v14 }
 0xe69   :  { %v2083_v58 = vmul.f32 0.125, %v2079_v41 }
 0xe6a   :  { %v2002_v2 = vadd.f32 %v12581_v29, %v1939_v30  ;;  %v12681_v29 = vld [vmem:[%s15365_s18 + $0x70] sm:$0xff] }
 0xe6b   :  { %v2087_v20 = vsel %vm781_vm10, %v2083_v58, -1e+30 }
 0xe6c   :  { %v2018_v21 = vpop.permute.xlu1 %2017  ;;  %v2097_v61 = vsel %vm226_vm0, %v2087_v20, -inf }
 0xe6d   :  { %v2026_v3 = vmul.f32 %v12669_v63, %v2018_v21  ;;  %2098 = vmax.xlane.f32.xlu0 %v2097_v61 }
 0xe6f   :  { %v2030_v5 = vadd.f32 %v2026_v3, %v2002_v2 }
 0xe71   :  { %v2054_v60 = vadd.f32 %v2050_v32, %v2030_v5  ;;  %v2066_v46 = vpop.permute.xlu1 %2065 }
 0xe72   :  { %v2074_v48 = vmul.f32 %v12681_v29, %v2066_v46 }
 0xe74   :  { %v2078_v17 = vadd.f32 %v2074_v48, %v2054_v60 }
 0xe76   :  { %v2082_v26 = vmul.f32 0.125, %v2078_v17 }
 0xe78   :  { %v2086_v16 = vsel %vm780_vm9, %v2082_v26, -1e+30 }
 0xe79   :  { %v2094_v14 = vsel %vm226_vm0, %v2086_v16, -inf }
 0xe7a   :  { %2095 = vmax.xlane.f32.xlu1 %v2094_v14 }
 0xee6   :  { %v2093_v41 = vpop.xlane.xlu0 %2092 }
 0xee7   :  { %v2101_v38 = vsub.f32 %v2085_v37, %v2093_v41 }
 0xee9   :  { %v2106_v30 = vmul.f32 1.442695, %v2101_v38 }
 0xeeb   :  { %11013 = vpow2.f32 %v2106_v30 }
 0xef0   :  { %v2090_v58 = vpop.xlane.xlu1 %2089 }
 0xef1   :  { %v2100_v21 = vsub.f32 %v2084_v15, %v2090_v58 }
 0xef3   :  { %v2104_v61 = vmul.f32 1.442695, %v2100_v21 }
 0xef5   :  { %v11014_v2 = vpop.eup %11013  ;;  %11015 = vpow2.f32 %v2104_v61 }
 0xef6   :  { %v2115_v3 = vsel %vm226_vm0, %v11014_v2, 0.0 }
 0xef7   :  { %2116 = vadd.xlane.f32.xlu0 %v2115_v3 }
 0xefa   :  { %v2099_v32 = vpop.xlane.xlu0 %2098 }
 0xefb   :  { %v2103_v5 = vsub.f32 %v2087_v20, %v2099_v32 }
 0xefd   :  { %v2110_v60 = vmul.f32 1.442695, %v2103_v5 }
 0xeff   :  { %v11016_v46 = vpop.eup %11015  ;;  %11017 = vpow2.f32 %v2110_v60 }
 0xf00   :  { %v2112_v48 = vsel %vm226_vm0, %v11016_v46, 0.0 }
 0xf01   :  { %2113 = vadd.xlane.f32.xlu1 %v2112_v48 }
 0xf07   :  { %v2096_v17 = vpop.xlane.xlu1 %2095 }
 0xf08   :  { %v2102_v37 = vsub.f32 %v2086_v16, %v2096_v17 }
 0xf09   :  { %v11018_v26 = vpop.eup %11017 }
 0xf0a   :  { %v2108_v14 = vmul.f32 1.442695, %v2102_v37  ;;  %v2121_v15 = vsel %vm226_vm0, %v11018_v26, 0.0 }
 0xf0b   :  { %2122 = vadd.xlane.f32.xlu0 %v2121_v15 }
 0xf0c   :  { %11019 = vpow2.f32 %v2108_v14 }
 0xf16   :  { %v11020_v41 = vpop.eup %11019 }
 0xf17   :  { %v2118_v38 = vsel %vm226_vm0, %v11020_v41, 0.0 }
 0xf18   :  { %2119 = vadd.xlane.f32.xlu1 %v2118_v38 }
 0xf84   :  { %v2117_v30 = vpop.xlane.xlu0 %2116 }
 0xf85   :  { %v2125_v20 = vmax.f32 %v2117_v30, 1e-30 }
 0xf87   :  { %11021 = vrcp.f32 %v2125_v20 }
 0xf8e   :  { %v2114_v58 = vpop.xlane.xlu1 %2113 }
 0xf8f   :  { %v2124_v21 = vmax.f32 %v2114_v58, 1e-30 }
 0xf91   :  { %11023 = vrcp.f32 %v2124_v21  ;;  %v11022_v61 = vpop.eup %11021 }
 0xf92   :  { %v2133_v32 = vmul.f32 %v11022_v61, %v11014_v2 }
 0xf94   :  { %v12692_v48 = vmul.f32 %v12161_v47, %v2133_v32 }
 0xf96   :  { %v2161_v15 = vmul.f32 %v12587_v9, %v12692_v48  ;;  %v2177_v61 = vmul.f32 %v12593_v35, %v12692_v48 }
 0xf98   :  { %v2123_v3 = vpop.xlane.xlu0 %2122  ;;  %v2167_v21 = vsel %vm226_vm0, %v2161_v15, 0.0 }
 0xf99   :  { %v2127_v16 = vmax.f32 %v2123_v3, 1e-30 }
 0xf9b   :  { %v11024_v5 = vpop.eup %11023  ;;  %11025 = vrcp.f32 %v2127_v16 }
 0xf9c   :  { %v2132_v60 = vmul.f32 %v11024_v5, %v11016_v46 }
 0xf9e   :  { %v12695_v17 = vmul.f32 %v12151_v31, %v2132_v60  ;;  %v2193_v60 = vmul.f32 %v12599_v13, %v12692_v48 }
 0xfa0   :  { %v2160_v37 = vmul.f32 %v12611_v0, %v12695_v17  ;;  %v2144_v14 = vmul.f32 %v12605_v18, %v12695_v17  ;;  %v2140_v2 = vpack.c.bf16 %v12692_v48, %v12695_v17  ;;  %v2176_v30 = vmul.f32 %v12620_v53, %v12695_v17 }
 0xfa1   :  { %v2192_v5 = vmul.f32 %v12626_v36, %v12695_v17 }
 0xfa2   :  { %v2164_v46 = vsel %vm226_vm0, %v2160_v37, 0.0  ;;  %v2148_v38 = vsel %vm226_vm0, %v2144_v14, 0.0  ;;  %v2180_v16 = vsel %vm226_vm0, %v2176_v30, 0.0  ;;  %v2183_v14 = vsel %vm226_vm0, %v2177_v61, 0.0 }
 0xfa3   :  { %2165 = vadd.xlane.f32.xlu0 %v2164_v46  ;;  %2149 = vadd.xlane.f32.xlu1 %v2148_v38  ;;  %v2196_v15 = vsel %vm226_vm0, %v2192_v5, 0.0  ;;  %v2199_v46 = vsel %vm226_vm0, %v2193_v60, 0.0 }
 0xfa5   :  { %v11026_v20 = vpop.eup %11025  ;;  %v2120_v58 = vpop.xlane.xlu1 %2119 }
 0xfa6   :  { %v2135_v3 = vmul.f32 %v11026_v20, %v11018_v26  ;;  %v2126_v32 = vmax.f32 %v2120_v58, 1e-30  ;;  %v2145_v26 = vmul.f32 %v12415_v40, %v12692_v48 }
 0xfa7   :  { %2168 = vadd.xlane.f32.xlu0 %v2167_v21  ;;  %2181 = vadd.xlane.f32.xlu1 %v2180_v16 }
 0xfa8   :  { %11027 = vrcp.f32 %v2126_v32  ;;  %v12718_v37 = vmul.f32 %v12181_v44, %v2135_v3  ;;  %v2151_v38 = vsel %vm226_vm0, %v2145_v26, 0.0 }
 0xfaa   :  { %v2163_v30 = vmul.f32 %v12638_v4, %v12718_v37  ;;  %v2147_v20 = vmul.f32 %v12632_v52, %v12718_v37  ;;  %v2179_v40 = vmul.f32 %v12647_v62, %v12718_v37 }
 0xfab   :  { %2184 = vadd.xlane.f32.xlu0 %v2183_v14  ;;  %2197 = vadd.xlane.f32.xlu1 %v2196_v15 }
 0xfac   :  { %v2173_v21 = vsel %vm226_vm0, %v2163_v30, 0.0  ;;  %v2157_v61 = vsel %vm226_vm0, %v2147_v20, 0.0  ;;  %v2189_v16 = vsel %vm226_vm0, %v2179_v40, 0.0 }
 0xfaf   :  { %2200 = vadd.xlane.f32.xlu0 %v2199_v46  ;;  %2152 = vadd.xlane.f32.xlu1 %v2151_v38  ;;  %v2195_v46 = vmul.f32 %v12653_v34, %v12718_v37 }
 0xfb1   :  { %v2205_v20 = vsel %vm226_vm0, %v2195_v46, 0.0 }
 0xfb2   :  { %v11028_v58 = vpop.eup %11027 }
 0xfb3   :  { %v2134_v3 = vmul.f32 %v11028_v58, %v11020_v41  ;;  %2174 = vadd.xlane.f32.xlu0 %v2173_v21  ;;  %2158 = vadd.xlane.f32.xlu1 %v2157_v61  ;;  %v1812_v21 = vadd.f32 %v12523_v7, %v11957_v59 }
 0xfb5   :  { %v12735_v32 = vmul.f32 %v12184_v12, %v2134_v3 }
 0xfb7   :  { %2190 = vadd.xlane.f32.xlu0 %v2189_v16  ;;  %v2146_v5 = vmul.f32 %v12659_v6, %v12735_v32  ;;  %v2162_v60 = vmul.f32 %v12669_v63, %v12735_v32  ;;  %v2141_v14 = vpack.c.bf16 %v12718_v37, %v12735_v32  ;;  %v2178_v26 = vmul.f32 %v12675_v45, %v12735_v32 }
 0xfb8   :  { %v2194_v30 = vmul.f32 %v12681_v29, %v12735_v32  ;;  %v1816_v37 = vadd.f32 %v12526_v56, %v11957_v59 }
 0xfb9   :  { %v2154_v15 = vsel %vm226_vm0, %v2146_v5, 0.0  ;;  %v2170_v41 = vsel %vm226_vm0, %v2162_v60, 0.0  ;;  %v2186_v38 = vsel %vm226_vm0, %v2178_v26, 0.0 }
 0xfba   :  { %2155 = vadd.xlane.f32.xlu1 %v2154_v15  ;;  %v2202_v58 = vsel %vm226_vm0, %v2194_v30, 0.0  ;;  %v2143_v46 = vpack.c.bf16 %v1816_v37, %v1812_v21 }
 0xfbb   :  { %2171 = vadd.xlane.f32.xlu0 %v2170_v41 }
 0xfbe   :  { %2187 = vadd.xlane.f32.xlu1 %v2186_v38 }
 0xfbf   :  { %2206 = vadd.xlane.f32.xlu0 %v2205_v20 }
 0xfc2   :  { %2203 = vadd.xlane.f32.xlu1 %v2202_v58 }
 0xfd3   :  { %2376 = vrot.lane.b32.xlu1 %v12507_v8, %s11568_s11 }
 0xfd5   :  { %2378 = vrot.lane.b32.xlu0 %v12510_v51, %s11568_s11 }
 0xfd7   :  { %2380 = vrot.lane.b32.xlu1 %v1812_v21, %s11568_s11 }
 0xfdb   :  { %2382 = vrot.lane.b32.xlu1 %v1816_v37, %s11568_s11 }
0x1030   :  { %v2166_v61 = vpop.xlane.xlu0 %2165  ;;  %v2150_v40 = vpop.xlane.xlu1 %2149 }
0x1031   :  { %v2208_v16 = vsel %vm906_vm15, %v2150_v40, %v2166_v61 }
0x1034   :  { %v2169_v3 = vpop.xlane.xlu0 %2168  ;;  %v2182_v32 = vpop.xlane.xlu1 %2181 }
0x1035   :  { %v2212_v8 = vsel %vm911_vm1, %v2208_v16, %v2182_v32 }
0x1038   :  { %v2185_v5 = vpop.xlane.xlu0 %2184  ;;  %v2198_v7 = vpop.xlane.xlu1 %2197 }
0x1039   :  { %v2216_v60 = vsel %vm916_vm2, %v2212_v8, %v2198_v7 }
0x103a   :  { %9848 = vmatprep.mubr.msk.f32.mxu0 %vm921_vm4, %v2216_v60 }
0x103c   :  { %v2201_v51 = vpop.xlane.xlu0 %2200  ;;  %v2153_v15 = vpop.xlane.xlu1 %2152 }
0x103d   :  { %v2209_v56 = vsel %vm906_vm15, %v2153_v15, %v2169_v3 }
0x103e   :  { %v2213_v41 = vsel %vm911_vm1, %v2209_v56, %v2185_v5 }
0x103f   :  { %v2217_v26 = vsel %vm916_vm2, %v2213_v41, %v2201_v51 }
0x1040   :  { %v2175_v38 = vpop.xlane.xlu0 %2174  ;;  %9849 = vmatmul.mubr.msk.f32.vlgmr.msra.gmra.mrb[32].mxu0 %vm921_vm4, %v2217_v26  ;;  %v2159_v30 = vpop.xlane.xlu1 %2158 }
0x1041   :  { %9855 = vmatpush3.bf16.msra.mxu0 %v12515_v42  ;;  %v2211_v16 = vsel %vm906_vm15, %v2159_v30, %v2175_v38 }
0x1042   :  { %9856 = vmatprep.subr.bf16.mxu0 %v2143_v46 }
0x1044   :  { %v2191_v20 = vpop.xlane.xlu0 %2190 }
0x1045   :  { %9857 = vmatpush3.bf16.msra.mxu0 %v2143_v46  ;;  %v2215_v8 = vsel %vm911_vm1, %v2211_v16, %v2191_v20 }
0x1046   :  { %10493 = vmatprep.subr.bf16.mxu0 %v11914_v23 }
0x1047   :  { %v2156_v58 = vpop.xlane.xlu1 %2155 }
0x1048   :  { %v2172_v61 = vpop.xlane.xlu0 %2171 }
0x1049   :  { %v2210_v3 = vsel %vm906_vm15, %v2156_v58, %v2172_v61 }
0x104b   :  { %v2188_v40 = vpop.xlane.xlu1 %2187 }
0x104c   :  { %v2207_v32 = vpop.xlane.xlu0 %2206  ;;  %v2214_v21 = vsel %vm911_vm1, %v2210_v3, %v2188_v40 }
0x104d   :  { %v2219_v5 = vsel %vm916_vm2, %v2215_v8, %v2207_v32 }
0x104f   :  { %v2204_v37 = vpop.xlane.xlu1 %2203 }
0x1050   :  { %v2218_v42 = vsel %vm916_vm2, %v2214_v21, %v2204_v37  ;;  %v2379_v40 = vpop.permute.xlu0 %2378 }
0x1051   :  { %9851 = vmatprep.mubr.msk.f32.mxu0 %vm921_vm4, %v2218_v42 }
0x1052   :  { %9852 = vmatmul.mubr.msk.f32.gmra.mrb[34].mxu0 %vm921_vm4, %v2219_v5 }
0x1053   :  { %9858 = vmatprep.mubr.msk.bf16.mxu0 %vm226_vm0, %v2140_v2  ;;  %v2377_v2 = vpop.permute.xlu1 %2376 }
0x1056   :  { %9859 = vmatmul.mubr.msk.bf16.vlgmr.msra.gmra.mrb[36].mxu0 %vm226_vm0, %v2141_v14 }
0x1057   :  { %10495 = vmatpush3.bf16.msra.mxu0 %v11914_v23  ;;  %v2381_v60 = vpop.permute.xlu1 %2380 }
0x1058   :  { %10497 = vmatprep.subr.bf16.mxu0 %v11919_v25 }
0x105b   :  { %10499 = vmatpush3.bf16.msra.mxu0 %v11919_v25  ;;  %v2383_v20 = vpop.permute.xlu1 %2382 }
0x105c   :  { %10501 = vmatprep.subr.bf16.mxu0 %v11930_v28 }
0x105f   :  { %10503 = vmatpush3.bf16.msra.mxu0 %v11930_v28 }
0x1060   :  { %10505 = vmatprep.subr.bf16.mxu0 %v11944_v50 }
0x1063   :  { %10507 = vmatpush3.bf16.msra.mxu0 %v11944_v50 }
0x1064   :  { %9892 = vmatprep.subr.msk.mxu0 %vm934_vm6, %v12496_v1 }
0x1113   :  { %v9850_v48 = vpop.f32.mrb[32].mxu0 }
0x1114   :  { %v2298_v17 = vpop.f32.mrb[33].mxu0 }
0x1125   :  { %v9853_v14 = vpop.f32.mrb[34].mxu0 }
0x1126   :  { %v2308_v7 = vpop.f32.mrb[35].mxu0 }
0x1129   :  { %v9860_v51 = vpop.f32.mrb[36].mxu0 }
0x112a   :  { %v2366_v15 = vadd.f32 %v9860_v51, %v2308_v7  ;;  %v2357_v56 = vpop.f32.mrb[37].mxu0 }
0x112b   :  { %v2358_v41 = vadd.f32 %v2357_v56, %v2298_v17  ;;  %v9861_v26 = vpop.f32.mrb[38].mxu0 }
0x112c   :  { %v2390_v46 = vadd.f32 %v2381_v60, %v2366_v15  ;;  %v2369_v38 = vadd.f32 %v9861_v26, %v9853_v14  ;;  %v2360_v30 = vpop.f32.mrb[39].mxu0 }
0x112d   :  { %v2388_v58 = vadd.f32 %v2377_v2, %v2358_v41  ;;  %v2361_v61 = vadd.f32 %v9850_v48, %v2360_v30 }
0x112e   :  { %v2398_v3 = vmul.f32 0.01, %v2390_v46  ;;  %v2391_v32 = vadd.f32 %v2383_v20, %v2369_v38  ;;  %vm2394_vm13 = vcmp.ge.f32.partialorder %v2390_v46, 0.0 }
0x112f   :  { %v2396_v16 = vmul.f32 0.01, %v2388_v58  ;;  %v2389_v21 = vadd.f32 %v2379_v40, %v2361_v61  ;;  %vm2392_vm14 = vcmp.ge.f32.partialorder %v2388_v58, 0.0 }
0x1130   :  { %vm2395_vm5 = vcmp.ge.f32.partialorder %v2391_v32, 0.0  ;;  %v2399_v37 = vmul.f32 0.01, %v2391_v32  ;;  %v2402_v42 = vsel %vm2394_vm13, %v2390_v46, %v2398_v3 }
0x1131   :  { %vm2393_vm11 = vcmp.ge.f32.partialorder %v2389_v21, 0.0  ;;  %v2397_v8 = vmul.f32 0.01, %v2389_v21  ;;  %v2400_v17 = vsel %vm2392_vm14, %v2388_v58, %v2396_v16 }
0x1132   :  { %v2403_v5 = vsel %vm2395_vm5, %v2391_v32, %v2399_v37 }
0x1133   :  { %v2401_v7 = vsel %vm2393_vm11, %v2389_v21, %v2397_v8  ;;  %v2405_v14 = vpack.c.bf16 %v2403_v5, %v2402_v42  ;;  %v12835_v42 = vld [vmem:[%s15364_s5 + $0x4] ss:$8 sps:$4 sm:$0xff]   ;;  %v12842_v5 = vld [vmem:[%s15364_s5] ss:$8 sps:$4 sm:$0xff]  }
0x1134   :  { %v2404_v60 = vpack.c.bf16 %v2401_v7, %v2400_v17  ;;  %v12849_v17 = vld [vmem:[%s15364_s5 + $0x14] ss:$8 sps:$4 sm:$0xff]   ;;  %v12855_v7 = vld [vmem:[%s15364_s5 + $0x10] ss:$8 sps:$4 sm:$0xff]  }
0x1136   :  { %9175 = vmatmul.mubr.msk.bf16.vlgmr.msra.gmra.mrb[36].mxu1 %vm433_vm3, %v2404_v60 }
0x1137   :  { %2454 = vmatprep.mubr.bf16.mxu1 %v15336_v19 }
0x113e   :  { %9176 = vmatmul.mubr.msk.bf16.gmra.mrb[40].mxu1 %vm433_vm3, %v2405_v14 }
0x1209   :  { %v2446_v48 = vpop.f32.mrb[36].mxu1 }
0x120a   :  { %v2447_v2 = vadd.f32 %v2446_v48, %v11955_v57  ;;  %v2448_v51 = vpop.f32.mrb[37].mxu1 }
0x120b   :  { %v2450_v15 = vpop.f32.mrb[38].mxu1  ;;  %v12804_v26 = vadd.f32 %v2448_v51, %v11957_v59 }
0x120c   :  { %v2451_v56 = vadd.f32 %v2450_v15, %v11955_v57  ;;  %v2452_v41 = vpop.f32.mrb[39].mxu1  ;;  %9878 = vmatprep.mubr.msk.f32.mxu0 %vm433_vm3, %v2447_v2 }
0x120d   :  { %v12807_v46 = vadd.f32 %v2452_v41, %v11957_v59 }
0x120e   :  { %v2465_v38 = vpack.c.bf16 %v2451_v56, %v2447_v2  ;;  %9879 = vmatmul.mubr.msk.f32.vlgmr.msra.gmra.mrb[40].mxu0 %vm433_vm3, %v2451_v56  ;;  %v12881_v56 = vld [vmem:[%s15365_s18 + $0x8] sm:$0xff] }
0x120f   :  { %v12812_v30 = vpack.c.bf16 %v12807_v46, %v12804_v26  ;;  %9893 = vmatpush3.msk.msra.mxu0 %vm934_vm6, %v12496_v1 }
0x1210   :  { %2590 = vrot.lane.b32.xlu0 %v2465_v38, %s11568_s11  ;;  %9888 = vmatprep.mubr.msk.bf16.mxu1 %vm433_vm3, %v2465_v38 }
0x1211   :  { %v2456_v20 = vpop.f32.mrb[40].mxu1  ;;  %9900 = vmatprep.subr.bf16.mxu0 %v12812_v30 }
0x1212   :  { %v2457_v58 = vadd.f32 %v2456_v20, %v11955_v57  ;;  %v12820_v61 = vpop.f32.mrb[41].mxu1 }
0x1213   :  { %v2460_v40 = vpop.f32.mrb[42].mxu1 }
0x1214   :  { %v2461_v3 = vadd.f32 %v2460_v40, %v11955_v57  ;;  %v12823_v32 = vpop.f32.mrb[43].mxu1  ;;  %9881 = vmatprep.mubr.msk.f32.mxu0 %vm433_vm3, %v2457_v58 }
0x1216   :  { %v2466_v16 = vpack.c.bf16 %v2461_v3, %v2457_v58  ;;  %9882 = vmatmul.mubr.msk.f32.gmra.mrb[42].mxu0 %vm433_vm3, %v2461_v3 }
0x1218   :  { %2592 = vrot.lane.b32.xlu1 %v2466_v16, %s11568_s11 }
0x1282   :  { %v2591_v1 = vpop.permute.xlu0 %2590 }
0x1283   :  { %10738 = vmatprep.subr.msk.bf16.mxu1 %vm433_vm3, %v2591_v1  ;;  %v2601_v21 = vsel %vm433_vm3, %v2591_v1, 0 }
0x1284   :  { %9885 = vmatpush3.bf16.xpose.msra.mxu1 %v2601_v21 }
0x128a   :  { %v2593_v37 = vpop.permute.xlu1 %2592 }
0x128b   :  { %10739 = vmatprep.subr.msk.bf16.mxu1 %vm433_vm3, %v2593_v37  ;;  %v2604_v8 = vsel %vm433_vm3, %v2593_v37, 0 }
0x128c   :  { %9887 = vmatpush3.bf16.xpose.msra.mxu1 %v2604_v8 }
0x128d   :  { %3059 = vmatprep.subr.bf16.mxu1 %v12835_v42 }
0x1293   :  { %9889 = vmatmul.mubr.msk.bf16.vlgmr.msra.gmra.mrb[44].mxu1 %vm433_vm3, %v2466_v16 }
0x1294   :  { %3060 = vmatpush1.bf16.msra.mxu1 %v12842_v5  ;;  %3091 = vmatprep.mubr.bf16.mxu1 %v15336_v19 }
0x1295   :  { %3061 = vmatprep.subr.bf16.mxu1 %v12849_v17 }
0x1298   :  { %3062 = vmatpush1.bf16.msra.mxu1 %v12855_v7 }
0x1299   :  { %3063 = vmatprep.subr.bf16.mxu1 %v12544_v55 }
0x129c   :  { %3064 = vmatpush1.bf16.msra.mxu1 %v12550_v10 }
0x129d   :  { %3065 = vmatprep.subr.bf16.mxu1 %v12556_v33 }
0x12a0   :  { %3066 = vmatpush1.bf16.msra.mxu1 %v12562_v43 }
0x12e1   :  { %v9880_v14 = vpop.f32.mrb[40].mxu0 }
0x12e2   :  { %v2545_v60 = vpop.f32.mrb[41].mxu0  ;;  %2660 = vperm.xlu0 %10826, %v9880_v14   ;;  %2571 = vperm.xlu1 %10825, %v9880_v14  }
0x12e6   :  { %10829 = vset.pattern.permute.xlu0 %v15336_v19  ;;  %10827 = vset.pattern.permute.xlu1 %v15334_v11 }
0x12e7   :  { %2566 = vperm.xlu0 %10829, %v2545_v60   ;;  %2684 = vperm.xlu1 %10827, %v9880_v14  }
0x12e9   :  { %v9883_v48 = vpop.f32.mrb[42].mxu0 }
0x12ea   :  { %v2555_v2 = vpop.f32.mrb[43].mxu0 }
0x12eb   :  { %10832 = vset.pattern.permute.xlu0 %v15366_v22  ;;  %10828 = vset.pattern.permute.xlu1 %v15366_v22 }
0x12ec   :  { %2704 = vperm.xlu0 %10832, %v2545_v60   ;;  %2708 = vperm.xlu1 %10828, %v9880_v14  }
0x12f0   :  { %10833 = vset.pattern.permute.xlu0 %v15336_v19  ;;  %10830 = vset.pattern.permute.xlu1 %v15367_v49 }
0x12f1   :  { %2581 = vperm.xlu0 %10833, %v9883_v48   ;;  %2656 = vperm.xlu1 %10830, %v2545_v60  }
0x12f5   :  { %10838 = vset.pattern.permute.xlu0 %v15334_v11  ;;  %10831 = vset.pattern.permute.xlu1 %v15334_v11 }
0x12f6   :  { %2688 = vperm.xlu0 %10838, %v2555_v2   ;;  %2680 = vperm.xlu1 %10831, %v2545_v60  }
0x12fa   :  { %10840 = vset.pattern.permute.xlu0 %v15366_v22  ;;  %10834 = vset.pattern.permute.xlu1 %v15367_v49 }
0x12fb   :  { %2716 = vperm.xlu0 %10840, %v9883_v48   ;;  %2668 = vperm.xlu1 %10834, %v9883_v48  }
0x12ff   :  { %10835 = vset.pattern.permute.xlu1 %v15334_v11  ;;  %10842 = vset.pattern.permute.xlu0 %v15367_v49 }
0x1300   :  { %2692 = vperm.xlu1 %10835, %v9883_v48  }
0x1304   :  { %10836 = vset.pattern.permute.xlu1 %v15336_v19 }
0x1305   :  { %2576 = vperm.xlu1 %10836, %v2555_v2  }
0x1309   :  { %10837 = vset.pattern.permute.xlu1 %v15367_v49 }
0x130a   :  { %2664 = vperm.xlu1 %10837, %v2555_v2  }
0x130e   :  { %10839 = vset.pattern.permute.xlu1 %v15366_v22 }
0x130f   :  { %2712 = vperm.xlu1 %10839, %v2555_v2  }
0x1313   :  { %10841 = vset.pattern.permute.xlu1 %v15336_v19 }
0x1361   :  { %v2661_v55 = vpop.permute.xlu0 %2660  ;;  %v2572_v10 = vpop.permute.xlu1 %2571 }
0x1362   :  { %v2585_v41 = vmul.f32 %v12881_v56, %v2572_v10  ;;  %v2672_v58 = vmul.f32 %v12587_v9, %v2661_v55 }
0x1366   :  { %v2567_v33 = vpop.permute.xlu0 %2566  ;;  %v9890_v43 = vpop.f32.mrb[44].mxu1 }
0x1367   :  { %v2685_v51 = vpop.permute.xlu1 %2684  ;;  %v2640_v15 = vpop.f32.mrb[45].mxu1  ;;  %v2584_v14 = vmul.f32 %v12605_v18, %v2567_v33 }
0x1368   :  { %v9891_v38 = vpop.f32.mrb[46].mxu1  ;;  %v2696_v16 = vmul.f32 %v12593_v35, %v2685_v51 }
0x1369   :  { %v2643_v20 = vpop.f32.mrb[47].mxu1  ;;  %v2641_v19 = vadd.f32 %v2640_v15, %v2584_v14 }
0x136a   :  { %v2644_v40 = vadd.f32 %v2643_v20, %v2585_v41 }
0x136b   :  { %v2709_v3 = vpop.permute.xlu1 %2708  ;;  %v2705_v21 = vpop.permute.xlu0 %2704 }
0x136c   :  { %v2676_v1 = vadd.f32 %v2672_v58, %v2644_v40  ;;  %v2720_v8 = vmul.f32 %v12599_v13, %v2709_v3  ;;  %v2719_v40 = vmul.f32 %v12626_v36, %v2705_v21 }
0x136e   :  { %v2700_v37 = vadd.f32 %v2696_v16, %v2676_v1 }
0x1370   :  { %v2724_v60 = vadd.f32 %v2720_v8, %v2700_v37  ;;  %v2657_v48 = vpop.permute.xlu1 %2656  ;;  %v2582_v11 = vpop.permute.xlu0 %2581 }
0x1371   :  { %v2671_v10 = vmul.f32 %v12611_v0, %v2657_v48  ;;  %v2587_v16 = vmul.f32 %v12632_v52, %v2582_v11 }
0x1372   :  { %v2728_v2 = vmul.f32 0.125, %v2724_v60 }
0x1373   :  { %v2675_v20 = vadd.f32 %v2671_v10, %v2641_v19  ;;  %v2652_v14 = vadd.f32 %v9891_v38, %v2587_v16 }
0x1374   :  { %v2732_v55 = vsel %vm779_vm7, %v2728_v2, -1e+30 }
0x1375   :  { %v2681_v41 = vpop.permute.xlu1 %2680  ;;  %v2738_v51 = vsel %vm226_vm0, %v2732_v55, -inf  ;;  %v2689_v3 = vpop.permute.xlu0 %2688 }
0x1376   :  { %v2695_v58 = vmul.f32 %v12620_v53, %v2681_v41  ;;  %2739 = vmax.xlane.f32.xlu0 %v2738_v51 }
0x1378   :  { %v2699_v33 = vadd.f32 %v2695_v58, %v2675_v20 }
0x137a   :  { %v2669_v1 = vpop.permute.xlu1 %2668  ;;  %v2723_v37 = vadd.f32 %v2719_v40, %v2699_v33  ;;  %v2717_v48 = vpop.permute.xlu0 %2716 }
0x137b   :  { %v2674_v15 = vmul.f32 %v12638_v4, %v2669_v1  ;;  %v2722_v41 = vmul.f32 %v12653_v34, %v2717_v48 }
0x137c   :  { %v2727_v8 = vmul.f32 0.125, %v2723_v37 }
0x137d   :  { %v2678_v10 = vadd.f32 %v2674_v15, %v2652_v14  ;;  %v2697_v15 = vmul.f32 %v12675_v45, %v2689_v3 }
0x137e   :  { %v2731_v60 = vsel %vm778_vm8, %v2727_v8, -1e+30 }
0x137f   :  { %v2693_v19 = vpop.permute.xlu1 %2692  ;;  %v2735_v2 = vsel %vm226_vm0, %v2731_v60, -inf }
0x1380   :  { %v2698_v21 = vmul.f32 %v12647_v62, %v2693_v19  ;;  %2736 = vmax.xlane.f32.xlu1 %v2735_v2 }
0x1382   :  { %v2702_v11 = vadd.f32 %v2698_v21, %v2678_v10 }
0x1384   :  { %v2577_v51 = vpop.permute.xlu1 %2576  ;;  %v2726_v20 = vadd.f32 %v2722_v41, %v2702_v11 }
0x1385   :  { %v2586_v58 = vmul.f32 %v12659_v6, %v2577_v51 }
0x1386   :  { %v2730_v40 = vmul.f32 0.125, %v2726_v20 }
0x1387   :  { %v2649_v1 = vadd.f32 %v9890_v43, %v2586_v58 }
0x1388   :  { %v2734_v38 = vsel %vm781_vm10, %v2730_v40, -1e+30 }
0x1389   :  { %v2665_v33 = vpop.permute.xlu1 %2664  ;;  %v2744_v16 = vsel %vm226_vm0, %v2734_v38, -inf }
0x138a   :  { %v2673_v37 = vmul.f32 %v12669_v63, %v2665_v33  ;;  %2745 = vmax.xlane.f32.xlu0 %v2744_v16 }
0x138c   :  { %v2677_v8 = vadd.f32 %v2673_v37, %v2649_v1 }
0x138e   :  { %v2701_v14 = vadd.f32 %v2697_v15, %v2677_v8  ;;  %v2713_v48 = vpop.permute.xlu1 %2712 }
0x138f   :  { %v2721_v19 = vmul.f32 %v12681_v29, %v2713_v48 }
0x1391   :  { %v2725_v2 = vadd.f32 %v2721_v19, %v2701_v14 }
0x1393   :  { %v2729_v10 = vmul.f32 0.125, %v2725_v2 }
0x1395   :  { %v2733_v21 = vsel %vm780_vm9, %v2729_v10, -1e+30 }
0x1396   :  { %v2741_v41 = vsel %vm226_vm0, %v2733_v21, -inf }
0x1397   :  { %2742 = vmax.xlane.f32.xlu1 %v2741_v41 }
0x1403   :  { %v2740_v11 = vpop.xlane.xlu0 %2739 }
0x1404   :  { %v2748_v43 = vsub.f32 %v2732_v55, %v2740_v11 }
0x1406   :  { %v2753_v51 = vmul.f32 1.442695, %v2748_v43 }
0x1408   :  { %11029 = vpow2.f32 %v2753_v51 }
0x140d   :  { %v2737_v20 = vpop.xlane.xlu1 %2736 }
0x140e   :  { %v2747_v58 = vsub.f32 %v2731_v60, %v2737_v20 }
0x1410   :  { %v2751_v3 = vmul.f32 1.442695, %v2747_v58 }
0x1412   :  { %v11030_v40 = vpop.eup %11029  ;;  %11031 = vpow2.f32 %v2751_v3 }
0x1413   :  { %v2762_v33 = vsel %vm226_vm0, %v11030_v40, 0.0 }
0x1414   :  { %2763 = vadd.xlane.f32.xlu0 %v2762_v33 }
0x1417   :  { %v2746_v16 = vpop.xlane.xlu0 %2745 }
0x1418   :  { %v2750_v1 = vsub.f32 %v2734_v38, %v2746_v16 }
0x141a   :  { %v2757_v37 = vmul.f32 1.442695, %v2750_v1 }
0x141c   :  { %v11032_v15 = vpop.eup %11031  ;;  %11033 = vpow2.f32 %v2757_v37 }
0x141d   :  { %v2759_v8 = vsel %vm226_vm0, %v11032_v15, 0.0 }
0x141e   :  { %2760 = vadd.xlane.f32.xlu1 %v2759_v8 }
0x1424   :  { %v2743_v14 = vpop.xlane.xlu1 %2742 }
0x1425   :  { %v2749_v55 = vsub.f32 %v2733_v21, %v2743_v14 }
0x1426   :  { %v11034_v48 = vpop.eup %11033 }
0x1427   :  { %v2755_v19 = vmul.f32 1.442695, %v2749_v55  ;;  %v2768_v60 = vsel %vm226_vm0, %v11034_v48, 0.0 }
0x1428   :  { %2769 = vadd.xlane.f32.xlu0 %v2768_v60 }
0x1429   :  { %11035 = vpow2.f32 %v2755_v19 }
0x1433   :  { %v11036_v2 = vpop.eup %11035 }
0x1434   :  { %v2765_v10 = vsel %vm226_vm0, %v11036_v2, 0.0 }
0x1435   :  { %2766 = vadd.xlane.f32.xlu1 %v2765_v10 }
0x14a1   :  { %v2764_v41 = vpop.xlane.xlu0 %2763 }
0x14a2   :  { %v2772_v38 = vmax.f32 %v2764_v41, 1e-30 }
0x14a4   :  { %11037 = vrcp.f32 %v2772_v38 }
0x14ab   :  { %v2761_v11 = vpop.xlane.xlu1 %2760 }
0x14ac   :  { %v2771_v43 = vmax.f32 %v2761_v11, 1e-30 }
0x14ae   :  { %11039 = vrcp.f32 %v2771_v43  ;;  %v11038_v51 = vpop.eup %11037 }
0x14af   :  { %v2780_v58 = vmul.f32 %v11038_v51, %v11030_v40 }
0x14b1   :  { %v12916_v16 = vmul.f32 %v12161_v47, %v2780_v58 }
0x14b3   :  { %v2808_v14 = vmul.f32 %v12587_v9, %v12916_v16 }
0x14b5   :  { %v2770_v20 = vpop.xlane.xlu0 %2769  ;;  %v2814_v10 = vsel %vm226_vm0, %v2808_v14, 0.0 }
0x14b6   :  { %v2774_v21 = vmax.f32 %v2770_v20, 1e-30 }
0x14b8   :  { %v11040_v3 = vpop.eup %11039  ;;  %11041 = vrcp.f32 %v2774_v21 }
0x14b9   :  { %v2779_v33 = vmul.f32 %v11040_v3, %v11032_v15 }
0x14bb   :  { %v12919_v1 = vmul.f32 %v12151_v31, %v2779_v33 }
0x14bd   :  { %v2807_v37 = vmul.f32 %v12611_v0, %v12919_v1  ;;  %v2791_v8 = vmul.f32 %v12605_v18, %v12919_v1  ;;  %v2787_v40 = vpack.c.bf16 %v12916_v16, %v12919_v1  ;;  %v2823_v19 = vmul.f32 %v12620_v53, %v12919_v1 }
0x14be   :  { %v2824_v18 = vmul.f32 %v12593_v35, %v12916_v16  ;;  %v2839_v11 = vmul.f32 %v12626_v36, %v12919_v1  ;;  %v2840_v53 = vmul.f32 %v12599_v13, %v12916_v16 }
0x14bf   :  { %v2811_v15 = vsel %vm226_vm0, %v2807_v37, 0.0  ;;  %v2795_v55 = vsel %vm226_vm0, %v2791_v8, 0.0  ;;  %v2827_v38 = vsel %vm226_vm0, %v2823_v19, 0.0 }
0x14c0   :  { %2812 = vadd.xlane.f32.xlu0 %v2811_v15  ;;  %2796 = vadd.xlane.f32.xlu1 %v2795_v55  ;;  %v2830_v51 = vsel %vm226_vm0, %v2824_v18, 0.0  ;;  %v2843_v35 = vsel %vm226_vm0, %v2839_v11, 0.0  ;;  %v2846_v36 = vsel %vm226_vm0, %v2840_v53, 0.0 }
0x14c2   :  { %v11042_v60 = vpop.eup %11041  ;;  %v2767_v0 = vpop.xlane.xlu1 %2766 }
0x14c3   :  { %v2782_v9 = vmul.f32 %v11042_v60, %v11034_v48  ;;  %v2773_v41 = vmax.f32 %v2767_v0, 1e-30  ;;  %v2792_v48 = vmul.f32 %v12881_v56, %v12916_v16  ;;  %v13022_v16 = vld [vmem:[%s15299_s10] sm:$0xf] }
0x14c4   :  { %2815 = vadd.xlane.f32.xlu0 %v2814_v10  ;;  %2828 = vadd.xlane.f32.xlu1 %v2827_v38 }
0x14c5   :  { %11043 = vrcp.f32 %v2773_v41  ;;  %v12942_v43 = vmul.f32 %v12181_v44, %v2782_v9  ;;  %v2798_v20 = vsel %vm226_vm0, %v2792_v48, 0.0 }
0x14c7   :  { %v2810_v58 = vmul.f32 %v12638_v4, %v12942_v43  ;;  %v2794_v13 = vmul.f32 %v12632_v52, %v12942_v43  ;;  %v2826_v37 = vmul.f32 %v12647_v62, %v12942_v43  ;;  %v2842_v60 = vmul.f32 %v12653_v34, %v12942_v43 }
0x14c8   :  { %2831 = vadd.xlane.f32.xlu0 %v2830_v51  ;;  %2844 = vadd.xlane.f32.xlu1 %v2843_v35  ;;  %v2463_v34 = vadd.f32 %v12823_v32, %v11957_v59 }
0x14c9   :  { %v2820_v3 = vsel %vm226_vm0, %v2810_v58, 0.0  ;;  %v2804_v33 = vsel %vm226_vm0, %v2794_v13, 0.0  ;;  %v2836_v4 = vsel %vm226_vm0, %v2826_v37, 0.0  ;;  %v2852_v0 = vsel %vm226_vm0, %v2842_v60, 0.0 }
0x14cc   :  { %2847 = vadd.xlane.f32.xlu0 %v2846_v36  ;;  %2799 = vadd.xlane.f32.xlu1 %v2798_v20 }
0x14cf   :  { %v11044_v21 = vpop.eup %11043 }
0x14d0   :  { %v2781_v8 = vmul.f32 %v11044_v21, %v11036_v2  ;;  %2821 = vadd.xlane.f32.xlu0 %v2820_v3  ;;  %2805 = vadd.xlane.f32.xlu1 %v2804_v33 }
0x14d2   :  { %v12959_v14 = vmul.f32 %v12184_v12, %v2781_v8 }
0x14d4   :  { %2837 = vadd.xlane.f32.xlu0 %v2836_v4  ;;  %v2793_v52 = vmul.f32 %v12659_v6, %v12959_v14  ;;  %v2809_v15 = vmul.f32 %v12669_v63, %v12959_v14  ;;  %v2788_v55 = vpack.c.bf16 %v12942_v43, %v12959_v14  ;;  %v2825_v19 = vmul.f32 %v12675_v45, %v12959_v14 }
0x14d5   :  { %v2841_v63 = vmul.f32 %v12681_v29, %v12959_v14  ;;  %v2459_v45 = vadd.f32 %v12820_v61, %v11957_v59 }
0x14d6   :  { %v2801_v62 = vsel %vm226_vm0, %v2793_v52, 0.0  ;;  %v2817_v2 = vsel %vm226_vm0, %v2809_v15, 0.0  ;;  %v2833_v6 = vsel %vm226_vm0, %v2825_v19, 0.0 }
0x14d7   :  { %2802 = vadd.xlane.f32.xlu1 %v2801_v62  ;;  %v2849_v10 = vsel %vm226_vm0, %v2841_v63, 0.0  ;;  %v2790_v48 = vpack.c.bf16 %v2463_v34, %v2459_v45 }
0x14d8   :  { %2818 = vadd.xlane.f32.xlu0 %v2817_v2 }
0x14db   :  { %2834 = vadd.xlane.f32.xlu1 %v2833_v6 }
0x14dc   :  { %2853 = vadd.xlane.f32.xlu0 %v2852_v0 }
0x14df   :  { %2850 = vadd.xlane.f32.xlu1 %v2849_v10 }
0x14f0   :  { %3023 = vrot.lane.b32.xlu1 %v12804_v26, %s11568_s11 }
0x14f2   :  { %3025 = vrot.lane.b32.xlu0 %v12807_v46, %s11568_s11 }
0x14f4   :  { %3027 = vrot.lane.b32.xlu1 %v2459_v45, %s11568_s11 }
0x14f8   :  { %3029 = vrot.lane.b32.xlu1 %v2463_v34, %s11568_s11 }
0x154d   :  { %v2813_v29 = vpop.xlane.xlu0 %2812  ;;  %v2797_v18 = vpop.xlane.xlu1 %2796 }
0x154e   :  { %v2855_v38 = vsel %vm906_vm15, %v2797_v18, %v2813_v29 }
0x1551   :  { %v2816_v9 = vpop.xlane.xlu0 %2815  ;;  %v2829_v41 = vpop.xlane.xlu1 %2828 }
0x1552   :  { %v2859_v26 = vsel %vm911_vm1, %v2855_v38, %v2829_v41 }
0x1555   :  { %v2832_v11 = vpop.xlane.xlu0 %2831  ;;  %v2845_v61 = vpop.xlane.xlu1 %2844 }
0x1556   :  { %v2863_v53 = vsel %vm916_vm2, %v2859_v26, %v2845_v61 }
0x1557   :  { %9894 = vmatprep.mubr.msk.f32.mxu0 %vm921_vm4, %v2863_v53 }
0x1559   :  { %v2848_v46 = vpop.xlane.xlu0 %2847  ;;  %v2800_v43 = vpop.xlane.xlu1 %2799 }
0x155a   :  { %v2856_v32 = vsel %vm906_vm15, %v2800_v43, %v2816_v9 }
0x155b   :  { %v2860_v51 = vsel %vm911_vm1, %v2856_v32, %v2832_v11 }
0x155c   :  { %v2864_v35 = vsel %vm916_vm2, %v2860_v51, %v2848_v46 }
0x155d   :  { %v2822_v36 = vpop.xlane.xlu0 %2821  ;;  %9895 = vmatmul.mubr.msk.f32.vlgmr.msra.gmra.mrb[44].mxu0 %vm921_vm4, %v2864_v35  ;;  %v2806_v20 = vpop.xlane.xlu1 %2805 }
0x155e   :  { %9901 = vmatpush3.bf16.msra.mxu0 %v12812_v30  ;;  %v2858_v8 = vsel %vm906_vm15, %v2806_v20, %v2822_v36 }
0x155f   :  { %9902 = vmatprep.subr.bf16.mxu0 %v2790_v48 }
0x1561   :  { %v2838_v58 = vpop.xlane.xlu0 %2837 }
0x1562   :  { %9903 = vmatpush3.bf16.msra.mxu0 %v2790_v48  ;;  %v2862_v52 = vsel %vm911_vm1, %v2858_v8, %v2838_v58  ;;  %v15368_v58 = vmov 0  }
0x1563   :  { %10509 = vmatprep.subr.bf16.mxu0 %v11914_v23 }
0x1564   :  { %v2803_v13 = vpop.xlane.xlu1 %2802 }
0x1565   :  { %v2819_v21 = vpop.xlane.xlu0 %2818 }
0x1566   :  { %v2857_v33 = vsel %vm906_vm15, %v2803_v13, %v2819_v21 }
0x1568   :  { %v2835_v3 = vpop.xlane.xlu1 %2834 }
0x1569   :  { %v2854_v37 = vpop.xlane.xlu0 %2853  ;;  %v2861_v14 = vsel %vm911_vm1, %v2857_v33, %v2835_v3 }
0x156a   :  { %v2866_v15 = vsel %vm916_vm2, %v2862_v52, %v2854_v37 }
0x156c   :  { %v2851_v4 = vpop.xlane.xlu1 %2850 }
0x156d   :  { %v2865_v30 = vsel %vm916_vm2, %v2861_v14, %v2851_v4  ;;  %v3026_v38 = vpop.permute.xlu0 %3025 }
0x156e   :  { %9897 = vmatprep.mubr.msk.f32.mxu0 %vm921_vm4, %v2865_v30 }
0x156f   :  { %9898 = vmatmul.mubr.msk.f32.gmra.mrb[46].mxu0 %vm921_vm4, %v2866_v15 }
0x1570   :  { %9904 = vmatprep.mubr.msk.bf16.mxu0 %vm226_vm0, %v2787_v40 }
0x1573   :  { %9905 = vmatmul.mubr.msk.bf16.vlgmr.msra.gmra.mrb[48].mxu0 %vm226_vm0, %v2788_v55  ;;  %v3024_v55 = vpop.permute.xlu1 %3023 }
0x1574   :  { %10511 = vmatpush3.bf16.msra.mxu0 %v11914_v23 }
0x1575   :  { %10513 = vmatprep.subr.bf16.mxu0 %v11919_v25 }
0x1577   :  { %v3028_v19 = vpop.permute.xlu1 %3027 }
0x1578   :  { %10515 = vmatpush3.bf16.msra.mxu0 %v11919_v25 }
0x1579   :  { %10517 = vmatprep.subr.bf16.mxu0 %v11930_v28 }
0x157b   :  { %v3030_v18 = vpop.permute.xlu1 %3029 }
0x157c   :  { %10519 = vmatpush3.bf16.msra.mxu0 %v11930_v28 }
0x157d   :  { %10521 = vmatprep.subr.bf16.mxu0 %v11944_v50 }
0x1580   :  { %10523 = vmatpush3.bf16.msra.mxu0 %v11944_v50 }
0x1581   :  { %9938 = vmatprep.subr.msk.mxu0 %vm934_vm6, %v13022_v16 }
0x1630   :  { %v9896_v1 = vpop.f32.mrb[44].mxu0 }
0x1631   :  { %v2945_v40 = vpop.f32.mrb[45].mxu0 }
0x1642   :  { %v9899_v62 = vpop.f32.mrb[46].mxu0 }
0x1643   :  { %v2955_v2 = vpop.f32.mrb[47].mxu0 }
0x1646   :  { %v9906_v60 = vpop.f32.mrb[48].mxu0 }
0x1647   :  { %v3013_v6 = vadd.f32 %v9906_v60, %v2955_v2  ;;  %v3004_v63 = vpop.f32.mrb[49].mxu0 }
0x1648   :  { %v3005_v0 = vadd.f32 %v3004_v63, %v2945_v40  ;;  %v9907_v10 = vpop.f32.mrb[50].mxu0 }
0x1649   :  { %v3037_v45 = vadd.f32 %v3028_v19, %v3013_v6  ;;  %v3016_v34 = vadd.f32 %v9907_v10, %v9899_v62  ;;  %v3007_v29 = vpop.f32.mrb[51].mxu0  ;;  %v13070_v10 = vld [vmem:[%s15364_s5 + $0x24] ss:$8 sps:$4 sm:$0xff]  }
0x164a   :  { %v3035_v9 = vadd.f32 %v3024_v55, %v3005_v0  ;;  %v3008_v41 = vadd.f32 %v9896_v1, %v3007_v29 }
0x164b   :  { %v3045_v26 = vmul.f32 0.01, %v3037_v45  ;;  %v3038_v11 = vadd.f32 %v3030_v18, %v3016_v34  ;;  %vm3041_vm12 = vcmp.ge.f32.partialorder %v3037_v45, 0.0  ;;  %v15369_v34 = vmov 2  }
0x164c   :  { %v3043_v61 = vmul.f32 0.01, %v3035_v9  ;;  %v3036_v53 = vadd.f32 %v3026_v38, %v3008_v41  ;;  %vm3039_vm13 = vcmp.ge.f32.partialorder %v3035_v9, 0.0 }
0x164d   :  { %vm3042_vm14 = vcmp.ge.f32.partialorder %v3038_v11, 0.0  ;;  %v3046_v46 = vmul.f32 0.01, %v3038_v11  ;;  %v3049_v32 = vsel %vm3041_vm12, %v3037_v45, %v3045_v26 }
0x164e   :  { %vm3040_vm5 = vcmp.ge.f32.partialorder %v3036_v53, 0.0  ;;  %v3044_v43 = vmul.f32 0.01, %v3036_v53  ;;  %v3047_v35 = vsel %vm3039_vm13, %v3035_v9, %v3043_v61 }
0x164f   :  { %v3050_v51 = vsel %vm3042_vm14, %v3038_v11, %v3046_v46 }
0x1650   :  { %v3048_v48 = vsel %vm3040_vm5, %v3036_v53, %v3044_v43  ;;  %v3052_v36 = vpack.c.bf16 %v3050_v51, %v3049_v32  ;;  %v13113_v32 = vld [vmem:[%s15365_s18 + $0x28] sm:$0xff] }
0x1651   :  { %v3051_v20 = vpack.c.bf16 %v3048_v48, %v3047_v35 }
0x1653   :  { %9190 = vmatmul.mubr.msk.bf16.vlgmr.msra.gmra.mrb[48].mxu1 %vm433_vm3, %v3051_v20 }
0x1654   :  { %3101 = vmatprep.mubr.bf16.mxu1 %v15368_v58 }
0x165b   :  { %9191 = vmatmul.mubr.msk.bf16.gmra.mrb[52].mxu1 %vm433_vm3, %v3052_v36  ;;  %v13119_v36 = vld [vmem:[%s15365_s18 + $0x48] sm:$0xff] }
0x1726   :  { %v3093_v13 = vpop.f32.mrb[48].mxu1 }
0x1727   :  { %v3094_v21 = vadd.f32 %v3093_v13, %v11955_v57  ;;  %v3095_v3 = vpop.f32.mrb[49].mxu1 }
0x1728   :  { %v3097_v33 = vpop.f32.mrb[50].mxu1  ;;  %v13033_v14 = vadd.f32 %v3095_v3, %v11957_v59 }
0x1729   :  { %v3098_v37 = vadd.f32 %v3097_v33, %v11955_v57  ;;  %v3099_v8 = vpop.f32.mrb[51].mxu1  ;;  %9924 = vmatprep.mubr.msk.f32.mxu0 %vm433_vm3, %v3094_v21  ;;  %v13125_v33 = vld [vmem:[%s15365_s18 + $0x68] sm:$0xff] }
0x172a   :  { %v13036_v4 = vadd.f32 %v3099_v8, %v11957_v59  ;;  %v13131_v8 = vld [vmem:[%s15365_s18] sm:$0xff] }
0x172b   :  { %v3112_v52 = vpack.c.bf16 %v3098_v37, %v3094_v21  ;;  %9925 = vmatmul.mubr.msk.f32.vlgmr.msra.gmra.mrb[52].mxu0 %vm433_vm3, %v3098_v37 }
0x172c   :  { %v13041_v30 = vpack.c.bf16 %v13036_v4, %v13033_v14  ;;  %9939 = vmatpush3.msk.msra.mxu0 %vm934_vm6, %v13022_v16 }
0x172d   :  { %3237 = vrot.lane.b32.xlu0 %v3112_v52, %s11568_s11  ;;  %9934 = vmatprep.mubr.msk.bf16.mxu1 %vm433_vm3, %v3112_v52 }
0x172e   :  { %v3103_v15 = vpop.f32.mrb[52].mxu1  ;;  %9946 = vmatprep.subr.bf16.mxu0 %v13041_v30 }
0x172f   :  { %v3104_v1 = vadd.f32 %v3103_v15, %v11955_v57  ;;  %v13049_v40 = vpop.f32.mrb[53].mxu1 }
0x1730   :  { %v3107_v55 = vpop.f32.mrb[54].mxu1 }
0x1731   :  { %v3108_v62 = vadd.f32 %v3107_v55, %v11955_v57  ;;  %v13052_v2 = vpop.f32.mrb[55].mxu1  ;;  %9927 = vmatprep.mubr.msk.f32.mxu0 %vm433_vm3, %v3104_v1 }
0x1733   :  { %v3113_v19 = vpack.c.bf16 %v3108_v62, %v3104_v1  ;;  %9928 = vmatmul.mubr.msk.f32.gmra.mrb[54].mxu0 %vm433_vm3, %v3108_v62  ;;  %v13137_v62 = vld [vmem:[%s15365_s18 + $0x20] sm:$0xff] }
0x1735   :  { %3239 = vrot.lane.b32.xlu1 %v3113_v19, %s11568_s11 }
0x179f   :  { %v3238_v60 = vpop.permute.xlu0 %3237 }
0x17a0   :  { %10740 = vmatprep.subr.msk.bf16.mxu1 %vm433_vm3, %v3238_v60  ;;  %v3248_v6 = vsel %vm433_vm3, %v3238_v60, 0 }
0x17a1   :  { %9931 = vmatpush3.bf16.xpose.msra.mxu1 %v3248_v6 }
0x17a7   :  { %v3240_v63 = vpop.permute.xlu1 %3239 }
0x17a8   :  { %10741 = vmatprep.subr.msk.bf16.mxu1 %vm433_vm3, %v3240_v63  ;;  %v3251_v0 = vsel %vm433_vm3, %v3240_v63, 0 }
0x17a9   :  { %9933 = vmatpush3.bf16.xpose.msra.mxu1 %v3251_v0 }
0x17aa   :  { %3706 = vmatprep.subr.bf16.mxu1 %v12835_v42  ;;  %v13076_v42 = vld [vmem:[%s15364_s5 + $0x20] ss:$8 sps:$4 sm:$0xff]  }
0x17b0   :  { %9935 = vmatmul.mubr.msk.bf16.vlgmr.msra.gmra.mrb[56].mxu1 %vm433_vm3, %v3113_v19 }
0x17b1   :  { %3707 = vmatpush1.bf16.msra.mxu1 %v12842_v5  ;;  %3738 = vmatprep.mubr.bf16.mxu1 %v15368_v58  ;;  %v13082_v5 = vld [vmem:[%s15364_s5 + $0x34] ss:$8 sps:$4 sm:$0xff]  }
0x17b2   :  { %3708 = vmatprep.subr.bf16.mxu1 %v12849_v17  ;;  %v13088_v17 = vld [vmem:[%s15364_s5 + $0x30] ss:$8 sps:$4 sm:$0xff]  }
0x17b5   :  { %3709 = vmatpush1.bf16.msra.mxu1 %v12855_v7 }
0x17b6   :  { %3710 = vmatprep.subr.bf16.mxu1 %v13070_v10 }
0x17b9   :  { %3711 = vmatpush1.bf16.msra.mxu1 %v13076_v42 }
0x17ba   :  { %3712 = vmatprep.subr.bf16.mxu1 %v13082_v5 }
0x17bd   :  { %3713 = vmatpush1.bf16.msra.mxu1 %v13088_v17 }
0x17fe   :  { %v9926_v7 = vpop.f32.mrb[52].mxu0 }
0x17ff   :  { %v3192_v45 = vpop.f32.mrb[53].mxu0  ;;  %3307 = vperm.xlu0 %10842, %v9926_v7   ;;  %3218 = vperm.xlu1 %10841, %v9926_v7  }
0x1803   :  { %10845 = vset.pattern.permute.xlu0 %v15368_v58  ;;  %10843 = vset.pattern.permute.xlu1 %v15369_v34 }
0x1804   :  { %3213 = vperm.xlu0 %10845, %v3192_v45   ;;  %3331 = vperm.xlu1 %10843, %v9926_v7  }
0x1806   :  { %v9929_v29 = vpop.f32.mrb[54].mxu0 }
0x1807   :  { %v3202_v18 = vpop.f32.mrb[55].mxu0 }
0x1808   :  { %10848 = vset.pattern.permute.xlu0 %v15366_v22  ;;  %10844 = vset.pattern.permute.xlu1 %v15366_v22 }
0x1809   :  { %3351 = vperm.xlu0 %10848, %v3192_v45   ;;  %3355 = vperm.xlu1 %10844, %v9926_v7  }
0x180d   :  { %10849 = vset.pattern.permute.xlu0 %v15368_v58  ;;  %10846 = vset.pattern.permute.xlu1 %v15367_v49 }
0x180e   :  { %3228 = vperm.xlu0 %10849, %v9929_v29   ;;  %3303 = vperm.xlu1 %10846, %v3192_v45  }
0x1812   :  { %10854 = vset.pattern.permute.xlu0 %v15369_v34  ;;  %10847 = vset.pattern.permute.xlu1 %v15369_v34 }
0x1813   :  { %3335 = vperm.xlu0 %10854, %v3202_v18   ;;  %3327 = vperm.xlu1 %10847, %v3192_v45  }
0x1817   :  { %10856 = vset.pattern.permute.xlu0 %v15366_v22  ;;  %10850 = vset.pattern.permute.xlu1 %v15367_v49 }
0x1818   :  { %3363 = vperm.xlu0 %10856, %v9929_v29   ;;  %3315 = vperm.xlu1 %10850, %v9929_v29  }
0x181c   :  { %10851 = vset.pattern.permute.xlu1 %v15369_v34  ;;  %10858 = vset.pattern.permute.xlu0 %v15367_v49 }
0x181d   :  { %3339 = vperm.xlu1 %10851, %v9929_v29   ;;  %v13146_v29 = vld [vmem:[%s15365_s18 + $0x40] sm:$0xff] }
0x1821   :  { %10852 = vset.pattern.permute.xlu1 %v15368_v58 }
0x1822   :  { %3223 = vperm.xlu1 %10852, %v3202_v18  }
0x1826   :  { %10853 = vset.pattern.permute.xlu1 %v15367_v49 }
0x1827   :  { %3311 = vperm.xlu1 %10853, %v3202_v18  }
0x182b   :  { %10855 = vset.pattern.permute.xlu1 %v15366_v22 }
0x182c   :  { %3359 = vperm.xlu1 %10855, %v3202_v18  }
0x1830   :  { %10857 = vset.pattern.permute.xlu1 %v15368_v58 }
0x187e   :  { %v3308_v9 = vpop.permute.xlu0 %3307  ;;  %v3219_v41 = vpop.permute.xlu1 %3218 }
0x187f   :  { %v3232_v53 = vmul.f32 %v12881_v56, %v3219_v41  ;;  %v3319_v51 = vmul.f32 %v13113_v32, %v3308_v9  ;;  %v13152_v9 = vld [vmem:[%s15365_s18 + $0x60] sm:$0xff] }
0x1883   :  { %v3214_v38 = vpop.permute.xlu0 %3213  ;;  %v13107_v26 = vpop.f32.mrb[56].mxu1 }
0x1884   :  { %v3332_v11 = vpop.permute.xlu1 %3331  ;;  %v3287_v61 = vpop.f32.mrb[57].mxu1  ;;  %v3231_v52 = vmul.f32 %v13131_v8, %v3214_v38 }
0x1885   :  { %v9937_v46 = vpop.f32.mrb[58].mxu1  ;;  %v3343_v20 = vmul.f32 %v13119_v36, %v3332_v11 }
0x1886   :  { %v3290_v43 = vpop.f32.mrb[59].mxu1  ;;  %v3288_v6 = vadd.f32 %v3287_v61, %v3231_v52  ;;  %v13158_v61 = vld [vmem:[%s15365_s18 + $0x18] sm:$0xff] }
0x1887   :  { %v3291_v35 = vadd.f32 %v3290_v43, %v3232_v53 }
0x1888   :  { %v3356_v48 = vpop.permute.xlu1 %3355  ;;  %v3352_v21 = vpop.permute.xlu0 %3351 }
0x1889   :  { %v3323_v13 = vadd.f32 %v3319_v51, %v3291_v35  ;;  %v3367_v37 = vmul.f32 %v13125_v33, %v3356_v48  ;;  %v3366_v41 = vmul.f32 %v13152_v9, %v3352_v21  ;;  %v13164_v35 = vld [vmem:[%s15365_s18 + $0x38] sm:$0xff] }
0x188b   :  { %v3347_v3 = vadd.f32 %v3343_v20, %v3323_v13 }
0x188d   :  { %v3371_v15 = vadd.f32 %v3367_v37, %v3347_v3  ;;  %v3304_v1 = vpop.permute.xlu1 %3303  ;;  %v3229_v60 = vpop.permute.xlu0 %3228 }
0x188e   :  { %v3318_v19 = vmul.f32 %v13137_v62, %v3304_v1  ;;  %v3234_v53 = vmul.f32 %v13158_v61, %v3229_v60  ;;  %v13173_v1 = vld [vmem:[%s15365_s18 + $0x58] sm:$0xff] }
0x188f   :  { %v3375_v55 = vmul.f32 0.125, %v3371_v15 }
0x1890   :  { %v3322_v45 = vadd.f32 %v3318_v19, %v3288_v6  ;;  %v3299_v13 = vadd.f32 %v9937_v46, %v3234_v53  ;;  %v13179_v46 = vld [vmem:[%s15365_s18 + $0x78] sm:$0xff] }
0x1891   :  { %v3379_v63 = vsel %vm779_vm7, %v3375_v55, -1e+30 }
0x1892   :  { %v3328_v0 = vpop.permute.xlu1 %3327  ;;  %v3385_v7 = vsel %vm226_vm0, %v3379_v63, -inf  ;;  %v3336_v11 = vpop.permute.xlu0 %3335 }
0x1893   :  { %v3342_v18 = vmul.f32 %v13146_v29, %v3328_v0  ;;  %3386 = vmax.xlane.f32.xlu0 %v3385_v7  ;;  %v13185_v7 = vld [vmem:[%s15365_s18 + $0x10] sm:$0xff] }
0x1895   :  { %v3346_v38 = vadd.f32 %v3342_v18, %v3322_v45 }
0x1897   :  { %v3316_v43 = vpop.permute.xlu1 %3315  ;;  %v3370_v51 = vadd.f32 %v3366_v41, %v3346_v38  ;;  %v3364_v3 = vpop.permute.xlu0 %3363 }
0x1898   :  { %v3321_v48 = vmul.f32 %v13164_v35, %v3316_v43  ;;  %v3369_v19 = vmul.f32 %v13179_v46, %v3364_v3 }
0x1899   :  { %v3374_v20 = vmul.f32 0.125, %v3370_v51  ;;  %v13195_v51 = vld [vmem:[%s15365_s18 + $0x30] sm:$0xff] }
0x189a   :  { %v3325_v15 = vadd.f32 %v3321_v48, %v3299_v13 }
0x189b   :  { %v3378_v21 = vsel %vm778_vm8, %v3374_v20, -1e+30  ;;  %v13201_v20 = vld [vmem:[%s15365_s18 + $0x50] sm:$0xff] }
0x189c   :  { %v3340_v37 = vpop.permute.xlu1 %3339  ;;  %v3382_v52 = vsel %vm226_vm0, %v3378_v21, -inf  ;;  %v3344_v13 = vmul.f32 %v13201_v20, %v3336_v11 }
0x189d   :  { %v3345_v55 = vmul.f32 %v13173_v1, %v3340_v37  ;;  %3383 = vmax.xlane.f32.xlu1 %v3382_v52 }
0x189f   :  { %v3349_v60 = vadd.f32 %v3345_v55, %v3325_v15 }
0x18a1   :  { %v3224_v6 = vpop.permute.xlu1 %3223  ;;  %v3373_v0 = vadd.f32 %v3369_v19, %v3349_v60 }
0x18a2   :  { %v3233_v45 = vmul.f32 %v13185_v7, %v3224_v6 }
0x18a3   :  { %v3377_v18 = vmul.f32 0.125, %v3373_v0 }
0x18a4   :  { %v3296_v43 = vadd.f32 %v13107_v26, %v3233_v45  ;;  %v13207_v26 = vld [vmem:[%s15365_s18 + $0x70] sm:$0xff] }
0x18a5   :  { %v3381_v41 = vsel %vm781_vm10, %v3377_v18, -1e+30 }
0x18a6   :  { %v3312_v38 = vpop.permute.xlu1 %3311  ;;  %v3391_v53 = vsel %vm226_vm0, %v3381_v41, -inf }
0x18a7   :  { %v3320_v48 = vmul.f32 %v13195_v51, %v3312_v38  ;;  %3392 = vmax.xlane.f32.xlu0 %v3391_v53 }
0x18a9   :  { %v3324_v3 = vadd.f32 %v3320_v48, %v3296_v43 }
0x18ab   :  { %v3348_v37 = vadd.f32 %v3344_v13, %v3324_v3  ;;  %v3360_v52 = vpop.permute.xlu1 %3359 }
0x18ac   :  { %v3368_v15 = vmul.f32 %v13207_v26, %v3360_v52 }
0x18ae   :  { %v3372_v55 = vadd.f32 %v3368_v15, %v3348_v37 }
0x18b0   :  { %v3376_v19 = vmul.f32 0.125, %v3372_v55 }
0x18b2   :  { %v3380_v60 = vsel %vm780_vm9, %v3376_v19, -1e+30 }
0x18b3   :  { %v3388_v6 = vsel %vm226_vm0, %v3380_v60, -inf }
0x18b4   :  { %3389 = vmax.xlane.f32.xlu1 %v3388_v6 }
0x1920   :  { %v3387_v0 = vpop.xlane.xlu0 %3386 }
0x1921   :  { %v3395_v11 = vsub.f32 %v3379_v63, %v3387_v0 }
0x1923   :  { %v3400_v45 = vmul.f32 1.442695, %v3395_v11 }
0x1925   :  { %11045 = vpow2.f32 %v3400_v45 }
0x192a   :  { %v3384_v18 = vpop.xlane.xlu1 %3383 }
0x192b   :  { %v3394_v38 = vsub.f32 %v3378_v21, %v3384_v18 }
0x192d   :  { %v3398_v53 = vmul.f32 1.442695, %v3394_v38 }
0x192f   :  { %v11046_v43 = vpop.eup %11045  ;;  %11047 = vpow2.f32 %v3398_v53 }
0x1930   :  { %v3409_v48 = vsel %vm226_vm0, %v11046_v43, 0.0 }
0x1931   :  { %3410 = vadd.xlane.f32.xlu0 %v3409_v48 }
0x1934   :  { %v3393_v13 = vpop.xlane.xlu0 %3392 }
0x1935   :  { %v3397_v3 = vsub.f32 %v3381_v41, %v3393_v13 }
0x1937   :  { %v3404_v37 = vmul.f32 1.442695, %v3397_v3 }
0x1939   :  { %v11048_v52 = vpop.eup %11047  ;;  %11049 = vpow2.f32 %v3404_v37 }
0x193a   :  { %v3406_v15 = vsel %vm226_vm0, %v11048_v52, 0.0 }
0x193b   :  { %3407 = vadd.xlane.f32.xlu1 %v3406_v15 }
0x1941   :  { %v3390_v55 = vpop.xlane.xlu1 %3389 }
0x1942   :  { %v3396_v63 = vsub.f32 %v3380_v60, %v3390_v55 }
0x1943   :  { %v11050_v19 = vpop.eup %11049 }
0x1944   :  { %v3402_v6 = vmul.f32 1.442695, %v3396_v63  ;;  %v3415_v21 = vsel %vm226_vm0, %v11050_v19, 0.0 }
0x1945   :  { %3416 = vadd.xlane.f32.xlu0 %v3415_v21 }
0x1946   :  { %11051 = vpow2.f32 %v3402_v6 }
0x1950   :  { %v11052_v0 = vpop.eup %11051 }
0x1951   :  { %v3412_v11 = vsel %vm226_vm0, %v11052_v0, 0.0 }
0x1952   :  { %3413 = vadd.xlane.f32.xlu1 %v3412_v11 }
0x19be   :  { %v3411_v45 = vpop.xlane.xlu0 %3410 }
0x19bf   :  { %v3419_v41 = vmax.f32 %v3411_v45, 1e-30 }
0x19c1   :  { %11053 = vrcp.f32 %v3419_v41 }
0x19c8   :  { %v3408_v18 = vpop.xlane.xlu1 %3407 }
0x19c9   :  { %v3418_v38 = vmax.f32 %v3408_v18, 1e-30 }
0x19cb   :  { %11055 = vrcp.f32 %v3418_v38  ;;  %v11054_v53 = vpop.eup %11053 }
0x19cc   :  { %v3427_v13 = vmul.f32 %v11054_v53, %v11046_v43 }
0x19ce   :  { %v13218_v15 = vmul.f32 %v12161_v47, %v3427_v13 }
0x19d0   :  { %v3455_v21 = vmul.f32 %v13113_v32, %v13218_v15  ;;  %v3471_v53 = vmul.f32 %v13119_v36, %v13218_v15 }
0x19d2   :  { %v3417_v48 = vpop.xlane.xlu0 %3416  ;;  %v3461_v38 = vsel %vm226_vm0, %v3455_v21, 0.0 }
0x19d3   :  { %v3421_v60 = vmax.f32 %v3417_v48, 1e-30 }
0x19d5   :  { %v11056_v3 = vpop.eup %11055  ;;  %11057 = vrcp.f32 %v3421_v60 }
0x19d6   :  { %v3426_v37 = vmul.f32 %v11056_v3, %v11048_v52 }
0x19d8   :  { %v13221_v55 = vmul.f32 %v12151_v31, %v3426_v37  ;;  %v3487_v37 = vmul.f32 %v13125_v33, %v13218_v15 }
0x19da   :  { %v3454_v63 = vmul.f32 %v13137_v62, %v13221_v55  ;;  %v3438_v6 = vmul.f32 %v13131_v8, %v13221_v55  ;;  %v3434_v43 = vpack.c.bf16 %v13218_v15, %v13221_v55  ;;  %v3470_v45 = vmul.f32 %v13146_v29, %v13221_v55 }
0x19db   :  { %v3486_v3 = vmul.f32 %v13152_v9, %v13221_v55 }
0x19dc   :  { %v3458_v52 = vsel %vm226_vm0, %v3454_v63, 0.0  ;;  %v3442_v11 = vsel %vm226_vm0, %v3438_v6, 0.0  ;;  %v3474_v60 = vsel %vm226_vm0, %v3470_v45, 0.0  ;;  %v3477_v6 = vsel %vm226_vm0, %v3471_v53, 0.0 }
0x19dd   :  { %3459 = vadd.xlane.f32.xlu0 %v3458_v52  ;;  %3443 = vadd.xlane.f32.xlu1 %v3442_v11  ;;  %v3490_v21 = vsel %vm226_vm0, %v3486_v3, 0.0  ;;  %v3493_v52 = vsel %vm226_vm0, %v3487_v37, 0.0 }
0x19df   :  { %v11058_v41 = vpop.eup %11057  ;;  %v3414_v18 = vpop.xlane.xlu1 %3413 }
0x19e0   :  { %v3429_v48 = vmul.f32 %v11058_v41, %v11050_v19  ;;  %v3420_v13 = vmax.f32 %v3414_v18, 1e-30  ;;  %v3439_v19 = vmul.f32 %v12881_v56, %v13218_v15 }
0x19e1   :  { %3462 = vadd.xlane.f32.xlu0 %v3461_v38  ;;  %3475 = vadd.xlane.f32.xlu1 %v3474_v60 }
0x19e2   :  { %11059 = vrcp.f32 %v3420_v13  ;;  %v13244_v63 = vmul.f32 %v12181_v44, %v3429_v48  ;;  %v3445_v11 = vsel %vm226_vm0, %v3439_v19, 0.0 }
0x19e4   :  { %v3457_v45 = vmul.f32 %v13164_v35, %v13244_v63  ;;  %v3441_v41 = vmul.f32 %v13158_v61, %v13244_v63  ;;  %v3473_v56 = vmul.f32 %v13173_v1, %v13244_v63 }
0x19e5   :  { %3478 = vadd.xlane.f32.xlu0 %v3477_v6  ;;  %3491 = vadd.xlane.f32.xlu1 %v3490_v21 }
0x19e6   :  { %v3467_v38 = vsel %vm226_vm0, %v3457_v45, 0.0  ;;  %v3451_v53 = vsel %vm226_vm0, %v3441_v41, 0.0  ;;  %v3483_v60 = vsel %vm226_vm0, %v3473_v56, 0.0 }
0x19e9   :  { %3494 = vadd.xlane.f32.xlu0 %v3493_v52  ;;  %3446 = vadd.xlane.f32.xlu1 %v3445_v11  ;;  %v3489_v52 = vmul.f32 %v13179_v46, %v13244_v63 }
0x19eb   :  { %v3499_v41 = vsel %vm226_vm0, %v3489_v52, 0.0 }
0x19ec   :  { %v11060_v18 = vpop.eup %11059 }
0x19ed   :  { %v3428_v48 = vmul.f32 %v11060_v18, %v11052_v0  ;;  %3468 = vadd.xlane.f32.xlu0 %v3467_v38  ;;  %3452 = vadd.xlane.f32.xlu1 %v3451_v53  ;;  %v3106_v38 = vadd.f32 %v13049_v40, %v11957_v59 }
0x19ef   :  { %v13261_v13 = vmul.f32 %v12184_v12, %v3428_v48 }
0x19f1   :  { %3484 = vadd.xlane.f32.xlu0 %v3483_v60  ;;  %v3440_v3 = vmul.f32 %v13185_v7, %v13261_v13  ;;  %v3456_v37 = vmul.f32 %v13195_v51, %v13261_v13  ;;  %v3435_v6 = vpack.c.bf16 %v13244_v63, %v13261_v13  ;;  %v3472_v19 = vmul.f32 %v13201_v20, %v13261_v13 }
0x19f2   :  { %v3488_v45 = vmul.f32 %v13207_v26, %v13261_v13  ;;  %v3110_v63 = vadd.f32 %v13052_v2, %v11957_v59 }
0x19f3   :  { %v3448_v21 = vsel %vm226_vm0, %v3440_v3, 0.0  ;;  %v3464_v0 = vsel %vm226_vm0, %v3456_v37, 0.0  ;;  %v3480_v11 = vsel %vm226_vm0, %v3472_v19, 0.0 }
0x19f4   :  { %3449 = vadd.xlane.f32.xlu1 %v3448_v21  ;;  %v3496_v18 = vsel %vm226_vm0, %v3488_v45, 0.0  ;;  %v3437_v52 = vpack.c.bf16 %v3110_v63, %v3106_v38 }
0x19f5   :  { %3465 = vadd.xlane.f32.xlu0 %v3464_v0 }
0x19f8   :  { %3481 = vadd.xlane.f32.xlu1 %v3480_v11 }
0x19f9   :  { %3500 = vadd.xlane.f32.xlu0 %v3499_v41 }
0x19fc   :  { %3497 = vadd.xlane.f32.xlu1 %v3496_v18 }
0x1a0d   :  { %3670 = vrot.lane.b32.xlu1 %v13033_v14, %s11568_s11 }
0x1a0f   :  { %3672 = vrot.lane.b32.xlu0 %v13036_v4, %s11568_s11 }
0x1a11   :  { %3674 = vrot.lane.b32.xlu1 %v3106_v38, %s11568_s11 }
0x1a15   :  { %3676 = vrot.lane.b32.xlu1 %v3110_v63, %s11568_s11 }
0x1a6a   :  { %v3460_v53 = vpop.xlane.xlu0 %3459  ;;  %v3444_v56 = vpop.xlane.xlu1 %3443 }
0x1a6b   :  { %v3502_v60 = vsel %vm906_vm15, %v3444_v56, %v3460_v53 }
0x1a6e   :  { %v3463_v48 = vpop.xlane.xlu0 %3462  ;;  %v3476_v13 = vpop.xlane.xlu1 %3475 }
0x1a6f   :  { %v3506_v14 = vsel %vm911_vm1, %v3502_v60, %v3476_v13 }
0x1a72   :  { %v3479_v3 = vpop.xlane.xlu0 %3478  ;;  %v3492_v40 = vpop.xlane.xlu1 %3491 }
0x1a73   :  { %v3510_v37 = vsel %vm916_vm2, %v3506_v14, %v3492_v40 }
0x1a74   :  { %9940 = vmatprep.mubr.msk.f32.mxu0 %vm921_vm4, %v3510_v37 }
0x1a76   :  { %v3495_v4 = vpop.xlane.xlu0 %3494  ;;  %v3447_v21 = vpop.xlane.xlu1 %3446 }
0x1a77   :  { %v3503_v2 = vsel %vm906_vm15, %v3447_v21, %v3463_v48 }
0x1a78   :  { %v3507_v0 = vsel %vm911_vm1, %v3503_v2, %v3479_v3 }
0x1a79   :  { %v3511_v19 = vsel %vm916_vm2, %v3507_v0, %v3495_v4 }
0x1a7a   :  { %v3469_v11 = vpop.xlane.xlu0 %3468  ;;  %9941 = vmatmul.mubr.msk.f32.vlgmr.msra.gmra.mrb[56].mxu0 %vm921_vm4, %v3511_v19  ;;  %v3453_v45 = vpop.xlane.xlu1 %3452 }
0x1a7b   :  { %9947 = vmatpush3.bf16.msra.mxu0 %v13041_v30  ;;  %v3505_v60 = vsel %vm906_vm15, %v3453_v45, %v3469_v11 }
0x1a7c   :  { %9948 = vmatprep.subr.bf16.mxu0 %v3437_v52 }
0x1a7e   :  { %v3485_v41 = vpop.xlane.xlu0 %3484 }
0x1a7f   :  { %9949 = vmatpush3.bf16.msra.mxu0 %v3437_v52  ;;  %v3509_v14 = vsel %vm911_vm1, %v3505_v60, %v3485_v41 }
0x1a80   :  { %10525 = vmatprep.subr.bf16.mxu0 %v11914_v23 }
0x1a81   :  { %v3450_v18 = vpop.xlane.xlu1 %3449 }
0x1a82   :  { %v3466_v53 = vpop.xlane.xlu0 %3465 }
0x1a83   :  { %v3504_v48 = vsel %vm906_vm15, %v3450_v18, %v3466_v53 }
0x1a85   :  { %v3482_v56 = vpop.xlane.xlu1 %3481 }
0x1a86   :  { %v3501_v13 = vpop.xlane.xlu0 %3500  ;;  %v3508_v38 = vsel %vm911_vm1, %v3504_v48, %v3482_v56 }
0x1a87   :  { %v3513_v3 = vsel %vm916_vm2, %v3509_v14, %v3501_v13 }
0x1a89   :  { %v3498_v63 = vpop.xlane.xlu1 %3497 }
0x1a8a   :  { %v3512_v30 = vsel %vm916_vm2, %v3508_v38, %v3498_v63  ;;  %v3673_v56 = vpop.permute.xlu0 %3672 }
0x1a8b   :  { %9943 = vmatprep.mubr.msk.f32.mxu0 %vm921_vm4, %v3512_v30 }
0x1a8c   :  { %9944 = vmatmul.mubr.msk.f32.gmra.mrb[58].mxu0 %vm921_vm4, %v3513_v3 }
0x1a8d   :  { %9950 = vmatprep.mubr.msk.bf16.mxu0 %vm226_vm0, %v3434_v43  ;;  %v3671_v43 = vpop.permute.xlu1 %3670 }
0x1a90   :  { %9951 = vmatmul.mubr.msk.bf16.vlgmr.msra.gmra.mrb[60].mxu0 %vm226_vm0, %v3435_v6 }
0x1a91   :  { %10527 = vmatpush3.bf16.msra.mxu0 %v11914_v23  ;;  %v3675_v37 = vpop.permute.xlu1 %3674 }
0x1a92   :  { %10529 = vmatprep.subr.bf16.mxu0 %v11919_v25 }
0x1a95   :  { %10531 = vmatpush3.bf16.msra.mxu0 %v11919_v25  ;;  %v3677_v41 = vpop.permute.xlu1 %3676 }
0x1a96   :  { %10533 = vmatprep.subr.bf16.mxu0 %v11930_v28 }
0x1a99   :  { %10535 = vmatpush3.bf16.msra.mxu0 %v11930_v28 }
0x1a9a   :  { %10537 = vmatprep.subr.bf16.mxu0 %v11944_v50 }
0x1a9d   :  { %10539 = vmatpush3.bf16.msra.mxu0 %v11944_v50 }
0x1a9e   :  { %9984 = vmatprep.subr.msk.mxu0 %vm934_vm6, %v13022_v16 }
0x1b4d   :  { %v9942_v15 = vpop.f32.mrb[56].mxu0 }
0x1b4e   :  { %v3592_v55 = vpop.f32.mrb[57].mxu0 }
0x1b5f   :  { %v9945_v6 = vpop.f32.mrb[58].mxu0 }
0x1b60   :  { %v3602_v40 = vpop.f32.mrb[59].mxu0 }
0x1b63   :  { %v9952_v4 = vpop.f32.mrb[60].mxu0 }
0x1b64   :  { %v3660_v21 = vadd.f32 %v9952_v4, %v3602_v40  ;;  %v3651_v2 = vpop.f32.mrb[61].mxu0 }
0x1b65   :  { %v3652_v0 = vadd.f32 %v3651_v2, %v3592_v55  ;;  %v9953_v19 = vpop.f32.mrb[62].mxu0 }
0x1b66   :  { %v3684_v52 = vadd.f32 %v3675_v37, %v3660_v21  ;;  %v3663_v11 = vadd.f32 %v9953_v19, %v9945_v6  ;;  %v3654_v45 = vpop.f32.mrb[63].mxu0 }
0x1b67   :  { %v3682_v18 = vadd.f32 %v3671_v43, %v3652_v0  ;;  %v3655_v53 = vadd.f32 %v9942_v15, %v3654_v45 }
0x1b68   :  { %v3692_v48 = vmul.f32 0.01, %v3684_v52  ;;  %v3685_v13 = vadd.f32 %v3677_v41, %v3663_v11  ;;  %vm3688_vm11 = vcmp.ge.f32.partialorder %v3684_v52, 0.0 }
0x1b69   :  { %v3690_v60 = vmul.f32 0.01, %v3682_v18  ;;  %v3683_v38 = vadd.f32 %v3673_v56, %v3655_v53  ;;  %vm3686_vm12 = vcmp.ge.f32.partialorder %v3682_v18, 0.0 }
0x1b6a   :  { %vm3689_vm13 = vcmp.ge.f32.partialorder %v3685_v13, 0.0  ;;  %v3693_v63 = vmul.f32 0.01, %v3685_v13  ;;  %v3696_v30 = vsel %vm3688_vm11, %v3684_v52, %v3692_v48 }
0x1b6b   :  { %vm3687_vm14 = vcmp.ge.f32.partialorder %v3683_v38, 0.0  ;;  %v3691_v14 = vmul.f32 0.01, %v3683_v38  ;;  %v3694_v55 = vsel %vm3686_vm12, %v3682_v18, %v3690_v60 }
0x1b6c   :  { %v3697_v3 = vsel %vm3689_vm13, %v3685_v13, %v3693_v63 }
0x1b6d   :  { %v3695_v40 = vsel %vm3687_vm14, %v3683_v38, %v3691_v14  ;;  %v3699_v6 = vpack.c.bf16 %v3697_v3, %v3696_v30  ;;  %v13361_v30 = vld [vmem:[%s15364_s5 + $0x4] ss:$8 sps:$4 sm:$0xff]   ;;  %v13368_v3 = vld [vmem:[%s15364_s5] ss:$8 sps:$4 sm:$0xff]  }
0x1b6e   :  { %v3698_v37 = vpack.c.bf16 %v3695_v40, %v3694_v55  ;;  %v13375_v55 = vld [vmem:[%s15364_s5 + $0x14] ss:$8 sps:$4 sm:$0xff]   ;;  %v13381_v40 = vld [vmem:[%s15364_s5 + $0x10] ss:$8 sps:$4 sm:$0xff]  }
0x1b70   :  { %9205 = vmatmul.mubr.msk.bf16.vlgmr.msra.gmra.mrb[60].mxu1 %vm433_vm3, %v3698_v37 }
0x1b71   :  { %3748 = vmatprep.mubr.bf16.mxu1 %v15368_v58 }
0x1b78   :  { %9206 = vmatmul.mubr.msk.bf16.gmra.mrb[64].mxu1 %vm433_vm3, %v3699_v6 }
0x1c43   :  { %v3740_v15 = vpop.f32.mrb[60].mxu1 }
0x1c44   :  { %v3741_v43 = vadd.f32 %v3740_v15, %v11955_v57  ;;  %v3742_v4 = vpop.f32.mrb[61].mxu1 }
0x1c45   :  { %v3744_v21 = vpop.f32.mrb[62].mxu1  ;;  %v13330_v19 = vadd.f32 %v3742_v4, %v11957_v59 }
0x1c46   :  { %v3745_v2 = vadd.f32 %v3744_v21, %v11955_v57  ;;  %v3746_v0 = vpop.f32.mrb[63].mxu1  ;;  %9970 = vmatprep.mubr.msk.f32.mxu0 %vm433_vm3, %v3741_v43 }
0x1c47   :  { %v13333_v52 = vadd.f32 %v3746_v0, %v11957_v59 }
0x1c48   :  { %v3759_v11 = vpack.c.bf16 %v3745_v2, %v3741_v43  ;;  %9971 = vmatmul.mubr.msk.f32.vlgmr.msra.gmra.mrb[64].mxu0 %vm433_vm3, %v3745_v2  ;;  %v13407_v2 = vld [vmem:[%s15365_s18 + $0x8] sm:$0xff] }
0x1c49   :  { %v13338_v45 = vpack.c.bf16 %v13333_v52, %v13330_v19  ;;  %9985 = vmatpush3.msk.msra.mxu0 %vm934_vm6, %v13022_v16 }
0x1c4a   :  { %3884 = vrot.lane.b32.xlu0 %v3759_v11, %s11568_s11  ;;  %9980 = vmatprep.mubr.msk.bf16.mxu1 %vm433_vm3, %v3759_v11 }
0x1c4b   :  { %v3750_v41 = vpop.f32.mrb[64].mxu1  ;;  %9992 = vmatprep.subr.bf16.mxu0 %v13338_v45 }
0x1c4c   :  { %v3751_v18 = vadd.f32 %v3750_v41, %v11955_v57  ;;  %v13346_v53 = vpop.f32.mrb[65].mxu1 }
0x1c4d   :  { %v3754_v56 = vpop.f32.mrb[66].mxu1 }
0x1c4e   :  { %v3755_v48 = vadd.f32 %v3754_v56, %v11955_v57  ;;  %v13349_v13 = vpop.f32.mrb[67].mxu1  ;;  %9973 = vmatprep.mubr.msk.f32.mxu0 %vm433_vm3, %v3751_v18 }
0x1c50   :  { %v3760_v60 = vpack.c.bf16 %v3755_v48, %v3751_v18  ;;  %9974 = vmatmul.mubr.msk.f32.gmra.mrb[66].mxu0 %vm433_vm3, %v3755_v48 }
0x1c52   :  { %3886 = vrot.lane.b32.xlu1 %v3760_v60, %s11568_s11 }
0x1cbc   :  { %v3885_v16 = vpop.permute.xlu0 %3884 }
0x1cbd   :  { %10742 = vmatprep.subr.msk.bf16.mxu1 %vm433_vm3, %v3885_v16  ;;  %v3895_v38 = vsel %vm433_vm3, %v3885_v16, 0 }
0x1cbe   :  { %9977 = vmatpush3.bf16.xpose.msra.mxu1 %v3895_v38 }
0x1cc4   :  { %v3887_v63 = vpop.permute.xlu1 %3886 }
0x1cc5   :  { %10743 = vmatprep.subr.msk.bf16.mxu1 %vm433_vm3, %v3887_v63  ;;  %v3898_v14 = vsel %vm433_vm3, %v3887_v63, 0 }
0x1cc6   :  { %9979 = vmatpush3.bf16.xpose.msra.mxu1 %v3898_v14 }
0x1cc7   :  { %4353 = vmatprep.subr.bf16.mxu1 %v13361_v30 }
0x1ccd   :  { %9981 = vmatmul.mubr.msk.bf16.vlgmr.msra.gmra.mrb[68].mxu1 %vm433_vm3, %v3760_v60 }
0x1cce   :  { %4354 = vmatpush1.bf16.msra.mxu1 %v13368_v3  ;;  %4385 = vmatprep.mubr.bf16.mxu1 %v15368_v58 }
0x1ccf   :  { %4355 = vmatprep.subr.bf16.mxu1 %v13375_v55 }
0x1cd2   :  { %4356 = vmatpush1.bf16.msra.mxu1 %v13381_v40 }
0x1cd3   :  { %4357 = vmatprep.subr.bf16.mxu1 %v13070_v10 }
0x1cd6   :  { %4358 = vmatpush1.bf16.msra.mxu1 %v13076_v42 }
0x1cd7   :  { %4359 = vmatprep.subr.bf16.mxu1 %v13082_v5 }
0x1cda   :  { %4360 = vmatpush1.bf16.msra.mxu1 %v13088_v17 }
0x1d1b   :  { %v9972_v6 = vpop.f32.mrb[64].mxu0 }
0x1d1c   :  { %v3839_v37 = vpop.f32.mrb[65].mxu0  ;;  %3954 = vperm.xlu0 %10858, %v9972_v6   ;;  %3865 = vperm.xlu1 %10857, %v9972_v6  }
0x1d20   :  { %10861 = vset.pattern.permute.xlu0 %v15368_v58  ;;  %10859 = vset.pattern.permute.xlu1 %v15369_v34 }
0x1d21   :  { %3860 = vperm.xlu0 %10861, %v3839_v37   ;;  %3978 = vperm.xlu1 %10859, %v9972_v6  }
0x1d23   :  { %v9975_v15 = vpop.f32.mrb[66].mxu0 }
0x1d24   :  { %v3849_v43 = vpop.f32.mrb[67].mxu0 }
0x1d25   :  { %10864 = vset.pattern.permute.xlu0 %v15366_v22  ;;  %10860 = vset.pattern.permute.xlu1 %v15366_v22 }
0x1d26   :  { %3998 = vperm.xlu0 %10864, %v3839_v37   ;;  %4002 = vperm.xlu1 %10860, %v9972_v6  }
0x1d2a   :  { %10865 = vset.pattern.permute.xlu0 %v15368_v58  ;;  %10862 = vset.pattern.permute.xlu1 %v15367_v49 }
0x1d2b   :  { %3875 = vperm.xlu0 %10865, %v9975_v15   ;;  %3950 = vperm.xlu1 %10862, %v3839_v37  }
0x1d2f   :  { %10870 = vset.pattern.permute.xlu0 %v15369_v34  ;;  %10863 = vset.pattern.permute.xlu1 %v15369_v34 }
0x1d30   :  { %3982 = vperm.xlu0 %10870, %v3849_v43   ;;  %3974 = vperm.xlu1 %10863, %v3839_v37  }
0x1d34   :  { %10872 = vset.pattern.permute.xlu0 %v15366_v22  ;;  %10866 = vset.pattern.permute.xlu1 %v15367_v49 }
0x1d35   :  { %4010 = vperm.xlu0 %10872, %v9975_v15   ;;  %3962 = vperm.xlu1 %10866, %v9975_v15  }
0x1d39   :  { %10867 = vset.pattern.permute.xlu1 %v15369_v34  ;;  %10874 = vset.pattern.permute.xlu0 %v15367_v49 }
0x1d3a   :  { %3986 = vperm.xlu1 %10867, %v9975_v15  }
0x1d3e   :  { %10868 = vset.pattern.permute.xlu1 %v15368_v58 }
0x1d3f   :  { %3870 = vperm.xlu1 %10868, %v3849_v43  }
0x1d43   :  { %10869 = vset.pattern.permute.xlu1 %v15367_v49 }
0x1d44   :  { %3958 = vperm.xlu1 %10869, %v3849_v43  }
0x1d48   :  { %10871 = vset.pattern.permute.xlu1 %v15366_v22 }
0x1d49   :  { %4006 = vperm.xlu1 %10871, %v3849_v43  }
0x1d4d   :  { %10873 = vset.pattern.permute.xlu1 %v15368_v58 }
0x1d9b   :  { %v3955_v10 = vpop.permute.xlu0 %3954  ;;  %v3866_v42 = vpop.permute.xlu1 %3865 }
0x1d9c   :  { %v3879_v0 = vmul.f32 %v13407_v2, %v3866_v42  ;;  %v3966_v18 = vmul.f32 %v13113_v32, %v3955_v10 }
0x1da0   :  { %v3861_v5 = vpop.permute.xlu0 %3860  ;;  %v9982_v17 = vpop.f32.mrb[68].mxu1 }
0x1da1   :  { %v3979_v4 = vpop.permute.xlu1 %3978  ;;  %v3934_v21 = vpop.f32.mrb[69].mxu1  ;;  %v3878_v6 = vmul.f32 %v13131_v8, %v3861_v5 }
0x1da2   :  { %v9983_v11 = vpop.f32.mrb[70].mxu1  ;;  %v3990_v60 = vmul.f32 %v13119_v36, %v3979_v4 }
0x1da3   :  { %v3937_v41 = vpop.f32.mrb[71].mxu1  ;;  %v3935_v22 = vadd.f32 %v3934_v21, %v3878_v6 }
0x1da4   :  { %v3938_v56 = vadd.f32 %v3937_v41, %v3879_v0 }
0x1da5   :  { %v4003_v48 = vpop.permute.xlu1 %4002  ;;  %v3999_v38 = vpop.permute.xlu0 %3998 }
0x1da6   :  { %v3970_v16 = vadd.f32 %v3966_v18, %v3938_v56  ;;  %v4014_v14 = vmul.f32 %v13125_v33, %v4003_v48  ;;  %v4013_v56 = vmul.f32 %v13152_v9, %v3999_v38 }
0x1da8   :  { %v3994_v63 = vadd.f32 %v3990_v60, %v3970_v16 }
0x1daa   :  { %v4018_v37 = vadd.f32 %v4014_v14, %v3994_v63  ;;  %v3951_v15 = vpop.permute.xlu1 %3950  ;;  %v3876_v49 = vpop.permute.xlu0 %3875 }
0x1dab   :  { %v3965_v42 = vmul.f32 %v13137_v62, %v3951_v15  ;;  %v3881_v60 = vmul.f32 %v13158_v61, %v3876_v49 }
0x1dac   :  { %v4022_v43 = vmul.f32 0.125, %v4018_v37 }
0x1dad   :  { %v3969_v41 = vadd.f32 %v3965_v42, %v3935_v22  ;;  %v3946_v6 = vadd.f32 %v9983_v11, %v3881_v60 }
0x1dae   :  { %v4026_v10 = vsel %vm779_vm7, %v4022_v43, -1e+30 }
0x1daf   :  { %v3975_v0 = vpop.permute.xlu1 %3974  ;;  %v4032_v4 = vsel %vm226_vm0, %v4026_v10, -inf  ;;  %v3983_v48 = vpop.permute.xlu0 %3982 }
0x1db0   :  { %v3989_v18 = vmul.f32 %v13146_v29, %v3975_v0  ;;  %4033 = vmax.xlane.f32.xlu0 %v4032_v4 }
0x1db2   :  { %v3993_v5 = vadd.f32 %v3989_v18, %v3969_v41 }
0x1db4   :  { %v3963_v16 = vpop.permute.xlu1 %3962  ;;  %v4017_v63 = vadd.f32 %v4013_v56, %v3993_v5  ;;  %v4011_v15 = vpop.permute.xlu0 %4010 }
0x1db5   :  { %v3968_v21 = vmul.f32 %v13164_v35, %v3963_v16  ;;  %v4016_v0 = vmul.f32 %v13179_v46, %v4011_v15 }
0x1db6   :  { %v4021_v14 = vmul.f32 0.125, %v4017_v63 }
0x1db7   :  { %v3972_v42 = vadd.f32 %v3968_v21, %v3946_v6  ;;  %v3991_v21 = vmul.f32 %v13201_v20, %v3983_v48 }
0x1db8   :  { %v4025_v37 = vsel %vm778_vm8, %v4021_v14, -1e+30 }
0x1db9   :  { %v3987_v22 = vpop.permute.xlu1 %3986  ;;  %v4029_v43 = vsel %vm226_vm0, %v4025_v37, -inf }
0x1dba   :  { %v3992_v38 = vmul.f32 %v13173_v1, %v3987_v22  ;;  %4030 = vmax.xlane.f32.xlu1 %v4029_v43 }
0x1dbc   :  { %v3996_v49 = vadd.f32 %v3992_v38, %v3972_v42 }
0x1dbe   :  { %v3871_v4 = vpop.permute.xlu1 %3870  ;;  %v4020_v41 = vadd.f32 %v4016_v0, %v3996_v49 }
0x1dbf   :  { %v3880_v18 = vmul.f32 %v13185_v7, %v3871_v4 }
0x1dc0   :  { %v4024_v56 = vmul.f32 0.125, %v4020_v41 }
0x1dc1   :  { %v3943_v16 = vadd.f32 %v9982_v17, %v3880_v18 }
0x1dc2   :  { %v4028_v11 = vsel %vm781_vm10, %v4024_v56, -1e+30 }
0x1dc3   :  { %v3959_v5 = vpop.permute.xlu1 %3958  ;;  %v4038_v60 = vsel %vm226_vm0, %v4028_v11, -inf }
0x1dc4   :  { %v3967_v63 = vmul.f32 %v13195_v51, %v3959_v5  ;;  %4039 = vmax.xlane.f32.xlu0 %v4038_v60 }
0x1dc6   :  { %v3971_v14 = vadd.f32 %v3967_v63, %v3943_v16 }
0x1dc8   :  { %v3995_v6 = vadd.f32 %v3991_v21, %v3971_v14  ;;  %v4007_v15 = vpop.permute.xlu1 %4006 }
0x1dc9   :  { %v4015_v22 = vmul.f32 %v13207_v26, %v4007_v15 }
0x1dcb   :  { %v4019_v43 = vadd.f32 %v4015_v22, %v3995_v6 }
0x1dcd   :  { %v4023_v42 = vmul.f32 0.125, %v4019_v43 }
0x1dcf   :  { %v4027_v38 = vsel %vm780_vm9, %v4023_v42, -1e+30 }
0x1dd0   :  { %v4035_v0 = vsel %vm226_vm0, %v4027_v38, -inf }
0x1dd1   :  { %4036 = vmax.xlane.f32.xlu1 %v4035_v0 }
0x1e3d   :  { %v4034_v49 = vpop.xlane.xlu0 %4033 }
0x1e3e   :  { %v4042_v17 = vsub.f32 %v4026_v10, %v4034_v49 }
0x1e40   :  { %v4047_v4 = vmul.f32 1.442695, %v4042_v17 }
0x1e42   :  { %11061 = vpow2.f32 %v4047_v4 }
0x1e47   :  { %v4031_v41 = vpop.xlane.xlu1 %4030 }
0x1e48   :  { %v4041_v18 = vsub.f32 %v4025_v37, %v4031_v41 }
0x1e4a   :  { %v4045_v48 = vmul.f32 1.442695, %v4041_v18 }
0x1e4c   :  { %v11062_v56 = vpop.eup %11061  ;;  %11063 = vpow2.f32 %v4045_v48 }
0x1e4d   :  { %v4056_v5 = vsel %vm226_vm0, %v11062_v56, 0.0 }
0x1e4e   :  { %4057 = vadd.xlane.f32.xlu0 %v4056_v5 }
0x1e51   :  { %v4040_v60 = vpop.xlane.xlu0 %4039 }
0x1e52   :  { %v4044_v16 = vsub.f32 %v4028_v11, %v4040_v60 }
0x1e54   :  { %v4051_v63 = vmul.f32 1.442695, %v4044_v16 }
0x1e56   :  { %v11064_v21 = vpop.eup %11063  ;;  %11065 = vpow2.f32 %v4051_v63 }
0x1e57   :  { %v4053_v14 = vsel %vm226_vm0, %v11064_v21, 0.0 }
0x1e58   :  { %4054 = vadd.xlane.f32.xlu1 %v4053_v14 }
0x1e5e   :  { %v4037_v6 = vpop.xlane.xlu1 %4036 }
0x1e5f   :  { %v4043_v10 = vsub.f32 %v4027_v38, %v4037_v6 }
0x1e60   :  { %v11066_v15 = vpop.eup %11065 }
0x1e61   :  { %v4049_v22 = vmul.f32 1.442695, %v4043_v10  ;;  %v4062_v37 = vsel %vm226_vm0, %v11066_v15, 0.0 }
0x1e62   :  { %4063 = vadd.xlane.f32.xlu0 %v4062_v37 }
0x1e63   :  { %11067 = vpow2.f32 %v4049_v22 }
0x1e6d   :  { %v11068_v43 = vpop.eup %11067 }
0x1e6e   :  { %v4059_v42 = vsel %vm226_vm0, %v11068_v43, 0.0 }
0x1e6f   :  { %4060 = vadd.xlane.f32.xlu1 %v4059_v42 }
0x1edb   :  { %v4058_v0 = vpop.xlane.xlu0 %4057 }
0x1edc   :  { %v4066_v11 = vmax.f32 %v4058_v0, 1e-30 }
0x1ede   :  { %11069 = vrcp.f32 %v4066_v11 }
0x1ee5   :  { %v4055_v49 = vpop.xlane.xlu1 %4054 }
0x1ee6   :  { %v4065_v17 = vmax.f32 %v4055_v49, 1e-30 }
0x1ee8   :  { %11071 = vrcp.f32 %v4065_v17  ;;  %v11070_v4 = vpop.eup %11069 }
0x1ee9   :  { %v4074_v18 = vmul.f32 %v11070_v4, %v11062_v56 }
0x1eeb   :  { %v13442_v60 = vmul.f32 %v12161_v47, %v4074_v18 }
0x1eed   :  { %v4102_v6 = vmul.f32 %v13113_v32, %v13442_v60 }
0x1eef   :  { %v4064_v41 = vpop.xlane.xlu0 %4063  ;;  %v4108_v42 = vsel %vm226_vm0, %v4102_v6, 0.0 }
0x1ef0   :  { %v4068_v38 = vmax.f32 %v4064_v41, 1e-30 }
0x1ef2   :  { %v11072_v48 = vpop.eup %11071  ;;  %11073 = vrcp.f32 %v4068_v38 }
0x1ef3   :  { %v4073_v5 = vmul.f32 %v11072_v48, %v11064_v21 }
0x1ef5   :  { %v13445_v16 = vmul.f32 %v12151_v31, %v4073_v5 }
0x1ef7   :  { %v4101_v63 = vmul.f32 %v13137_v62, %v13445_v16  ;;  %v4085_v14 = vmul.f32 %v13131_v8, %v13445_v16  ;;  %v4081_v56 = vpack.c.bf16 %v13442_v60, %v13445_v16  ;;  %v4117_v22 = vmul.f32 %v13146_v29, %v13445_v16 }
0x1ef8   :  { %v4118_v8 = vmul.f32 %v13119_v36, %v13442_v60  ;;  %v4133_v49 = vmul.f32 %v13152_v9, %v13445_v16  ;;  %v4134_v29 = vmul.f32 %v13125_v33, %v13442_v60 }
0x1ef9   :  { %v4105_v21 = vsel %vm226_vm0, %v4101_v63, 0.0  ;;  %v4089_v10 = vsel %vm226_vm0, %v4085_v14, 0.0  ;;  %v4121_v11 = vsel %vm226_vm0, %v4117_v22, 0.0 }
0x1efa   :  { %4106 = vadd.xlane.f32.xlu0 %v4105_v21  ;;  %4090 = vadd.xlane.f32.xlu1 %v4089_v10  ;;  %v4124_v4 = vsel %vm226_vm0, %v4118_v8, 0.0  ;;  %v4137_v36 = vsel %vm226_vm0, %v4133_v49, 0.0  ;;  %v4140_v9 = vsel %vm226_vm0, %v4134_v29, 0.0 }
0x1efc   :  { %v11074_v37 = vpop.eup %11073  ;;  %v4061_v62 = vpop.xlane.xlu1 %4060 }
0x1efd   :  { %v4076_v32 = vmul.f32 %v11074_v37, %v11066_v15  ;;  %v4067_v0 = vmax.f32 %v4061_v62, 1e-30  ;;  %v4086_v15 = vmul.f32 %v13407_v2, %v13442_v60  ;;  %v13548_v60 = vld [vmem:[%s15299_s10] sm:$0xf] }
0x1efe   :  { %4109 = vadd.xlane.f32.xlu0 %v4108_v42  ;;  %4122 = vadd.xlane.f32.xlu1 %v4121_v11 }
0x1eff   :  { %11075 = vrcp.f32 %v4067_v0  ;;  %v13468_v17 = vmul.f32 %v12181_v44, %v4076_v32  ;;  %v4092_v41 = vsel %vm226_vm0, %v4086_v15, 0.0 }
0x1f01   :  { %v4104_v18 = vmul.f32 %v13164_v35, %v13468_v17  ;;  %v4088_v33 = vmul.f32 %v13158_v61, %v13468_v17  ;;  %v4120_v63 = vmul.f32 %v13173_v1, %v13468_v17  ;;  %v4136_v37 = vmul.f32 %v13179_v46, %v13468_v17 }
0x1f02   :  { %4125 = vadd.xlane.f32.xlu0 %v4124_v4  ;;  %4138 = vadd.xlane.f32.xlu1 %v4137_v36  ;;  %v3757_v46 = vadd.f32 %v13349_v13, %v11957_v59 }
0x1f03   :  { %v4114_v48 = vsel %vm226_vm0, %v4104_v18, 0.0  ;;  %v4098_v5 = vsel %vm226_vm0, %v4088_v33, 0.0  ;;  %v4130_v35 = vsel %vm226_vm0, %v4120_v63, 0.0  ;;  %v4146_v62 = vsel %vm226_vm0, %v4136_v37, 0.0 }
0x1f06   :  { %4141 = vadd.xlane.f32.xlu0 %v4140_v9  ;;  %4093 = vadd.xlane.f32.xlu1 %v4092_v41 }
0x1f09   :  { %v11076_v38 = vpop.eup %11075 }
0x1f0a   :  { %v4075_v14 = vmul.f32 %v11076_v38, %v11068_v43  ;;  %4115 = vadd.xlane.f32.xlu0 %v4114_v48  ;;  %4099 = vadd.xlane.f32.xlu1 %v4098_v5 }
0x1f0c   :  { %v13485_v6 = vmul.f32 %v12184_v12, %v4075_v14 }
0x1f0e   :  { %4131 = vadd.xlane.f32.xlu0 %v4130_v35  ;;  %v4087_v61 = vmul.f32 %v13185_v7, %v13485_v6  ;;  %v4103_v21 = vmul.f32 %v13195_v51, %v13485_v6  ;;  %v4082_v10 = vpack.c.bf16 %v13468_v17, %v13485_v6  ;;  %v4119_v22 = vmul.f32 %v13201_v20, %v13485_v6 }
0x1f0f   :  { %v4135_v51 = vmul.f32 %v13207_v26, %v13485_v6  ;;  %v3753_v20 = vadd.f32 %v13346_v53, %v11957_v59 }
0x1f10   :  { %v4095_v1 = vsel %vm226_vm0, %v4087_v61, 0.0  ;;  %v4111_v43 = vsel %vm226_vm0, %v4103_v21, 0.0  ;;  %v4127_v7 = vsel %vm226_vm0, %v4119_v22, 0.0 }
0x1f11   :  { %4096 = vadd.xlane.f32.xlu1 %v4095_v1  ;;  %v4143_v42 = vsel %vm226_vm0, %v4135_v51, 0.0  ;;  %v4084_v15 = vpack.c.bf16 %v3757_v46, %v3753_v20 }
0x1f12   :  { %4112 = vadd.xlane.f32.xlu0 %v4111_v43 }
0x1f15   :  { %4128 = vadd.xlane.f32.xlu1 %v4127_v7 }
0x1f16   :  { %4147 = vadd.xlane.f32.xlu0 %v4146_v62 }
0x1f19   :  { %4144 = vadd.xlane.f32.xlu1 %v4143_v42 }
0x1f2a   :  { %4317 = vrot.lane.b32.xlu1 %v13330_v19, %s11568_s11 }
0x1f2c   :  { %4319 = vrot.lane.b32.xlu0 %v13333_v52, %s11568_s11 }
0x1f2e   :  { %4321 = vrot.lane.b32.xlu1 %v3753_v20, %s11568_s11 }
0x1f32   :  { %4323 = vrot.lane.b32.xlu1 %v3757_v46, %s11568_s11 }
0x1f87   :  { %v4107_v26 = vpop.xlane.xlu0 %4106  ;;  %v4091_v8 = vpop.xlane.xlu1 %4090 }
0x1f88   :  { %v4149_v11 = vsel %vm906_vm15, %v4091_v8, %v4107_v26 }
0x1f8b   :  { %v4110_v32 = vpop.xlane.xlu0 %4109  ;;  %v4123_v0 = vpop.xlane.xlu1 %4122 }
0x1f8c   :  { %v4153_v19 = vsel %vm911_vm1, %v4149_v11, %v4123_v0 }
0x1f8f   :  { %v4126_v49 = vpop.xlane.xlu0 %4125  ;;  %v4139_v53 = vpop.xlane.xlu1 %4138 }
0x1f90   :  { %v4157_v29 = vsel %vm916_vm2, %v4153_v19, %v4139_v53 }
0x1f91   :  { %9986 = vmatprep.mubr.msk.f32.mxu0 %vm921_vm4, %v4157_v29 }
0x1f93   :  { %v4142_v52 = vpop.xlane.xlu0 %4141  ;;  %v4094_v17 = vpop.xlane.xlu1 %4093 }
0x1f94   :  { %v4150_v13 = vsel %vm906_vm15, %v4094_v17, %v4110_v32 }
0x1f95   :  { %v4154_v4 = vsel %vm911_vm1, %v4150_v13, %v4126_v49 }
0x1f96   :  { %v4158_v36 = vsel %vm916_vm2, %v4154_v4, %v4142_v52 }
0x1f97   :  { %v4116_v9 = vpop.xlane.xlu0 %4115  ;;  %9987 = vmatmul.mubr.msk.f32.vlgmr.msra.gmra.mrb[68].mxu0 %vm921_vm4, %v4158_v36  ;;  %v4100_v41 = vpop.xlane.xlu1 %4099 }
0x1f98   :  { %9993 = vmatpush3.bf16.msra.mxu0 %v13338_v45  ;;  %v4152_v14 = vsel %vm906_vm15, %v4100_v41, %v4116_v9 }
0x1f99   :  { %9994 = vmatprep.subr.bf16.mxu0 %v4084_v15 }
0x1f9b   :  { %v4132_v18 = vpop.xlane.xlu0 %4131 }
0x1f9c   :  { %9995 = vmatpush3.bf16.msra.mxu0 %v4084_v15  ;;  %v4156_v61 = vsel %vm911_vm1, %v4152_v14, %v4132_v18 }
0x1f9d   :  { %10541 = vmatprep.subr.bf16.mxu0 %v11914_v23 }
0x1f9e   :  { %v4097_v33 = vpop.xlane.xlu1 %4096 }
0x1f9f   :  { %v4113_v38 = vpop.xlane.xlu0 %4112 }
0x1fa0   :  { %v4151_v5 = vsel %vm906_vm15, %v4097_v33, %v4113_v38 }
0x1fa2   :  { %v4129_v48 = vpop.xlane.xlu1 %4128 }
0x1fa3   :  { %v4148_v63 = vpop.xlane.xlu0 %4147  ;;  %v4155_v6 = vsel %vm911_vm1, %v4151_v5, %v4129_v48 }
0x1fa4   :  { %v4160_v21 = vsel %vm916_vm2, %v4156_v61, %v4148_v63 }
0x1fa6   :  { %v4145_v35 = vpop.xlane.xlu1 %4144 }
0x1fa7   :  { %v4159_v45 = vsel %vm916_vm2, %v4155_v6, %v4145_v35  ;;  %v4320_v11 = vpop.permute.xlu0 %4319 }
0x1fa8   :  { %9989 = vmatprep.mubr.msk.f32.mxu0 %vm921_vm4, %v4159_v45 }
0x1fa9   :  { %9990 = vmatmul.mubr.msk.f32.gmra.mrb[70].mxu0 %vm921_vm4, %v4160_v21 }
0x1faa   :  { %9996 = vmatprep.mubr.msk.bf16.mxu0 %vm226_vm0, %v4081_v56 }
0x1fad   :  { %9997 = vmatmul.mubr.msk.bf16.vlgmr.msra.gmra.mrb[72].mxu0 %vm226_vm0, %v4082_v10  ;;  %v4318_v10 = vpop.permute.xlu1 %4317 }
0x1fae   :  { %10543 = vmatpush3.bf16.msra.mxu0 %v11914_v23 }
0x1faf   :  { %10545 = vmatprep.subr.bf16.mxu0 %v11919_v25 }
0x1fb1   :  { %v4322_v22 = vpop.permute.xlu1 %4321 }
0x1fb2   :  { %10547 = vmatpush3.bf16.msra.mxu0 %v11919_v25 }
0x1fb3   :  { %10549 = vmatprep.subr.bf16.mxu0 %v11930_v28 }
0x1fb5   :  { %v4324_v8 = vpop.permute.xlu1 %4323 }
0x1fb6   :  { %10551 = vmatpush3.bf16.msra.mxu0 %v11930_v28 }
0x1fb7   :  { %10553 = vmatprep.subr.bf16.mxu0 %v11944_v50 }
0x1fba   :  { %10555 = vmatpush3.bf16.msra.mxu0 %v11944_v50 }
0x1fbb   :  { %10030 = vmatprep.subr.msk.mxu0 %vm934_vm6, %v13548_v60 }
0x206a   :  { %v9988_v16 = vpop.f32.mrb[68].mxu0 }
0x206b   :  { %v4239_v56 = vpop.f32.mrb[69].mxu0 }
0x207c   :  { %v9991_v1 = vpop.f32.mrb[70].mxu0 }
0x207d   :  { %v4249_v43 = vpop.f32.mrb[71].mxu0 }
0x2080   :  { %v9998_v37 = vpop.f32.mrb[72].mxu0 }
0x2081   :  { %v4307_v7 = vadd.f32 %v9998_v37, %v4249_v43  ;;  %v4298_v51 = vpop.f32.mrb[73].mxu0 }
0x2082   :  { %v4299_v62 = vadd.f32 %v4298_v51, %v4239_v56  ;;  %v9999_v42 = vpop.f32.mrb[74].mxu0 }
0x2083   :  { %v4331_v20 = vadd.f32 %v4322_v22, %v4307_v7  ;;  %v4310_v46 = vadd.f32 %v9999_v42, %v9991_v1  ;;  %v4301_v26 = vpop.f32.mrb[75].mxu0 }
0x2084   :  { %v4329_v32 = vadd.f32 %v4318_v10, %v4299_v62  ;;  %v4302_v0 = vadd.f32 %v9988_v16, %v4301_v26  ;;  %v13596_v62 = vld [vmem:[%s15364_s5 + $0x24] ss:$8 sps:$4 sm:$0xff]   ;;  %v15370_v26 = vmov 3  }
0x2085   :  { %v4339_v19 = vmul.f32 0.01, %v4331_v20  ;;  %v4332_v49 = vadd.f32 %v4324_v8, %v4310_v46  ;;  %vm4335_vm5 = vcmp.ge.f32.partialorder %v4331_v20, 0.0  ;;  %v15371_v8 = vmov 1  }
0x2086   :  { %v4337_v53 = vmul.f32 0.01, %v4329_v32  ;;  %v4330_v29 = vadd.f32 %v4320_v11, %v4302_v0  ;;  %vm4333_vm11 = vcmp.ge.f32.partialorder %v4329_v32, 0.0 }
0x2087   :  { %vm4336_vm12 = vcmp.ge.f32.partialorder %v4332_v49, 0.0  ;;  %v4340_v52 = vmul.f32 0.01, %v4332_v49  ;;  %v4343_v13 = vsel %vm4335_vm5, %v4331_v20, %v4339_v19 }
0x2088   :  { %vm4334_vm13 = vcmp.ge.f32.partialorder %v4330_v29, 0.0  ;;  %v4338_v17 = vmul.f32 0.01, %v4330_v29  ;;  %v4341_v36 = vsel %vm4333_vm11, %v4329_v32, %v4337_v53 }
0x2089   :  { %v4344_v4 = vsel %vm4336_vm12, %v4332_v49, %v4340_v52 }
0x208a   :  { %v4342_v15 = vsel %vm4334_vm13, %v4330_v29, %v4338_v17  ;;  %v4346_v9 = vpack.c.bf16 %v4344_v4, %v4343_v13  ;;  %v13639_v13 = vld [vmem:[%s15365_s18 + $0x28] sm:$0xff] }
0x208b   :  { %v4345_v41 = vpack.c.bf16 %v4342_v15, %v4341_v36 }
0x208d   :  { %9220 = vmatmul.mubr.msk.bf16.vlgmr.msra.gmra.mrb[72].mxu1 %vm433_vm3, %v4345_v41 }
0x208e   :  { %4395 = vmatprep.mubr.bf16.mxu1 %v15368_v58 }
0x2095   :  { %9221 = vmatmul.mubr.msk.bf16.gmra.mrb[76].mxu1 %vm433_vm3, %v4346_v9  ;;  %v13645_v9 = vld [vmem:[%s15365_s18 + $0x48] sm:$0xff] }
0x2160   :  { %v4387_v18 = vpop.f32.mrb[72].mxu1 }
0x2161   :  { %v4388_v33 = vadd.f32 %v4387_v18, %v11955_v57  ;;  %v4389_v38 = vpop.f32.mrb[73].mxu1 }
0x2162   :  { %v4391_v48 = vpop.f32.mrb[74].mxu1  ;;  %v13559_v14 = vadd.f32 %v4389_v38, %v11957_v59 }
0x2163   :  { %v4392_v5 = vadd.f32 %v4391_v48, %v11955_v57  ;;  %v4393_v63 = vpop.f32.mrb[75].mxu1  ;;  %10016 = vmatprep.mubr.msk.f32.mxu0 %vm433_vm3, %v4388_v33  ;;  %v13651_v48 = vld [vmem:[%s15365_s18 + $0x68] sm:$0xff] }
0x2164   :  { %v13562_v6 = vadd.f32 %v4393_v63, %v11957_v59  ;;  %v13657_v63 = vld [vmem:[%s15365_s18] sm:$0xff] }
0x2165   :  { %v4406_v35 = vpack.c.bf16 %v4392_v5, %v4388_v33  ;;  %10017 = vmatmul.mubr.msk.f32.vlgmr.msra.gmra.mrb[76].mxu0 %vm433_vm3, %v4392_v5 }
0x2166   :  { %v13567_v61 = vpack.c.bf16 %v13562_v6, %v13559_v14  ;;  %10031 = vmatpush3.msk.msra.mxu0 %vm934_vm6, %v13548_v60 }
0x2167   :  { %4531 = vrot.lane.b32.xlu0 %v4406_v35, %s11568_s11  ;;  %10026 = vmatprep.mubr.msk.bf16.mxu1 %vm433_vm3, %v4406_v35 }
0x2168   :  { %v4397_v45 = vpop.f32.mrb[76].mxu1  ;;  %10038 = vmatprep.subr.bf16.mxu0 %v13567_v61 }
0x2169   :  { %v4398_v21 = vadd.f32 %v4397_v45, %v11955_v57  ;;  %v13575_v16 = vpop.f32.mrb[77].mxu1 }
0x216a   :  { %v4401_v56 = vpop.f32.mrb[78].mxu1 }
0x216b   :  { %v4402_v10 = vadd.f32 %v4401_v56, %v11955_v57  ;;  %v13578_v1 = vpop.f32.mrb[79].mxu1  ;;  %10019 = vmatprep.mubr.msk.f32.mxu0 %vm433_vm3, %v4398_v21 }
0x216d   :  { %v4407_v43 = vpack.c.bf16 %v4402_v10, %v4398_v21  ;;  %10020 = vmatmul.mubr.msk.f32.gmra.mrb[78].mxu0 %vm433_vm3, %v4402_v10  ;;  %v13663_v10 = vld [vmem:[%s15365_s18 + $0x20] sm:$0xff] }
0x216f   :  { %4533 = vrot.lane.b32.xlu1 %v4407_v43, %s11568_s11 }
0x21d9   :  { %v4532_v22 = vpop.permute.xlu0 %4531 }
0x21da   :  { %10744 = vmatprep.subr.msk.bf16.mxu1 %vm433_vm3, %v4532_v22  ;;  %v4542_v37 = vsel %vm433_vm3, %v4532_v22, 0 }
0x21db   :  { %10023 = vmatpush3.bf16.xpose.msra.mxu1 %v4542_v37 }
0x21e1   :  { %v4534_v7 = vpop.permute.xlu1 %4533 }
0x21e2   :  { %10745 = vmatprep.subr.msk.bf16.mxu1 %vm433_vm3, %v4534_v7  ;;  %v4545_v51 = vsel %vm433_vm3, %v4534_v7, 0 }
0x21e3   :  { %10025 = vmatpush3.bf16.xpose.msra.mxu1 %v4545_v51 }
0x21e4   :  { %5000 = vmatprep.subr.bf16.mxu1 %v13361_v30  ;;  %v13602_v30 = vld [vmem:[%s15364_s5 + $0x20] ss:$8 sps:$4 sm:$0xff]  }
0x21ea   :  { %10027 = vmatmul.mubr.msk.bf16.vlgmr.msra.gmra.mrb[80].mxu1 %vm433_vm3, %v4407_v43 }
0x21eb   :  { %5001 = vmatpush1.bf16.msra.mxu1 %v13368_v3  ;;  %5032 = vmatprep.mubr.bf16.mxu1 %v15368_v58  ;;  %v13608_v3 = vld [vmem:[%s15364_s5 + $0x34] ss:$8 sps:$4 sm:$0xff]  }
0x21ec   :  { %5002 = vmatprep.subr.bf16.mxu1 %v13375_v55  ;;  %v13614_v55 = vld [vmem:[%s15364_s5 + $0x30] ss:$8 sps:$4 sm:$0xff]  }
0x21ef   :  { %5003 = vmatpush1.bf16.msra.mxu1 %v13381_v40 }
0x21f0   :  { %5004 = vmatprep.subr.bf16.mxu1 %v13596_v62 }
0x21f3   :  { %5005 = vmatpush1.bf16.msra.mxu1 %v13602_v30 }
0x21f4   :  { %5006 = vmatprep.subr.bf16.mxu1 %v13608_v3 }
0x21f7   :  { %5007 = vmatpush1.bf16.msra.mxu1 %v13614_v55 }
0x2238   :  { %v10018_v40 = vpop.f32.mrb[76].mxu0 }
0x2239   :  { %v4486_v42 = vpop.f32.mrb[77].mxu0  ;;  %4601 = vperm.xlu0 %10874, %v10018_v40   ;;  %4512 = vperm.xlu1 %10873, %v10018_v40  }
0x223d   :  { %10877 = vset.pattern.permute.xlu0 %v15368_v58  ;;  %10875 = vset.pattern.permute.xlu1 %v15369_v34 }
0x223e   :  { %4507 = vperm.xlu0 %10877, %v4486_v42   ;;  %4625 = vperm.xlu1 %10875, %v10018_v40  }
0x2240   :  { %v10021_v20 = vpop.f32.mrb[78].mxu0 }
0x2241   :  { %v4496_v46 = vpop.f32.mrb[79].mxu0 }
0x2242   :  { %10880 = vset.pattern.permute.xlu0 %v15370_v26  ;;  %10876 = vset.pattern.permute.xlu1 %v15370_v26 }
0x2243   :  { %4645 = vperm.xlu0 %10880, %v4486_v42   ;;  %4649 = vperm.xlu1 %10876, %v10018_v40  }
0x2247   :  { %10881 = vset.pattern.permute.xlu0 %v15368_v58  ;;  %10878 = vset.pattern.permute.xlu1 %v15371_v8 }
0x2248   :  { %4522 = vperm.xlu0 %10881, %v10021_v20   ;;  %4597 = vperm.xlu1 %10878, %v4486_v42  }
0x224c   :  { %10886 = vset.pattern.permute.xlu0 %v15369_v34  ;;  %10879 = vset.pattern.permute.xlu1 %v15369_v34 }
0x224d   :  { %4629 = vperm.xlu0 %10886, %v4496_v46   ;;  %4621 = vperm.xlu1 %10879, %v4486_v42  }
0x2251   :  { %10888 = vset.pattern.permute.xlu0 %v15370_v26  ;;  %10882 = vset.pattern.permute.xlu1 %v15371_v8 }
0x2252   :  { %4657 = vperm.xlu0 %10888, %v10021_v20   ;;  %4609 = vperm.xlu1 %10882, %v10021_v20  }
0x2256   :  { %10883 = vset.pattern.permute.xlu1 %v15369_v34  ;;  %10890 = vset.pattern.permute.xlu0 %v15371_v8 }
0x2257   :  { %4633 = vperm.xlu1 %10883, %v10021_v20   ;;  %v13672_v20 = vld [vmem:[%s15365_s18 + $0x40] sm:$0xff] }
0x225b   :  { %10884 = vset.pattern.permute.xlu1 %v15368_v58 }
0x225c   :  { %4517 = vperm.xlu1 %10884, %v4496_v46  }
0x2260   :  { %10885 = vset.pattern.permute.xlu1 %v15371_v8 }
0x2261   :  { %4605 = vperm.xlu1 %10885, %v4496_v46  }
0x2265   :  { %10887 = vset.pattern.permute.xlu1 %v15370_v26 }
0x2266   :  { %4653 = vperm.xlu1 %10887, %v4496_v46  }
0x226a   :  { %10889 = vset.pattern.permute.xlu1 %v15368_v58 }
0x22b8   :  { %v4602_v32 = vpop.permute.xlu0 %4601  ;;  %v4513_v0 = vpop.permute.xlu1 %4512 }
0x22b9   :  { %v4526_v29 = vmul.f32 %v13407_v2, %v4513_v0  ;;  %v4613_v4 = vmul.f32 %v13639_v13, %v4602_v32  ;;  %v13678_v32 = vld [vmem:[%s15365_s18 + $0x60] sm:$0xff] }
0x22bd   :  { %v4508_v11 = vpop.permute.xlu0 %4507  ;;  %v13633_v19 = vpop.f32.mrb[80].mxu1 }
0x22be   :  { %v4626_v49 = vpop.permute.xlu1 %4625  ;;  %v4581_v53 = vpop.f32.mrb[81].mxu1  ;;  %v4525_v35 = vmul.f32 %v13657_v63, %v4508_v11 }
0x22bf   :  { %v10029_v52 = vpop.f32.mrb[82].mxu1  ;;  %v4637_v41 = vmul.f32 %v13645_v9, %v4626_v49 }
0x22c0   :  { %v4584_v17 = vpop.f32.mrb[83].mxu1  ;;  %v4582_v37 = vadd.f32 %v4581_v53, %v4525_v35  ;;  %v13684_v53 = vld [vmem:[%s15365_s18 + $0x18] sm:$0xff] }
0x22c1   :  { %v4585_v36 = vadd.f32 %v4584_v17, %v4526_v29 }
0x22c2   :  { %v4650_v15 = vpop.permute.xlu1 %4649  ;;  %v4646_v33 = vpop.permute.xlu0 %4645 }
0x22c3   :  { %v4617_v18 = vadd.f32 %v4613_v4, %v4585_v36  ;;  %v4661_v5 = vmul.f32 %v13651_v48, %v4650_v15  ;;  %v4660_v0 = vmul.f32 %v13678_v32, %v4646_v33  ;;  %v13690_v36 = vld [vmem:[%s15365_s18 + $0x38] sm:$0xff] }
0x22c5   :  { %v4641_v38 = vadd.f32 %v4637_v41, %v4617_v18 }
0x22c7   :  { %v4665_v45 = vadd.f32 %v4661_v5, %v4641_v38  ;;  %v4598_v21 = vpop.permute.xlu1 %4597  ;;  %v4523_v22 = vpop.permute.xlu0 %4522 }
0x22c8   :  { %v4612_v43 = vmul.f32 %v13663_v10, %v4598_v21  ;;  %v4528_v29 = vmul.f32 %v13684_v53, %v4523_v22  ;;  %v13699_v21 = vld [vmem:[%s15365_s18 + $0x58] sm:$0xff] }
0x22c9   :  { %v4669_v56 = vmul.f32 0.125, %v4665_v45 }
0x22ca   :  { %v4616_v42 = vadd.f32 %v4612_v43, %v4582_v37  ;;  %v4593_v18 = vadd.f32 %v10029_v52, %v4528_v29  ;;  %v13705_v52 = vld [vmem:[%s15365_s18 + $0x78] sm:$0xff] }
0x22cb   :  { %v4673_v7 = vsel %vm779_vm7, %v4669_v56, -1e+30 }
0x22cc   :  { %v4622_v51 = vpop.permute.xlu1 %4621  ;;  %v4679_v40 = vsel %vm226_vm0, %v4673_v7, -inf  ;;  %v4630_v49 = vpop.permute.xlu0 %4629 }
0x22cd   :  { %v4636_v46 = vmul.f32 %v13672_v20, %v4622_v51  ;;  %4680 = vmax.xlane.f32.xlu0 %v4679_v40  ;;  %v13711_v40 = vld [vmem:[%s15365_s18 + $0x10] sm:$0xff] }
0x22cf   :  { %v4640_v11 = vadd.f32 %v4636_v46, %v4616_v42 }
0x22d1   :  { %v4610_v17 = vpop.permute.xlu1 %4609  ;;  %v4664_v4 = vadd.f32 %v4660_v0, %v4640_v11  ;;  %v4658_v38 = vpop.permute.xlu0 %4657 }
0x22d2   :  { %v4615_v15 = vmul.f32 %v13690_v36, %v4610_v17  ;;  %v4663_v43 = vmul.f32 %v13705_v52, %v4658_v38 }
0x22d3   :  { %v4668_v41 = vmul.f32 0.125, %v4664_v4  ;;  %v13721_v4 = vld [vmem:[%s15365_s18 + $0x30] sm:$0xff] }
0x22d4   :  { %v4619_v45 = vadd.f32 %v4615_v15, %v4593_v18 }
0x22d5   :  { %v4672_v33 = vsel %vm778_vm8, %v4668_v41, -1e+30  ;;  %v13727_v41 = vld [vmem:[%s15365_s18 + $0x50] sm:$0xff] }
0x22d6   :  { %v4634_v5 = vpop.permute.xlu1 %4633  ;;  %v4676_v35 = vsel %vm226_vm0, %v4672_v33, -inf  ;;  %v4638_v18 = vmul.f32 %v13727_v41, %v4630_v49 }
0x22d7   :  { %v4639_v56 = vmul.f32 %v13699_v21, %v4634_v5  ;;  %4677 = vmax.xlane.f32.xlu1 %v4676_v35 }
0x22d9   :  { %v4643_v22 = vadd.f32 %v4639_v56, %v4619_v45 }
0x22db   :  { %v4518_v37 = vpop.permute.xlu1 %4517  ;;  %v4667_v51 = vadd.f32 %v4663_v43, %v4643_v22 }
0x22dc   :  { %v4527_v42 = vmul.f32 %v13711_v40, %v4518_v37 }
0x22dd   :  { %v4671_v46 = vmul.f32 0.125, %v4667_v51 }
0x22de   :  { %v4590_v17 = vadd.f32 %v13633_v19, %v4527_v42  ;;  %v13733_v19 = vld [vmem:[%s15365_s18 + $0x70] sm:$0xff] }
0x22df   :  { %v4675_v0 = vsel %vm781_vm10, %v4671_v46, -1e+30 }
0x22e0   :  { %v4606_v11 = vpop.permute.xlu1 %4605  ;;  %v4685_v29 = vsel %vm226_vm0, %v4675_v0, -inf }
0x22e1   :  { %v4614_v15 = vmul.f32 %v13721_v4, %v4606_v11  ;;  %4686 = vmax.xlane.f32.xlu0 %v4685_v29 }
0x22e3   :  { %v4618_v38 = vadd.f32 %v4614_v15, %v4590_v17 }
0x22e5   :  { %v4642_v5 = vadd.f32 %v4638_v18, %v4618_v38  ;;  %v4654_v35 = vpop.permute.xlu1 %4653 }
0x22e6   :  { %v4662_v45 = vmul.f32 %v13733_v19, %v4654_v35 }
0x22e8   :  { %v4666_v56 = vadd.f32 %v4662_v45, %v4642_v5 }
0x22ea   :  { %v4670_v43 = vmul.f32 0.125, %v4666_v56 }
0x22ec   :  { %v4674_v22 = vsel %vm780_vm9, %v4670_v43, -1e+30 }
0x22ed   :  { %v4682_v37 = vsel %vm226_vm0, %v4674_v22, -inf }
0x22ee   :  { %4683 = vmax.xlane.f32.xlu1 %v4682_v37 }
0x235a   :  { %v4681_v51 = vpop.xlane.xlu0 %4680 }
0x235b   :  { %v4689_v49 = vsub.f32 %v4673_v7, %v4681_v51 }
0x235d   :  { %v4694_v42 = vmul.f32 1.442695, %v4689_v49 }
0x235f   :  { %11077 = vpow2.f32 %v4694_v42 }
0x2364   :  { %v4678_v46 = vpop.xlane.xlu1 %4677 }
0x2365   :  { %v4688_v11 = vsub.f32 %v4672_v33, %v4678_v46 }
0x2367   :  { %v4692_v29 = vmul.f32 1.442695, %v4688_v11 }
0x2369   :  { %v11078_v17 = vpop.eup %11077  ;;  %11079 = vpow2.f32 %v4692_v29 }
0x236a   :  { %v4703_v15 = vsel %vm226_vm0, %v11078_v17, 0.0 }
0x236b   :  { %4704 = vadd.xlane.f32.xlu0 %v4703_v15 }
0x236e   :  { %v4687_v18 = vpop.xlane.xlu0 %4686 }
0x236f   :  { %v4691_v38 = vsub.f32 %v4675_v0, %v4687_v18 }
0x2371   :  { %v4698_v5 = vmul.f32 1.442695, %v4691_v38 }
0x2373   :  { %v11080_v35 = vpop.eup %11079  ;;  %11081 = vpow2.f32 %v4698_v5 }
0x2374   :  { %v4700_v45 = vsel %vm226_vm0, %v11080_v35, 0.0 }
0x2375   :  { %4701 = vadd.xlane.f32.xlu1 %v4700_v45 }
0x237b   :  { %v4684_v56 = vpop.xlane.xlu1 %4683 }
0x237c   :  { %v4690_v7 = vsub.f32 %v4674_v22, %v4684_v56 }
0x237d   :  { %v11082_v43 = vpop.eup %11081 }
0x237e   :  { %v4696_v37 = vmul.f32 1.442695, %v4690_v7  ;;  %v4709_v33 = vsel %vm226_vm0, %v11082_v43, 0.0 }
0x237f   :  { %4710 = vadd.xlane.f32.xlu0 %v4709_v33 }
0x2380   :  { %11083 = vpow2.f32 %v4696_v37 }
0x238a   :  { %v11084_v51 = vpop.eup %11083 }
0x238b   :  { %v4706_v49 = vsel %vm226_vm0, %v11084_v51, 0.0 }
0x238c   :  { %4707 = vadd.xlane.f32.xlu1 %v4706_v49 }
0x23f8   :  { %v4705_v42 = vpop.xlane.xlu0 %4704 }
0x23f9   :  { %v4713_v0 = vmax.f32 %v4705_v42, 1e-30 }
0x23fb   :  { %11085 = vrcp.f32 %v4713_v0 }
0x2402   :  { %v4702_v46 = vpop.xlane.xlu1 %4701 }
0x2403   :  { %v4712_v11 = vmax.f32 %v4702_v46, 1e-30 }
0x2405   :  { %11087 = vrcp.f32 %v4712_v11  ;;  %v11086_v29 = vpop.eup %11085 }
0x2406   :  { %v4721_v18 = vmul.f32 %v11086_v29, %v11078_v17 }
0x2408   :  { %v13744_v45 = vmul.f32 %v12161_v47, %v4721_v18 }
0x240a   :  { %v4749_v33 = vmul.f32 %v13639_v13, %v13744_v45  ;;  %v4765_v29 = vmul.f32 %v13645_v9, %v13744_v45 }
0x240c   :  { %v4711_v15 = vpop.xlane.xlu0 %4710  ;;  %v4755_v11 = vsel %vm226_vm0, %v4749_v33, 0.0 }
0x240d   :  { %v4715_v22 = vmax.f32 %v4711_v15, 1e-30 }
0x240f   :  { %v11088_v38 = vpop.eup %11087  ;;  %11089 = vrcp.f32 %v4715_v22 }
0x2410   :  { %v4720_v5 = vmul.f32 %v11088_v38, %v11080_v35 }
0x2412   :  { %v13747_v56 = vmul.f32 %v12151_v31, %v4720_v5  ;;  %v4781_v5 = vmul.f32 %v13651_v48, %v13744_v45 }
0x2414   :  { %v4748_v7 = vmul.f32 %v13663_v10, %v13747_v56  ;;  %v4732_v37 = vmul.f32 %v13657_v63, %v13747_v56  ;;  %v4728_v17 = vpack.c.bf16 %v13744_v45, %v13747_v56  ;;  %v4764_v42 = vmul.f32 %v13672_v20, %v13747_v56 }
0x2415   :  { %v4780_v38 = vmul.f32 %v13678_v32, %v13747_v56 }
0x2416   :  { %v4752_v35 = vsel %vm226_vm0, %v4748_v7, 0.0  ;;  %v4736_v49 = vsel %vm226_vm0, %v4732_v37, 0.0  ;;  %v4768_v22 = vsel %vm226_vm0, %v4764_v42, 0.0  ;;  %v4771_v37 = vsel %vm226_vm0, %v4765_v29, 0.0 }
0x2417   :  { %4753 = vadd.xlane.f32.xlu0 %v4752_v35  ;;  %4737 = vadd.xlane.f32.xlu1 %v4736_v49  ;;  %v4784_v33 = vsel %vm226_vm0, %v4780_v38, 0.0  ;;  %v4787_v35 = vsel %vm226_vm0, %v4781_v5, 0.0 }
0x2419   :  { %v11090_v0 = vpop.eup %11089  ;;  %v4708_v46 = vpop.xlane.xlu1 %4707 }
0x241a   :  { %v4723_v15 = vmul.f32 %v11090_v0, %v11082_v43  ;;  %v4714_v18 = vmax.f32 %v4708_v46, 1e-30  ;;  %v4733_v43 = vmul.f32 %v13407_v2, %v13744_v45 }
0x241b   :  { %4756 = vadd.xlane.f32.xlu0 %v4755_v11  ;;  %4769 = vadd.xlane.f32.xlu1 %v4768_v22 }
0x241c   :  { %11091 = vrcp.f32 %v4714_v18  ;;  %v13770_v7 = vmul.f32 %v12181_v44, %v4723_v15  ;;  %v4739_v49 = vsel %vm226_vm0, %v4733_v43, 0.0 }
0x241e   :  { %v4751_v42 = vmul.f32 %v13690_v36, %v13770_v7  ;;  %v4735_v0 = vmul.f32 %v13684_v53, %v13770_v7  ;;  %v4767_v2 = vmul.f32 %v13699_v21, %v13770_v7 }
0x241f   :  { %4772 = vadd.xlane.f32.xlu0 %v4771_v37  ;;  %4785 = vadd.xlane.f32.xlu1 %v4784_v33 }
0x2420   :  { %v4761_v11 = vsel %vm226_vm0, %v4751_v42, 0.0  ;;  %v4745_v29 = vsel %vm226_vm0, %v4735_v0, 0.0  ;;  %v4777_v22 = vsel %vm226_vm0, %v4767_v2, 0.0 }
0x2423   :  { %4788 = vadd.xlane.f32.xlu0 %v4787_v35  ;;  %4740 = vadd.xlane.f32.xlu1 %v4739_v49  ;;  %v4783_v35 = vmul.f32 %v13705_v52, %v13770_v7 }
0x2425   :  { %v4793_v0 = vsel %vm226_vm0, %v4783_v35, 0.0 }
0x2426   :  { %v11092_v46 = vpop.eup %11091 }
0x2427   :  { %v4722_v15 = vmul.f32 %v11092_v46, %v11084_v51  ;;  %4762 = vadd.xlane.f32.xlu0 %v4761_v11  ;;  %4746 = vadd.xlane.f32.xlu1 %v4745_v29  ;;  %v4400_v11 = vadd.f32 %v13575_v16, %v11957_v59 }
0x2429   :  { %v13787_v18 = vmul.f32 %v12184_v12, %v4722_v15 }
0x242b   :  { %4778 = vadd.xlane.f32.xlu0 %v4777_v22  ;;  %v4734_v38 = vmul.f32 %v13711_v40, %v13787_v18  ;;  %v4750_v5 = vmul.f32 %v13721_v4, %v13787_v18  ;;  %v4729_v37 = vpack.c.bf16 %v13770_v7, %v13787_v18  ;;  %v4766_v43 = vmul.f32 %v13727_v41, %v13787_v18 }
0x242c   :  { %v4782_v42 = vmul.f32 %v13733_v19, %v13787_v18  ;;  %v4404_v7 = vadd.f32 %v13578_v1, %v11957_v59 }
0x242d   :  { %v4742_v33 = vsel %vm226_vm0, %v4734_v38, 0.0  ;;  %v4758_v51 = vsel %vm226_vm0, %v4750_v5, 0.0  ;;  %v4774_v49 = vsel %vm226_vm0, %v4766_v43, 0.0 }
0x242e   :  { %4743 = vadd.xlane.f32.xlu1 %v4742_v33  ;;  %v4790_v46 = vsel %vm226_vm0, %v4782_v42, 0.0  ;;  %v4731_v35 = vpack.c.bf16 %v4404_v7, %v4400_v11 }
0x242f   :  { %4759 = vadd.xlane.f32.xlu0 %v4758_v51 }
0x2432   :  { %4775 = vadd.xlane.f32.xlu1 %v4774_v49 }
0x2433   :  { %4794 = vadd.xlane.f32.xlu0 %v4793_v0 }
0x2436   :  { %4791 = vadd.xlane.f32.xlu1 %v4790_v46 }
0x2447   :  { %4964 = vrot.lane.b32.xlu1 %v13559_v14, %s11568_s11 }
0x2449   :  { %4966 = vrot.lane.b32.xlu0 %v13562_v6, %s11568_s11 }
0x244b   :  { %4968 = vrot.lane.b32.xlu1 %v4400_v11, %s11568_s11 }
0x244f   :  { %4970 = vrot.lane.b32.xlu1 %v4404_v7, %s11568_s11 }
0x24a4   :  { %v4754_v29 = vpop.xlane.xlu0 %4753  ;;  %v4738_v2 = vpop.xlane.xlu1 %4737 }
0x24a5   :  { %v4796_v22 = vsel %vm906_vm15, %v4738_v2, %v4754_v29 }
0x24a8   :  { %v4757_v15 = vpop.xlane.xlu0 %4756  ;;  %v4770_v18 = vpop.xlane.xlu1 %4769 }
0x24a9   :  { %v4800_v14 = vsel %vm911_vm1, %v4796_v22, %v4770_v18 }
0x24ac   :  { %v4773_v38 = vpop.xlane.xlu0 %4772  ;;  %v4786_v16 = vpop.xlane.xlu1 %4785 }
0x24ad   :  { %v4804_v5 = vsel %vm916_vm2, %v4800_v14, %v4786_v16 }
0x24ae   :  { %10032 = vmatprep.mubr.msk.f32.mxu0 %vm921_vm4, %v4804_v5 }
0x24b0   :  { %v4789_v6 = vpop.xlane.xlu0 %4788  ;;  %v4741_v33 = vpop.xlane.xlu1 %4740 }
0x24b1   :  { %v4797_v1 = vsel %vm906_vm15, %v4741_v33, %v4757_v15 }
0x24b2   :  { %v4801_v51 = vsel %vm911_vm1, %v4797_v1, %v4773_v38 }
0x24b3   :  { %v4805_v43 = vsel %vm916_vm2, %v4801_v51, %v4789_v6 }
0x24b4   :  { %v4763_v49 = vpop.xlane.xlu0 %4762  ;;  %10033 = vmatmul.mubr.msk.f32.vlgmr.msra.gmra.mrb[80].mxu0 %vm921_vm4, %v4805_v43  ;;  %v4747_v42 = vpop.xlane.xlu1 %4746 }
0x24b5   :  { %10039 = vmatpush3.bf16.msra.mxu0 %v13567_v61  ;;  %v4799_v22 = vsel %vm906_vm15, %v4747_v42, %v4763_v49 }
0x24b6   :  { %10040 = vmatprep.subr.bf16.mxu0 %v4731_v35 }
0x24b8   :  { %v4779_v0 = vpop.xlane.xlu0 %4778 }
0x24b9   :  { %10041 = vmatpush3.bf16.msra.mxu0 %v4731_v35  ;;  %v4803_v14 = vsel %vm911_vm1, %v4799_v22, %v4779_v0 }
0x24ba   :  { %10557 = vmatprep.subr.bf16.mxu0 %v11914_v23 }
0x24bb   :  { %v4744_v46 = vpop.xlane.xlu1 %4743 }
0x24bc   :  { %v4760_v29 = vpop.xlane.xlu0 %4759 }
0x24bd   :  { %v4798_v15 = vsel %vm906_vm15, %v4744_v46, %v4760_v29 }
0x24bf   :  { %v4776_v2 = vpop.xlane.xlu1 %4775 }
0x24c0   :  { %v4795_v18 = vpop.xlane.xlu0 %4794  ;;  %v4802_v11 = vsel %vm911_vm1, %v4798_v15, %v4776_v2 }
0x24c1   :  { %v4807_v38 = vsel %vm916_vm2, %v4803_v14, %v4795_v18 }
0x24c3   :  { %v4792_v7 = vpop.xlane.xlu1 %4791 }
0x24c4   :  { %v4806_v61 = vsel %vm916_vm2, %v4802_v11, %v4792_v7  ;;  %v4967_v2 = vpop.permute.xlu0 %4966 }
0x24c5   :  { %10035 = vmatprep.mubr.msk.f32.mxu0 %vm921_vm4, %v4806_v61 }
0x24c6   :  { %10036 = vmatmul.mubr.msk.f32.gmra.mrb[82].mxu0 %vm921_vm4, %v4807_v38 }
0x24c7   :  { %10042 = vmatprep.mubr.msk.bf16.mxu0 %vm226_vm0, %v4728_v17  ;;  %v4965_v17 = vpop.permute.xlu1 %4964 }
0x24ca   :  { %10043 = vmatmul.mubr.msk.bf16.vlgmr.msra.gmra.mrb[84].mxu0 %vm226_vm0, %v4729_v37 }
0x24cb   :  { %10559 = vmatpush3.bf16.msra.mxu0 %v11914_v23  ;;  %v4969_v5 = vpop.permute.xlu1 %4968 }
0x24cc   :  { %10561 = vmatprep.subr.bf16.mxu0 %v11919_v25 }
0x24cf   :  { %10563 = vmatpush3.bf16.msra.mxu0 %v11919_v25  ;;  %v4971_v0 = vpop.permute.xlu1 %4970 }
0x24d0   :  { %10565 = vmatprep.subr.bf16.mxu0 %v11930_v28 }
0x24d3   :  { %10567 = vmatpush3.bf16.msra.mxu0 %v11930_v28 }
0x24d4   :  { %10569 = vmatprep.subr.bf16.mxu0 %v11944_v50 }
0x24d7   :  { %10571 = vmatpush3.bf16.msra.mxu0 %v11944_v50 }
0x24d8   :  { %10076 = vmatprep.subr.msk.mxu0 %vm934_vm6, %v13548_v60 }
0x2587   :  { %v10034_v45 = vpop.f32.mrb[80].mxu0 }
0x2588   :  { %v4886_v56 = vpop.f32.mrb[81].mxu0 }
0x2599   :  { %v10037_v37 = vpop.f32.mrb[82].mxu0 }
0x259a   :  { %v4896_v16 = vpop.f32.mrb[83].mxu0 }
0x259d   :  { %v10044_v6 = vpop.f32.mrb[84].mxu0 }
0x259e   :  { %v4954_v33 = vadd.f32 %v10044_v6, %v4896_v16  ;;  %v4945_v1 = vpop.f32.mrb[85].mxu0 }
0x259f   :  { %v4946_v51 = vadd.f32 %v4945_v1, %v4886_v56  ;;  %v10045_v43 = vpop.f32.mrb[86].mxu0 }
0x25a0   :  { %v4978_v35 = vadd.f32 %v4969_v5, %v4954_v33  ;;  %v4957_v49 = vadd.f32 %v10045_v43, %v10037_v37  ;;  %v4948_v42 = vpop.f32.mrb[87].mxu0 }
0x25a1   :  { %v4976_v46 = vadd.f32 %v4965_v17, %v4946_v51  ;;  %v4949_v29 = vadd.f32 %v10034_v45, %v4948_v42 }
0x25a2   :  { %v4986_v15 = vmul.f32 0.01, %v4978_v35  ;;  %v4979_v18 = vadd.f32 %v4971_v0, %v4957_v49  ;;  %vm4982_vm14 = vcmp.ge.f32.partialorder %v4978_v35, 0.0 }
0x25a3   :  { %v4984_v22 = vmul.f32 0.01, %v4976_v46  ;;  %v4977_v11 = vadd.f32 %v4967_v2, %v4949_v29  ;;  %vm4980_vm5 = vcmp.ge.f32.partialorder %v4976_v46, 0.0 }
0x25a4   :  { %vm4983_vm11 = vcmp.ge.f32.partialorder %v4979_v18, 0.0  ;;  %v4987_v7 = vmul.f32 0.01, %v4979_v18  ;;  %v4990_v61 = vsel %vm4982_vm14, %v4978_v35, %v4986_v15 }
0x25a5   :  { %vm4981_vm12 = vcmp.ge.f32.partialorder %v4977_v11, 0.0  ;;  %v4985_v14 = vmul.f32 0.01, %v4977_v11  ;;  %v4988_v56 = vsel %vm4980_vm5, %v4976_v46, %v4984_v22 }
0x25a6   :  { %v4991_v38 = vsel %vm4983_vm11, %v4979_v18, %v4987_v7 }
0x25a7   :  { %v4989_v16 = vsel %vm4981_vm12, %v4977_v11, %v4985_v14  ;;  %v4993_v37 = vpack.c.bf16 %v4991_v38, %v4990_v61  ;;  %v13887_v61 = vld [vmem:[%s15364_s5 + $0x4] ss:$8 sps:$4 sm:$0xff]   ;;  %v13894_v38 = vld [vmem:[%s15364_s5] ss:$8 sps:$4 sm:$0xff]  }
0x25a8   :  { %v4992_v5 = vpack.c.bf16 %v4989_v16, %v4988_v56  ;;  %v13901_v56 = vld [vmem:[%s15364_s5 + $0x14] ss:$8 sps:$4 sm:$0xff]   ;;  %v13907_v16 = vld [vmem:[%s15364_s5 + $0x10] ss:$8 sps:$4 sm:$0xff]  }
0x25aa   :  { %9235 = vmatmul.mubr.msk.bf16.vlgmr.msra.gmra.mrb[84].mxu1 %vm433_vm3, %v4992_v5 }
0x25ab   :  { %5042 = vmatprep.mubr.bf16.mxu1 %v15368_v58 }
0x25b2   :  { %9236 = vmatmul.mubr.msk.bf16.gmra.mrb[88].mxu1 %vm433_vm3, %v4993_v37 }
0x267d   :  { %v5034_v45 = vpop.f32.mrb[84].mxu1 }
0x267e   :  { %v5035_v17 = vadd.f32 %v5034_v45, %v11955_v57  ;;  %v5036_v6 = vpop.f32.mrb[85].mxu1 }
0x267f   :  { %v5038_v33 = vpop.f32.mrb[86].mxu1  ;;  %v13856_v43 = vadd.f32 %v5036_v6, %v11957_v59 }
0x2680   :  { %v5039_v1 = vadd.f32 %v5038_v33, %v11955_v57  ;;  %v5040_v51 = vpop.f32.mrb[87].mxu1  ;;  %10062 = vmatprep.mubr.msk.f32.mxu0 %vm433_vm3, %v5035_v17 }
0x2681   :  { %v13859_v35 = vadd.f32 %v5040_v51, %v11957_v59 }
0x2682   :  { %v5053_v49 = vpack.c.bf16 %v5039_v1, %v5035_v17  ;;  %10063 = vmatmul.mubr.msk.f32.vlgmr.msra.gmra.mrb[88].mxu0 %vm433_vm3, %v5039_v1  ;;  %v13933_v1 = vld [vmem:[%s15365_s18 + $0x8] sm:$0xff] }
0x2683   :  { %v13864_v42 = vpack.c.bf16 %v13859_v35, %v13856_v43  ;;  %10077 = vmatpush3.msk.msra.mxu0 %vm934_vm6, %v13548_v60 }
0x2684   :  { %5178 = vrot.lane.b32.xlu0 %v5053_v49, %s11568_s11  ;;  %10072 = vmatprep.mubr.msk.bf16.mxu1 %vm433_vm3, %v5053_v49 }
0x2685   :  { %v5044_v0 = vpop.f32.mrb[88].mxu1  ;;  %10084 = vmatprep.subr.bf16.mxu0 %v13864_v42 }
0x2686   :  { %v5045_v46 = vadd.f32 %v5044_v0, %v11955_v57  ;;  %v13872_v29 = vpop.f32.mrb[89].mxu1 }
0x2687   :  { %v5048_v2 = vpop.f32.mrb[90].mxu1 }
0x2688   :  { %v5049_v15 = vadd.f32 %v5048_v2, %v11955_v57  ;;  %v13875_v18 = vpop.f32.mrb[91].mxu1  ;;  %10065 = vmatprep.mubr.msk.f32.mxu0 %vm433_vm3, %v5045_v46 }
0x268a   :  { %v5054_v22 = vpack.c.bf16 %v5049_v15, %v5045_v46  ;;  %10066 = vmatmul.mubr.msk.f32.gmra.mrb[90].mxu0 %vm433_vm3, %v5049_v15 }
0x268c   :  { %5180 = vrot.lane.b32.xlu1 %v5054_v22, %s11568_s11 }
0x26f6   :  { %v5179_v60 = vpop.permute.xlu0 %5178 }
0x26f7   :  { %10746 = vmatprep.subr.msk.bf16.mxu1 %vm433_vm3, %v5179_v60  ;;  %v5189_v11 = vsel %vm433_vm3, %v5179_v60, 0 }
0x26f8   :  { %10069 = vmatpush3.bf16.xpose.msra.mxu1 %v5189_v11 }
0x26fe   :  { %v5181_v7 = vpop.permute.xlu1 %5180 }
0x26ff   :  { %10747 = vmatprep.subr.msk.bf16.mxu1 %vm433_vm3, %v5181_v7  ;;  %v5192_v14 = vsel %vm433_vm3, %v5181_v7, 0 }
0x2700   :  { %10071 = vmatpush3.bf16.xpose.msra.mxu1 %v5192_v14 }
0x2701   :  { %5647 = vmatprep.subr.bf16.mxu1 %v13887_v61 }
0x2707   :  { %10073 = vmatmul.mubr.msk.bf16.vlgmr.msra.gmra.mrb[92].mxu1 %vm433_vm3, %v5054_v22 }
0x2708   :  { %5648 = vmatpush1.bf16.msra.mxu1 %v13894_v38  ;;  %5679 = vmatprep.mubr.bf16.mxu1 %v15368_v58 }
0x2709   :  { %5649 = vmatprep.subr.bf16.mxu1 %v13901_v56 }
0x270c   :  { %5650 = vmatpush1.bf16.msra.mxu1 %v13907_v16 }
0x270d   :  { %5651 = vmatprep.subr.bf16.mxu1 %v13596_v62 }
0x2710   :  { %5652 = vmatpush1.bf16.msra.mxu1 %v13602_v30 }
0x2711   :  { %5653 = vmatprep.subr.bf16.mxu1 %v13608_v3 }
0x2714   :  { %5654 = vmatpush1.bf16.msra.mxu1 %v13614_v55 }
0x2755   :  { %v10064_v37 = vpop.f32.mrb[88].mxu0 }
0x2756   :  { %v5133_v5 = vpop.f32.mrb[89].mxu0  ;;  %5248 = vperm.xlu0 %10890, %v10064_v37   ;;  %5159 = vperm.xlu1 %10889, %v10064_v37  }
0x275a   :  { %10893 = vset.pattern.permute.xlu0 %v15368_v58  ;;  %10891 = vset.pattern.permute.xlu1 %v15369_v34 }
0x275b   :  { %5154 = vperm.xlu0 %10893, %v5133_v5   ;;  %5272 = vperm.xlu1 %10891, %v10064_v37  }
0x275d   :  { %v10067_v45 = vpop.f32.mrb[90].mxu0 }
0x275e   :  { %v5143_v17 = vpop.f32.mrb[91].mxu0 }
0x275f   :  { %10896 = vset.pattern.permute.xlu0 %v15370_v26  ;;  %10892 = vset.pattern.permute.xlu1 %v15370_v26 }
0x2760   :  { %5292 = vperm.xlu0 %10896, %v5133_v5   ;;  %5296 = vperm.xlu1 %10892, %v10064_v37  }
0x2764   :  { %10897 = vset.pattern.permute.xlu0 %v15368_v58  ;;  %10894 = vset.pattern.permute.xlu1 %v15371_v8 }
0x2765   :  { %5169 = vperm.xlu0 %10897, %v10067_v45   ;;  %5244 = vperm.xlu1 %10894, %v5133_v5  }
0x2769   :  { %10902 = vset.pattern.permute.xlu0 %v15369_v34  ;;  %10895 = vset.pattern.permute.xlu1 %v15369_v34 }
0x276a   :  { %5276 = vperm.xlu0 %10902, %v5143_v17   ;;  %5268 = vperm.xlu1 %10895, %v5133_v5  }
0x276e   :  { %10904 = vset.pattern.permute.xlu0 %v15370_v26  ;;  %10898 = vset.pattern.permute.xlu1 %v15371_v8 }
0x276f   :  { %5304 = vperm.xlu0 %10904, %v10067_v45   ;;  %5256 = vperm.xlu1 %10898, %v10067_v45  }
0x2773   :  { %10899 = vset.pattern.permute.xlu1 %v15369_v34  ;;  %10906 = vset.pattern.permute.xlu0 %v15371_v8 }
0x2774   :  { %5280 = vperm.xlu1 %10899, %v10067_v45  }
0x2778   :  { %10900 = vset.pattern.permute.xlu1 %v15368_v58 }
0x2779   :  { %5164 = vperm.xlu1 %10900, %v5143_v17  }
0x277d   :  { %10901 = vset.pattern.permute.xlu1 %v15371_v8 }
0x277e   :  { %5252 = vperm.xlu1 %10901, %v5143_v17  }
0x2782   :  { %10903 = vset.pattern.permute.xlu1 %v15370_v26 }
0x2783   :  { %5300 = vperm.xlu1 %10903, %v5143_v17  }
0x2787   :  { %10905 = vset.pattern.permute.xlu1 %v15368_v58 }
0x27d5   :  { %v5249_v62 = vpop.permute.xlu0 %5248  ;;  %v5160_v30 = vpop.permute.xlu1 %5159 }
0x27d6   :  { %v5173_v51 = vmul.f32 %v13933_v1, %v5160_v30  ;;  %v5260_v46 = vmul.f32 %v13639_v13, %v5249_v62 }
0x27da   :  { %v5155_v3 = vpop.permute.xlu0 %5154  ;;  %v10074_v55 = vpop.f32.mrb[92].mxu1 }
0x27db   :  { %v5273_v6 = vpop.permute.xlu1 %5272  ;;  %v5228_v33 = vpop.f32.mrb[93].mxu1  ;;  %v5172_v37 = vmul.f32 %v13657_v63, %v5155_v3 }
0x27dc   :  { %v10075_v49 = vpop.f32.mrb[94].mxu1  ;;  %v5284_v22 = vmul.f32 %v13645_v9, %v5273_v6 }
0x27dd   :  { %v5231_v0 = vpop.f32.mrb[95].mxu1  ;;  %v5229_v26 = vadd.f32 %v5228_v33, %v5172_v37 }
0x27de   :  { %v5232_v2 = vadd.f32 %v5231_v0, %v5173_v51 }
0x27df   :  { %v5297_v15 = vpop.permute.xlu1 %5296  ;;  %v5293_v11 = vpop.permute.xlu0 %5292 }
0x27e0   :  { %v5264_v60 = vadd.f32 %v5260_v46, %v5232_v2  ;;  %v5308_v14 = vmul.f32 %v13651_v48, %v5297_v15  ;;  %v5307_v2 = vmul.f32 %v13678_v32, %v5293_v11 }
0x27e2   :  { %v5288_v7 = vadd.f32 %v5284_v22, %v5264_v60 }
0x27e4   :  { %v5312_v5 = vadd.f32 %v5308_v14, %v5288_v7  ;;  %v5245_v45 = vpop.permute.xlu1 %5244  ;;  %v5170_v8 = vpop.permute.xlu0 %5169 }
0x27e5   :  { %v5259_v30 = vmul.f32 %v13663_v10, %v5245_v45  ;;  %v5175_v22 = vmul.f32 %v13684_v53, %v5170_v8 }
0x27e6   :  { %v5316_v17 = vmul.f32 0.125, %v5312_v5 }
0x27e7   :  { %v5263_v0 = vadd.f32 %v5259_v30, %v5229_v26  ;;  %v5240_v37 = vadd.f32 %v10075_v49, %v5175_v22 }
0x27e8   :  { %v5320_v62 = vsel %vm779_vm7, %v5316_v17, -1e+30 }
0x27e9   :  { %v5269_v51 = vpop.permute.xlu1 %5268  ;;  %v5326_v6 = vsel %vm226_vm0, %v5320_v62, -inf  ;;  %v5277_v15 = vpop.permute.xlu0 %5276 }
0x27ea   :  { %v5283_v46 = vmul.f32 %v13672_v20, %v5269_v51  ;;  %5327 = vmax.xlane.f32.xlu0 %v5326_v6 }
0x27ec   :  { %v5287_v3 = vadd.f32 %v5283_v46, %v5263_v0 }
0x27ee   :  { %v5257_v60 = vpop.permute.xlu1 %5256  ;;  %v5311_v7 = vadd.f32 %v5307_v2, %v5287_v3  ;;  %v5305_v45 = vpop.permute.xlu0 %5304 }
0x27ef   :  { %v5262_v33 = vmul.f32 %v13690_v36, %v5257_v60  ;;  %v5310_v51 = vmul.f32 %v13705_v52, %v5305_v45 }
0x27f0   :  { %v5315_v14 = vmul.f32 0.125, %v5311_v7 }
0x27f1   :  { %v5266_v30 = vadd.f32 %v5262_v33, %v5240_v37  ;;  %v5285_v33 = vmul.f32 %v13727_v41, %v5277_v15 }
0x27f2   :  { %v5319_v5 = vsel %vm778_vm8, %v5315_v14, -1e+30 }
0x27f3   :  { %v5281_v26 = vpop.permute.xlu1 %5280  ;;  %v5323_v17 = vsel %vm226_vm0, %v5319_v5, -inf }
0x27f4   :  { %v5286_v11 = vmul.f32 %v13699_v21, %v5281_v26  ;;  %5324 = vmax.xlane.f32.xlu1 %v5323_v17 }
0x27f6   :  { %v5290_v8 = vadd.f32 %v5286_v11, %v5266_v30 }
0x27f8   :  { %v5165_v6 = vpop.permute.xlu1 %5164  ;;  %v5314_v0 = vadd.f32 %v5310_v51, %v5290_v8 }
0x27f9   :  { %v5174_v46 = vmul.f32 %v13711_v40, %v5165_v6 }
0x27fa   :  { %v5318_v2 = vmul.f32 0.125, %v5314_v0 }
0x27fb   :  { %v5237_v60 = vadd.f32 %v10074_v55, %v5174_v46 }
0x27fc   :  { %v5322_v49 = vsel %vm781_vm10, %v5318_v2, -1e+30 }
0x27fd   :  { %v5253_v3 = vpop.permute.xlu1 %5252  ;;  %v5332_v22 = vsel %vm226_vm0, %v5322_v49, -inf }
0x27fe   :  { %v5261_v7 = vmul.f32 %v13721_v4, %v5253_v3  ;;  %5333 = vmax.xlane.f32.xlu0 %v5332_v22 }
0x2800   :  { %v5265_v14 = vadd.f32 %v5261_v7, %v5237_v60 }
0x2802   :  { %v5289_v37 = vadd.f32 %v5285_v33, %v5265_v14  ;;  %v5301_v45 = vpop.permute.xlu1 %5300 }
0x2803   :  { %v5309_v26 = vmul.f32 %v13733_v19, %v5301_v45 }
0x2805   :  { %v5313_v17 = vadd.f32 %v5309_v26, %v5289_v37 }
0x2807   :  { %v5317_v30 = vmul.f32 0.125, %v5313_v17 }
0x2809   :  { %v5321_v11 = vsel %vm780_vm9, %v5317_v30, -1e+30 }
0x280a   :  { %v5329_v51 = vsel %vm226_vm0, %v5321_v11, -inf }
0x280b   :  { %5330 = vmax.xlane.f32.xlu1 %v5329_v51 }
0x2877   :  { %v5328_v8 = vpop.xlane.xlu0 %5327 }
0x2878   :  { %v5336_v55 = vsub.f32 %v5320_v62, %v5328_v8 }
0x287a   :  { %v5341_v6 = vmul.f32 1.442695, %v5336_v55 }
0x287c   :  { %11093 = vpow2.f32 %v5341_v6 }
0x2881   :  { %v5325_v0 = vpop.xlane.xlu1 %5324 }
0x2882   :  { %v5335_v46 = vsub.f32 %v5319_v5, %v5325_v0 }
0x2884   :  { %v5339_v15 = vmul.f32 1.442695, %v5335_v46 }
0x2886   :  { %v11094_v2 = vpop.eup %11093  ;;  %11095 = vpow2.f32 %v5339_v15 }
0x2887   :  { %v5350_v3 = vsel %vm226_vm0, %v11094_v2, 0.0 }
0x2888   :  { %5351 = vadd.xlane.f32.xlu0 %v5350_v3 }
0x288b   :  { %v5334_v22 = vpop.xlane.xlu0 %5333 }
0x288c   :  { %v5338_v60 = vsub.f32 %v5322_v49, %v5334_v22 }
0x288e   :  { %v5345_v7 = vmul.f32 1.442695, %v5338_v60 }
0x2890   :  { %v11096_v33 = vpop.eup %11095  ;;  %11097 = vpow2.f32 %v5345_v7 }
0x2891   :  { %v5347_v14 = vsel %vm226_vm0, %v11096_v33, 0.0 }
0x2892   :  { %5348 = vadd.xlane.f32.xlu1 %v5347_v14 }
0x2898   :  { %v5331_v37 = vpop.xlane.xlu1 %5330 }
0x2899   :  { %v5337_v62 = vsub.f32 %v5321_v11, %v5331_v37 }
0x289a   :  { %v11098_v45 = vpop.eup %11097 }
0x289b   :  { %v5343_v26 = vmul.f32 1.442695, %v5337_v62  ;;  %v5356_v5 = vsel %vm226_vm0, %v11098_v45, 0.0 }
0x289c   :  { %5357 = vadd.xlane.f32.xlu0 %v5356_v5 }
0x289d   :  { %11099 = vpow2.f32 %v5343_v26 }
0x28a7   :  { %v11100_v17 = vpop.eup %11099 }
0x28a8   :  { %v5353_v30 = vsel %vm226_vm0, %v11100_v17, 0.0 }
0x28a9   :  { %5354 = vadd.xlane.f32.xlu1 %v5353_v30 }
0x2915   :  { %v5352_v51 = vpop.xlane.xlu0 %5351 }
0x2916   :  { %v5360_v49 = vmax.f32 %v5352_v51, 1e-30 }
0x2918   :  { %11101 = vrcp.f32 %v5360_v49 }
0x291f   :  { %v5349_v8 = vpop.xlane.xlu1 %5348 }
0x2920   :  { %v5359_v55 = vmax.f32 %v5349_v8, 1e-30 }
0x2922   :  { %11103 = vrcp.f32 %v5359_v55  ;;  %v11102_v6 = vpop.eup %11101 }
0x2923   :  { %v5368_v46 = vmul.f32 %v11102_v6, %v11094_v2 }
0x2925   :  { %v13968_v22 = vmul.f32 %v12161_v47, %v5368_v46 }
0x2927   :  { %v5396_v37 = vmul.f32 %v13639_v13, %v13968_v22 }
0x2929   :  { %v5358_v0 = vpop.xlane.xlu0 %5357  ;;  %v5402_v30 = vsel %vm226_vm0, %v5396_v37, 0.0 }
0x292a   :  { %v5362_v11 = vmax.f32 %v5358_v0, 1e-30 }
0x292c   :  { %v11104_v15 = vpop.eup %11103  ;;  %11105 = vrcp.f32 %v5362_v11 }
0x292d   :  { %v5367_v3 = vmul.f32 %v11104_v15, %v11096_v33 }
0x292f   :  { %v13971_v60 = vmul.f32 %v12151_v31, %v5367_v3 }
0x2931   :  { %v5395_v7 = vmul.f32 %v13663_v10, %v13971_v60  ;;  %v5379_v14 = vmul.f32 %v13657_v63, %v13971_v60  ;;  %v5375_v2 = vpack.c.bf16 %v13968_v22, %v13971_v60  ;;  %v5411_v26 = vmul.f32 %v13672_v20, %v13971_v60 }
0x2932   :  { %v5412_v63 = vmul.f32 %v13645_v9, %v13968_v22  ;;  %v5427_v8 = vmul.f32 %v13678_v32, %v13971_v60  ;;  %v5428_v20 = vmul.f32 %v13651_v48, %v13968_v22 }
0x2933   :  { %v5399_v33 = vsel %vm226_vm0, %v5395_v7, 0.0  ;;  %v5383_v62 = vsel %vm226_vm0, %v5379_v14, 0.0  ;;  %v5415_v49 = vsel %vm226_vm0, %v5411_v26, 0.0 }
0x2934   :  { %5400 = vadd.xlane.f32.xlu0 %v5399_v33  ;;  %5384 = vadd.xlane.f32.xlu1 %v5383_v62  ;;  %v5418_v6 = vsel %vm226_vm0, %v5412_v63, 0.0  ;;  %v5431_v9 = vsel %vm226_vm0, %v5427_v8, 0.0  ;;  %v5434_v32 = vsel %vm226_vm0, %v5428_v20, 0.0 }
0x2936   :  { %v11106_v5 = vpop.eup %11105  ;;  %v5355_v10 = vpop.xlane.xlu1 %5354 }
0x2937   :  { %v5370_v13 = vmul.f32 %v11106_v5, %v11098_v45  ;;  %v5361_v51 = vmax.f32 %v5355_v10, 1e-30  ;;  %v5380_v45 = vmul.f32 %v13933_v1, %v13968_v22  ;;  %v14074_v22 = vld [vmem:[%s15299_s10] sm:$0xf] }
0x2938   :  { %5403 = vadd.xlane.f32.xlu0 %v5402_v30  ;;  %5416 = vadd.xlane.f32.xlu1 %v5415_v49 }
0x2939   :  { %11107 = vrcp.f32 %v5361_v51  ;;  %v13994_v55 = vmul.f32 %v12181_v44, %v5370_v13  ;;  %v5386_v0 = vsel %vm226_vm0, %v5380_v45, 0.0 }
0x293b   :  { %v5398_v46 = vmul.f32 %v13690_v36, %v13994_v55  ;;  %v5382_v48 = vmul.f32 %v13684_v53, %v13994_v55  ;;  %v5414_v7 = vmul.f32 %v13699_v21, %v13994_v55  ;;  %v5430_v5 = vmul.f32 %v13705_v52, %v13994_v55 }
0x293c   :  { %5419 = vadd.xlane.f32.xlu0 %v5418_v6  ;;  %5432 = vadd.xlane.f32.xlu1 %v5431_v9  ;;  %v5051_v52 = vadd.f32 %v13875_v18, %v11957_v59 }
0x293d   :  { %v5408_v15 = vsel %vm226_vm0, %v5398_v46, 0.0  ;;  %v5392_v3 = vsel %vm226_vm0, %v5382_v48, 0.0  ;;  %v5424_v36 = vsel %vm226_vm0, %v5414_v7, 0.0  ;;  %v5440_v10 = vsel %vm226_vm0, %v5430_v5, 0.0 }
0x2940   :  { %5435 = vadd.xlane.f32.xlu0 %v5434_v32  ;;  %5387 = vadd.xlane.f32.xlu1 %v5386_v0 }
0x2943   :  { %v11108_v11 = vpop.eup %11107 }
0x2944   :  { %v5369_v14 = vmul.f32 %v11108_v11, %v11100_v17  ;;  %5409 = vadd.xlane.f32.xlu0 %v5408_v15  ;;  %5393 = vadd.xlane.f32.xlu1 %v5392_v3 }
0x2946   :  { %v14011_v37 = vmul.f32 %v12184_v12, %v5369_v14 }
0x2948   :  { %5425 = vadd.xlane.f32.xlu0 %v5424_v36  ;;  %v5381_v53 = vmul.f32 %v13711_v40, %v14011_v37  ;;  %v5397_v33 = vmul.f32 %v13721_v4, %v14011_v37  ;;  %v5376_v62 = vpack.c.bf16 %v13994_v55, %v14011_v37  ;;  %v5413_v26 = vmul.f32 %v13727_v41, %v14011_v37 }
0x2949   :  { %v5429_v4 = vmul.f32 %v13733_v19, %v14011_v37  ;;  %v5047_v41 = vadd.f32 %v13872_v29, %v11957_v59 }
0x294a   :  { %v5389_v21 = vsel %vm226_vm0, %v5381_v53, 0.0  ;;  %v5405_v17 = vsel %vm226_vm0, %v5397_v33, 0.0  ;;  %v5421_v40 = vsel %vm226_vm0, %v5413_v26, 0.0 }
0x294b   :  { %5390 = vadd.xlane.f32.xlu1 %v5389_v21  ;;  %v5437_v30 = vsel %vm226_vm0, %v5429_v4, 0.0  ;;  %v5378_v45 = vpack.c.bf16 %v5051_v52, %v5047_v41 }
0x294c   :  { %5406 = vadd.xlane.f32.xlu0 %v5405_v17 }
0x294f   :  { %5422 = vadd.xlane.f32.xlu1 %v5421_v40 }
0x2950   :  { %5441 = vadd.xlane.f32.xlu0 %v5440_v10 }
0x2953   :  { %5438 = vadd.xlane.f32.xlu1 %v5437_v30 }
0x2964   :  { %5611 = vrot.lane.b32.xlu1 %v13856_v43, %s11568_s11 }
0x2966   :  { %5613 = vrot.lane.b32.xlu0 %v13859_v35, %s11568_s11 }
0x2968   :  { %5615 = vrot.lane.b32.xlu1 %v5047_v41, %s11568_s11 }
0x296c   :  { %5617 = vrot.lane.b32.xlu1 %v5051_v52, %s11568_s11 }
0x29c1   :  { %v5401_v19 = vpop.xlane.xlu0 %5400  ;;  %v5385_v63 = vpop.xlane.xlu1 %5384 }
0x29c2   :  { %v5443_v49 = vsel %vm906_vm15, %v5385_v63, %v5401_v19 }
0x29c5   :  { %v5404_v13 = vpop.xlane.xlu0 %5403  ;;  %v5417_v51 = vpop.xlane.xlu1 %5416 }
0x29c6   :  { %v5447_v43 = vsel %vm911_vm1, %v5443_v49, %v5417_v51 }
0x29c9   :  { %v5420_v8 = vpop.xlane.xlu0 %5419  ;;  %v5433_v29 = vpop.xlane.xlu1 %5432 }
0x29ca   :  { %v5451_v20 = vsel %vm916_vm2, %v5447_v43, %v5433_v29 }
0x29cb   :  { %10078 = vmatprep.mubr.msk.f32.mxu0 %vm921_vm4, %v5451_v20 }
0x29cd   :  { %v5436_v35 = vpop.xlane.xlu0 %5435  ;;  %v5388_v55 = vpop.xlane.xlu1 %5387 }
0x29ce   :  { %v5444_v18 = vsel %vm906_vm15, %v5388_v55, %v5404_v13 }
0x29cf   :  { %v5448_v6 = vsel %vm911_vm1, %v5444_v18, %v5420_v8 }
0x29d0   :  { %v5452_v9 = vsel %vm916_vm2, %v5448_v6, %v5436_v35 }
0x29d1   :  { %v5410_v32 = vpop.xlane.xlu0 %5409  ;;  %10079 = vmatmul.mubr.msk.f32.vlgmr.msra.gmra.mrb[92].mxu0 %vm921_vm4, %v5452_v9  ;;  %v5394_v0 = vpop.xlane.xlu1 %5393 }
0x29d2   :  { %10085 = vmatpush3.bf16.msra.mxu0 %v13864_v42  ;;  %v5446_v14 = vsel %vm906_vm15, %v5394_v0, %v5410_v32 }
0x29d3   :  { %10086 = vmatprep.subr.bf16.mxu0 %v5378_v45 }
0x29d5   :  { %v5426_v46 = vpop.xlane.xlu0 %5425 }
0x29d6   :  { %10087 = vmatpush3.bf16.msra.mxu0 %v5378_v45  ;;  %v5450_v53 = vsel %vm911_vm1, %v5446_v14, %v5426_v46 }
0x29d7   :  { %10573 = vmatprep.subr.bf16.mxu0 %v11914_v23 }
0x29d8   :  { %v5391_v48 = vpop.xlane.xlu1 %5390 }
0x29d9   :  { %v5407_v11 = vpop.xlane.xlu0 %5406 }
0x29da   :  { %v5445_v3 = vsel %vm906_vm15, %v5391_v48, %v5407_v11 }
0x29dc   :  { %v5423_v15 = vpop.xlane.xlu1 %5422 }
0x29dd   :  { %v5442_v7 = vpop.xlane.xlu0 %5441  ;;  %v5449_v37 = vsel %vm911_vm1, %v5445_v3, %v5423_v15 }
0x29de   :  { %v5454_v33 = vsel %vm916_vm2, %v5450_v53, %v5442_v7 }
0x29e0   :  { %v5439_v36 = vpop.xlane.xlu1 %5438 }
0x29e1   :  { %v5453_v42 = vsel %vm916_vm2, %v5449_v37, %v5439_v36  ;;  %v5614_v49 = vpop.permute.xlu0 %5613 }
0x29e2   :  { %10081 = vmatprep.mubr.msk.f32.mxu0 %vm921_vm4, %v5453_v42 }
0x29e3   :  { %10082 = vmatmul.mubr.msk.f32.gmra.mrb[94].mxu0 %vm921_vm4, %v5454_v33 }
0x29e4   :  { %10088 = vmatprep.mubr.msk.bf16.mxu0 %vm226_vm0, %v5375_v2 }
0x29e7   :  { %10089 = vmatmul.mubr.msk.bf16.vlgmr.msra.gmra.mrb[96].mxu0 %vm226_vm0, %v5376_v62  ;;  %v5612_v62 = vpop.permute.xlu1 %5611 }
0x29e8   :  { %10575 = vmatpush3.bf16.msra.mxu0 %v11914_v23 }
0x29e9   :  { %10577 = vmatprep.subr.bf16.mxu0 %v11919_v25 }
0x29eb   :  { %v5616_v26 = vpop.permute.xlu1 %5615 }
0x29ec   :  { %10579 = vmatpush3.bf16.msra.mxu0 %v11919_v25 }
0x29ed   :  { %10581 = vmatprep.subr.bf16.mxu0 %v11930_v28 }
0x29ef   :  { %v5618_v63 = vpop.permute.xlu1 %5617 }
0x29f0   :  { %10583 = vmatpush3.bf16.msra.mxu0 %v11930_v28 }
0x29f1   :  { %10585 = vmatprep.subr.bf16.mxu0 %v11944_v50 }
0x29f4   :  { %10587 = vmatpush3.bf16.msra.mxu0 %v11944_v50 }
0x29f5   :  { %10122 = vmatprep.subr.msk.mxu0 %vm934_vm6, %v14074_v22 }
0x2aa4   :  { %v10080_v60 = vpop.f32.mrb[92].mxu0 }
0x2aa5   :  { %v5533_v2 = vpop.f32.mrb[93].mxu0 }
0x2ab6   :  { %v10083_v21 = vpop.f32.mrb[94].mxu0 }
0x2ab7   :  { %v5543_v17 = vpop.f32.mrb[95].mxu0 }
0x2aba   :  { %v10090_v5 = vpop.f32.mrb[96].mxu0 }
0x2abb   :  { %v5601_v40 = vadd.f32 %v10090_v5, %v5543_v17  ;;  %v5592_v4 = vpop.f32.mrb[97].mxu0 }
0x2abc   :  { %v5593_v10 = vadd.f32 %v5592_v4, %v5533_v2  ;;  %v10091_v30 = vpop.f32.mrb[98].mxu0 }
0x2abd   :  { %v5625_v41 = vadd.f32 %v5616_v26, %v5601_v40  ;;  %v5604_v52 = vadd.f32 %v10091_v30, %v10083_v21  ;;  %v5595_v19 = vpop.f32.mrb[99].mxu0 }
0x2abe   :  { %v5623_v13 = vadd.f32 %v5612_v62, %v5593_v10  ;;  %v5596_v51 = vadd.f32 %v10080_v60, %v5595_v19  ;;  %v14122_v10 = vld [vmem:[%s15364_s5 + $0x24] ss:$8 sps:$4 sm:$0xff]   ;;  %v15372_v19 = vmov 3  }
0x2abf   :  { %v5633_v43 = vmul.f32 0.01, %v5625_v41  ;;  %v5626_v8 = vadd.f32 %v5618_v63, %v5604_v52  ;;  %vm5629_vm13 = vcmp.ge.f32.partialorder %v5625_v41, 0.0  ;;  %v15373_v63 = vmov 1  }
0x2ac0   :  { %v5631_v29 = vmul.f32 0.01, %v5623_v13  ;;  %v5624_v20 = vadd.f32 %v5614_v49, %v5596_v51  ;;  %vm5627_vm14 = vcmp.ge.f32.partialorder %v5623_v13, 0.0 }
0x2ac1   :  { %vm5630_vm5 = vcmp.ge.f32.partialorder %v5626_v8, 0.0  ;;  %v5634_v35 = vmul.f32 0.01, %v5626_v8  ;;  %v5637_v18 = vsel %vm5629_vm13, %v5625_v41, %v5633_v43 }
0x2ac2   :  { %vm5628_vm11 = vcmp.ge.f32.partialorder %v5624_v20, 0.0  ;;  %v5632_v55 = vmul.f32 0.01, %v5624_v20  ;;  %v5635_v9 = vsel %vm5627_vm14, %v5623_v13, %v5631_v29 }
0x2ac3   :  { %v5638_v6 = vsel %vm5630_vm5, %v5626_v8, %v5634_v35 }
0x2ac4   :  { %v5636_v45 = vsel %vm5628_vm11, %v5624_v20, %v5632_v55  ;;  %v5640_v32 = vpack.c.bf16 %v5638_v6, %v5637_v18  ;;  %v14165_v18 = vld [vmem:[%s15365_s18 + $0x28] sm:$0xff] }
0x2ac5   :  { %v5639_v0 = vpack.c.bf16 %v5636_v45, %v5635_v9 }
0x2ac7   :  { %9250 = vmatmul.mubr.msk.bf16.vlgmr.msra.gmra.mrb[96].mxu1 %vm433_vm3, %v5639_v0 }
0x2ac8   :  { %5689 = vmatprep.mubr.bf16.mxu1 %v15368_v58 }
0x2acf   :  { %9251 = vmatmul.mubr.msk.bf16.gmra.mrb[100].mxu1 %vm433_vm3, %v5640_v32  ;;  %v14171_v32 = vld [vmem:[%s15365_s18 + $0x48] sm:$0xff] }
0x2b9a   :  { %v5681_v46 = vpop.f32.mrb[96].mxu1 }
0x2b9b   :  { %v5682_v48 = vadd.f32 %v5681_v46, %v11955_v57  ;;  %v5683_v11 = vpop.f32.mrb[97].mxu1 }
0x2b9c   :  { %v5685_v15 = vpop.f32.mrb[98].mxu1  ;;  %v14085_v14 = vadd.f32 %v5683_v11, %v11957_v59 }
0x2b9d   :  { %v5686_v3 = vadd.f32 %v5685_v15, %v11955_v57  ;;  %v5687_v7 = vpop.f32.mrb[99].mxu1  ;;  %10108 = vmatprep.mubr.msk.f32.mxu0 %vm433_vm3, %v5682_v48  ;;  %v14177_v15 = vld [vmem:[%s15365_s18 + $0x68] sm:$0xff] }
0x2b9e   :  { %v14088_v37 = vadd.f32 %v5687_v7, %v11957_v59  ;;  %v14183_v7 = vld [vmem:[%s15365_s18] sm:$0xff] }
0x2b9f   :  { %v5700_v36 = vpack.c.bf16 %v5686_v3, %v5682_v48  ;;  %10109 = vmatmul.mubr.msk.f32.vlgmr.msra.gmra.mrb[100].mxu0 %vm433_vm3, %v5686_v3 }
0x2ba0   :  { %v14093_v53 = vpack.c.bf16 %v14088_v37, %v14085_v14  ;;  %10123 = vmatpush3.msk.msra.mxu0 %vm934_vm6, %v14074_v22 }
0x2ba1   :  { %5825 = vrot.lane.b32.xlu0 %v5700_v36, %s11568_s11  ;;  %10118 = vmatprep.mubr.msk.bf16.mxu1 %vm433_vm3, %v5700_v36 }
0x2ba2   :  { %v5691_v42 = vpop.f32.mrb[100].mxu1  ;;  %10130 = vmatprep.subr.bf16.mxu0 %v14093_v53 }
0x2ba3   :  { %v5692_v33 = vadd.f32 %v5691_v42, %v11955_v57  ;;  %v14101_v60 = vpop.f32.mrb[101].mxu1 }
0x2ba4   :  { %v5695_v2 = vpop.f32.mrb[102].mxu1 }
0x2ba5   :  { %v5696_v62 = vadd.f32 %v5695_v2, %v11955_v57  ;;  %v14104_v21 = vpop.f32.mrb[103].mxu1  ;;  %10111 = vmatprep.mubr.msk.f32.mxu0 %vm433_vm3, %v5692_v33 }
0x2ba7   :  { %v5701_v17 = vpack.c.bf16 %v5696_v62, %v5692_v33  ;;  %10112 = vmatmul.mubr.msk.f32.gmra.mrb[102].mxu0 %vm433_vm3, %v5696_v62  ;;  %v14189_v62 = vld [vmem:[%s15365_s18 + $0x20] sm:$0xff] }
0x2ba9   :  { %5827 = vrot.lane.b32.xlu1 %v5701_v17, %s11568_s11 }
0x2c13   :  { %v5826_v26 = vpop.permute.xlu0 %5825 }
0x2c14   :  { %10748 = vmatprep.subr.msk.bf16.mxu1 %vm433_vm3, %v5826_v26  ;;  %v5836_v5 = vsel %vm433_vm3, %v5826_v26, 0 }
0x2c15   :  { %10115 = vmatpush3.bf16.xpose.msra.mxu1 %v5836_v5 }
0x2c1b   :  { %v5828_v40 = vpop.permute.xlu1 %5827 }
0x2c1c   :  { %10749 = vmatprep.subr.msk.bf16.mxu1 %vm433_vm3, %v5828_v40  ;;  %v5839_v4 = vsel %vm433_vm3, %v5828_v40, 0 }
0x2c1d   :  { %10117 = vmatpush3.bf16.xpose.msra.mxu1 %v5839_v4 }
0x2c1e   :  { %6294 = vmatprep.subr.bf16.mxu1 %v13887_v61  ;;  %v14128_v61 = vld [vmem:[%s15364_s5 + $0x20] ss:$8 sps:$4 sm:$0xff]  }
0x2c24   :  { %10119 = vmatmul.mubr.msk.bf16.vlgmr.msra.gmra.mrb[104].mxu1 %vm433_vm3, %v5701_v17 }
0x2c25   :  { %6295 = vmatpush1.bf16.msra.mxu1 %v13894_v38  ;;  %6326 = vmatprep.mubr.bf16.mxu1 %v15368_v58  ;;  %v14134_v38 = vld [vmem:[%s15364_s5 + $0x34] ss:$8 sps:$4 sm:$0xff]  }
0x2c26   :  { %6296 = vmatprep.subr.bf16.mxu1 %v13901_v56  ;;  %v14140_v56 = vld [vmem:[%s15364_s5 + $0x30] ss:$8 sps:$4 sm:$0xff]  }
0x2c29   :  { %6297 = vmatpush1.bf16.msra.mxu1 %v13907_v16 }
0x2c2a   :  { %6298 = vmatprep.subr.bf16.mxu1 %v14122_v10 }
0x2c2d   :  { %6299 = vmatpush1.bf16.msra.mxu1 %v14128_v61 }
0x2c2e   :  { %6300 = vmatprep.subr.bf16.mxu1 %v14134_v38 }
0x2c31   :  { %6301 = vmatpush1.bf16.msra.mxu1 %v14140_v56 }
0x2c72   :  { %v10110_v16 = vpop.f32.mrb[100].mxu0 }
0x2c73   :  { %v5780_v30 = vpop.f32.mrb[101].mxu0  ;;  %5895 = vperm.xlu0 %10906, %v10110_v16   ;;  %5806 = vperm.xlu1 %10905, %v10110_v16  }
0x2c77   :  { %10909 = vset.pattern.permute.xlu0 %v15368_v58  ;;  %10907 = vset.pattern.permute.xlu1 %v15369_v34 }
0x2c78   :  { %5801 = vperm.xlu0 %10909, %v5780_v30   ;;  %5919 = vperm.xlu1 %10907, %v10110_v16  }
0x2c7a   :  { %v10113_v41 = vpop.f32.mrb[102].mxu0 }
0x2c7b   :  { %v5790_v52 = vpop.f32.mrb[103].mxu0 }
0x2c7c   :  { %10912 = vset.pattern.permute.xlu0 %v15372_v19  ;;  %10908 = vset.pattern.permute.xlu1 %v15372_v19 }
0x2c7d   :  { %5939 = vperm.xlu0 %10912, %v5780_v30   ;;  %5943 = vperm.xlu1 %10908, %v10110_v16  }
0x2c81   :  { %10913 = vset.pattern.permute.xlu0 %v15368_v58  ;;  %10910 = vset.pattern.permute.xlu1 %v15373_v63 }
0x2c82   :  { %5816 = vperm.xlu0 %10913, %v10113_v41   ;;  %5891 = vperm.xlu1 %10910, %v5780_v30  }
0x2c86   :  { %10918 = vset.pattern.permute.xlu0 %v15369_v34  ;;  %10911 = vset.pattern.permute.xlu1 %v15369_v34 }
0x2c87   :  { %5923 = vperm.xlu0 %10918, %v5790_v52   ;;  %5915 = vperm.xlu1 %10911, %v5780_v30  }
0x2c8b   :  { %10920 = vset.pattern.permute.xlu0 %v15372_v19  ;;  %10914 = vset.pattern.permute.xlu1 %v15373_v63 }
0x2c8c   :  { %5951 = vperm.xlu0 %10920, %v10113_v41   ;;  %5903 = vperm.xlu1 %10914, %v10113_v41  }
0x2c90   :  { %10915 = vset.pattern.permute.xlu1 %v15369_v34  ;;  %10922 = vset.pattern.permute.xlu0 %v15373_v63 }
0x2c91   :  { %5927 = vperm.xlu1 %10915, %v10113_v41   ;;  %v14198_v41 = vld [vmem:[%s15365_s18 + $0x40] sm:$0xff] }
0x2c95   :  { %10916 = vset.pattern.permute.xlu1 %v15368_v58 }
0x2c96   :  { %5811 = vperm.xlu1 %10916, %v5790_v52  }
0x2c9a   :  { %10917 = vset.pattern.permute.xlu1 %v15373_v63 }
0x2c9b   :  { %5899 = vperm.xlu1 %10917, %v5790_v52  }
0x2c9f   :  { %10919 = vset.pattern.permute.xlu1 %v15372_v19 }
0x2ca0   :  { %5947 = vperm.xlu1 %10919, %v5790_v52  }
0x2ca4   :  { %10921 = vset.pattern.permute.xlu1 %v15368_v58 }
0x2cf2   :  { %v5896_v13 = vpop.permute.xlu0 %5895  ;;  %v5807_v51 = vpop.permute.xlu1 %5806 }
0x2cf3   :  { %v5820_v20 = vmul.f32 %v13933_v1, %v5807_v51  ;;  %v5907_v6 = vmul.f32 %v14165_v18, %v5896_v13  ;;  %v14204_v13 = vld [vmem:[%s15365_s18 + $0x60] sm:$0xff] }
0x2cf7   :  { %v5802_v49 = vpop.permute.xlu0 %5801  ;;  %v14159_v43 = vpop.f32.mrb[104].mxu1 }
0x2cf8   :  { %v5920_v8 = vpop.permute.xlu1 %5919  ;;  %v5875_v29 = vpop.f32.mrb[105].mxu1  ;;  %v5819_v36 = vmul.f32 %v14183_v7, %v5802_v49 }
0x2cf9   :  { %v10121_v35 = vpop.f32.mrb[106].mxu1  ;;  %v5931_v0 = vmul.f32 %v14171_v32, %v5920_v8 }
0x2cfa   :  { %v5878_v55 = vpop.f32.mrb[107].mxu1  ;;  %v5876_v5 = vadd.f32 %v5875_v29, %v5819_v36  ;;  %v14210_v29 = vld [vmem:[%s15365_s18 + $0x18] sm:$0xff] }
0x2cfb   :  { %v5879_v9 = vadd.f32 %v5878_v55, %v5820_v20 }
0x2cfc   :  { %v5944_v45 = vpop.permute.xlu1 %5943  ;;  %v5940_v48 = vpop.permute.xlu0 %5939 }
0x2cfd   :  { %v5911_v46 = vadd.f32 %v5907_v6, %v5879_v9  ;;  %v5955_v3 = vmul.f32 %v14177_v15, %v5944_v45  ;;  %v5954_v51 = vmul.f32 %v14204_v13, %v5940_v48  ;;  %v14216_v9 = vld [vmem:[%s15365_s18 + $0x38] sm:$0xff] }
0x2cff   :  { %v5935_v11 = vadd.f32 %v5931_v0, %v5911_v46 }
0x2d01   :  { %v5959_v42 = vadd.f32 %v5955_v3, %v5935_v11  ;;  %v5892_v33 = vpop.permute.xlu1 %5891  ;;  %v5817_v26 = vpop.permute.xlu0 %5816 }
0x2d02   :  { %v5906_v17 = vmul.f32 %v14189_v62, %v5892_v33  ;;  %v5822_v20 = vmul.f32 %v14210_v29, %v5817_v26  ;;  %v14225_v33 = vld [vmem:[%s15365_s18 + $0x58] sm:$0xff] }
0x2d03   :  { %v5963_v2 = vmul.f32 0.125, %v5959_v42 }
0x2d04   :  { %v5910_v30 = vadd.f32 %v5906_v17, %v5876_v5  ;;  %v5887_v46 = vadd.f32 %v10121_v35, %v5822_v20  ;;  %v14231_v35 = vld [vmem:[%s15365_s18 + $0x78] sm:$0xff] }
0x2d05   :  { %v5967_v40 = vsel %vm779_vm7, %v5963_v2, -1e+30 }
0x2d06   :  { %v5916_v4 = vpop.permute.xlu1 %5915  ;;  %v5973_v16 = vsel %vm226_vm0, %v5967_v40, -inf  ;;  %v5924_v8 = vpop.permute.xlu0 %5923 }
0x2d07   :  { %v5930_v52 = vmul.f32 %v14198_v41, %v5916_v4  ;;  %5974 = vmax.xlane.f32.xlu0 %v5973_v16  ;;  %v14237_v16 = vld [vmem:[%s15365_s18 + $0x10] sm:$0xff] }
0x2d09   :  { %v5934_v49 = vadd.f32 %v5930_v52, %v5910_v30 }
0x2d0b   :  { %v5904_v55 = vpop.permute.xlu1 %5903  ;;  %v5958_v6 = vadd.f32 %v5954_v51, %v5934_v49  ;;  %v5952_v11 = vpop.permute.xlu0 %5951 }
0x2d0c   :  { %v5909_v45 = vmul.f32 %v14216_v9, %v5904_v55  ;;  %v5957_v17 = vmul.f32 %v14231_v35, %v5952_v11 }
0x2d0d   :  { %v5962_v0 = vmul.f32 0.125, %v5958_v6  ;;  %v14247_v6 = vld [vmem:[%s15365_s18 + $0x30] sm:$0xff] }
0x2d0e   :  { %v5913_v42 = vadd.f32 %v5909_v45, %v5887_v46 }
0x2d0f   :  { %v5966_v48 = vsel %vm778_vm8, %v5962_v0, -1e+30  ;;  %v14253_v0 = vld [vmem:[%s15365_s18 + $0x50] sm:$0xff] }
0x2d10   :  { %v5928_v3 = vpop.permute.xlu1 %5927  ;;  %v5970_v36 = vsel %vm226_vm0, %v5966_v48, -inf  ;;  %v5932_v46 = vmul.f32 %v14253_v0, %v5924_v8 }
0x2d11   :  { %v5933_v2 = vmul.f32 %v14225_v33, %v5928_v3  ;;  %5971 = vmax.xlane.f32.xlu1 %v5970_v36 }
0x2d13   :  { %v5937_v26 = vadd.f32 %v5933_v2, %v5913_v42 }
0x2d15   :  { %v5812_v5 = vpop.permute.xlu1 %5811  ;;  %v5961_v4 = vadd.f32 %v5957_v17, %v5937_v26 }
0x2d16   :  { %v5821_v30 = vmul.f32 %v14237_v16, %v5812_v5 }
0x2d17   :  { %v5965_v52 = vmul.f32 0.125, %v5961_v4 }
0x2d18   :  { %v5884_v55 = vadd.f32 %v14159_v43, %v5821_v30  ;;  %v14259_v43 = vld [vmem:[%s15365_s18 + $0x70] sm:$0xff] }
0x2d19   :  { %v5969_v51 = vsel %vm781_vm10, %v5965_v52, -1e+30 }
0x2d1a   :  { %v5900_v49 = vpop.permute.xlu1 %5899  ;;  %v5979_v20 = vsel %vm226_vm0, %v5969_v51, -inf }
0x2d1b   :  { %v5908_v45 = vmul.f32 %v14247_v6, %v5900_v49  ;;  %5980 = vmax.xlane.f32.xlu0 %v5979_v20 }
0x2d1d   :  { %v5912_v11 = vadd.f32 %v5908_v45, %v5884_v55 }
0x2d1f   :  { %v5936_v3 = vadd.f32 %v5932_v46, %v5912_v11  ;;  %v5948_v36 = vpop.permute.xlu1 %5947 }
0x2d20   :  { %v5956_v42 = vmul.f32 %v14259_v43, %v5948_v36 }
0x2d22   :  { %v5960_v2 = vadd.f32 %v5956_v42, %v5936_v3 }
0x2d24   :  { %v5964_v17 = vmul.f32 0.125, %v5960_v2 }
0x2d26   :  { %v5968_v26 = vsel %vm780_vm9, %v5964_v17, -1e+30 }
0x2d27   :  { %v5976_v5 = vsel %vm226_vm0, %v5968_v26, -inf }
0x2d28   :  { %5977 = vmax.xlane.f32.xlu1 %v5976_v5 }
0x2d94   :  { %v5975_v4 = vpop.xlane.xlu0 %5974 }
0x2d95   :  { %v5983_v8 = vsub.f32 %v5967_v40, %v5975_v4 }
0x2d97   :  { %v5988_v30 = vmul.f32 1.442695, %v5983_v8 }
0x2d99   :  { %11109 = vpow2.f32 %v5988_v30 }
0x2d9e   :  { %v5972_v52 = vpop.xlane.xlu1 %5971 }
0x2d9f   :  { %v5982_v49 = vsub.f32 %v5966_v48, %v5972_v52 }
0x2da1   :  { %v5986_v20 = vmul.f32 1.442695, %v5982_v49 }
0x2da3   :  { %v11110_v55 = vpop.eup %11109  ;;  %11111 = vpow2.f32 %v5986_v20 }
0x2da4   :  { %v5997_v45 = vsel %vm226_vm0, %v11110_v55, 0.0 }
0x2da5   :  { %5998 = vadd.xlane.f32.xlu0 %v5997_v45 }
0x2da8   :  { %v5981_v46 = vpop.xlane.xlu0 %5980 }
0x2da9   :  { %v5985_v11 = vsub.f32 %v5969_v51, %v5981_v46 }
0x2dab   :  { %v5992_v3 = vmul.f32 1.442695, %v5985_v11 }
0x2dad   :  { %v11112_v36 = vpop.eup %11111  ;;  %11113 = vpow2.f32 %v5992_v3 }
0x2dae   :  { %v5994_v42 = vsel %vm226_vm0, %v11112_v36, 0.0 }
0x2daf   :  { %5995 = vadd.xlane.f32.xlu1 %v5994_v42 }
0x2db5   :  { %v5978_v2 = vpop.xlane.xlu1 %5977 }
0x2db6   :  { %v5984_v40 = vsub.f32 %v5968_v26, %v5978_v2 }
0x2db7   :  { %v11114_v17 = vpop.eup %11113 }
0x2db8   :  { %v5990_v5 = vmul.f32 1.442695, %v5984_v40  ;;  %v6003_v48 = vsel %vm226_vm0, %v11114_v17, 0.0 }
0x2db9   :  { %6004 = vadd.xlane.f32.xlu0 %v6003_v48 }
0x2dba   :  { %11115 = vpow2.f32 %v5990_v5 }
0x2dc4   :  { %v11116_v4 = vpop.eup %11115 }
0x2dc5   :  { %v6000_v8 = vsel %vm226_vm0, %v11116_v4, 0.0 }
0x2dc6   :  { %6001 = vadd.xlane.f32.xlu1 %v6000_v8 }
0x2e32   :  { %v5999_v30 = vpop.xlane.xlu0 %5998 }
0x2e33   :  { %v6007_v51 = vmax.f32 %v5999_v30, 1e-30 }
0x2e35   :  { %11117 = vrcp.f32 %v6007_v51 }
0x2e3c   :  { %v5996_v52 = vpop.xlane.xlu1 %5995 }
0x2e3d   :  { %v6006_v49 = vmax.f32 %v5996_v52, 1e-30 }
0x2e3f   :  { %11119 = vrcp.f32 %v6006_v49  ;;  %v11118_v20 = vpop.eup %11117 }
0x2e40   :  { %v6015_v46 = vmul.f32 %v11118_v20, %v11110_v55 }
0x2e42   :  { %v14270_v42 = vmul.f32 %v12161_v47, %v6015_v46 }
0x2e44   :  { %v6043_v48 = vmul.f32 %v14165_v18, %v14270_v42  ;;  %v6059_v20 = vmul.f32 %v14171_v32, %v14270_v42 }
0x2e46   :  { %v6005_v45 = vpop.xlane.xlu0 %6004  ;;  %v6049_v49 = vsel %vm226_vm0, %v6043_v48, 0.0 }
0x2e47   :  { %v6009_v26 = vmax.f32 %v6005_v45, 1e-30 }
0x2e49   :  { %v11120_v11 = vpop.eup %11119  ;;  %11121 = vrcp.f32 %v6009_v26 }
0x2e4a   :  { %v6014_v3 = vmul.f32 %v11120_v11, %v11112_v36 }
0x2e4c   :  { %v14273_v2 = vmul.f32 %v12151_v31, %v6014_v3  ;;  %v6075_v3 = vmul.f32 %v14177_v15, %v14270_v42 }
0x2e4e   :  { %v6042_v40 = vmul.f32 %v14189_v62, %v14273_v2  ;;  %v6026_v5 = vmul.f32 %v14183_v7, %v14273_v2  ;;  %v6022_v55 = vpack.c.bf16 %v14270_v42, %v14273_v2  ;;  %v6058_v30 = vmul.f32 %v14198_v41, %v14273_v2 }
0x2e4f   :  { %v6074_v11 = vmul.f32 %v14204_v13, %v14273_v2 }
0x2e50   :  { %v6046_v36 = vsel %vm226_vm0, %v6042_v40, 0.0  ;;  %v6030_v8 = vsel %vm226_vm0, %v6026_v5, 0.0  ;;  %v6062_v26 = vsel %vm226_vm0, %v6058_v30, 0.0  ;;  %v6065_v5 = vsel %vm226_vm0, %v6059_v20, 0.0 }
0x2e51   :  { %6047 = vadd.xlane.f32.xlu0 %v6046_v36  ;;  %6031 = vadd.xlane.f32.xlu1 %v6030_v8  ;;  %v6078_v48 = vsel %vm226_vm0, %v6074_v11, 0.0  ;;  %v6081_v36 = vsel %vm226_vm0, %v6075_v3, 0.0 }
0x2e53   :  { %v11122_v51 = vpop.eup %11121  ;;  %v6002_v52 = vpop.xlane.xlu1 %6001 }
0x2e54   :  { %v6017_v45 = vmul.f32 %v11122_v51, %v11114_v17  ;;  %v6008_v46 = vmax.f32 %v6002_v52, 1e-30  ;;  %v6027_v17 = vmul.f32 %v13933_v1, %v14270_v42 }
0x2e55   :  { %6050 = vadd.xlane.f32.xlu0 %v6049_v49  ;;  %6063 = vadd.xlane.f32.xlu1 %v6062_v26 }
0x2e56   :  { %11123 = vrcp.f32 %v6008_v46  ;;  %v14296_v40 = vmul.f32 %v12181_v44, %v6017_v45  ;;  %v6033_v8 = vsel %vm226_vm0, %v6027_v17, 0.0 }
0x2e58   :  { %v6045_v30 = vmul.f32 %v14216_v9, %v14296_v40  ;;  %v6029_v51 = vmul.f32 %v14210_v29, %v14296_v40  ;;  %v6061_v1 = vmul.f32 %v14225_v33, %v14296_v40 }
0x2e59   :  { %6066 = vadd.xlane.f32.xlu0 %v6065_v5  ;;  %6079 = vadd.xlane.f32.xlu1 %v6078_v48 }
0x2e5a   :  { %v6055_v49 = vsel %vm226_vm0, %v6045_v30, 0.0  ;;  %v6039_v20 = vsel %vm226_vm0, %v6029_v51, 0.0  ;;  %v6071_v26 = vsel %vm226_vm0, %v6061_v1, 0.0 }
0x2e5d   :  { %6082 = vadd.xlane.f32.xlu0 %v6081_v36  ;;  %6034 = vadd.xlane.f32.xlu1 %v6033_v8  ;;  %v6077_v36 = vmul.f32 %v14231_v35, %v14296_v40 }
0x2e5f   :  { %v6087_v51 = vsel %vm226_vm0, %v6077_v36, 0.0 }
0x2e60   :  { %v11124_v52 = vpop.eup %11123 }
0x2e61   :  { %v6016_v45 = vmul.f32 %v11124_v52, %v11116_v4  ;;  %6056 = vadd.xlane.f32.xlu0 %v6055_v49  ;;  %6040 = vadd.xlane.f32.xlu1 %v6039_v20  ;;  %v5694_v49 = vadd.f32 %v14101_v60, %v11957_v59 }
0x2e63   :  { %v14313_v46 = vmul.f32 %v12184_v12, %v6016_v45 }
0x2e65   :  { %6072 = vadd.xlane.f32.xlu0 %v6071_v26  ;;  %v6028_v11 = vmul.f32 %v14237_v16, %v14313_v46  ;;  %v6044_v3 = vmul.f32 %v14247_v6, %v14313_v46  ;;  %v6023_v5 = vpack.c.bf16 %v14296_v40, %v14313_v46  ;;  %v6060_v17 = vmul.f32 %v14253_v0, %v14313_v46 }
0x2e66   :  { %v6076_v30 = vmul.f32 %v14259_v43, %v14313_v46  ;;  %v5698_v40 = vadd.f32 %v14104_v21, %v11957_v59 }
0x2e67   :  { %v6036_v48 = vsel %vm226_vm0, %v6028_v11, 0.0  ;;  %v6052_v4 = vsel %vm226_vm0, %v6044_v3, 0.0  ;;  %v6068_v8 = vsel %vm226_vm0, %v6060_v17, 0.0 }
0x2e68   :  { %6037 = vadd.xlane.f32.xlu1 %v6036_v48  ;;  %v6084_v52 = vsel %vm226_vm0, %v6076_v30, 0.0  ;;  %v6025_v36 = vpack.c.bf16 %v5698_v40, %v5694_v49 }
0x2e69   :  { %6053 = vadd.xlane.f32.xlu0 %v6052_v4 }
0x2e6c   :  { %6069 = vadd.xlane.f32.xlu1 %v6068_v8 }
0x2e6d   :  { %6088 = vadd.xlane.f32.xlu0 %v6087_v51 }
0x2e70   :  { %6085 = vadd.xlane.f32.xlu1 %v6084_v52 }
0x2e81   :  { %6258 = vrot.lane.b32.xlu1 %v14085_v14, %s11568_s11 }
0x2e83   :  { %6260 = vrot.lane.b32.xlu0 %v14088_v37, %s11568_s11 }
0x2e85   :  { %6262 = vrot.lane.b32.xlu1 %v5694_v49, %s11568_s11 }
0x2e89   :  { %6264 = vrot.lane.b32.xlu1 %v5698_v40, %s11568_s11 }
0x2ede   :  { %v6048_v20 = vpop.xlane.xlu0 %6047  ;;  %v6032_v1 = vpop.xlane.xlu1 %6031 }
0x2edf   :  { %v6090_v26 = vsel %vm906_vm15, %v6032_v1, %v6048_v20 }
0x2ee2   :  { %v6051_v45 = vpop.xlane.xlu0 %6050  ;;  %v6064_v46 = vpop.xlane.xlu1 %6063 }
0x2ee3   :  { %v6094_v14 = vsel %vm911_vm1, %v6090_v26, %v6064_v46 }
0x2ee6   :  { %v6067_v11 = vpop.xlane.xlu0 %6066  ;;  %v6080_v60 = vpop.xlane.xlu1 %6079 }
0x2ee7   :  { %v6098_v3 = vsel %vm916_vm2, %v6094_v14, %v6080_v60 }
0x2ee8   :  { %10124 = vmatprep.mubr.msk.f32.mxu0 %vm921_vm4, %v6098_v3 }
0x2eea   :  { %v6083_v37 = vpop.xlane.xlu0 %6082  ;;  %v6035_v48 = vpop.xlane.xlu1 %6034 }
0x2eeb   :  { %v6091_v21 = vsel %vm906_vm15, %v6035_v48, %v6051_v45 }
0x2eec   :  { %v6095_v4 = vsel %vm911_vm1, %v6091_v21, %v6067_v11 }
0x2eed   :  { %v6099_v17 = vsel %vm916_vm2, %v6095_v4, %v6083_v37 }
0x2eee   :  { %v6057_v8 = vpop.xlane.xlu0 %6056  ;;  %10125 = vmatmul.mubr.msk.f32.vlgmr.msra.gmra.mrb[104].mxu0 %vm921_vm4, %v6099_v17  ;;  %v6041_v30 = vpop.xlane.xlu1 %6040 }
0x2eef   :  { %10131 = vmatpush3.bf16.msra.mxu0 %v14093_v53  ;;  %v6093_v26 = vsel %vm906_vm15, %v6041_v30, %v6057_v8 }
0x2ef0   :  { %10132 = vmatprep.subr.bf16.mxu0 %v6025_v36 }
0x2ef2   :  { %v6073_v51 = vpop.xlane.xlu0 %6072 }
0x2ef3   :  { %10133 = vmatpush3.bf16.msra.mxu0 %v6025_v36  ;;  %v6097_v14 = vsel %vm911_vm1, %v6093_v26, %v6073_v51 }
0x2ef4   :  { %10589 = vmatprep.subr.bf16.mxu0 %v11914_v23 }
0x2ef5   :  { %v6038_v52 = vpop.xlane.xlu1 %6037 }
0x2ef6   :  { %v6054_v20 = vpop.xlane.xlu0 %6053 }
0x2ef7   :  { %v6092_v45 = vsel %vm906_vm15, %v6038_v52, %v6054_v20 }
0x2ef9   :  { %v6070_v1 = vpop.xlane.xlu1 %6069 }
0x2efa   :  { %v6089_v46 = vpop.xlane.xlu0 %6088  ;;  %v6096_v49 = vsel %vm911_vm1, %v6092_v45, %v6070_v1 }
0x2efb   :  { %v6101_v11 = vsel %vm916_vm2, %v6097_v14, %v6089_v46 }
0x2efd   :  { %v6086_v40 = vpop.xlane.xlu1 %6085 }
0x2efe   :  { %v6100_v53 = vsel %vm916_vm2, %v6096_v49, %v6086_v40  ;;  %v6261_v1 = vpop.permute.xlu0 %6260 }
0x2eff   :  { %10127 = vmatprep.mubr.msk.f32.mxu0 %vm921_vm4, %v6100_v53 }
0x2f00   :  { %10128 = vmatmul.mubr.msk.f32.gmra.mrb[106].mxu0 %vm921_vm4, %v6101_v11 }
0x2f01   :  { %10134 = vmatprep.mubr.msk.bf16.mxu0 %vm226_vm0, %v6022_v55  ;;  %v6259_v55 = vpop.permute.xlu1 %6258 }
0x2f04   :  { %10135 = vmatmul.mubr.msk.bf16.vlgmr.msra.gmra.mrb[108].mxu0 %vm226_vm0, %v6023_v5 }
0x2f05   :  { %10591 = vmatpush3.bf16.msra.mxu0 %v11914_v23  ;;  %v6263_v3 = vpop.permute.xlu1 %6262 }
0x2f06   :  { %10593 = vmatprep.subr.bf16.mxu0 %v11919_v25 }
0x2f09   :  { %10595 = vmatpush3.bf16.msra.mxu0 %v11919_v25  ;;  %v6265_v51 = vpop.permute.xlu1 %6264 }
0x2f0a   :  { %10597 = vmatprep.subr.bf16.mxu0 %v11930_v28 }
0x2f0d   :  { %10599 = vmatpush3.bf16.msra.mxu0 %v11930_v28 }
0x2f0e   :  { %10601 = vmatprep.subr.bf16.mxu0 %v11944_v50 }
0x2f11   :  { %10603 = vmatpush3.bf16.msra.mxu0 %v11944_v50 }
0x2f12   :  { %10168 = vmatprep.subr.msk.mxu0 %vm934_vm6, %v14074_v22 }
0x2fc1   :  { %v10126_v42 = vpop.f32.mrb[104].mxu0 }
0x2fc2   :  { %v6180_v2 = vpop.f32.mrb[105].mxu0 }
0x2fd3   :  { %v10129_v5 = vpop.f32.mrb[106].mxu0 }
0x2fd4   :  { %v6190_v60 = vpop.f32.mrb[107].mxu0 }
0x2fd7   :  { %v10136_v37 = vpop.f32.mrb[108].mxu0 }
0x2fd8   :  { %v6248_v48 = vadd.f32 %v10136_v37, %v6190_v60  ;;  %v6239_v21 = vpop.f32.mrb[109].mxu0 }
0x2fd9   :  { %v6240_v4 = vadd.f32 %v6239_v21, %v6180_v2  ;;  %v10137_v17 = vpop.f32.mrb[110].mxu0 }
0x2fda   :  { %v6272_v36 = vadd.f32 %v6263_v3, %v6248_v48  ;;  %v6251_v8 = vadd.f32 %v10137_v17, %v10129_v5  ;;  %v6242_v30 = vpop.f32.mrb[111].mxu0 }
0x2fdb   :  { %v6270_v52 = vadd.f32 %v6259_v55, %v6240_v4  ;;  %v6243_v20 = vadd.f32 %v10126_v42, %v6242_v30 }
0x2fdc   :  { %v6280_v45 = vmul.f32 0.01, %v6272_v36  ;;  %v6273_v46 = vadd.f32 %v6265_v51, %v6251_v8  ;;  %vm6276_vm12 = vcmp.ge.f32.partialorder %v6272_v36, 0.0 }
0x2fdd   :  { %v6278_v26 = vmul.f32 0.01, %v6270_v52  ;;  %v6271_v49 = vadd.f32 %v6261_v1, %v6243_v20  ;;  %vm6274_vm13 = vcmp.ge.f32.partialorder %v6270_v52, 0.0 }
0x2fde   :  { %vm6277_vm14 = vcmp.ge.f32.partialorder %v6273_v46, 0.0  ;;  %v6281_v40 = vmul.f32 0.01, %v6273_v46  ;;  %v6284_v53 = vsel %vm6276_vm12, %v6272_v36, %v6280_v45 }
0x2fdf   :  { %vm6275_vm5 = vcmp.ge.f32.partialorder %v6271_v49, 0.0  ;;  %v6279_v14 = vmul.f32 0.01, %v6271_v49  ;;  %v6282_v2 = vsel %vm6274_vm13, %v6270_v52, %v6278_v26 }
0x2fe0   :  { %v6285_v11 = vsel %vm6277_vm14, %v6273_v46, %v6281_v40 }
0x2fe1   :  { %v6283_v60 = vsel %vm6275_vm5, %v6271_v49, %v6279_v14  ;;  %v6287_v5 = vpack.c.bf16 %v6285_v11, %v6284_v53  ;;  %v14413_v53 = vld [vmem:[%s15364_s5 + $0x4] ss:$8 sps:$4 sm:$0xff]   ;;  %v14420_v11 = vld [vmem:[%s15364_s5] ss:$8 sps:$4 sm:$0xff]  }
0x2fe2   :  { %v6286_v3 = vpack.c.bf16 %v6283_v60, %v6282_v2  ;;  %v14427_v2 = vld [vmem:[%s15364_s5 + $0x14] ss:$8 sps:$4 sm:$0xff]   ;;  %v14433_v60 = vld [vmem:[%s15364_s5 + $0x10] ss:$8 sps:$4 sm:$0xff]  }
0x2fe4   :  { %9265 = vmatmul.mubr.msk.bf16.vlgmr.msra.gmra.mrb[108].mxu1 %vm433_vm3, %v6286_v3 }
0x2fe5   :  { %6336 = vmatprep.mubr.bf16.mxu1 %v15368_v58 }
0x2fec   :  { %9266 = vmatmul.mubr.msk.bf16.gmra.mrb[112].mxu1 %vm433_vm3, %v6287_v5 }
0x30b7   :  { %v6328_v42 = vpop.f32.mrb[108].mxu1 }
0x30b8   :  { %v6329_v55 = vadd.f32 %v6328_v42, %v11955_v57  ;;  %v6330_v37 = vpop.f32.mrb[109].mxu1 }
0x30b9   :  { %v6332_v48 = vpop.f32.mrb[110].mxu1  ;;  %v14382_v17 = vadd.f32 %v6330_v37, %v11957_v59 }
0x30ba   :  { %v6333_v21 = vadd.f32 %v6332_v48, %v11955_v57  ;;  %v6334_v4 = vpop.f32.mrb[111].mxu1  ;;  %10154 = vmatprep.mubr.msk.f32.mxu0 %vm433_vm3, %v6329_v55 }
0x30bb   :  { %v14385_v36 = vadd.f32 %v6334_v4, %v11957_v59 }
0x30bc   :  { %v6347_v8 = vpack.c.bf16 %v6333_v21, %v6329_v55  ;;  %10155 = vmatmul.mubr.msk.f32.vlgmr.msra.gmra.mrb[112].mxu0 %vm433_vm3, %v6333_v21  ;;  %v14459_v21 = vld [vmem:[%s15365_s18 + $0x8] sm:$0xff] }
0x30bd   :  { %v14390_v30 = vpack.c.bf16 %v14385_v36, %v14382_v17  ;;  %10169 = vmatpush3.msk.msra.mxu0 %vm934_vm6, %v14074_v22 }
0x30be   :  { %6472 = vrot.lane.b32.xlu0 %v6347_v8, %s11568_s11  ;;  %10164 = vmatprep.mubr.msk.bf16.mxu1 %vm433_vm3, %v6347_v8 }
0x30bf   :  { %v6338_v51 = vpop.f32.mrb[112].mxu1  ;;  %10176 = vmatprep.subr.bf16.mxu0 %v14390_v30 }
0x30c0   :  { %v6339_v52 = vadd.f32 %v6338_v51, %v11955_v57  ;;  %v14398_v20 = vpop.f32.mrb[113].mxu1 }
0x30c1   :  { %v6342_v1 = vpop.f32.mrb[114].mxu1 }
0x30c2   :  { %v6343_v45 = vadd.f32 %v6342_v1, %v11955_v57  ;;  %v14401_v46 = vpop.f32.mrb[115].mxu1  ;;  %10157 = vmatprep.mubr.msk.f32.mxu0 %vm433_vm3, %v6339_v52 }
0x30c4   :  { %v6348_v26 = vpack.c.bf16 %v6343_v45, %v6339_v52  ;;  %10158 = vmatmul.mubr.msk.f32.gmra.mrb[114].mxu0 %vm433_vm3, %v6343_v45 }
0x30c6   :  { %6474 = vrot.lane.b32.xlu1 %v6348_v26, %s11568_s11 }
0x3130   :  { %v6473_v22 = vpop.permute.xlu0 %6472 }
0x3131   :  { %10750 = vmatprep.subr.msk.bf16.mxu1 %vm433_vm3, %v6473_v22  ;;  %v6483_v49 = vsel %vm433_vm3, %v6473_v22, 0 }
0x3132   :  { %10161 = vmatpush3.bf16.xpose.msra.mxu1 %v6483_v49 }
0x3138   :  { %v6475_v40 = vpop.permute.xlu1 %6474 }
0x3139   :  { %10751 = vmatprep.subr.msk.bf16.mxu1 %vm433_vm3, %v6475_v40  ;;  %v6486_v14 = vsel %vm433_vm3, %v6475_v40, 0 }
0x313a   :  { %10163 = vmatpush3.bf16.xpose.msra.mxu1 %v6486_v14 }
0x313b   :  { %6941 = vmatprep.subr.bf16.mxu1 %v14413_v53 }
0x3141   :  { %10165 = vmatmul.mubr.msk.bf16.vlgmr.msra.gmra.mrb[116].mxu1 %vm433_vm3, %v6348_v26 }
0x3142   :  { %6942 = vmatpush1.bf16.msra.mxu1 %v14420_v11  ;;  %6973 = vmatprep.mubr.bf16.mxu1 %v15368_v58 }
0x3143   :  { %6943 = vmatprep.subr.bf16.mxu1 %v14427_v2 }
0x3146   :  { %6944 = vmatpush1.bf16.msra.mxu1 %v14433_v60 }
0x3147   :  { %6945 = vmatprep.subr.bf16.mxu1 %v14122_v10 }
0x314a   :  { %6946 = vmatpush1.bf16.msra.mxu1 %v14128_v61 }
0x314b   :  { %6947 = vmatprep.subr.bf16.mxu1 %v14134_v38 }
0x314e   :  { %6948 = vmatpush1.bf16.msra.mxu1 %v14140_v56 }
0x318f   :  { %v10156_v5 = vpop.f32.mrb[112].mxu0 }
0x3190   :  { %v6427_v3 = vpop.f32.mrb[113].mxu0  ;;  %6542 = vperm.xlu0 %10922, %v10156_v5   ;;  %6453 = vperm.xlu1 %10921, %v10156_v5  }
0x3194   :  { %10925 = vset.pattern.permute.xlu0 %v15368_v58  ;;  %10923 = vset.pattern.permute.xlu1 %v15369_v34 }
0x3195   :  { %6448 = vperm.xlu0 %10925, %v6427_v3   ;;  %6566 = vperm.xlu1 %10923, %v10156_v5  }
0x3197   :  { %v10159_v42 = vpop.f32.mrb[114].mxu0 }
0x3198   :  { %v6437_v55 = vpop.f32.mrb[115].mxu0 }
0x3199   :  { %10928 = vset.pattern.permute.xlu0 %v15372_v19  ;;  %10924 = vset.pattern.permute.xlu1 %v15372_v19 }
0x319a   :  { %6586 = vperm.xlu0 %10928, %v6427_v3   ;;  %6590 = vperm.xlu1 %10924, %v10156_v5  }
0x319e   :  { %10929 = vset.pattern.permute.xlu0 %v15368_v58  ;;  %10926 = vset.pattern.permute.xlu1 %v15373_v63 }
0x319f   :  { %6463 = vperm.xlu0 %10929, %v10159_v42   ;;  %6538 = vperm.xlu1 %10926, %v6427_v3  }
0x31a3   :  { %10934 = vset.pattern.permute.xlu0 %v15369_v34  ;;  %10927 = vset.pattern.permute.xlu1 %v15369_v34 }
0x31a4   :  { %6570 = vperm.xlu0 %10934, %v6437_v55   ;;  %6562 = vperm.xlu1 %10927, %v6427_v3  }
0x31a8   :  { %10936 = vset.pattern.permute.xlu0 %v15372_v19  ;;  %10930 = vset.pattern.permute.xlu1 %v15373_v63 }
0x31a9   :  { %6598 = vperm.xlu0 %10936, %v10159_v42   ;;  %6550 = vperm.xlu1 %10930, %v10159_v42  }
0x31ad   :  { %10931 = vset.pattern.permute.xlu1 %v15369_v34  ;;  %10938 = vset.pattern.permute.xlu0 %v15373_v63 }
0x31ae   :  { %6574 = vperm.xlu1 %10931, %v10159_v42  }
0x31b2   :  { %10932 = vset.pattern.permute.xlu1 %v15368_v58 }
0x31b3   :  { %6458 = vperm.xlu1 %10932, %v6437_v55  }
0x31b7   :  { %10933 = vset.pattern.permute.xlu1 %v15373_v63 }
0x31b8   :  { %6546 = vperm.xlu1 %10933, %v6437_v55  }
0x31bc   :  { %10935 = vset.pattern.permute.xlu1 %v15372_v19 }
0x31bd   :  { %6594 = vperm.xlu1 %10935, %v6437_v55  }
0x31c1   :  { %10937 = vset.pattern.permute.xlu1 %v15368_v58 }
0x320f   :  { %v6543_v10 = vpop.permute.xlu0 %6542  ;;  %v6454_v61 = vpop.permute.xlu1 %6453 }
0x3210   :  { %v6467_v4 = vmul.f32 %v14459_v21, %v6454_v61  ;;  %v6554_v52 = vmul.f32 %v14165_v18, %v6543_v10 }
0x3214   :  { %v6449_v38 = vpop.permute.xlu0 %6448  ;;  %v10166_v56 = vpop.f32.mrb[116].mxu1 }
0x3215   :  { %v6567_v37 = vpop.permute.xlu1 %6566  ;;  %v6522_v48 = vpop.f32.mrb[117].mxu1  ;;  %v6466_v5 = vmul.f32 %v14183_v7, %v6449_v38 }
0x3216   :  { %v10167_v8 = vpop.f32.mrb[118].mxu1  ;;  %v6578_v26 = vmul.f32 %v14171_v32, %v6567_v37 }
0x3217   :  { %v6525_v51 = vpop.f32.mrb[119].mxu1  ;;  %v6523_v19 = vadd.f32 %v6522_v48, %v6466_v5 }
0x3218   :  { %v6526_v1 = vadd.f32 %v6525_v51, %v6467_v4 }
0x3219   :  { %v6591_v45 = vpop.permute.xlu1 %6590  ;;  %v6587_v49 = vpop.permute.xlu0 %6586 }
0x321a   :  { %v6558_v22 = vadd.f32 %v6554_v52, %v6526_v1  ;;  %v6602_v14 = vmul.f32 %v14177_v15, %v6591_v45  ;;  %v6601_v1 = vmul.f32 %v14204_v13, %v6587_v49 }
0x321c   :  { %v6582_v40 = vadd.f32 %v6578_v26, %v6558_v22 }
0x321e   :  { %v6606_v3 = vadd.f32 %v6602_v14, %v6582_v40  ;;  %v6539_v42 = vpop.permute.xlu1 %6538  ;;  %v6464_v63 = vpop.permute.xlu0 %6463 }
0x321f   :  { %v6553_v61 = vmul.f32 %v14189_v62, %v6539_v42  ;;  %v6469_v26 = vmul.f32 %v14210_v29, %v6464_v63 }
0x3220   :  { %v6610_v55 = vmul.f32 0.125, %v6606_v3 }
0x3221   :  { %v6557_v51 = vadd.f32 %v6553_v61, %v6523_v19  ;;  %v6534_v5 = vadd.f32 %v10167_v8, %v6469_v26 }
0x3222   :  { %v6614_v10 = vsel %vm779_vm7, %v6610_v55, -1e+30 }
0x3223   :  { %v6563_v4 = vpop.permute.xlu1 %6562  ;;  %v6620_v37 = vsel %vm226_vm0, %v6614_v10, -inf  ;;  %v6571_v45 = vpop.permute.xlu0 %6570 }
0x3224   :  { %v6577_v52 = vmul.f32 %v14198_v41, %v6563_v4  ;;  %6621 = vmax.xlane.f32.xlu0 %v6620_v37 }
0x3226   :  { %v6581_v38 = vadd.f32 %v6577_v52, %v6557_v51 }
0x3228   :  { %v6551_v22 = vpop.permute.xlu1 %6550  ;;  %v6605_v40 = vadd.f32 %v6601_v1, %v6581_v38  ;;  %v6599_v42 = vpop.permute.xlu0 %6598 }
0x3229   :  { %v6556_v48 = vmul.f32 %v14216_v9, %v6551_v22  ;;  %v6604_v4 = vmul.f32 %v14231_v35, %v6599_v42 }
0x322a   :  { %v6609_v14 = vmul.f32 0.125, %v6605_v40 }
0x322b   :  { %v6560_v61 = vadd.f32 %v6556_v48, %v6534_v5  ;;  %v6579_v48 = vmul.f32 %v14253_v0, %v6571_v45 }
0x322c   :  { %v6613_v3 = vsel %vm778_vm8, %v6609_v14, -1e+30 }
0x322d   :  { %v6575_v19 = vpop.permute.xlu1 %6574  ;;  %v6617_v55 = vsel %vm226_vm0, %v6613_v3, -inf }
0x322e   :  { %v6580_v49 = vmul.f32 %v14225_v33, %v6575_v19  ;;  %6618 = vmax.xlane.f32.xlu1 %v6617_v55 }
0x3230   :  { %v6584_v63 = vadd.f32 %v6580_v49, %v6560_v61 }
0x3232   :  { %v6459_v37 = vpop.permute.xlu1 %6458  ;;  %v6608_v51 = vadd.f32 %v6604_v4, %v6584_v63 }
0x3233   :  { %v6468_v52 = vmul.f32 %v14237_v16, %v6459_v37 }
0x3234   :  { %v6612_v1 = vmul.f32 0.125, %v6608_v51 }
0x3235   :  { %v6531_v22 = vadd.f32 %v10166_v56, %v6468_v52 }
0x3236   :  { %v6616_v8 = vsel %vm781_vm10, %v6612_v1, -1e+30 }
0x3237   :  { %v6547_v38 = vpop.permute.xlu1 %6546  ;;  %v6626_v26 = vsel %vm226_vm0, %v6616_v8, -inf }
0x3238   :  { %v6555_v40 = vmul.f32 %v14247_v6, %v6547_v38  ;;  %6627 = vmax.xlane.f32.xlu0 %v6626_v26 }
0x323a   :  { %v6559_v14 = vadd.f32 %v6555_v40, %v6531_v22 }
0x323c   :  { %v6583_v5 = vadd.f32 %v6579_v48, %v6559_v14  ;;  %v6595_v42 = vpop.permute.xlu1 %6594 }
0x323d   :  { %v6603_v19 = vmul.f32 %v14259_v43, %v6595_v42 }
0x323f   :  { %v6607_v55 = vadd.f32 %v6603_v19, %v6583_v5 }
0x3241   :  { %v6611_v61 = vmul.f32 0.125, %v6607_v55 }
0x3243   :  { %v6615_v49 = vsel %vm780_vm9, %v6611_v61, -1e+30 }
0x3244   :  { %v6623_v4 = vsel %vm226_vm0, %v6615_v49, -inf }
0x3245   :  { %6624 = vmax.xlane.f32.xlu1 %v6623_v4 }
0x32b1   :  { %v6622_v63 = vpop.xlane.xlu0 %6621 }
0x32b2   :  { %v6630_v56 = vsub.f32 %v6614_v10, %v6622_v63 }
0x32b4   :  { %v6635_v37 = vmul.f32 1.442695, %v6630_v56 }
0x32b6   :  { %11125 = vpow2.f32 %v6635_v37 }
0x32bb   :  { %v6619_v51 = vpop.xlane.xlu1 %6618 }
0x32bc   :  { %v6629_v52 = vsub.f32 %v6613_v3, %v6619_v51 }
0x32be   :  { %v6633_v45 = vmul.f32 1.442695, %v6629_v52 }
0x32c0   :  { %v11126_v1 = vpop.eup %11125  ;;  %11127 = vpow2.f32 %v6633_v45 }
0x32c1   :  { %v6644_v38 = vsel %vm226_vm0, %v11126_v1, 0.0 }
0x32c2   :  { %6645 = vadd.xlane.f32.xlu0 %v6644_v38 }
0x32c5   :  { %v6628_v26 = vpop.xlane.xlu0 %6627 }
0x32c6   :  { %v6632_v22 = vsub.f32 %v6616_v8, %v6628_v26 }
0x32c8   :  { %v6639_v40 = vmul.f32 1.442695, %v6632_v22 }
0x32ca   :  { %v11128_v48 = vpop.eup %11127  ;;  %11129 = vpow2.f32 %v6639_v40 }
0x32cb   :  { %v6641_v14 = vsel %vm226_vm0, %v11128_v48, 0.0 }
0x32cc   :  { %6642 = vadd.xlane.f32.xlu1 %v6641_v14 }
0x32d2   :  { %v6625_v5 = vpop.xlane.xlu1 %6624 }
0x32d3   :  { %v6631_v10 = vsub.f32 %v6615_v49, %v6625_v5 }
0x32d4   :  { %v11130_v42 = vpop.eup %11129 }
0x32d5   :  { %v6637_v19 = vmul.f32 1.442695, %v6631_v10  ;;  %v6650_v3 = vsel %vm226_vm0, %v11130_v42, 0.0 }
0x32d6   :  { %6651 = vadd.xlane.f32.xlu0 %v6650_v3 }
0x32d7   :  { %11131 = vpow2.f32 %v6637_v19 }
0x32e1   :  { %v11132_v55 = vpop.eup %11131 }
0x32e2   :  { %v6647_v61 = vsel %vm226_vm0, %v11132_v55, 0.0 }
0x32e3   :  { %6648 = vadd.xlane.f32.xlu1 %v6647_v61 }
0x334f   :  { %v6646_v4 = vpop.xlane.xlu0 %6645 }
0x3350   :  { %v6654_v8 = vmax.f32 %v6646_v4, 1e-30 }
0x3352   :  { %11133 = vrcp.f32 %v6654_v8 }
0x3359   :  { %v6643_v63 = vpop.xlane.xlu1 %6642 }
0x335a   :  { %v6653_v56 = vmax.f32 %v6643_v63, 1e-30 }
0x335c   :  { %11135 = vrcp.f32 %v6653_v56  ;;  %v11134_v37 = vpop.eup %11133 }
0x335d   :  { %v6662_v52 = vmul.f32 %v11134_v37, %v11126_v1 }
0x335f   :  { %v14494_v26 = vmul.f32 %v12161_v47, %v6662_v52 }
0x3361   :  { %v6690_v5 = vmul.f32 %v14165_v18, %v14494_v26 }
0x3363   :  { %v6652_v51 = vpop.xlane.xlu0 %6651  ;;  %v6696_v61 = vsel %vm226_vm0, %v6690_v5, 0.0 }
0x3364   :  { %v6656_v49 = vmax.f32 %v6652_v51, 1e-30 }
0x3366   :  { %v11136_v45 = vpop.eup %11135  ;;  %11137 = vrcp.f32 %v6656_v49 }
0x3367   :  { %v6661_v38 = vmul.f32 %v11136_v45, %v11128_v48 }
0x3369   :  { %v14497_v22 = vmul.f32 %v12151_v31, %v6661_v38 }
0x336b   :  { %v6689_v40 = vmul.f32 %v14189_v62, %v14497_v22  ;;  %v6673_v14 = vmul.f32 %v14183_v7, %v14497_v22  ;;  %v6669_v1 = vpack.c.bf16 %v14494_v26, %v14497_v22  ;;  %v6705_v19 = vmul.f32 %v14198_v41, %v14497_v22 }
0x336c   :  { %v6706_v7 = vmul.f32 %v14171_v32, %v14494_v26  ;;  %v6721_v63 = vmul.f32 %v14204_v13, %v14497_v22  ;;  %v6722_v41 = vmul.f32 %v14177_v15, %v14494_v26 }
0x336d   :  { %v6693_v48 = vsel %vm226_vm0, %v6689_v40, 0.0  ;;  %v6677_v10 = vsel %vm226_vm0, %v6673_v14, 0.0  ;;  %v6709_v8 = vsel %vm226_vm0, %v6705_v19, 0.0 }
0x336e   :  { %6694 = vadd.xlane.f32.xlu0 %v6693_v48  ;;  %6678 = vadd.xlane.f32.xlu1 %v6677_v10  ;;  %v6712_v37 = vsel %vm226_vm0, %v6706_v7, 0.0  ;;  %v6725_v32 = vsel %vm226_vm0, %v6721_v63, 0.0  ;;  %v6728_v13 = vsel %vm226_vm0, %v6722_v41, 0.0 }
0x3370   :  { %v11138_v3 = vpop.eup %11137  ;;  %v6649_v62 = vpop.xlane.xlu1 %6648 }
0x3371   :  { %v6664_v18 = vmul.f32 %v11138_v3, %v11130_v42  ;;  %v6655_v4 = vmax.f32 %v6649_v62, 1e-30  ;;  %v6674_v42 = vmul.f32 %v14459_v21, %v14494_v26  ;;  %v14600_v26 = vld [vmem:[%s15299_s10] sm:$0xf] }
0x3372   :  { %6697 = vadd.xlane.f32.xlu0 %v6696_v61  ;;  %6710 = vadd.xlane.f32.xlu1 %v6709_v8 }
0x3373   :  { %11139 = vrcp.f32 %v6655_v4  ;;  %v14520_v56 = vmul.f32 %v12181_v44, %v6664_v18  ;;  %v6680_v51 = vsel %vm226_vm0, %v6674_v42, 0.0 }
0x3375   :  { %v6692_v52 = vmul.f32 %v14216_v9, %v14520_v56  ;;  %v6676_v15 = vmul.f32 %v14210_v29, %v14520_v56  ;;  %v6708_v40 = vmul.f32 %v14225_v33, %v14520_v56  ;;  %v6724_v3 = vmul.f32 %v14231_v35, %v14520_v56 }
0x3376   :  { %6713 = vadd.xlane.f32.xlu0 %v6712_v37  ;;  %6726 = vadd.xlane.f32.xlu1 %v6725_v32  ;;  %v6345_v35 = vadd.f32 %v14401_v46, %v11957_v59 }
0x3377   :  { %v6702_v45 = vsel %vm226_vm0, %v6692_v52, 0.0  ;;  %v6686_v38 = vsel %vm226_vm0, %v6676_v15, 0.0  ;;  %v6718_v9 = vsel %vm226_vm0, %v6708_v40, 0.0  ;;  %v6734_v62 = vsel %vm226_vm0, %v6724_v3, 0.0 }
0x337a   :  { %6729 = vadd.xlane.f32.xlu0 %v6728_v13  ;;  %6681 = vadd.xlane.f32.xlu1 %v6680_v51 }
0x337d   :  { %v11140_v49 = vpop.eup %11139 }
0x337e   :  { %v6663_v14 = vmul.f32 %v11140_v49, %v11132_v55  ;;  %6703 = vadd.xlane.f32.xlu0 %v6702_v45  ;;  %6687 = vadd.xlane.f32.xlu1 %v6686_v38 }
0x3380   :  { %v14537_v5 = vmul.f32 %v12184_v12, %v6663_v14 }
0x3382   :  { %6719 = vadd.xlane.f32.xlu0 %v6718_v9  ;;  %v6675_v29 = vmul.f32 %v14237_v16, %v14537_v5  ;;  %v6691_v48 = vmul.f32 %v14247_v6, %v14537_v5  ;;  %v6670_v10 = vpack.c.bf16 %v14520_v56, %v14537_v5  ;;  %v6707_v19 = vmul.f32 %v14253_v0, %v14537_v5 }
0x3383   :  { %v6723_v6 = vmul.f32 %v14259_v43, %v14537_v5  ;;  %v6341_v0 = vadd.f32 %v14398_v20, %v11957_v59 }
0x3384   :  { %v6683_v33 = vsel %vm226_vm0, %v6675_v29, 0.0  ;;  %v6699_v55 = vsel %vm226_vm0, %v6691_v48, 0.0  ;;  %v6715_v16 = vsel %vm226_vm0, %v6707_v19, 0.0 }
0x3385   :  { %6684 = vadd.xlane.f32.xlu1 %v6683_v33  ;;  %v6731_v61 = vsel %vm226_vm0, %v6723_v6, 0.0  ;;  %v6672_v42 = vpack.c.bf16 %v6345_v35, %v6341_v0 }
0x3386   :  { %6700 = vadd.xlane.f32.xlu0 %v6699_v55 }
0x3389   :  { %6716 = vadd.xlane.f32.xlu1 %v6715_v16 }
0x338a   :  { %6735 = vadd.xlane.f32.xlu0 %v6734_v62 }
0x338d   :  { %6732 = vadd.xlane.f32.xlu1 %v6731_v61 }
0x339e   :  { %6905 = vrot.lane.b32.xlu1 %v14382_v17, %s11568_s11 }
0x33a0   :  { %6907 = vrot.lane.b32.xlu0 %v14385_v36, %s11568_s11 }
0x33a2   :  { %6909 = vrot.lane.b32.xlu1 %v6341_v0, %s11568_s11 }
0x33a6   :  { %6911 = vrot.lane.b32.xlu1 %v6345_v35, %s11568_s11 }
0x33fb   :  { %v6695_v43 = vpop.xlane.xlu0 %6694  ;;  %v6679_v7 = vpop.xlane.xlu1 %6678 }
0x33fc   :  { %v6737_v8 = vsel %vm906_vm15, %v6679_v7, %v6695_v43 }
0x33ff   :  { %v6698_v18 = vpop.xlane.xlu0 %6697  ;;  %v6711_v4 = vpop.xlane.xlu1 %6710 }
0x3400   :  { %v6741_v17 = vsel %vm911_vm1, %v6737_v8, %v6711_v4 }
0x3403   :  { %v6714_v63 = vpop.xlane.xlu0 %6713  ;;  %v6727_v20 = vpop.xlane.xlu1 %6726 }
0x3404   :  { %v6745_v41 = vsel %vm916_vm2, %v6741_v17, %v6727_v20 }
0x3405   :  { %10170 = vmatprep.mubr.msk.f32.mxu0 %vm921_vm4, %v6745_v41 }
0x3407   :  { %v6730_v36 = vpop.xlane.xlu0 %6729  ;;  %v6682_v56 = vpop.xlane.xlu1 %6681 }
0x3408   :  { %v6738_v46 = vsel %vm906_vm15, %v6682_v56, %v6698_v18 }
0x3409   :  { %v6742_v37 = vsel %vm911_vm1, %v6738_v46, %v6714_v63 }
0x340a   :  { %v6746_v32 = vsel %vm916_vm2, %v6742_v37, %v6730_v36 }
0x340b   :  { %v6704_v13 = vpop.xlane.xlu0 %6703  ;;  %10171 = vmatmul.mubr.msk.f32.vlgmr.msra.gmra.mrb[116].mxu0 %vm921_vm4, %v6746_v32  ;;  %v6688_v51 = vpop.xlane.xlu1 %6687 }
0x340c   :  { %10177 = vmatpush3.bf16.msra.mxu0 %v14390_v30  ;;  %v6740_v14 = vsel %vm906_vm15, %v6688_v51, %v6704_v13 }
0x340d   :  { %10178 = vmatprep.subr.bf16.mxu0 %v6672_v42 }
0x340f   :  { %v6720_v52 = vpop.xlane.xlu0 %6719 }
0x3410   :  { %10179 = vmatpush3.bf16.msra.mxu0 %v6672_v42  ;;  %v6744_v29 = vsel %vm911_vm1, %v6740_v14, %v6720_v52 }
0x3411   :  { %10605 = vmatprep.subr.bf16.mxu0 %v11914_v23 }
0x3412   :  { %v6685_v15 = vpop.xlane.xlu1 %6684 }
0x3413   :  { %v6701_v49 = vpop.xlane.xlu0 %6700 }
0x3414   :  { %v6739_v38 = vsel %vm906_vm15, %v6685_v15, %v6701_v49 }
0x3416   :  { %v6717_v45 = vpop.xlane.xlu1 %6716 }
0x3417   :  { %v6736_v40 = vpop.xlane.xlu0 %6735  ;;  %v6743_v5 = vsel %vm911_vm1, %v6739_v38, %v6717_v45 }
0x3418   :  { %v6748_v48 = vsel %vm916_vm2, %v6744_v29, %v6736_v40 }
0x341a   :  { %v6733_v9 = vpop.xlane.xlu1 %6732 }
0x341b   :  { %v6747_v30 = vsel %vm916_vm2, %v6743_v5, %v6733_v9  ;;  %v6908_v8 = vpop.permute.xlu0 %6907 }
0x341c   :  { %10173 = vmatprep.mubr.msk.f32.mxu0 %vm921_vm4, %v6747_v30 }
0x341d   :  { %10174 = vmatmul.mubr.msk.f32.gmra.mrb[118].mxu0 %vm921_vm4, %v6748_v48 }
0x341e   :  { %10180 = vmatprep.mubr.msk.bf16.mxu0 %vm226_vm0, %v6669_v1 }
0x3421   :  { %10181 = vmatmul.mubr.msk.bf16.vlgmr.msra.gmra.mrb[120].mxu0 %vm226_vm0, %v6670_v10  ;;  %v6906_v10 = vpop.permute.xlu1 %6905 }
0x3422   :  { %10607 = vmatpush3.bf16.msra.mxu0 %v11914_v23 }
0x3423   :  { %10609 = vmatprep.subr.bf16.mxu0 %v11919_v25 }
0x3425   :  { %v6910_v19 = vpop.permute.xlu1 %6909 }
0x3426   :  { %10611 = vmatpush3.bf16.msra.mxu0 %v11919_v25 }
0x3427   :  { %10613 = vmatprep.subr.bf16.mxu0 %v11930_v28 }
0x3429   :  { %v6912_v7 = vpop.permute.xlu1 %6911 }
0x342a   :  { %10615 = vmatpush3.bf16.msra.mxu0 %v11930_v28 }
0x342b   :  { %10617 = vmatprep.subr.bf16.mxu0 %v11944_v50 }
0x342e   :  { %10619 = vmatpush3.bf16.msra.mxu0 %v11944_v50 }
0x342f   :  { %10214 = vmatprep.subr.msk.mxu0 %vm934_vm6, %v14600_v26 }
0x34de   :  { %v10172_v22 = vpop.f32.mrb[116].mxu0 }
0x34df   :  { %v6827_v1 = vpop.f32.mrb[117].mxu0 }
0x34f0   :  { %v10175_v33 = vpop.f32.mrb[118].mxu0 }
0x34f1   :  { %v6837_v55 = vpop.f32.mrb[119].mxu0 }
0x34f4   :  { %v10182_v3 = vpop.f32.mrb[120].mxu0 }
0x34f5   :  { %v6895_v16 = vadd.f32 %v10182_v3, %v6837_v55  ;;  %v6886_v6 = vpop.f32.mrb[121].mxu0 }
0x34f6   :  { %v6887_v62 = vadd.f32 %v6886_v6, %v6827_v1  ;;  %v10183_v61 = vpop.f32.mrb[122].mxu0 }
0x34f7   :  { %v6919_v0 = vadd.f32 %v6910_v19, %v6895_v16  ;;  %v6898_v35 = vadd.f32 %v10183_v61, %v10175_v33  ;;  %v6889_v43 = vpop.f32.mrb[123].mxu0  ;;  %v11280_v61 = vld [vmem:[%s15364_s5 + $0x20] ss:$8 sps:$4 sm:$0xff]  }
0x34f8   :  { %v6917_v18 = vadd.f32 %v6906_v10, %v6887_v62  ;;  %v6890_v4 = vadd.f32 %v10172_v22, %v6889_v43  ;;  %v11279_v62 = vld [vmem:[%s15364_s5 + $0x24] ss:$8 sps:$4 sm:$0xff]   ;;  %v15374_v43 = vmov 3  }
0x34f9   :  { %v6927_v17 = vmul.f32 0.01, %v6919_v0  ;;  %v6920_v63 = vadd.f32 %v6912_v7, %v6898_v35  ;;  %vm6923_vm11 = vcmp.ge.f32.partialorder %v6919_v0, 0.0  ;;  %v15375_v7 = vmov 1  }
0x34fa   :  { %v6925_v20 = vmul.f32 0.01, %v6917_v18  ;;  %v6918_v41 = vadd.f32 %v6908_v8, %v6890_v4  ;;  %vm6921_vm12 = vcmp.ge.f32.partialorder %v6917_v18, 0.0 }
0x34fb   :  { %vm6924_vm13 = vcmp.ge.f32.partialorder %v6920_v63, 0.0  ;;  %v6928_v36 = vmul.f32 0.01, %v6920_v63  ;;  %v6931_v46 = vsel %vm6923_vm11, %v6919_v0, %v6927_v17 }
0x34fc   :  { %vm6922_vm14 = vcmp.ge.f32.partialorder %v6918_v41, 0.0  ;;  %v6926_v56 = vmul.f32 0.01, %v6918_v41  ;;  %v6929_v32 = vsel %vm6921_vm12, %v6917_v18, %v6925_v20 }
0x34fd   :  { %v6932_v37 = vsel %vm6924_vm13, %v6920_v63, %v6928_v36 }
0x34fe   :  { %v6930_v42 = vsel %vm6922_vm14, %v6918_v41, %v6926_v56  ;;  %v6934_v13 = vpack.c.bf16 %v6932_v37, %v6931_v46  ;;  %v14679_v46 = vld [vmem:[%s15365_s18 + $0x28] sm:$0xff] }
0x34ff   :  { %v6933_v51 = vpack.c.bf16 %v6930_v42, %v6929_v32 }
0x3501   :  { %9280 = vmatmul.mubr.msk.bf16.vlgmr.msra.gmra.mrb[120].mxu1 %vm433_vm3, %v6933_v51 }
0x3502   :  { %6983 = vmatprep.mubr.bf16.mxu1 %v15368_v58 }
0x3509   :  { %9281 = vmatmul.mubr.msk.bf16.gmra.mrb[124].mxu1 %vm433_vm3, %v6934_v13  ;;  %v14685_v13 = vld [vmem:[%s15365_s18 + $0x48] sm:$0xff] }
0x35d4   :  { %v6975_v52 = vpop.f32.mrb[120].mxu1 }
0x35d5   :  { %v6976_v15 = vadd.f32 %v6975_v52, %v11955_v57  ;;  %v6977_v49 = vpop.f32.mrb[121].mxu1 }
0x35d6   :  { %v6979_v45 = vpop.f32.mrb[122].mxu1  ;;  %v14611_v14 = vadd.f32 %v6977_v49, %v11957_v59 }
0x35d7   :  { %v6980_v38 = vadd.f32 %v6979_v45, %v11955_v57  ;;  %v6981_v40 = vpop.f32.mrb[123].mxu1  ;;  %10200 = vmatprep.mubr.msk.f32.mxu0 %vm433_vm3, %v6976_v15  ;;  %v14691_v45 = vld [vmem:[%s15365_s18 + $0x68] sm:$0xff] }
0x35d8   :  { %v14614_v5 = vadd.f32 %v6981_v40, %v11957_v59  ;;  %v14697_v40 = vld [vmem:[%s15365_s18] sm:$0xff] }
0x35d9   :  { %v6994_v9 = vpack.c.bf16 %v6980_v38, %v6976_v15  ;;  %10201 = vmatmul.mubr.msk.f32.vlgmr.msra.gmra.mrb[124].mxu0 %vm433_vm3, %v6980_v38 }
0x35da   :  { %v14619_v29 = vpack.c.bf16 %v14614_v5, %v14611_v14  ;;  %10215 = vmatpush3.msk.msra.mxu0 %vm934_vm6, %v14600_v26 }
0x35db   :  { %7119 = vrot.lane.b32.xlu0 %v6994_v9, %s11568_s11  ;;  %10210 = vmatprep.mubr.msk.bf16.mxu1 %vm433_vm3, %v6994_v9 }
0x35dc   :  { %v6985_v30 = vpop.f32.mrb[124].mxu1  ;;  %10222 = vmatprep.subr.bf16.mxu0 %v14619_v29 }
0x35dd   :  { %v6986_v48 = vadd.f32 %v6985_v30, %v11955_v57  ;;  %v14627_v22 = vpop.f32.mrb[125].mxu1 }
0x35de   :  { %v6989_v1 = vpop.f32.mrb[126].mxu1 }
0x35df   :  { %v6990_v10 = vadd.f32 %v6989_v1, %v11955_v57  ;;  %v14630_v33 = vpop.f32.mrb[127].mxu1  ;;  %10203 = vmatprep.mubr.msk.f32.mxu0 %vm433_vm3, %v6986_v48 }
0x35e1   :  { %v6995_v55 = vpack.c.bf16 %v6990_v10, %v6986_v48  ;;  %10204 = vmatmul.mubr.msk.f32.gmra.mrb[126].mxu0 %vm433_vm3, %v6990_v10  ;;  %v14703_v10 = vld [vmem:[%s15365_s18 + $0x20] sm:$0xff] }
0x35e3   :  { %7121 = vrot.lane.b32.xlu1 %v6995_v55, %s11568_s11 }
0x364d   :  { %v7120_v19 = vpop.permute.xlu0 %7119 }
0x364e   :  { %v7130_v3 = vsel %vm433_vm3, %v7120_v19, 0  ;;  %10752 = vmatprep.subr.msk.bf16.mxu1 %vm433_vm3, %v7120_v19 }
0x364f   :  { %10207 = vmatpush3.bf16.xpose.msra.mxu1 %v7130_v3 }
0x3655   :  { %v7122_v16 = vpop.permute.xlu1 %7121 }
0x3656   :  { %10753 = vmatprep.subr.msk.bf16.mxu1 %vm433_vm3, %v7122_v16  ;;  %v7133_v6 = vsel %vm433_vm3, %v7122_v16, 0 }
0x3657   :  { %10209 = vmatpush3.bf16.xpose.msra.mxu1 %v7133_v6 }
0x3658   :  { %7588 = vmatprep.subr.bf16.mxu1 %v14413_v53  ;;  %v11281_v53 = vld [vmem:[%s15364_s5 + $0x34] ss:$8 sps:$4 sm:$0xff]  }
0x365e   :  { %10211 = vmatmul.mubr.msk.bf16.vlgmr.msra.gmra.mrb[128].mxu1 %vm433_vm3, %v6995_v55 }
0x365f   :  { %7589 = vmatpush1.bf16.msra.mxu1 %v14420_v11  ;;  %7620 = vmatprep.mubr.bf16.mxu1 %v15368_v58  ;;  %v11282_v11 = vld [vmem:[%s15364_s5 + $0x30] ss:$8 sps:$4 sm:$0xff]  }
0x3660   :  { %7590 = vmatprep.subr.bf16.mxu1 %v14427_v2 }
0x3663   :  { %7591 = vmatpush1.bf16.msra.mxu1 %v14433_v60 }
0x3664   :  { %7592 = vmatprep.subr.bf16.mxu1 %v11279_v62 }
0x3667   :  { %7593 = vmatpush1.bf16.msra.mxu1 %v11280_v61 }
0x3668   :  { %7594 = vmatprep.subr.bf16.mxu1 %v11281_v53  ;;  %v14712_v53 = vld [vmem:[%s15365_s18 + $0x40] sm:$0xff] }
0x366b   :  { %7595 = vmatpush1.bf16.msra.mxu1 %v11282_v11 }
0x36ac   :  { %v10202_v2 = vpop.f32.mrb[124].mxu0 }
0x36ad   :  { %v7074_v60 = vpop.f32.mrb[125].mxu0  ;;  %7189 = vperm.xlu0 %10938, %v10202_v2   ;;  %7100 = vperm.xlu1 %10937, %v10202_v2  }
0x36b1   :  { %10941 = vset.pattern.permute.xlu0 %v15368_v58  ;;  %10939 = vset.pattern.permute.xlu1 %v15369_v34 }
0x36b2   :  { %7095 = vperm.xlu0 %10941, %v7074_v60   ;;  %7213 = vperm.xlu1 %10939, %v10202_v2  }
0x36b4   :  { %v10205_v0 = vpop.f32.mrb[126].mxu0 }
0x36b5   :  { %v7084_v35 = vpop.f32.mrb[127].mxu0 }
0x36b6   :  { %10944 = vset.pattern.permute.xlu0 %v15374_v43  ;;  %10940 = vset.pattern.permute.xlu1 %v15374_v43 }
0x36b7   :  { %7233 = vperm.xlu0 %10944, %v7074_v60   ;;  %7237 = vperm.xlu1 %10940, %v10202_v2   ;;  %v14718_v2 = vld [vmem:[%s15365_s18 + $0x60] sm:$0xff] }
0x36bb   :  { %10945 = vset.pattern.permute.xlu0 %v15368_v58  ;;  %10942 = vset.pattern.permute.xlu1 %v15375_v7 }
0x36bc   :  { %7110 = vperm.xlu0 %10945, %v10205_v0   ;;  %7185 = vperm.xlu1 %10942, %v7074_v60  }
0x36c0   :  { %10950 = vset.pattern.permute.xlu0 %v15369_v34  ;;  %10943 = vset.pattern.permute.xlu1 %v15369_v34 }
0x36c1   :  { %7217 = vperm.xlu0 %10950, %v7084_v35   ;;  %7209 = vperm.xlu1 %10943, %v7074_v60  }
0x36c5   :  { %10952 = vset.pattern.permute.xlu0 %v15374_v43  ;;  %10946 = vset.pattern.permute.xlu1 %v15375_v7 }
0x36c6   :  { %7245 = vperm.xlu0 %10952, %v10205_v0   ;;  %7197 = vperm.xlu1 %10946, %v10205_v0  }
0x36ca   :  { %10947 = vset.pattern.permute.xlu1 %v15369_v34  ;;  %10954 = vset.pattern.permute.xlu0 %v15375_v7 }
0x36cb   :  { %7221 = vperm.xlu1 %10947, %v10205_v0  }
0x36cf   :  { %10948 = vset.pattern.permute.xlu1 %v15368_v58 }
0x36d0   :  { %7105 = vperm.xlu1 %10948, %v7084_v35  }
0x36d4   :  { %10949 = vset.pattern.permute.xlu1 %v15375_v7 }
0x36d5   :  { %7193 = vperm.xlu1 %10949, %v7084_v35  }
0x36d9   :  { %10951 = vset.pattern.permute.xlu1 %v15374_v43 }
0x36da   :  { %7241 = vperm.xlu1 %10951, %v7084_v35  }
0x36de   :  { %10953 = vset.pattern.permute.xlu1 %v15368_v58 }
0x372c   :  { %v7190_v18 = vpop.permute.xlu0 %7189  ;;  %v7101_v4 = vpop.permute.xlu1 %7100 }
0x372d   :  { %v7114_v41 = vmul.f32 %v14459_v21, %v7101_v4  ;;  %v7201_v37 = vmul.f32 %v14679_v46, %v7190_v18  ;;  %v14724_v18 = vld [vmem:[%s15365_s18 + $0x18] sm:$0xff] }
0x3731   :  { %v7096_v8 = vpop.permute.xlu0 %7095  ;;  %v14673_v17 = vpop.f32.mrb[128].mxu1 }
0x3732   :  { %v7214_v63 = vpop.permute.xlu1 %7213  ;;  %v7169_v20 = vpop.f32.mrb[129].mxu1  ;;  %v7113_v9 = vmul.f32 %v14697_v40, %v7096_v8 }
0x3733   :  { %v10213_v36 = vpop.f32.mrb[130].mxu1  ;;  %v7225_v51 = vmul.f32 %v14685_v13, %v7214_v63 }
0x3734   :  { %v7172_v56 = vpop.f32.mrb[131].mxu1  ;;  %v7170_v3 = vadd.f32 %v7169_v20, %v7113_v9  ;;  %v14730_v20 = vld [vmem:[%s15365_s18 + $0x38] sm:$0xff] }
0x3735   :  { %v7173_v32 = vadd.f32 %v7172_v56, %v7114_v41 }
0x3736   :  { %v7238_v42 = vpop.permute.xlu1 %7237  ;;  %v7234_v15 = vpop.permute.xlu0 %7233 }
0x3737   :  { %v7205_v52 = vadd.f32 %v7201_v37, %v7173_v32  ;;  %v7249_v38 = vmul.f32 %v14691_v45, %v7238_v42  ;;  %v7248_v60 = vmul.f32 %v14718_v2, %v7234_v15 }
0x3739   :  { %v7229_v49 = vadd.f32 %v7225_v51, %v7205_v52 }
0x373b   :  { %v7253_v30 = vadd.f32 %v7249_v38, %v7229_v49  ;;  %v7186_v48 = vpop.permute.xlu1 %7185  ;;  %v7111_v19 = vpop.permute.xlu0 %7110  ;;  %v14739_v49 = vld [vmem:[%s15365_s18 + $0x58] sm:$0xff] }
0x373c   :  { %v7200_v55 = vmul.f32 %v14703_v10, %v7186_v48  ;;  %v7116_v4 = vmul.f32 %v14724_v18, %v7111_v19 }
0x373d   :  { %v7257_v1 = vmul.f32 0.125, %v7253_v30 }
0x373e   :  { %v7204_v61 = vadd.f32 %v7200_v55, %v7170_v3  ;;  %v7181_v37 = vadd.f32 %v10213_v36, %v7116_v4  ;;  %v14745_v36 = vld [vmem:[%s15365_s18 + $0x78] sm:$0xff]  ;;  %v14751_v55 = vld [vmem:[%s15365_s18 + $0x10] sm:$0xff] }
0x373f   :  { %v7261_v16 = vsel %vm779_vm7, %v7257_v1, -1e+30  ;;  %v14767_v4 = vld [vmem:[%s15365_s18 + $0x50] sm:$0xff] }
0x3740   :  { %v7210_v6 = vpop.permute.xlu1 %7209  ;;  %v7267_v62 = vsel %vm226_vm0, %v7261_v16, -inf  ;;  %v7218_v35 = vpop.permute.xlu0 %7217 }
0x3741   :  { %v7224_v11 = vmul.f32 %v14712_v53, %v7210_v6  ;;  %7268 = vmax.xlane.f32.xlu0 %v7267_v62 }
0x3743   :  { %v7228_v0 = vadd.f32 %v7224_v11, %v7204_v61 }
0x3745   :  { %v7252_v8 = vadd.f32 %v7248_v60, %v7228_v0  ;;  %v7198_v63 = vpop.permute.xlu1 %7197  ;;  %v7246_v42 = vpop.permute.xlu0 %7245  ;;  %v14761_v60 = vld [vmem:[%s15365_s18 + $0x30] sm:$0xff] }
0x3746   :  { %v7203_v41 = vmul.f32 %v14730_v20, %v7198_v63  ;;  %v7251_v9 = vmul.f32 %v14745_v36, %v7246_v42 }
0x3747   :  { %v7256_v56 = vmul.f32 0.125, %v7252_v8  ;;  %v7226_v8 = vmul.f32 %v14767_v4, %v7218_v35 }
0x3748   :  { %v7207_v15 = vadd.f32 %v7203_v41, %v7181_v37 }
0x3749   :  { %v7260_v32 = vsel %vm778_vm8, %v7256_v56, -1e+30 }
0x374a   :  { %v7222_v51 = vpop.permute.xlu1 %7221  ;;  %v7264_v52 = vsel %vm226_vm0, %v7260_v32, -inf }
0x374b   :  { %v7227_v38 = vmul.f32 %v14739_v49, %v7222_v51  ;;  %7265 = vmax.xlane.f32.xlu1 %v7264_v52 }
0x374d   :  { %v7231_v30 = vadd.f32 %v7227_v38, %v7207_v15 }
0x374f   :  { %v7255_v48 = vadd.f32 %v7251_v9, %v7231_v30  ;;  %v7106_v1 = vpop.permute.xlu1 %7105 }
0x3750   :  { %v7115_v19 = vmul.f32 %v14751_v55, %v7106_v1 }
0x3751   :  { %v7259_v3 = vmul.f32 0.125, %v7255_v48 }
0x3752   :  { %v7178_v11 = vadd.f32 %v14673_v17, %v7115_v19  ;;  %v14773_v17 = vld [vmem:[%s15365_s18 + $0x70] sm:$0xff] }
0x3753   :  { %v7263_v6 = vsel %vm781_vm10, %v7259_v3, -1e+30 }
0x3754   :  { %v7194_v62 = vpop.permute.xlu1 %7193  ;;  %v7273_v61 = vsel %vm226_vm0, %v7263_v6, -inf }
0x3755   :  { %v7202_v0 = vmul.f32 %v14761_v60, %v7194_v62  ;;  %7274 = vmax.xlane.f32.xlu0 %v7273_v61 }
0x3757   :  { %v7206_v63 = vadd.f32 %v7202_v0, %v7178_v11 }
0x3759   :  { %v7230_v41 = vadd.f32 %v7226_v8, %v7206_v63  ;;  %v7242_v56 = vpop.permute.xlu1 %7241 }
0x375a   :  { %v7250_v37 = vmul.f32 %v14773_v17, %v7242_v56 }
0x375c   :  { %v7254_v42 = vadd.f32 %v7250_v37, %v7230_v41 }
0x375e   :  { %v7258_v51 = vmul.f32 0.125, %v7254_v42 }
0x3760   :  { %v7262_v52 = vsel %vm780_vm9, %v7258_v51, -1e+30 }
0x3761   :  { %v7270_v15 = vsel %vm226_vm0, %v7262_v52, -inf }
0x3762   :  { %7271 = vmax.xlane.f32.xlu1 %v7270_v15 }
0x37ce   :  { %v7269_v38 = vpop.xlane.xlu0 %7268 }
0x37cf   :  { %v7277_v35 = vsub.f32 %v7261_v16, %v7269_v38 }
0x37d1   :  { %v7282_v9 = vmul.f32 1.442695, %v7277_v35 }
0x37d3   :  { %11141 = vpow2.f32 %v7282_v9 }
0x37d8   :  { %v7266_v30 = vpop.xlane.xlu1 %7265 }
0x37d9   :  { %v7276_v48 = vsub.f32 %v7260_v32, %v7266_v30 }
0x37db   :  { %v7280_v1 = vmul.f32 1.442695, %v7276_v48 }
0x37dd   :  { %v11142_v19 = vpop.eup %11141  ;;  %11143 = vpow2.f32 %v7280_v1 }
0x37de   :  { %v7291_v3 = vsel %vm226_vm0, %v11142_v19, 0.0 }
0x37df   :  { %7292 = vadd.xlane.f32.xlu0 %v7291_v3 }
0x37e2   :  { %v7275_v62 = vpop.xlane.xlu0 %7274 }
0x37e3   :  { %v7279_v61 = vsub.f32 %v7263_v6, %v7275_v62 }
0x37e5   :  { %v7286_v11 = vmul.f32 1.442695, %v7279_v61 }
0x37e7   :  { %v11144_v0 = vpop.eup %11143  ;;  %11145 = vpow2.f32 %v7286_v11 }
0x37e8   :  { %v7288_v8 = vsel %vm226_vm0, %v11144_v0, 0.0 }
0x37e9   :  { %7289 = vadd.xlane.f32.xlu1 %v7288_v8 }
0x37ef   :  { %v7272_v63 = vpop.xlane.xlu1 %7271 }
0x37f0   :  { %v7278_v16 = vsub.f32 %v7262_v52, %v7272_v63 }
0x37f1   :  { %v11146_v41 = vpop.eup %11145 }
0x37f2   :  { %v7284_v56 = vmul.f32 1.442695, %v7278_v16  ;;  %v7297_v32 = vsel %vm226_vm0, %v11146_v41, 0.0 }
0x37f3   :  { %7298 = vadd.xlane.f32.xlu0 %v7297_v32 }
0x37f4   :  { %11147 = vpow2.f32 %v7284_v56 }
0x37fe   :  { %v11148_v37 = vpop.eup %11147 }
0x37ff   :  { %v7294_v42 = vsel %vm226_vm0, %v11148_v37, 0.0 }
0x3800   :  { %7295 = vadd.xlane.f32.xlu1 %v7294_v42 }
0x386c   :  { %v7293_v51 = vpop.xlane.xlu0 %7292 }
0x386d   :  { %v7301_v6 = vmax.f32 %v7293_v51, 1e-30 }
0x386f   :  { %11149 = vrcp.f32 %v7301_v6 }
0x3876   :  { %v7290_v15 = vpop.xlane.xlu1 %7289 }
0x3877   :  { %v7300_v38 = vmax.f32 %v7290_v15, 1e-30 }
0x3879   :  { %11151 = vrcp.f32 %v7300_v38  ;;  %v11150_v35 = vpop.eup %11149 }
0x387a   :  { %v7309_v30 = vmul.f32 %v11150_v35, %v11142_v19 }
0x387c   :  { %v14784_v3 = vmul.f32 %v12161_v47, %v7309_v30 }
0x387e   :  { %v7337_v8 = vmul.f32 %v14679_v46, %v14784_v3  ;;  %v7353_v51 = vmul.f32 %v14685_v13, %v14784_v3 }
0x3880   :  { %v7299_v9 = vpop.xlane.xlu0 %7298  ;;  %v7343_v42 = vsel %vm226_vm0, %v7337_v8, 0.0 }
0x3881   :  { %v7303_v52 = vmax.f32 %v7299_v9, 1e-30  ;;  %v7369_v9 = vmul.f32 %v14691_v45, %v14784_v3 }
0x3883   :  { %v11152_v48 = vpop.eup %11151  ;;  %11153 = vrcp.f32 %v7303_v52  ;;  %v7359_v52 = vsel %vm226_vm0, %v7353_v51, 0.0 }
0x3884   :  { %v7308_v1 = vmul.f32 %v11152_v48, %v11144_v0 }
0x3886   :  { %v14787_v62 = vmul.f32 %v12151_v31, %v7308_v1  ;;  %v7375_v1 = vsel %vm226_vm0, %v7369_v9, 0.0 }
0x3888   :  { %v7336_v61 = vmul.f32 %v14703_v10, %v14787_v62  ;;  %v7320_v11 = vmul.f32 %v14697_v40, %v14787_v62  ;;  %v7316_v19 = vpack.c.bf16 %v14784_v3, %v14787_v62  ;;  %v7352_v16 = vmul.f32 %v14712_v53, %v14787_v62 }
0x3889   :  { %v7368_v35 = vmul.f32 %v14718_v2, %v14787_v62 }
0x388a   :  { %v7340_v0 = vsel %vm226_vm0, %v7336_v61, 0.0  ;;  %v7324_v63 = vsel %vm226_vm0, %v7320_v11, 0.0  ;;  %v7356_v38 = vsel %vm226_vm0, %v7352_v16, 0.0 }
0x388b   :  { %7341 = vadd.xlane.f32.xlu0 %v7340_v0  ;;  %7325 = vadd.xlane.f32.xlu1 %v7324_v63  ;;  %v7372_v48 = vsel %vm226_vm0, %v7368_v35, 0.0 }
0x388d   :  { %v11154_v56 = vpop.eup %11153  ;;  %v7296_v32 = vpop.xlane.xlu1 %7295 }
0x388e   :  { %v7311_v6 = vmul.f32 %v11154_v56, %v11146_v41  ;;  %v7302_v15 = vmax.f32 %v7296_v32, 1e-30  ;;  %v7321_v41 = vmul.f32 %v14459_v21, %v14784_v3 }
0x388f   :  { %7344 = vadd.xlane.f32.xlu0 %v7343_v42  ;;  %7357 = vadd.xlane.f32.xlu1 %v7356_v38 }
0x3890   :  { %11155 = vrcp.f32 %v7302_v15  ;;  %v14810_v30 = vmul.f32 %v12181_v44, %v7311_v6  ;;  %v7327_v61 = vsel %vm226_vm0, %v7321_v41, 0.0 }
0x3892   :  { %v7339_v11 = vmul.f32 %v14730_v20, %v14810_v30  ;;  %v7323_v8 = vmul.f32 %v14724_v18, %v14810_v30  ;;  %v7355_v21 = vmul.f32 %v14739_v49, %v14810_v30  ;;  %v7371_v9 = vmul.f32 %v14745_v36, %v14810_v30 }
0x3893   :  { %7360 = vadd.xlane.f32.xlu0 %v7359_v52  ;;  %7373 = vadd.xlane.f32.xlu1 %v7372_v48 }
0x3894   :  { %v7349_v63 = vsel %vm226_vm0, %v7339_v11, 0.0  ;;  %v7333_v16 = vsel %vm226_vm0, %v7323_v8, 0.0  ;;  %v7365_v42 = vsel %vm226_vm0, %v7355_v21, 0.0  ;;  %v7381_v41 = vsel %vm226_vm0, %v7371_v9, 0.0 }
0x3897   :  { %7376 = vadd.xlane.f32.xlu0 %v7375_v1  ;;  %7328 = vadd.xlane.f32.xlu1 %v7327_v61  ;;  %v6988_v61 = vadd.f32 %v14627_v22, %v11957_v59 }
0x389a   :  { %v11156_v0 = vpop.eup %11155 }
0x389b   :  { %v7310_v56 = vmul.f32 %v11156_v0, %v11148_v37  ;;  %7350 = vadd.xlane.f32.xlu0 %v7349_v63  ;;  %7334 = vadd.xlane.f32.xlu1 %v7333_v16 }
0x389d   :  { %v14827_v32 = vmul.f32 %v12184_v12, %v7310_v56 }
0x389f   :  { %7366 = vadd.xlane.f32.xlu0 %v7365_v42  ;;  %v7322_v51 = vmul.f32 %v14751_v55, %v14827_v32  ;;  %v7338_v6 = vmul.f32 %v14761_v60, %v14827_v32  ;;  %v7317_v15 = vpack.c.bf16 %v14810_v30, %v14827_v32  ;;  %v7354_v35 = vmul.f32 %v14767_v4, %v14827_v32 }
0x38a0   :  { %v7370_v48 = vmul.f32 %v14773_v17, %v14827_v32  ;;  %v6992_v30 = vadd.f32 %v14630_v33, %v11957_v59 }
0x38a1   :  { %v7330_v38 = vsel %vm226_vm0, %v7322_v51, 0.0  ;;  %v7346_v37 = vsel %vm226_vm0, %v7338_v6, 0.0  ;;  %v7362_v52 = vsel %vm226_vm0, %v7354_v35, 0.0 }
0x38a2   :  { %7331 = vadd.xlane.f32.xlu1 %v7330_v38  ;;  %v7378_v1 = vsel %vm226_vm0, %v7370_v48, 0.0  ;;  %v7319_v6 = vpack.c.bf16 %v6992_v30, %v6988_v61 }
0x38a3   :  { %7347 = vadd.xlane.f32.xlu0 %v7346_v37 }
0x38a6   :  { %7363 = vadd.xlane.f32.xlu1 %v7362_v52 }
0x38a7   :  { %7382 = vadd.xlane.f32.xlu0 %v7381_v41 }
0x38aa   :  { %7379 = vadd.xlane.f32.xlu1 %v7378_v1 }
0x38bb   :  { %7552 = vrot.lane.b32.xlu1 %v14611_v14, %s11568_s11 }
0x38bd   :  { %7554 = vrot.lane.b32.xlu0 %v14614_v5, %s11568_s11 }
0x38bf   :  { %7556 = vrot.lane.b32.xlu1 %v6988_v61, %s11568_s11 }
0x38c3   :  { %7558 = vrot.lane.b32.xlu1 %v6992_v30, %s11568_s11 }
0x3918   :  { %v7342_v11 = vpop.xlane.xlu0 %7341  ;;  %v7326_v8 = vpop.xlane.xlu1 %7325 }
0x3919   :  { %v7384_v16 = vsel %vm906_vm15, %v7326_v8, %v7342_v11 }
0x391c   :  { %v7345_v0 = vpop.xlane.xlu0 %7344  ;;  %v7358_v63 = vpop.xlane.xlu1 %7357 }
0x391d   :  { %v7388_v14 = vsel %vm911_vm1, %v7384_v16, %v7358_v63 }
0x3920   :  { %v7361_v21 = vpop.xlane.xlu0 %7360  ;;  %v7374_v22 = vpop.xlane.xlu1 %7373 }
0x3921   :  { %v7392_v56 = vsel %vm916_vm2, %v7388_v14, %v7374_v22 }
0x3922   :  { %10216 = vmatprep.mubr.msk.f32.mxu0 %vm921_vm4, %v7392_v56 }
0x3924   :  { %v7377_v5 = vpop.xlane.xlu0 %7376  ;;  %v7329_v32 = vpop.xlane.xlu1 %7328 }
0x3925   :  { %v7385_v33 = vsel %vm906_vm15, %v7329_v32, %v7345_v0 }
0x3926   :  { %v7389_v42 = vsel %vm911_vm1, %v7385_v33, %v7361_v21 }
0x3927   :  { %v7393_v51 = vsel %vm916_vm2, %v7389_v42, %v7377_v5 }
0x3928   :  { %v7351_v38 = vpop.xlane.xlu0 %7350  ;;  %10217 = vmatmul.mubr.msk.f32.vlgmr.msra.gmra.mrb[128].mxu0 %vm921_vm4, %v7393_v51  ;;  %v7335_v37 = vpop.xlane.xlu1 %7334 }
0x3929   :  { %10223 = vmatpush3.bf16.msra.mxu0 %v14619_v29  ;;  %v7387_v11 = vsel %vm906_vm15, %v7335_v37, %v7351_v38 }
0x392a   :  { %10224 = vmatprep.subr.bf16.mxu0 %v7319_v6 }
0x392c   :  { %v7367_v35 = vpop.xlane.xlu0 %7366 }
0x392d   :  { %10225 = vmatpush3.bf16.msra.mxu0 %v7319_v6  ;;  %v7391_v8 = vsel %vm911_vm1, %v7387_v11, %v7367_v35 }
0x392e   :  { %10621 = vmatprep.subr.bf16.mxu0 %v11914_v23 }
0x392f   :  { %v7332_v9 = vpop.xlane.xlu1 %7331 }
0x3930   :  { %v7348_v52 = vpop.xlane.xlu0 %7347 }
0x3931   :  { %v7386_v41 = vsel %vm906_vm15, %v7332_v9, %v7348_v52 }
0x3933   :  { %v7364_v48 = vpop.xlane.xlu1 %7363 }
0x3934   :  { %v7383_v1 = vpop.xlane.xlu0 %7382  ;;  %v7390_v61 = vsel %vm911_vm1, %v7386_v41, %v7364_v48 }
0x3935   :  { %v7395_v0 = vsel %vm916_vm2, %v7391_v8, %v7383_v1 }
0x3937   :  { %v7380_v30 = vpop.xlane.xlu1 %7379 }
0x3938   :  { %v7394_v29 = vsel %vm916_vm2, %v7390_v61, %v7380_v30  ;;  %v7555_v42 = vpop.permute.xlu0 %7554 }
0x3939   :  { %10219 = vmatprep.mubr.msk.f32.mxu0 %vm921_vm4, %v7394_v29 }
0x393a   :  { %10220 = vmatmul.mubr.msk.f32.gmra.mrb[130].mxu0 %vm921_vm4, %v7395_v0 }
0x393b   :  { %10226 = vmatprep.mubr.msk.bf16.mxu0 %vm226_vm0, %v7316_v19  ;;  %v7553_v19 = vpop.permute.xlu1 %7552 }
0x393e   :  { %10227 = vmatmul.mubr.msk.bf16.vlgmr.msra.gmra.mrb[132].mxu0 %vm226_vm0, %v7317_v15 }
0x393f   :  { %10623 = vmatpush3.bf16.msra.mxu0 %v11914_v23  ;;  %v7557_v63 = vpop.permute.xlu1 %7556 }
0x3940   :  { %10625 = vmatprep.subr.bf16.mxu0 %v11919_v25 }
0x3943   :  { %10627 = vmatpush3.bf16.msra.mxu0 %v11919_v25  ;;  %v7559_v32 = vpop.permute.xlu1 %7558 }
0x3944   :  { %10629 = vmatprep.subr.bf16.mxu0 %v11930_v28 }
0x3947   :  { %10631 = vmatpush3.bf16.msra.mxu0 %v11930_v28 }
0x3948   :  { %10633 = vmatprep.subr.bf16.mxu0 %v11944_v50 }
0x394b   :  { %10635 = vmatpush3.bf16.msra.mxu0 %v11944_v50 }
0x394c   :  { %10260 = vmatprep.subr.msk.mxu0 %vm934_vm6, %v14600_v26 }
0x39fb   :  { %v10218_v3 = vpop.f32.mrb[128].mxu0 }
0x39fc   :  { %v7474_v62 = vpop.f32.mrb[129].mxu0 }
0x3a0d   :  { %v10221_v15 = vpop.f32.mrb[130].mxu0 }
0x3a0e   :  { %v7484_v23 = vpop.f32.mrb[131].mxu0 }
0x3a11   :  { %v10228_v16 = vpop.f32.mrb[132].mxu0 }
0x3a12   :  { %v7542_v14 = vadd.f32 %v10228_v16, %v7484_v23  ;;  %v7533_v25 = vpop.f32.mrb[133].mxu0 }
0x3a13   :  { %v7534_v21 = vadd.f32 %v7533_v25, %v7474_v62  ;;  %v10229_v22 = vpop.f32.mrb[134].mxu0 }
0x3a14   :  { %v7566_v56 = vadd.f32 %v7557_v63, %v7542_v14  ;;  %v7545_v28 = vadd.f32 %v10229_v22, %v10221_v15  ;;  %v7536_v5 = vpop.f32.mrb[135].mxu0 }
0x3a15   :  { %v7564_v33 = vadd.f32 %v7553_v19, %v7534_v21  ;;  %v7537_v50 = vadd.f32 %v10218_v3, %v7536_v5 }
0x3a16   :  { %v7574_v51 = vmul.f32 0.01, %v7566_v56  ;;  %v7567_v6 = vadd.f32 %v7559_v32, %v7545_v28  ;;  %vm7570_vm5 = vcmp.ge.f32.partialorder %v7566_v56, 0.0 }
0x3a17   :  { %v7572_v38 = vmul.f32 0.01, %v7564_v33  ;;  %v7565_v37 = vadd.f32 %v7555_v42, %v7537_v50  ;;  %vm7568_vm11 = vcmp.ge.f32.partialorder %v7564_v33, 0.0 }
0x3a18   :  { %vm7571_vm12 = vcmp.ge.f32.partialorder %v7567_v6, 0.0  ;;  %v7575_v35 = vmul.f32 0.01, %v7567_v6  ;;  %v7578_v52 = vsel %vm7570_vm5, %v7566_v56, %v7574_v51 }
0x3a19   :  { %vm7569_vm13 = vcmp.ge.f32.partialorder %v7565_v37, 0.0  ;;  %v7573_v9 = vmul.f32 0.01, %v7565_v37  ;;  %v7576_v41 = vsel %vm7568_vm11, %v7564_v33, %v7572_v38 }
0x3a1a   :  { %v7579_v48 = vsel %vm7571_vm12, %v7567_v6, %v7575_v35 }
0x3a1b   :  { %v7577_v1 = vsel %vm7569_vm13, %v7565_v37, %v7573_v9  ;;  %v7581_v11 = vpack.c.bf16 %v7579_v48, %v7578_v52 }
0x3a1c   :  { %v7580_v61 = vpack.c.bf16 %v7577_v1, %v7576_v41 }
0x3a1e   :  { %9295 = vmatmul.mubr.msk.bf16.vlgmr.msra.gmra.mrb[132].mxu1 %vm433_vm3, %v7580_v61 }
0x3a1f   :  { %7630 = vmatprep.mubr.bf16.mxu1 %v15368_v58 }
0x3a26   :  { %9296 = vmatmul.mubr.msk.bf16.gmra.mrb[136].mxu1 %vm433_vm3, %v7581_v11 }
0x3af1   :  { %v7622_v30 = vpop.f32.mrb[132].mxu1 }
0x3af2   :  { %v7623_v8 = vadd.f32 %v7622_v30, %v11955_v57  ;;  %v7624_v29 = vpop.f32.mrb[133].mxu1 }
0x3af3   :  { %v7626_v0 = vpop.f32.mrb[134].mxu1  ;;  %v14896_v19 = vadd.f32 %v7624_v29, %v11957_v59 }
0x3af4   :  { %v7627_v3 = vadd.f32 %v7626_v0, %v11955_v57  ;;  %v7628_v62 = vpop.f32.mrb[135].mxu1  ;;  %10246 = vmatprep.mubr.msk.f32.mxu0 %vm433_vm3, %v7623_v8 }
0x3af5   :  { %v14899_v15 = vadd.f32 %v7628_v62, %v11957_v59 }
0x3af6   :  { %v7641_v23 = vpack.c.bf16 %v7627_v3, %v7623_v8  ;;  %10247 = vmatmul.mubr.msk.f32.vlgmr.msra.gmra.mrb[136].mxu0 %vm433_vm3, %v7627_v3 }
0x3af7   :  { %v14904_v63 = vpack.c.bf16 %v14899_v15, %v14896_v19  ;;  %10261 = vmatpush3.msk.msra.mxu0 %vm934_vm6, %v14600_v26  ;;  %vm11574_vm6 = vmmov 0  }
0x3af8   :  { %7766 = vrot.lane.b32.xlu0 %v7641_v23, %s11568_s11  ;;  %10256 = vmatprep.mubr.msk.bf16.mxu1 %vm433_vm3, %v7641_v23 }
0x3af9   :  { %v7632_v16 = vpop.f32.mrb[136].mxu1  ;;  %10268 = vmatprep.subr.bf16.mxu0 %v14904_v63 }
0x3afa   :  { %v7633_v14 = vadd.f32 %v7632_v16, %v11955_v57  ;;  %v14912_v25 = vpop.f32.mrb[137].mxu1 }
0x3afb   :  { %v7636_v21 = vpop.f32.mrb[138].mxu1 }
0x3afc   :  { %v7637_v22 = vadd.f32 %v7636_v21, %v11955_v57  ;;  %v14915_v56 = vpop.f32.mrb[139].mxu1  ;;  %10249 = vmatprep.mubr.msk.f32.mxu0 %vm433_vm3, %v7633_v14  ;;  %v15376_v57 = vmov 0.0  }
0x3afe   :  { %v7642_v28 = vpack.c.bf16 %v7637_v22, %v7633_v14  ;;  %10250 = vmatmul.mubr.msk.f32.gmra.mrb[138].mxu0 %vm433_vm3, %v7637_v22 }
0x3b00   :  { %7768 = vrot.lane.b32.xlu1 %v7642_v28, %s11568_s11 }
0x3b6a   :  { %v7767_v26 = vpop.permute.xlu0 %7766 }
0x3b6b   :  { %v7777_v5 = vsel %vm433_vm3, %v7767_v26, 0  ;;  %10754 = vmatprep.subr.msk.bf16.mxu1 %vm433_vm3, %v7767_v26 }
0x3b6c   :  { %10253 = vmatpush3.bf16.xpose.msra.mxu1 %v7777_v5 }
0x3b72   :  { %v7769_v32 = vpop.permute.xlu1 %7768 }
0x3b73   :  { %v7780_v33 = vsel %vm433_vm3, %v7769_v32, 0  ;;  %10755 = vmatprep.subr.msk.bf16.mxu1 %vm433_vm3, %v7769_v32 }
0x3b74   :  { %10255 = vmatpush3.bf16.xpose.msra.mxu1 %v7780_v33 }
0x3b75   :  { %10298 = vmatprep.subr.mxu1 %v15376_v57 }
0x3b7b   :  { %10257 = vmatmul.mubr.msk.bf16.vlgmr.msra.gmra.mrb[140].mxu1 %vm433_vm3, %v7642_v28 }
0x3b7c   :  { %10300 = vmatprep.mubr.msk.f32.mxu1 %vm11574_vm6, %v15376_v57 }
0x3bc9   :  { %v10248_v50 = vpop.f32.mrb[136].mxu0 }
0x3bca   :  { %v7721_v42 = vpop.f32.mrb[137].mxu0  ;;  %7836 = vperm.xlu0 %10954, %v10248_v50   ;;  %7747 = vperm.xlu1 %10953, %v10248_v50  }
0x3bce   :  { %10957 = vset.pattern.permute.xlu0 %v15368_v58  ;;  %10955 = vset.pattern.permute.xlu1 %v15369_v34 }
0x3bcf   :  { %7742 = vperm.xlu0 %10957, %v7721_v42   ;;  %7860 = vperm.xlu1 %10955, %v10248_v50  }
0x3bd1   :  { %v10251_v51 = vpop.f32.mrb[138].mxu0 }
0x3bd2   :  { %v7731_v6 = vpop.f32.mrb[139].mxu0 }
0x3bd3   :  { %10960 = vset.pattern.permute.xlu0 %v15374_v43  ;;  %10956 = vset.pattern.permute.xlu1 %v15374_v43 }
0x3bd4   :  { %7880 = vperm.xlu0 %10960, %v7721_v42   ;;  %7884 = vperm.xlu1 %10956, %v10248_v50  }
0x3bd8   :  { %10961 = vset.pattern.permute.xlu0 %v15368_v58  ;;  %10958 = vset.pattern.permute.xlu1 %v15375_v7 }
0x3bd9   :  { %7757 = vperm.xlu0 %10961, %v10251_v51   ;;  %7832 = vperm.xlu1 %10958, %v7721_v42  }
0x3bdd   :  { %10966 = vset.pattern.permute.xlu0 %v15369_v34  ;;  %10959 = vset.pattern.permute.xlu1 %v15369_v34 }
0x3bde   :  { %7864 = vperm.xlu0 %10966, %v7731_v6   ;;  %7856 = vperm.xlu1 %10959, %v7721_v42  }
0x3be2   :  { %10968 = vset.pattern.permute.xlu0 %v15374_v43  ;;  %10962 = vset.pattern.permute.xlu1 %v15375_v7 }
0x3be3   :  { %7892 = vperm.xlu0 %10968, %v10251_v51   ;;  %7844 = vperm.xlu1 %10962, %v10251_v51  }
0x3be7   :  { %10963 = vset.pattern.permute.xlu1 %v15369_v34  ;;  %v14943_v34 = vld [vmem:[%s15365_s18 + $0x8] sm:$0xff] }
0x3be8   :  { %7868 = vperm.xlu1 %10963, %v10251_v51  }
0x3bec   :  { %10964 = vset.pattern.permute.xlu1 %v15368_v58 }
0x3bed   :  { %7752 = vperm.xlu1 %10964, %v7731_v6  }
0x3bf1   :  { %10965 = vset.pattern.permute.xlu1 %v15375_v7 }
0x3bf2   :  { %7840 = vperm.xlu1 %10965, %v7731_v6  }
0x3bf6   :  { %10967 = vset.pattern.permute.xlu1 %v15374_v43 }
0x3bf7   :  { %7888 = vperm.xlu1 %10967, %v7731_v6  }
0x3c49   :  { %v7837_v38 = vpop.permute.xlu0 %7836  ;;  %v7748_v37 = vpop.permute.xlu1 %7747 }
0x3c4a   :  { %v7761_v58 = vmul.f32 %v14943_v34, %v7748_v37  ;;  %v7848_v7 = vmul.f32 %v14679_v46, %v7837_v38 }
0x3c4e   :  { %v7743_v35 = vpop.permute.xlu0 %7742  ;;  %v10258_v9 = vpop.f32.mrb[140].mxu1 }
0x3c4f   :  { %v7861_v52 = vpop.permute.xlu1 %7860  ;;  %v7816_v48 = vpop.f32.mrb[141].mxu1  ;;  %v7760_v3 = vmul.f32 %v14697_v40, %v7743_v35 }
0x3c50   :  { %v10259_v41 = vpop.f32.mrb[142].mxu1  ;;  %v7872_v61 = vmul.f32 %v14685_v13, %v7861_v52 }
0x3c51   :  { %v7819_v1 = vpop.f32.mrb[143].mxu1  ;;  %v7817_v22 = vadd.f32 %v7816_v48, %v7760_v3 }
0x3c52   :  { %v7820_v11 = vadd.f32 %v7819_v1, %v7761_v58 }
0x3c53   :  { %v7885_v43 = vpop.permute.xlu1 %7884  ;;  %v7881_v8 = vpop.permute.xlu0 %7880 }
0x3c54   :  { %v7852_v30 = vadd.f32 %v7848_v7, %v7820_v11  ;;  %v7896_v0 = vmul.f32 %v14691_v45, %v7885_v43  ;;  %v7895_v50 = vmul.f32 %v14718_v2, %v7881_v8 }
0x3c56   :  { %v7876_v29 = vadd.f32 %v7872_v61, %v7852_v30 }
0x3c58   :  { %v7900_v62 = vadd.f32 %v7896_v0, %v7876_v29  ;;  %v7833_v23 = vpop.permute.xlu1 %7832  ;;  %v7758_v21 = vpop.permute.xlu0 %7757 }
0x3c59   :  { %v7847_v14 = vmul.f32 %v14703_v10, %v7833_v23  ;;  %v7763_v6 = vmul.f32 %v14724_v18, %v7758_v21 }
0x3c5a   :  { %v7904_v16 = vmul.f32 0.125, %v7900_v62 }
0x3c5b   :  { %v7851_v32 = vadd.f32 %v7847_v14, %v7817_v22  ;;  %v7828_v54 = vadd.f32 %v10259_v41, %v7763_v6 }
0x3c5c   :  { %v7908_v28 = vsel %vm779_vm7, %v7904_v16, -1e+30 }
0x3c5d   :  { %v7857_v26 = vpop.permute.xlu1 %7856  ;;  %v7914_v5 = vsel %vm226_vm0, %v7908_v28, -inf  ;;  %v7865_v51 = vpop.permute.xlu0 %7864 }
0x3c5e   :  { %v7871_v33 = vmul.f32 %v14712_v53, %v7857_v26  ;;  %7915 = vmax.xlane.f32.xlu0 %v7914_v5  ;;  %v7873_v14 = vmul.f32 %v14767_v4, %v7865_v51 }
0x3c60   :  { %v7875_v42 = vadd.f32 %v7871_v33, %v7851_v32 }
0x3c62   :  { %v7899_v38 = vadd.f32 %v7895_v50, %v7875_v42  ;;  %v7845_v37 = vpop.permute.xlu1 %7844  ;;  %v7893_v58 = vpop.permute.xlu0 %7892 }
0x3c63   :  { %v7850_v35 = vmul.f32 %v14730_v20, %v7845_v37  ;;  %v7898_v61 = vmul.f32 %v14745_v36, %v7893_v58 }
0x3c64   :  { %v7903_v52 = vmul.f32 0.125, %v7899_v38 }
0x3c65   :  { %v7854_v11 = vadd.f32 %v7850_v35, %v7828_v54 }
0x3c66   :  { %v7907_v48 = vsel %vm778_vm8, %v7903_v52, -1e+30 }
0x3c67   :  { %v7869_v1 = vpop.permute.xlu1 %7868  ;;  %v7911_v7 = vsel %vm226_vm0, %v7907_v48, -inf }
0x3c68   :  { %v7874_v43 = vmul.f32 %v14739_v49, %v7869_v1  ;;  %7912 = vmax.xlane.f32.xlu1 %v7911_v7 }
0x3c6a   :  { %v7878_v30 = vadd.f32 %v7874_v43, %v7854_v11 }
0x3c6c   :  { %v7902_v8 = vadd.f32 %v7898_v61, %v7878_v30  ;;  %v7753_v29 = vpop.permute.xlu1 %7752 }
0x3c6d   :  { %v7762_v0 = vmul.f32 %v14751_v55, %v7753_v29 }
0x3c6e   :  { %v7906_v3 = vmul.f32 0.125, %v7902_v8 }
0x3c6f   :  { %v7825_v23 = vadd.f32 %v10258_v9, %v7762_v0 }
0x3c70   :  { %v7910_v27 = vsel %vm781_vm10, %v7906_v3, -1e+30 }
0x3c71   :  { %v7841_v41 = vpop.permute.xlu1 %7840  ;;  %v7920_v62 = vsel %vm226_vm0, %v7910_v27, -inf }
0x3c72   :  { %v7849_v16 = vmul.f32 %v14761_v60, %v7841_v41  ;;  %7921 = vmax.xlane.f32.xlu0 %v7920_v62 }
0x3c74   :  { %v7853_v21 = vadd.f32 %v7849_v16, %v7825_v23 }
0x3c76   :  { %v7877_v22 = vadd.f32 %v7873_v14, %v7853_v21  ;;  %v7889_v26 = vpop.permute.xlu1 %7888 }
0x3c77   :  { %v7897_v5 = vmul.f32 %v14773_v17, %v7889_v26 }
0x3c79   :  { %v7901_v32 = vadd.f32 %v7897_v5, %v7877_v22 }
0x3c7b   :  { %v7905_v33 = vmul.f32 0.125, %v7901_v32 }
0x3c7d   :  { %v7909_v39 = vsel %vm780_vm9, %v7905_v33, -1e+30 }
0x3c7e   :  { %v7917_v50 = vsel %vm226_vm0, %v7909_v39, -inf }
0x3c7f   :  { %7918 = vmax.xlane.f32.xlu1 %v7917_v50 }
0x3ceb   :  { %v7916_v42 = vpop.xlane.xlu0 %7915 }
0x3cec   :  { %v7924_v9 = vsub.f32 %v7908_v28, %v7916_v42 }
0x3cee   :  { %v7929_v6 = vmul.f32 1.442695, %v7924_v9 }
0x3cf0   :  { %11157 = vpow2.f32 %v7929_v6 }
0x3cf5   :  { %v7913_v38 = vpop.xlane.xlu1 %7912 }
0x3cf6   :  { %v7923_v37 = vsub.f32 %v7907_v48, %v7913_v38 }
0x3cf8   :  { %v7927_v51 = vmul.f32 1.442695, %v7923_v37 }
0x3cfa   :  { %v11158_v35 = vpop.eup %11157  ;;  %11159 = vpow2.f32 %v7927_v51 }
0x3cfb   :  { %v7938_v52 = vsel %vm226_vm0, %v11158_v35, 0.0 }
0x3cfc   :  { %7939 = vadd.xlane.f32.xlu0 %v7938_v52 }
0x3cff   :  { %v7922_v54 = vpop.xlane.xlu0 %7921 }
0x3d00   :  { %v7926_v58 = vsub.f32 %v7910_v27, %v7922_v54 }
0x3d02   :  { %v7933_v1 = vmul.f32 1.442695, %v7926_v58 }
0x3d04   :  { %v11160_v24 = vpop.eup %11159  ;;  %11161 = vpow2.f32 %v7933_v1 }
0x3d05   :  { %v7935_v7 = vsel %vm226_vm0, %v11160_v24, 0.0 }
0x3d06   :  { %7936 = vadd.xlane.f32.xlu1 %v7935_v7 }
0x3d0c   :  { %v7919_v11 = vpop.xlane.xlu1 %7918 }
0x3d0d   :  { %v7925_v28 = vsub.f32 %v7909_v39, %v7919_v11 }
0x3d0e   :  { %v11162_v43 = vpop.eup %11161 }
0x3d0f   :  { %v7931_v61 = vmul.f32 1.442695, %v7925_v28  ;;  %v7944_v48 = vsel %vm226_vm0, %v11162_v43, 0.0 }
0x3d10   :  { %7945 = vadd.xlane.f32.xlu0 %v7944_v48 }
0x3d11   :  { %11163 = vpow2.f32 %v7931_v61 }
0x3d1b   :  { %v11164_v30 = vpop.eup %11163 }
0x3d1c   :  { %v7941_v8 = vsel %vm226_vm0, %v11164_v30, 0.0 }
0x3d1d   :  { %7942 = vadd.xlane.f32.xlu1 %v7941_v8 }
0x3d89   :  { %v7940_v29 = vpop.xlane.xlu0 %7939 }
0x3d8a   :  { %v7948_v0 = vmax.f32 %v7940_v29, 1e-30 }
0x3d8c   :  { %11165 = vrcp.f32 %v7948_v0 }
0x3d93   :  { %v7937_v3 = vpop.xlane.xlu1 %7936 }
0x3d94   :  { %v7947_v27 = vmax.f32 %v7937_v3, 1e-30 }
0x3d96   :  { %11167 = vrcp.f32 %v7947_v27  ;;  %v11166_v41 = vpop.eup %11165 }
0x3d97   :  { %v7956_v23 = vmul.f32 %v11166_v41, %v11158_v35 }
0x3d99   :  { %v14978_v22 = vmul.f32 %v12161_v47, %v7956_v23 }
0x3d9b   :  { %v7984_v33 = vmul.f32 %v14679_v46, %v14978_v22  ;;  %v7968_v52 = vmul.f32 %v14943_v34, %v14978_v22 }
0x3d9d   :  { %v7946_v62 = vpop.xlane.xlu0 %7945  ;;  %v7990_v9 = vsel %vm226_vm0, %v7984_v33, 0.0  ;;  %v7974_v54 = vsel %vm226_vm0, %v7968_v52, 0.0 }
0x3d9e   :  { %v7950_v16 = vmax.f32 %v7946_v62, 1e-30 }
0x3da0   :  { %v11168_v14 = vpop.eup %11167  ;;  %11169 = vrcp.f32 %v7950_v16 }
0x3da1   :  { %v7955_v21 = vmul.f32 %v11168_v14, %v11160_v24 }
0x3da3   :  { %v14981_v26 = vmul.f32 %v12151_v31, %v7955_v21 }
0x3da5   :  { %v7983_v5 = vmul.f32 %v14703_v10, %v14981_v26  ;;  %v7967_v32 = vmul.f32 %v14697_v40, %v14981_v26  ;;  %v7963_v39 = vpack.c.bf16 %v14978_v22, %v14981_v26  ;;  %v7999_v31 = vmul.f32 %v14712_v53, %v14981_v26 }
0x3da6   :  { %v8000_v40 = vmul.f32 %v14685_v13, %v14978_v22  ;;  %v8015_v37 = vmul.f32 %v14718_v2, %v14981_v26  ;;  %v8016_v53 = vmul.f32 %v14691_v45, %v14978_v22 }
0x3da7   :  { %v7987_v50 = vsel %vm226_vm0, %v7983_v5, 0.0  ;;  %v7971_v47 = vsel %vm226_vm0, %v7967_v32, 0.0  ;;  %v8003_v38 = vsel %vm226_vm0, %v7999_v31, 0.0 }
0x3da8   :  { %7988 = vadd.xlane.f32.xlu0 %v7987_v50  ;;  %7972 = vadd.xlane.f32.xlu1 %v7971_v47  ;;  %v8006_v35 = vsel %vm226_vm0, %v8000_v40, 0.0  ;;  %v8019_v13 = vsel %vm226_vm0, %v8015_v37, 0.0  ;;  %v8022_v2 = vsel %vm226_vm0, %v8016_v53, 0.0 }
0x3daa   :  { %v11170_v42 = vpop.eup %11169  ;;  %v7943_v10 = vpop.xlane.xlu1 %7942 }
0x3dab   :  { %v7958_v46 = vmul.f32 %v11170_v42, %v11162_v43  ;;  %v7949_v6 = vmax.f32 %v7943_v10, 1e-30 }
0x3dac   :  { %7991 = vadd.xlane.f32.xlu0 %v7990_v9  ;;  %8004 = vadd.xlane.f32.xlu1 %v8003_v38  ;;  %v11573_v38 = vmov 0.0|0.0  }
0x3dad   :  { %11171 = vrcp.f32 %v7949_v6  ;;  %v15004_v51 = vmul.f32 %v12181_v44, %v7958_v46 }
0x3daf   :  { %v7986_v58 = vmul.f32 %v14730_v20, %v15004_v51  ;;  %v7970_v44 = vmul.f32 %v14724_v18, %v15004_v51  ;;  %v8002_v34 = vmul.f32 %v14739_v49, %v15004_v51  ;;  %v8018_v48 = vmul.f32 %v14745_v36, %v15004_v51 }
0x3db0   :  { %8007 = vadd.xlane.f32.xlu0 %v8006_v35  ;;  %8020 = vadd.xlane.f32.xlu1 %v8019_v13  ;;  %v7639_v36 = vadd.f32 %v14915_v56, %v11957_v59 }
0x3db1   :  { %v7996_v1 = vsel %vm226_vm0, %v7986_v58, 0.0  ;;  %v7980_v24 = vsel %vm226_vm0, %v7970_v44, 0.0  ;;  %v8012_v20 = vsel %vm226_vm0, %v8002_v34, 0.0 }
0x3db4   :  { %8023 = vadd.xlane.f32.xlu0 %v8022_v2  ;;  %7975 = vadd.xlane.f32.xlu1 %v7974_v54 }
0x3db7   :  { %v11172_v45 = vpop.eup %11171 }
0x3db8   :  { %v7957_v7 = vmul.f32 %v11172_v45, %v11164_v30  ;;  %7997 = vadd.xlane.f32.xlu0 %v7996_v1  ;;  %7981 = vadd.xlane.f32.xlu1 %v7980_v24  ;;  %v8028_v30 = vsel %vm226_vm0, %v8018_v48, 0.0 }
0x3dba   :  { %v15021_v11 = vmul.f32 %v12184_v12, %v7957_v7 }
0x3dbc   :  { %8013 = vadd.xlane.f32.xlu0 %v8012_v20  ;;  %v7969_v18 = vmul.f32 %v14751_v55, %v15021_v11  ;;  %v7985_v28 = vmul.f32 %v14761_v60, %v15021_v11  ;;  %v7964_v43 = vpack.c.bf16 %v15004_v51, %v15021_v11  ;;  %v8001_v12 = vmul.f32 %v14767_v4, %v15021_v11 }
0x3dbd   :  { %v8017_v60 = vmul.f32 %v14773_v17, %v15021_v11  ;;  %v7635_v4 = vadd.f32 %v14912_v25, %v11957_v59 }
0x3dbe   :  { %v7977_v49 = vsel %vm226_vm0, %v7969_v18, 0.0  ;;  %v7993_v61 = vsel %vm226_vm0, %v7985_v28, 0.0  ;;  %v8009_v55 = vsel %vm226_vm0, %v8001_v12, 0.0 }
0x3dbf   :  { %7978 = vadd.xlane.f32.xlu1 %v7977_v49  ;;  %v8025_v8 = vsel %vm226_vm0, %v8017_v60, 0.0  ;;  %v7966_v14 = vpack.c.bf16 %v7639_v36, %v7635_v4 }
0x3dc0   :  { %7994 = vadd.xlane.f32.xlu0 %v7993_v61 }
0x3dc3   :  { %8010 = vadd.xlane.f32.xlu1 %v8009_v55 }
0x3dc4   :  { %8029 = vadd.xlane.f32.xlu0 %v8028_v30 }
0x3dc7   :  { %8026 = vadd.xlane.f32.xlu1 %v8025_v8  ;;  %v8227_v8 = vld [vmem:[#allocation8] sm:$0x3] }
0x3dd8   :  { %8199 = vrot.lane.b32.xlu1 %v14896_v19, %s11568_s11 }
0x3dda   :  { %8201 = vrot.lane.b32.xlu0 %v14899_v15, %s11568_s11 }
0x3ddc   :  { %8203 = vrot.lane.b32.xlu1 %v7635_v4, %s11568_s11  ;;  %v8301_v4 = vld [vmem:[#allocation9] sm:$0xff] }
0x3de0   :  { %8205 = vrot.lane.b32.xlu1 %v7639_v36, %s11568_s11  ;;  %v8453_v36 = vld [vmem:[%s15301_s12] sm:$0xff]  ;;  %s15377_s11 = sld [smem:[#allocation33_spill]] }
0x3e35   :  { %v7989_v17 = vpop.xlane.xlu0 %7988  ;;  %v7973_v29 = vpop.xlane.xlu1 %7972 }
0x3e36   :  { %v8031_v27 = vsel %vm906_vm15, %v7973_v29, %v7989_v17  ;;  %v8454_v17 = vld [vmem:[%s15301_s12 + $0x8] sm:$0xff] }
0x3e37   :  { %v10661_v29 = vpack.c.bf16 %v8454_v17, %v8453_v36  ;;  %v8808_v17 = vld [vmem:[#allocation17 + $0x10] sm:$0xff] }
0x3e39   :  { %v7992_v0 = vpop.xlane.xlu0 %7991  ;;  %v8005_v3 = vpop.xlane.xlu1 %8004 }
0x3e3a   :  { %v8035_v19 = vsel %vm911_vm1, %v8031_v27, %v8005_v3  ;;  %v8456_v3 = vld [vmem:[%s15301_s12 + $0x18] sm:$0xff] }
0x3e3d   :  { %v8008_v41 = vpop.xlane.xlu0 %8007  ;;  %v8021_v25 = vpop.xlane.xlu1 %8020 }
0x3e3e   :  { %v8039_v62 = vsel %vm916_vm2, %v8035_v19, %v8021_v25  ;;  %v8457_v19 = vld [vmem:[%s15301_s12 + $0x20] sm:$0xff] }
0x3e3f   :  { %10262 = vmatprep.mubr.msk.f32.mxu0 %vm921_vm4, %v8039_v62  ;;  %v8459_v62 = vld [vmem:[%s15301_s12 + $0x30] sm:$0xff] }
0x3e41   :  { %v8024_v15 = vpop.xlane.xlu0 %8023  ;;  %v7976_v23 = vpop.xlane.xlu1 %7975 }
0x3e42   :  { %v8032_v59 = vsel %vm906_vm15, %v7976_v23, %v7992_v0  ;;  %v8455_v0 = vld [vmem:[%s15301_s12 + $0x10] sm:$0xff] }
0x3e43   :  { %v8036_v56 = vsel %vm911_vm1, %v8032_v59, %v8008_v41  ;;  %v10664_v27 = vpack.c.bf16 %v8456_v3, %v8455_v0  ;;  %v8458_v41 = vld [vmem:[%s15301_s12 + $0x28] sm:$0xff]  ;;  %v8461_v59 = vld [vmem:[%s15301_s12 + $0x40] sm:$0xff] }
0x3e44   :  { %v8040_v16 = vsel %vm916_vm2, %v8036_v56, %v8024_v15  ;;  %v10667_v25 = vpack.c.bf16 %v8458_v41, %v8457_v19  ;;  %v8460_v15 = vld [vmem:[%s15301_s12 + $0x38] sm:$0xff]  ;;  %v8462_v56 = vld [vmem:[%s15301_s12 + $0x48] sm:$0xff] }
0x3e45   :  { %v7998_v21 = vpop.xlane.xlu0 %7997  ;;  %10263 = vmatmul.mubr.msk.f32.vlgmr.msra.gmra.mrb[140].mxu0 %vm921_vm4, %v8040_v16  ;;  %v7982_v5 = vpop.xlane.xlu1 %7981  ;;  %v10670_v23 = vpack.c.bf16 %v8460_v15, %v8459_v62  ;;  %v8375_v16 = vld [vmem:[%s15377_s11] sm:$0xff]  ;;  %v8813_v62 = vld [vmem:[#allocation17 + $0x38] sm:$0xff] }
0x3e46   :  { %10269 = vmatpush3.bf16.msra.mxu0 %v14904_v63  ;;  %v8034_v10 = vsel %vm906_vm15, %v7982_v5, %v7998_v21  ;;  %v8463_v5 = vld [vmem:[%s15301_s12 + $0x50] sm:$0xff]  ;;  %v8811_v19 = vld [vmem:[#allocation17 + $0x28] sm:$0xff] }
0x3e47   :  { %10270 = vmatprep.subr.bf16.mxu0 %v7966_v14 }
0x3e49   :  { %v8014_v32 = vpop.xlane.xlu0 %8013 }
0x3e4a   :  { %10271 = vmatpush3.bf16.msra.mxu0 %v7966_v14  ;;  %v8038_v46 = vsel %vm911_vm1, %v8034_v10, %v8014_v32  ;;  %v10649_v14 = vpack.c.bf16 %v8462_v56, %v8461_v59  ;;  %v8464_v32 = vld [vmem:[%s15301_s12 + $0x58] sm:$0xff]  ;;  %v8467_v10 = vld [vmem:[%s15301_s12 + $0x70] sm:$0xff] }
0x3e4b   :  { %10636 = vmatprep.subr.bf16.mxu0 %v11573_v38  ;;  %v8724_v59 = vld [vmem:[%s15305_s16 + $0x38] sm:$0xff] }
0x3e4c   :  { %v7979_v33 = vpop.xlane.xlu1 %7978 }
0x3e4d   :  { %v7995_v50 = vpop.xlane.xlu0 %7994 }
0x3e4e   :  { %v8033_v31 = vsel %vm906_vm15, %v7979_v33, %v7995_v50  ;;  %v10652_v50 = vpack.c.bf16 %v8464_v32, %v8463_v5  ;;  %v8897_v5 = vld [vmem:[#allocation18 + $0x8] sm:$0xff] }
0x3e50   :  { %v8011_v47 = vpop.xlane.xlu1 %8010 }
0x3e51   :  { %v8030_v42 = vpop.xlane.xlu0 %8029  ;;  %v8037_v9 = vsel %vm911_vm1, %v8033_v31, %v8011_v47  ;;  %v8465_v47 = vld [vmem:[%s15301_s12 + $0x60] sm:$0xff]  ;;  %v8466_v31 = vld [vmem:[%s15301_s12 + $0x68] sm:$0xff] }
0x3e52   :  { %v8042_v63 = vsel %vm916_vm2, %v8038_v46, %v8030_v42  ;;  %v10655_v42 = vpack.c.bf16 %v8466_v31, %v8465_v47  ;;  %v8898_v31 = vld [vmem:[#allocation18 + $0x10] sm:$0xff] }
0x3e54   :  { %v8027_v40 = vpop.xlane.xlu1 %8026 }
0x3e55   :  { %v8041_v6 = vsel %vm916_vm2, %v8037_v9, %v8027_v40  ;;  %v8202_v7 = vpop.permute.xlu0 %8201  ;;  %v8468_v9 = vld [vmem:[%s15301_s12 + $0x78] sm:$0xff] }
0x3e56   :  { %10265 = vmatprep.mubr.msk.f32.mxu0 %vm921_vm4, %v8041_v6  ;;  %v10658_v40 = vpack.c.bf16 %v8468_v9, %v8467_v10 }
0x3e57   :  { %10266 = vmatmul.mubr.msk.f32.gmra.mrb[142].mxu0 %vm921_vm4, %v8042_v63  ;;  %v8626_v63 = vld [vmem:[%s15303_s14] sm:$0xff] }
0x3e58   :  { %10272 = vmatprep.mubr.msk.bf16.mxu0 %vm226_vm0, %v7963_v39  ;;  %v8200_v51 = vpop.permute.xlu1 %8199 }
0x3e5b   :  { %10273 = vmatmul.mubr.msk.bf16.vlgmr.msra.gmra.mrb[144].mxu0 %vm226_vm0, %v7964_v43 }
0x3e5c   :  { %10284 = vmatprep.mubr.msk.f32.mxu0 %vm11574_vm6, %v15376_v57  ;;  %v8204_v22 = vpop.permute.xlu1 %8203 }
0x3e60   :  { %v8206_v1 = vpop.permute.xlu1 %8205 }
0x3f18   :  { %v10264_v37 = vpop.f32.mrb[140].mxu0 }
0x3f19   :  { %v8121_v53 = vpop.f32.mrb[141].mxu0 }
0x3f2a   :  { %v10267_v35 = vpop.f32.mrb[142].mxu0 }
0x3f2b   :  { %v8131_v13 = vpop.f32.mrb[143].mxu0 }
0x3f2e   :  { %v10274_v26 = vpop.f32.mrb[144].mxu0 }
0x3f2f   :  { %v8189_v39 = vadd.f32 %v10274_v26, %v8131_v13  ;;  %v8180_v52 = vpop.f32.mrb[145].mxu0 }
0x3f30   :  { %v8181_v2 = vadd.f32 %v8180_v52, %v8121_v53  ;;  %v10275_v54 = vpop.f32.mrb[146].mxu0  ;;  %v8631_v52 = vld [vmem:[%s15303_s14 + $0x28] sm:$0xff] }
0x3f31   :  { %v8213_v58 = vadd.f32 %v8204_v22, %v8189_v39  ;;  %v8192_v44 = vadd.f32 %v10275_v54, %v10267_v35  ;;  %v8183_v45 = vpop.f32.mrb[147].mxu0  ;;  %v8629_v35 = vld [vmem:[%s15303_s14 + $0x18] sm:$0xff]  ;;  %v8630_v39 = vld [vmem:[%s15303_s14 + $0x20] sm:$0xff] }
0x3f32   :  { %v8211_v24 = vadd.f32 %v8200_v51, %v8181_v2  ;;  %v8184_v34 = vadd.f32 %v10264_v37, %v8183_v45  ;;  %v8627_v37 = vld [vmem:[%s15303_s14 + $0x8] sm:$0xff]  ;;  %v8628_v51 = vld [vmem:[%s15303_s14 + $0x10] sm:$0xff]  ;;  %v10679_v54 = vpack.c.bf16 %v8631_v52, %v8630_v39  ;;  %v8633_v45 = vld [vmem:[%s15303_s14 + $0x38] sm:$0xff] }
0x3f33   :  { %v8221_v11 = vmul.f32 0.01, %v8213_v58  ;;  %v8214_v20 = vadd.f32 %v8206_v1, %v8192_v44  ;;  %vm8217_vm7 = vcmp.ge.f32.partialorder %v8213_v58, 0.0  ;;  %v10673_v53 = vpack.c.bf16 %v8627_v37, %v8626_v63  ;;  %v8632_v44 = vld [vmem:[%s15303_s14 + $0x30] sm:$0xff]  ;;  %v8902_v63 = vld [vmem:[#allocation18 + $0x30] sm:$0xff] }
0x3f34   :  { %v8219_v18 = vmul.f32 0.01, %v8211_v24  ;;  %v8212_v28 = vadd.f32 %v8202_v7, %v8184_v34  ;;  %vm8215_vm8 = vcmp.ge.f32.partialorder %v8211_v24, 0.0  ;;  %v10676_v26 = vpack.c.bf16 %v8629_v35, %v8628_v51  ;;  %v8718_v34 = vld [vmem:[%s15305_s16 + $0x8] sm:$0xff]  ;;  %v8719_v7 = vld [vmem:[%s15305_s16 + $0x10] sm:$0xff]  ;;  %v8987_v39 = vld [vmem:[%s15311_s22] sm:$0xff] }
0x3f35   :  { %vm8218_vm9 = vcmp.ge.f32.partialorder %v8214_v20, 0.0  ;;  %v8222_v43 = vmul.f32 0.01, %v8214_v20  ;;  %v8225_v61 = vsel %vm8217_vm7, %v8213_v58, %v8221_v11  ;;  %v10682_v1 = vpack.c.bf16 %v8633_v45, %v8632_v44  ;;  %v8903_v37 = vld [vmem:[#allocation18 + $0x38] sm:$0xff]  ;;  %v8991_v45 = vld [vmem:[%s15311_s22 + $0x20] sm:$0xff] }
0x3f36   :  { %vm8216_vm10 = vcmp.ge.f32.partialorder %v8212_v28, 0.0  ;;  %v8220_v49 = vmul.f32 0.01, %v8212_v28  ;;  %v8223_v48 = vsel %vm8215_vm8, %v8211_v24, %v8219_v18  ;;  %v8717_v24 = vld [vmem:[%s15305_s16] sm:$0xff]  ;;  %v10718_v51 = vpack.c.bf16 %v8903_v37, %v8902_v63  ;;  %v8988_v52 = vld [vmem:[%s15311_s22 + $0x8] sm:$0xff] }
0x3f37   :  { %v8226_v12 = vsel %vm8218_vm9, %v8214_v20, %v8222_v43  ;;  %v10685_v11 = vpack.c.bf16 %v8718_v34, %v8717_v24  ;;  %v8720_v20 = vld [vmem:[%s15305_s16 + $0x18] sm:$0xff]  ;;  %v8722_v43 = vld [vmem:[%s15305_s16 + $0x28] sm:$0xff]  ;;  %v8993_v34 = vld [vmem:[%s15311_s22 + $0x30] sm:$0xff] }
0x3f38   :  { %v8224_v55 = vsel %vm8216_vm10, %v8212_v28, %v8220_v49  ;;  %v10640_v60 = vpack.c.bf16 %v8226_v12, %v8225_v61  ;;  %v10688_v18 = vpack.c.bf16 %v8720_v20, %v8719_v7  ;;  %v8721_v28 = vld [vmem:[%s15305_s16 + $0x20] sm:$0xff]  ;;  %v9316_v12 = vld [vmem:[#allocation15] ss:$0 sm:$0xff]  ;;  %v8994_v7 = vld [vmem:[%s15311_s22 + $0x38] sm:$0xff] }
0x3f39   :  { %v10637_v30 = vpack.c.bf16 %v8224_v55, %v8223_v48  ;;  %v10691_v49 = vpack.c.bf16 %v8722_v43, %v8721_v28  ;;  %v9319_v20 = vld [vmem:[%s15306_s17] ss:$0 sm:$0xff] }
0x3f3b   :  { %10638 = vmatpush3.bf16.msra.mxu0 %v10637_v30 }
0x3f3c   :  { %10639 = vmatprep.subr.bf16.mxu0 %v11573_v38 }
0x3f3f   :  { %10641 = vmatpush3.bf16.msra.mxu0 %v10640_v60 }
0x3f40   :  { %10642 = vmatprep.subr.bf16.mxu0 %v11573_v38 }
0x3f42   :  { %10285 = vmatmul.mubr.msk.f32.vlgmr.msra.gmra.mrb[148].mxu0 %vm226_vm0, %v8227_v8 }
0x3f43   :  { %10644 = vmatpush3.bf16.msra.mxu0 %v10637_v30  ;;  %10295 = vmatprep.mubr.msk.f32.mxu0 %vm11574_vm6, %v15376_v57  ;;  %v8807_v30 = vld [vmem:[#allocation17 + $0x8] sm:$0xff] }
0x3f44   :  { %10645 = vmatprep.subr.bf16.mxu0 %v11573_v38 }
0x3f47   :  { %10647 = vmatpush3.bf16.msra.mxu0 %v10640_v60  ;;  %v8806_v60 = vld [vmem:[#allocation17] sm:$0xff] }
0x3f48   :  { %10660 = vmatprep.subr.bf16.mxu0 %v11573_v38  ;;  %v10697_v36 = vpack.c.bf16 %v8807_v30, %v8806_v60 }
0x3f4a   :  { %10296 = vmatmul.mubr.msk.f32.vlgmr.msra.gmra.mrb[150].mxu0 %vm226_vm0, %v8301_v4  ;;  %vm8379_vm0 = vcmask 1041408  }
0x3f4b   :  { %10338 = vmatprep.mubr.msk.f32.mxu0 %vm11574_vm6, %v15376_v57  ;;  %10662 = vmatpush3.bf16.msra.mxu0 %v10661_v29  ;;  %v8809_v29 = vld [vmem:[#allocation17 + $0x18] sm:$0xff] }
0x3f4c   :  { %10663 = vmatprep.subr.bf16.mxu0 %v11573_v38  ;;  %v10700_v3 = vpack.c.bf16 %v8809_v29, %v8808_v17 }
0x3f4f   :  { %10665 = vmatpush3.bf16.msra.mxu0 %v10664_v27  ;;  %v8810_v27 = vld [vmem:[#allocation17 + $0x20] sm:$0xff] }
0x3f50   :  { %10666 = vmatprep.subr.bf16.mxu0 %v11573_v38  ;;  %v10703_v41 = vpack.c.bf16 %v8811_v19, %v8810_v27 }
0x3f53   :  { %10668 = vmatpush3.bf16.msra.mxu0 %v10667_v25  ;;  %v8812_v25 = vld [vmem:[#allocation17 + $0x30] sm:$0xff] }
0x3f54   :  { %10669 = vmatprep.subr.bf16.mxu0 %v11573_v38  ;;  %v10706_v15 = vpack.c.bf16 %v8813_v62, %v8812_v25 }
0x3f57   :  { %10671 = vmatpush3.bf16.msra.mxu0 %v10670_v23  ;;  %v8723_v23 = vld [vmem:[%s15305_s16 + $0x30] sm:$0xff] }
0x3f58   :  { %10684 = vmatprep.subr.bf16.mxu0 %v11573_v38  ;;  %v10694_v56 = vpack.c.bf16 %v8724_v59, %v8723_v23 }
0x4015   :  { %v15125_v21 = vpop.f32.mrb[148].mxu0 }
0x4016   :  { %v10286_v33 = vpop.f32.mrb[149].mxu0  ;;  %10299 = vmatpush3.msk.msra.mxu1 %vm8379_vm0, %v15125_v21 }
0x4017   :  { %10301 = vmatmul.mubr.msk.f32.vlgmr.msra.gmra.mrb[144].mxu1 %vm911_vm1, %v8375_v16  ;;  %10648 = vmatprep.subr.bf16.mxu1 %v11573_v38  ;;  %v9317_v16 = vld [vmem:[%s15304_s15] ss:$0 sm:$0xff] }
0x4018   :  { %10650 = vmatpush3.bf16.msra.mxu1 %v10649_v14  ;;  %10319 = vmatprep.mubr.msk.f32.mxu1 %vm11574_vm6, %v15376_v57 }
0x4019   :  { %10651 = vmatprep.subr.bf16.mxu1 %v11573_v38 }
0x401c   :  { %10653 = vmatpush3.bf16.msra.mxu1 %v10652_v50 }
0x401d   :  { %10654 = vmatprep.subr.bf16.mxu1 %v11573_v38  ;;  %v8371_v46 = vpop.f32.mrb[150].mxu0 }
0x401e   :  { %10339 = vmatmul.mubr.msk.f32.vlgmr.msra.gmra.mrb[152].mxu0 %vm433_vm3, %v8371_v46  ;;  %v10297_v6 = vpop.f32.mrb[151].mxu0  ;;  %v8901_v46 = vld [vmem:[#allocation18 + $0x28] sm:$0xff] }
0x401f   :  { %10376 = vmatprep.mubr.msk.f32.mxu0 %vm11574_vm6, %v15376_v57  ;;  %10686 = vmatpush3.bf16.msra.mxu0 %v10685_v11  ;;  %v10730_v11 = vpack.c.bf16 %v8994_v7, %v8993_v34 }
0x4020   :  { %10656 = vmatpush3.bf16.msra.mxu1 %v10655_v42  ;;  %10687 = vmatprep.subr.bf16.mxu0 %v11573_v38  ;;  %v8899_v42 = vld [vmem:[#allocation18 + $0x18] sm:$0xff] }
0x4021   :  { %10657 = vmatprep.subr.bf16.mxu1 %v11573_v38  ;;  %v10712_v9 = vpack.c.bf16 %v8899_v42, %v8898_v31 }
0x4023   :  { %10689 = vmatpush3.bf16.msra.mxu0 %v10688_v18 }
0x4024   :  { %10659 = vmatpush3.bf16.msra.mxu1 %v10658_v40  ;;  %10690 = vmatprep.subr.bf16.mxu0 %v11573_v38  ;;  %v8900_v40 = vld [vmem:[#allocation18 + $0x20] sm:$0xff] }
0x4025   :  { %10672 = vmatprep.subr.bf16.mxu1 %v11573_v38  ;;  %v10715_v6 = vpack.c.bf16 %v8901_v46, %v8900_v40 }
0x4027   :  { %10692 = vmatpush3.bf16.msra.mxu0 %v10691_v49 }
0x4028   :  { %10693 = vmatprep.subr.bf16.mxu0 %v11573_v38 }
0x402b   :  { %10695 = vmatpush3.bf16.msra.mxu0 %v10694_v56 }
0x402c   :  { %10708 = vmatprep.subr.bf16.mxu0 %v11573_v38 }
0x40ea   :  { %v8449_v13 = vpop.f32.mrb[144].mxu1 }
0x40eb   :  { %10320 = vmatmul.mubr.msk.f32.vlgmr.msra.gmra.mrb[146].mxu1 %vm433_vm3, %v8449_v13  ;;  %v10302_v22 = vpop.f32.mrb[145].mxu1 }
0x40ec   :  { %10674 = vmatpush3.bf16.msra.mxu1 %v10673_v53  ;;  %10357 = vmatprep.mubr.msk.f32.mxu1 %vm11574_vm6, %v15376_v57  ;;  %v9321_v53 = vld [vmem:[%s15308_s19] ss:$0 sm:$0xff] }
0x40ed   :  { %10675 = vmatprep.subr.bf16.mxu1 %v11573_v38 }
0x40f0   :  { %10677 = vmatpush3.bf16.msra.mxu1 %v10676_v26 }
0x40f1   :  { %10678 = vmatprep.subr.bf16.mxu1 %v11573_v38  ;;  %v8611_v2 = vpop.f32.mrb[152].mxu0 }
0x40f2   :  { %v10340_v58 = vpop.f32.mrb[153].mxu0 }
0x40f3   :  { %v8990_v58 = vld [vmem:[%s15311_s22 + $0x18] sm:$0xff] }
0x40f4   :  { %10680 = vmatpush3.bf16.msra.mxu1 %v10679_v54  ;;  %v10721_v54 = vpack.c.bf16 %v8988_v52, %v8987_v39 }
0x40f5   :  { %10681 = vmatprep.subr.bf16.mxu1 %v11573_v38 }
0x40f8   :  { %10683 = vmatpush3.bf16.msra.mxu1 %v10682_v1  ;;  %v8992_v1 = vld [vmem:[%s15311_s22 + $0x28] sm:$0xff] }
0x40f9   :  { %10696 = vmatprep.subr.bf16.mxu1 %v11573_v38  ;;  %v10727_v24 = vpack.c.bf16 %v8992_v1, %v8991_v45 }
0x41be   :  { %v8538_v61 = vpop.f32.mrb[146].mxu1 }
0x41bf   :  { %v8612_v48 = vadd.f32 %v8611_v2, %v8538_v61  ;;  %v10321_v55 = vpop.f32.mrb[147].mxu1  ;;  %v8989_v2 = vld [vmem:[%s15311_s22 + $0x10] sm:$0xff]  ;;  %s11575_s22 = smov [#allocation20]  }
0x41c0   :  { %v10724_v44 = vpack.c.bf16 %v8990_v58, %v8989_v2  ;;  %s9083_s1 = sshll.u32 %s11575_s22, 4  ;;  %s9084_s1 = int_to_ptr.vmem [resolvable:$true] %s9083_s1 }
0x41c1   :  { %v8622_v8 = vadd.f32 %v9316_v12, %v8612_v48  ;;  %s11519_s17 = scalar_lea.vmem %s9084_s1, 128  ;;  %p11524_p11 = scmp.lt.s32.totalorder %s9084_s1, %s9084_s1 }
0x41c2   :  { %p11520_p10 = scmp.ne.s32.totalorder %s9084_s1, %s11519_s17  ;;  %p11525_p12 = scmp.lt.s32.totalorder %s11519_s17, %s11519_s17 }
0x41c3   :  { %vm8623_vm15 = vcmp.ge.f32.partialorder %v8622_v8, 0.0  ;;  %v8624_v4 = vmul.f32 0.01, %v8622_v8 }
0x41c4   :  { %p11526_p13 = por %p11525_p12, %p11524_p11 }
0x41c5   :  { %v8625_v0 = vsel %vm8623_vm15, %v8622_v8, %v8624_v4 }
0x41c6   :  { %10358 = vmatmul.mubr.msk.f32.vlgmr.msra.gmra.mrb[148].mxu1 %vm433_vm3, %v8625_v0  ;;  %p11527_p0 = pnand %p11526_p13, %p11520_p10 }
0x41c7   :  { %10698 = vmatpush3.bf16.msra.mxu1 %v10697_v36  ;;  %10395 = vmatprep.mubr.msk.f32.mxu1 %vm11574_vm6, %v15376_v57 }
0x41c8   :  { %10699 = vmatprep.subr.bf16.mxu1 %v11573_v38 }
0x41cb   :  { %10701 = vmatpush3.bf16.msra.mxu1 %v10700_v3 }
0x41cc   :  { %10702 = vmatprep.subr.bf16.mxu1 %v11573_v38 }
0x41cf   :  { %10704 = vmatpush3.bf16.msra.mxu1 %v10703_v41 }
0x41d0   :  { %10705 = vmatprep.subr.bf16.mxu1 %v11573_v38 }
0x41d3   :  { %10707 = vmatpush3.bf16.msra.mxu1 %v10706_v15 }
0x41d4   :  { %10720 = vmatprep.subr.bf16.mxu1 %v11573_v38 }
0x41d6   :  { %10396 = vmatmul.mubr.msk.f32.vlgmr.msra.gmra.mrb[150].mxu1 %vm433_vm3, %v15125_v21  ;;  %v8896_v21 = vld [vmem:[#allocation18] sm:$0xff] }
0x41d7   :  { %10433 = vmatprep.mubr.msk.f32.mxu1 %vm11574_vm6, %v15376_v57  ;;  %v10709_v47 = vpack.c.bf16 %v8897_v5, %v8896_v21  ;;  %10722 = vmatpush3.bf16.msra.mxu1 %v10721_v54 }
0x41d8   :  { %10723 = vmatprep.subr.bf16.mxu1 %v11573_v38 }
0x41db   :  { %10725 = vmatpush3.bf16.msra.mxu1 %v10724_v44 }
0x41dc   :  { %10726 = vmatprep.subr.bf16.mxu1 %v11573_v38 }
0x41df   :  { %10728 = vmatpush3.bf16.msra.mxu1 %v10727_v24 }
0x41e0   :  { %10729 = vmatprep.subr.bf16.mxu1 %v11573_v38 }
0x41e3   :  { %10731 = vmatpush3.bf16.msra.mxu1 %v10730_v11 }
0x4299   :  { %v8710_v14 = vpop.f32.mrb[148].mxu1 }
0x429a   :  { %v8711_v32 = vadd.f32 %v9317_v16, %v8710_v14  ;;  %v10359_v33 = vpop.f32.mrb[149].mxu1 }
0x429c   :  { %vm8714_vm1 = vcmp.ge.f32.partialorder %v8711_v32, 0.0  ;;  %v8715_v50 = vmul.f32 0.01, %v8711_v32 }
0x429e   :  { %v8716_v10 = vsel %vm8714_vm1, %v8711_v32, %v8715_v50 }
0x429f   :  { %10377 = vmatmul.mubr.msk.f32.vlgmr.msra.gmra.mrb[154].mxu0 %vm433_vm3, %v8716_v10 }
0x42a0   :  { %10710 = vmatpush3.bf16.msra.mxu0 %v10709_v47  ;;  %10414 = vmatprep.mubr.msk.f32.mxu0 %vm11574_vm6, %v15376_v57 }
0x42a1   :  { %10711 = vmatprep.subr.bf16.mxu0 %v11573_v38 }
0x42a4   :  { %10713 = vmatpush3.bf16.msra.mxu0 %v10712_v9 }
0x42a5   :  { %10714 = vmatprep.subr.bf16.mxu0 %v11573_v38 }
0x42a8   :  { %10716 = vmatpush3.bf16.msra.mxu0 %v10715_v6 }
0x42a9   :  { %v8889_v35 = vpop.f32.mrb[150].mxu1  ;;  %10717 = vmatprep.subr.bf16.mxu0 %v11573_v38  ;;  %v9323_v38 = vld [vmem:[%s15310_s21] ss:$0 sm:$0xff] }
0x42aa   :  { %v8890_v57 = vadd.f32 %v9321_v53, %v8889_v35  ;;  %v10397_v13 = vpop.f32.mrb[151].mxu1 }
0x42ac   :  { %vm8893_vm2 = vcmp.ge.f32.partialorder %v8890_v57, 0.0  ;;  %v8894_v22 = vmul.f32 0.01, %v8890_v57  ;;  %10719 = vmatpush3.bf16.msra.mxu0 %v10718_v51 }
0x42ae   :  { %v8895_v26 = vsel %vm8893_vm2, %v8890_v57, %v8894_v22 }
0x42af   :  { %10415 = vmatmul.mubr.msk.f32.vlgmr.msra.gmra.mrb[156].mxu0 %vm433_vm3, %v8895_v26 }
0x4372   :  { %v8801_v18 = vpop.f32.mrb[154].mxu0 }
0x4373   :  { %v8802_v28 = vadd.f32 %v9319_v20, %v8801_v18  ;;  %v10378_v43 = vpop.f32.mrb[155].mxu0 }
0x4375   :  { %8805 = vst [vmem:[#allocation20] sm:$0xff] %v8802_v28 }
0x4382   :  { %v8980_v49 = vpop.f32.mrb[156].mxu0 }
0x4383   :  { %v8981_v61 = vadd.f32 %v9323_v38, %v8980_v49  ;;  %v10416_v12 = vpop.f32.mrb[157].mxu0 }
0x4385   :  { %vm8984_vm4 = vcmp.ge.f32.partialorder %v8981_v61, 0.0  ;;  %v8985_v48 = vmul.f32 0.01, %v8981_v61 }
0x4387   :  { %v8986_v55 = vsel %vm8984_vm4, %v8981_v61, %v8985_v48 }
0x4388   :  { %10434 = vmatmul.mubr.msk.f32.vlgmr.msra.gmra.mrb[152].mxu1 %vm433_vm3, %v8986_v55 }
0x4389   :  { %11530 = shalt.err (!%p11527_p0)
}
0x438a   :  { %s11531_s27 = scalar_lea.hbm %s15313_s24, 128 }
0x438b   :  { %p11532_p1 = scmp.ne.s32.totalorder %s15313_s24, %s11531_s27  ;;  %p11535_p2 = scmp.lt.u32.totalorder %s11531_s27, %s15313_s24 }
0x438d   :  { %p11537_p3 = pnand %p11535_p2, %p11532_p1 }
0x438f   :  { %11540 = shalt.err (!%p11537_p3)
}
0x4390   :  { %9086 = dma.vmem_to_hbm [thread:$0]  %s9084_s1, 128, %s15313_s24, [#allocation5]   ;;  %v9325_v60 = vld [vmem:[#allocation2] ss:$0 sm:$0xff]  ;;  %vm9075_vm3 = vcmask 1024  }
0x4391   :  { %s15378_s19 = sld [smem:[#allocation38_spill]] }
0x445b   :  { %v9071_v30 = vpop.f32.mrb[152].mxu1 }
0x445c   :  { %v9072_v8 = vadd.f32 %v9325_v60, %v9071_v30  ;;  %v10435_v4 = vpop.f32.mrb[153].mxu1 }
0x445e   :  { %9076 = vst.msk [vmem:[%s15378_s19] sm:$0x3] %vm9075_vm3, %v9072_v8 }
0x445f   :  { %11553 = dma.done.wait [#allocation5], 128  }
0x4460   :  { %11554 = vsyncadd [#allocation5], 4294967168 }
0x4461   :  { %9094 = vsyncpa [#allocation4], 1 }
0x4462   :  { %9095 = vsyncpa [#allocation7], 1 }
0x4463   :  { %9096 = vsyncpa [#allocation10], 1 }
0x4464   :  { %9097 = vsyncpa [#allocation13], 1 }
0x4465   :  { %9098 = vsyncpa [#allocation16], 1 }
0x4466   :  { %9099 = vsyncpa [#allocation19], 1 }
0x4467   :  { %9100 = vsyncpa [#allocation5], 1 }

</bundles_post_ra>
